<compile_context>
chip_gen: v5e
topology: v5e:2x2
jax: 0.10.0
libtpu: 0.0.40
codegen_flags: <defaults>
</compile_context>

<pallas_src>
import functools

import jax
import jax.numpy as jnp
import numpy as np
from jax.experimental import pallas as pl
from jax.experimental.pallas import tpu as pltpu

_LANE = 128
_SUBLANE = 8
_EPS = 1e-5


def _round_up(x, m):
    return (x + m - 1) // m * m


def _basic_block_kernel(x_ref, w1_ref, b1_ref, w2_ref, b2_ref, out_ref, cat_ref,
                        *, h, w, cp):
    """One image: relu(bn2(conv2(relu(bn1(conv1(x))))) + x), BN folded into w/b.

    x_ref  : (1, h, w, cp)     bf16 NHWC activation (lane-dense channels)
    w?_ref : (3, 3*cp, cp)     bf16 conv weight, BN scale folded, dx merged into K
    b?_ref : (1, 1, cp)        f32 folded BN bias
    out_ref: (1, h, w, cp)     bf16 output
    cat_ref: (h+2, wp, 3*cp)   bf16 scratch: dx-tap-concatenated, zero-haloed
                               activation slab, shared by both convs
    """
    hp = h + 2
    wp = cat_ref.shape[1]

    # Zero only the halo cells the matmuls actually read for valid output
    # columns (1..w).  The interior is fully overwritten below, and these cells
    # are disjoint from every interior write, so this is all the per-step init
    # needed (safe under megacore "parallel" grid splitting).
    zrow = jnp.zeros((1, wp, 3 * cp), jnp.bfloat16)
    zcol = jnp.zeros((h, 1, cp), jnp.bfloat16)
    cat_ref[0:1, :, :] = zrow                          # top conv padding row
    cat_ref[hp - 1:hp, :, :] = zrow                    # bottom conv padding row
    cat_ref[1:1 + h, 1:2, 0:cp] = zcol                 # dx=0 tap, left padding col
    cat_ref[1:1 + h, w:w + 1, 2 * cp:3 * cp] = zcol    # dx=2 tap, right padding col

    def conv3x3(src, w_ref):
        # src: (h, w, cp) interior activation (bf16).  Lay the three dx-shifted
        # copies side by side on the lane axis so that
        #   cat[r, c, dx*cp:(dx+1)*cp] == zero_padded_src[r, c - 1 + dx]
        # holds for every row r and every valid padded column c in 1..w.
        cat_ref[1:1 + h, 2:2 + w, 0:cp] = src          # dx = 0 (reads col c-1)
        cat_ref[1:1 + h, 1:1 + w, cp:2 * cp] = src     # dx = 1 (reads col c)
        cat_ref[1:1 + h, 0:w, 2 * cp:3 * cp] = src     # dx = 2 (reads col c+1)
        acc = None
        for dy in range(3):                            # 3 dots, K = 3*cp
            lhs = cat_ref[dy:dy + h, :, :].reshape(h * wp, 3 * cp)
            d = jnp.dot(lhs, w_ref[dy], preferred_element_type=jnp.float32)
            acc = d if acc is None else acc + d
        # Only padded columns 1..w hold valid outputs; the rest is never used.
        return acc.reshape(h, wp, cp)[:, 1:1 + w, :]

    x = x_ref[0]                                       # (h, w, cp) bf16

    # conv1 (+ folded bn1 bias) + relu
    y1 = jnp.maximum(conv3x3(x, w1_ref) + b1_ref[...], 0.0).astype(jnp.bfloat16)

    # conv2 (+ folded bn2 bias) + residual shortcut + relu
    y2 = conv3x3(y1, w2_ref) + b2_ref[...]
    out = jnp.maximum(y2 + x.astype(jnp.float32), 0.0)
    out_ref[...] = out.astype(out_ref.dtype).reshape(out_ref.shape)


def fold_basic_block_params(params):
    """Fold eval-mode BN into the conv weights/biases; pad & pack for the kernel."""
    w1, g1, be1, m1, v1, w2, g2, be2, m2, v2 = params
    cout, cin = w1.shape[0], w1.shape[1]
    cp = _round_up(max(cin, cout), _LANE)

    s1 = g1 / jnp.sqrt(v1 + _EPS)
    s2 = g2 / jnp.sqrt(v2 + _EPS)
    b1 = be1 - m1 * s1
    b2 = be2 - m2 * s2

    def pack(w_oihw, s, ci):
        w = jnp.transpose(w_oihw, (2, 3, 1, 0)) * s             # HWIO, BN folded
        w = jnp.pad(w, ((0, 0), (0, 0), (0, cp - ci), (0, cp - w.shape[-1])))
        return w.reshape(3, 3 * cp, cp).astype(jnp.bfloat16)    # dx merged into K

    w1p = pack(w1, s1, cin)
    w2p = pack(w2, s2, cout)
    b1p = jnp.pad(b1, (0, cp - cout)).reshape(1, 1, cp).astype(jnp.float32)
    b2p = jnp.pad(b2, (0, cp - cout)).reshape(1, 1, cp).astype(jnp.float32)
    return (w1p, b1p, w2p, b2p), cp


def basic_block_nhwc(x_nhwc, packed):
    """x_nhwc: (N, H, W, Cp) bf16, channel-padded NHWC.  Returns the same layout.

    This is the layout consecutive BasicBlocks should exchange so the
    NCHW<->NHWC transposes and channel pad/slice happen once per network,
    not once per block.
    """
    w1p, b1p, w2p, b2p = packed
    n, h, w, cp = x_nhwc.shape
    hp = h + 2
    wp = _round_up(w + 2, _SUBLANE)

    flops = n * 2 * 3 * 2 * (h * wp) * (3 * cp) * cp
    bytes_accessed = (2 * n * h * w * cp * 2          # activations in + out (bf16)
                      + 2 * 3 * 3 * cp * cp * 2       # weights (bf16)
                      + 2 * cp * 4)                   # biases (f32)

    kernel = functools.partial(_basic_block_kernel, h=h, w=w, cp=cp)

    return pl.pallas_call(
        kernel,
        out_shape=jax.ShapeDtypeStruct((n, h, w, cp), jnp.bfloat16),
        grid=(n,),
        in_specs=[
            pl.BlockSpec((1, h, w, cp), lambda i: (i, 0, 0, 0)),
            pl.BlockSpec((3, 3 * cp, cp), lambda i: (0, 0, 0)),
            pl.BlockSpec((1, 1, cp), lambda i: (0, 0, 0)),
            pl.BlockSpec((3, 3 * cp, cp), lambda i: (0, 0, 0)),
            pl.BlockSpec((1, 1, cp), lambda i: (0, 0, 0)),
        ],
        out_specs=pl.BlockSpec((1, h, w, cp), lambda i: (i, 0, 0, 0)),
        scratch_shapes=[pltpu.VMEM((hp, wp, 3 * cp), jnp.bfloat16)],
        compiler_params=pltpu.CompilerParams(
            dimension_semantics=("parallel",),
            vmem_limit_bytes=32 * 1024 * 1024,
        ),
        cost_estimate=pl.CostEstimate(flops=flops, transcendentals=0,
                                      bytes_accessed=bytes_accessed),
    )(x_nhwc, w1p, b1p, w2p, b2p)


def basic_block_forward(x_nchw, params):
    """NCHW float32 -> NCHW float32 demo wrapper (one-time layout glue only)."""
    n, cin, h, w = x_nchw.shape
    cout = params[0].shape[0]
    assert cin == cout, "downsample=None requires in_channel == out_channel"

    packed, cp = fold_basic_block_params(params)
    x = jnp.transpose(x_nchw, (0, 2, 3, 1)).astype(jnp.bfloat16)
    x = jnp.pad(x, ((0, 0), (0, 0), (0, 0), (0, cp - cin)))

    out = basic_block_nhwc(x, packed)                 # (n, h, w, cp) bf16
    out = out[..., :cout].astype(jnp.float32)
    return jnp.transpose(out, (0, 3, 1, 2))           # NHWC -> NCHW


def _reference_forward(x_nchw, params):
    """Pure-JAX reference mirroring the kernel's bf16 rounding points."""
    w1, g1, be1, m1, v1, w2, g2, be2, m2, v2 = params
    s1 = g1 / jnp.sqrt(v1 + _EPS)
    b1 = be1 - m1 * s1
    s2 = g2 / jnp.sqrt(v2 + _EPS)
    b2 = be2 - m2 * s2

    def bf16(t):
        return t.astype(jnp.bfloat16).astype(jnp.float32)

    def conv(x_nhwc, w_hwio):
        return jax.lax.conv_general_dilated(
            x_nhwc, w_hwio, window_strides=(1, 1), padding="SAME",
            dimension_numbers=("NHWC", "HWIO", "NHWC"),
            preferred_element_type=jnp.float32)

    x = bf16(jnp.transpose(x_nchw, (0, 2, 3, 1)))
    w1e = bf16(jnp.transpose(w1, (2, 3, 1, 0)) * s1)
    w2e = bf16(jnp.transpose(w2, (2, 3, 1, 0)) * s2)

    y1 = bf16(jax.nn.relu(conv(x, w1e) + b1))         # kernel keeps y1 in bf16
    y = bf16(jax.nn.relu(conv(y1, w2e) + b2 + x))     # kernel output is bf16
    return jnp.transpose(y, (0, 3, 1, 2))


def init_params(key, in_ch, out_ch):
    ks = jax.random.split(key, 8)
    w1 = jax.random.normal(ks[0], (out_ch, in_ch, 3, 3), jnp.float32) * 0.1
    w2 = jax.random.normal(ks[1], (out_ch, out_ch, 3, 3), jnp.float32) * 0.1
    g1 = 1.0 + 0.1 * jax.random.normal(ks[2], (out_ch,), jnp.float32)
    be1 = 0.1 * jax.random.normal(ks[3], (out_ch,), jnp.float32)
    m1 = 0.1 * jax.random.normal(ks[4], (out_ch,), jnp.float32)
    v1 = jnp.abs(jax.random.normal(ks[5], (out_ch,), jnp.float32)) + 0.5
    g2 = 1.0 + 0.1 * jax.random.normal(ks[6], (out_ch,), jnp.float32)
    be2 = 0.1 * jax.random.normal(ks[7], (out_ch,), jnp.float32)
    m2 = jnp.zeros((out_ch,), jnp.float32)
    v2 = jnp.ones((out_ch,), jnp.float32)
    return (w1, g1, be1, m1, v1, w2, g2, be2, m2, v2)


if __name__ == "__main__":
    # in_channel == out_channel, stride=1, downsample=None
    N, C, H, W = 2, 64, 16, 16
    key = jax.random.PRNGKey(0)
    kx, kp = jax.random.split(key)
    x = jax.random.normal(kx, (N, C, H, W), jnp.float32)
    params = init_params(kp, C, C)

    out = jax.block_until_ready(basic_block_forward(x, params))
    ref = jax.block_until_ready(_reference_forward(x, params))

    # bf16 weights/activations/output + MXU accumulation-order differences vs.
    # lax.conv => bf16-appropriate tolerance (observed deltas are ~4e-3 abs).
    np.testing.assert_allclose(np.asarray(out), np.asarray(ref),
                               rtol=3e-2, atol=3e-2)
    print("KERNEL_OK")
</pallas_src>

<mosaic_0001>
module attributes {stable_mosaic.version = 11 : i64} {
  func.func @_basic_block_kernel(%arg0: i32, %arg1: memref<1x16x16x128xbf16, #tpu.memory_space<vmem>>, %arg2: memref<3x384x128xbf16, #tpu.memory_space<vmem>>, %arg3: memref<1x1x128xf32, #tpu.memory_space<vmem>>, %arg4: memref<3x384x128xbf16, #tpu.memory_space<vmem>>, %arg5: memref<1x1x128xf32, #tpu.memory_space<vmem>>, %arg6: memref<1x16x16x128xbf16, #tpu.memory_space<vmem>>, %arg7: memref<18x24x384xbf16, #tpu.memory_space<vmem>>) attributes {dimension_semantics = [#tpu.dimension_semantics<parallel>], iteration_bounds = array<i64: 2>, scalar_prefetch = 0 : i64, scratch_operands = 1 : i64, tpu.core_type = #tpu.core_type<tc>, window_params = [{transform_indices = @transform_0, window_bounds = array<i64: 1, 16, 16, 128>}, {pipeline_mode = #tpu.pipeline_mode<synchronous>, transform_indices = @transform_1, window_bounds = array<i64: 3, 384, 128>}, {pipeline_mode = #tpu.pipeline_mode<synchronous>, transform_indices = @transform_2, window_bounds = array<i64: 1, 1, 128>}, {pipeline_mode = #tpu.pipeline_mode<synchronous>, transform_indices = @transform_3, window_bounds = array<i64: 3, 384, 128>}, {pipeline_mode = #tpu.pipeline_mode<synchronous>, transform_indices = @transform_4, window_bounds = array<i64: 1, 1, 128>}, {transform_indices = @transform_5, window_bounds = array<i64: 1, 16, 16, 128>}]} {
    %cst = arith.constant 0.000000e+00 : bf16
    %0 = vector.broadcast %cst : bf16 to vector<1x24x384xbf16>
    %cst_0 = arith.constant 0.000000e+00 : bf16
    %1 = vector.broadcast %cst_0 : bf16 to vector<16x1x128xbf16>
    %c0 = arith.constant 0 : index
    %c0_1 = arith.constant 0 : index
    %c0_2 = arith.constant 0 : index
    %2 = vector.load %arg7[%c0, %c0_1, %c0_2] : memref<18x24x384xbf16, #tpu.memory_space<vmem>>, vector<1x24x384xbf16>
    tpu.vector_store %arg7[%c0, %c0_1, %c0_2], %0 {strides = array<i32>} : memref<18x24x384xbf16, #tpu.memory_space<vmem>>, vector<1x24x384xbf16>,
    %c17 = arith.constant 17 : index
    %c0_3 = arith.constant 0 : index
    %c0_4 = arith.constant 0 : index
    %3 = vector.load %arg7[%c17, %c0_3, %c0_4] : memref<18x24x384xbf16, #tpu.memory_space<vmem>>, vector<1x24x384xbf16>
    tpu.vector_store %arg7[%c17, %c0_3, %c0_4], %0 {strides = array<i32>} : memref<18x24x384xbf16, #tpu.memory_space<vmem>>, vector<1x24x384xbf16>,
    %c1 = arith.constant 1 : index
    %c1_5 = arith.constant 1 : index
    %c0_6 = arith.constant 0 : index
    %4 = vector.load %arg7[%c1, %c1_5, %c0_6] : memref<18x24x384xbf16, #tpu.memory_space<vmem>>, vector<16x1x128xbf16>
    tpu.vector_store %arg7[%c1, %c1_5, %c0_6], %1 {strides = array<i32>} : memref<18x24x384xbf16, #tpu.memory_space<vmem>>, vector<16x1x128xbf16>,
    %c1_7 = arith.constant 1 : index
    %c16 = arith.constant 16 : index
    %c256 = arith.constant 256 : index
    %5 = vector.load %arg7[%c1_7, %c16, %c256] : memref<18x24x384xbf16, #tpu.memory_space<vmem>>, vector<16x1x128xbf16>
    tpu.vector_store %arg7[%c1_7, %c16, %c256], %1 {strides = array<i32>} : memref<18x24x384xbf16, #tpu.memory_space<vmem>>, vector<16x1x128xbf16>,
    %c0_8 = arith.constant 0 : index
    %c0_9 = arith.constant 0 : index
    %c0_10 = arith.constant 0 : index
    %c0_11 = arith.constant 0 : index
    %6 = vector.load %arg1[%c0_8, %c0_9, %c0_10, %c0_11] : memref<1x16x16x128xbf16, #tpu.memory_space<vmem>>, vector<1x16x16x128xbf16>
    %7 = vector.shape_cast %6 : vector<1x16x16x128xbf16> to vector<16x16x128xbf16>
    %c1_12 = arith.constant 1 : index
    %c2 = arith.constant 2 : index
    %c0_13 = arith.constant 0 : index
    %8 = vector.load %arg7[%c1_12, %c2, %c0_13] : memref<18x24x384xbf16, #tpu.memory_space<vmem>>, vector<16x16x128xbf16>
    tpu.vector_store %arg7[%c1_12, %c2, %c0_13], %7 {strides = array<i32>} : memref<18x24x384xbf16, #tpu.memory_space<vmem>>, vector<16x16x128xbf16>,
    %c1_14 = arith.constant 1 : index
    %c1_15 = arith.constant 1 : index
    %c128 = arith.constant 128 : index
    %9 = vector.load %arg7[%c1_14, %c1_15, %c128] : memref<18x24x384xbf16, #tpu.memory_space<vmem>>, vector<16x16x128xbf16>
    tpu.vector_store %arg7[%c1_14, %c1_15, %c128], %7 {strides = array<i32>} : memref<18x24x384xbf16, #tpu.memory_space<vmem>>, vector<16x16x128xbf16>,
    %c1_16 = arith.constant 1 : index
    %c0_17 = arith.constant 0 : index
    %c256_18 = arith.constant 256 : index
    %10 = vector.load %arg7[%c1_16, %c0_17, %c256_18] : memref<18x24x384xbf16, #tpu.memory_space<vmem>>, vector<16x16x128xbf16>
    tpu.vector_store %arg7[%c1_16, %c0_17, %c256_18], %7 {strides = array<i32>} : memref<18x24x384xbf16, #tpu.memory_space<vmem>>, vector<16x16x128xbf16>,
    %c0_19 = arith.constant 0 : index
    %c0_20 = arith.constant 0 : index
    %c0_21 = arith.constant 0 : index
    %11 = vector.load %arg7[%c0_19, %c0_20, %c0_21] : memref<18x24x384xbf16, #tpu.memory_space<vmem>>, vector<16x24x384xbf16>
    %12 = vector.shape_cast %11 : vector<16x24x384xbf16> to vector<384x384xbf16>
    %c0_22 = arith.constant 0 : index
    %c0_23 = arith.constant 0 : index
    %c0_24 = arith.constant 0 : index
    %13 = vector.load %arg2[%c0_22, %c0_23, %c0_24] : memref<3x384x128xbf16, #tpu.memory_space<vmem>>, vector<1x384x128xbf16>
    %14 = vector.shape_cast %13 : vector<1x384x128xbf16> to vector<384x128xbf16>
    %cst_25 = arith.constant dense<0.000000e+00> : vector<384x128xf32>
    %15 = tpu.matmul %12, %14, %cst_25 {dimension_numbers = #tpu.dot_dimension_numbers<[1], [0], [0], [1], [0, 0, 1, 1], [], []>} : vector<384x384xbf16>, vector<384x128xbf16>, vector<384x128xf32> -> vector<384x128xf32>
    %c1_26 = arith.constant 1 : index
    %c0_27 = arith.constant 0 : index
    %c0_28 = arith.constant 0 : index
    %16 = vector.load %arg7[%c1_26, %c0_27, %c0_28] : memref<18x24x384xbf16, #tpu.memory_space<vmem>>, vector<16x24x384xbf16>
    %17 = vector.shape_cast %16 : vector<16x24x384xbf16> to vector<384x384xbf16>
    %c1_29 = arith.constant 1 : index
    %c0_30 = arith.constant 0 : index
    %c0_31 = arith.constant 0 : index
    %18 = vector.load %arg2[%c1_29, %c0_30, %c0_31] : memref<3x384x128xbf16, #tpu.memory_space<vmem>>, vector<1x384x128xbf16>
    %19 = vector.shape_cast %18 : vector<1x384x128xbf16> to vector<384x128xbf16>
    %cst_32 = arith.constant dense<0.000000e+00> : vector<384x128xf32>
    %20 = tpu.matmul %17, %19, %cst_32 {dimension_numbers = #tpu.dot_dimension_numbers<[1], [0], [0], [1], [0, 0, 1, 1], [], []>} : vector<384x384xbf16>, vector<384x128xbf16>, vector<384x128xf32> -> vector<384x128xf32>
    %21 = arith.addf %15, %20 : vector<384x128xf32>
    %c2_33 = arith.constant 2 : index
    %c0_34 = arith.constant 0 : index
    %c0_35 = arith.constant 0 : index
    %22 = vector.load %arg7[%c2_33, %c0_34, %c0_35] : memref<18x24x384xbf16, #tpu.memory_space<vmem>>, vector<16x24x384xbf16>
    %23 = vector.shape_cast %22 : vector<16x24x384xbf16> to vector<384x384xbf16>
    %c2_36 = arith.constant 2 : index
    %c0_37 = arith.constant 0 : index
    %c0_38 = arith.constant 0 : index
    %24 = vector.load %arg2[%c2_36, %c0_37, %c0_38] : memref<3x384x128xbf16, #tpu.memory_space<vmem>>, vector<1x384x128xbf16>
    %25 = vector.shape_cast %24 : vector<1x384x128xbf16> to vector<384x128xbf16>
    %cst_39 = arith.constant dense<0.000000e+00> : vector<384x128xf32>
    %26 = tpu.matmul %23, %25, %cst_39 {dimension_numbers = #tpu.dot_dimension_numbers<[1], [0], [0], [1], [0, 0, 1, 1], [], []>} : vector<384x384xbf16>, vector<384x128xbf16>, vector<384x128xf32> -> vector<384x128xf32>
    %27 = arith.addf %21, %26 : vector<384x128xf32>
    %28 = vector.shape_cast %27 : vector<384x128xf32> to vector<16x24x128xf32>
    %29 = vector.extract_strided_slice %28 {offsets = [0, 1, 0], sizes = [16, 16, 128], strides = [1, 1, 1]} : vector<16x24x128xf32> to vector<16x16x128xf32>
    %c0_40 = arith.constant 0 : index
    %c0_41 = arith.constant 0 : index
    %c0_42 = arith.constant 0 : index
    %30 = vector.load %arg3[%c0_40, %c0_41, %c0_42] : memref<1x1x128xf32, #tpu.memory_space<vmem>>, vector<1x1x128xf32>
    %31 = vector.broadcast %30 : vector<1x1x128xf32> to vector<16x16x128xf32>
    %32 = arith.addf %29, %31 : vector<16x16x128xf32>
    %cst_43 = arith.constant 0.000000e+00 : f32
    %33 = vector.broadcast %cst_43 : f32 to vector<16x16x128xf32>
    %34 = arith.maximumf %32, %33 : vector<16x16x128xf32>
    %35 = arith.truncf %34 : vector<16x16x128xf32> to vector<16x16x128xbf16>
    %c1_44 = arith.constant 1 : index
    %c2_45 = arith.constant 2 : index
    %c0_46 = arith.constant 0 : index
    %36 = vector.load %arg7[%c1_44, %c2_45, %c0_46] : memref<18x24x384xbf16, #tpu.memory_space<vmem>>, vector<16x16x128xbf16>
    tpu.vector_store %arg7[%c1_44, %c2_45, %c0_46], %35 {strides = array<i32>} : memref<18x24x384xbf16, #tpu.memory_space<vmem>>, vector<16x16x128xbf16>,
    %c1_47 = arith.constant 1 : index
    %c1_48 = arith.constant 1 : index
    %c128_49 = arith.constant 128 : index
    %37 = vector.load %arg7[%c1_47, %c1_48, %c128_49] : memref<18x24x384xbf16, #tpu.memory_space<vmem>>, vector<16x16x128xbf16>
    tpu.vector_store %arg7[%c1_47, %c1_48, %c128_49], %35 {strides = array<i32>} : memref<18x24x384xbf16, #tpu.memory_space<vmem>>, vector<16x16x128xbf16>,
    %c1_50 = arith.constant 1 : index
    %c0_51 = arith.constant 0 : index
    %c256_52 = arith.constant 256 : index
    %38 = vector.load %arg7[%c1_50, %c0_51, %c256_52] : memref<18x24x384xbf16, #tpu.memory_space<vmem>>, vector<16x16x128xbf16>
    tpu.vector_store %arg7[%c1_50, %c0_51, %c256_52], %35 {strides = array<i32>} : memref<18x24x384xbf16, #tpu.memory_space<vmem>>, vector<16x16x128xbf16>,
    %c0_53 = arith.constant 0 : index
    %c0_54 = arith.constant 0 : index
    %c0_55 = arith.constant 0 : index
    %39 = vector.load %arg7[%c0_53, %c0_54, %c0_55] : memref<18x24x384xbf16, #tpu.memory_space<vmem>>, vector<16x24x384xbf16>
    %40 = vector.shape_cast %39 : vector<16x24x384xbf16> to vector<384x384xbf16>
    %c0_56 = arith.constant 0 : index
    %c0_57 = arith.constant 0 : index
    %c0_58 = arith.constant 0 : index
    %41 = vector.load %arg4[%c0_56, %c0_57, %c0_58] : memref<3x384x128xbf16, #tpu.memory_space<vmem>>, vector<1x384x128xbf16>
    %42 = vector.shape_cast %41 : vector<1x384x128xbf16> to vector<384x128xbf16>
    %cst_59 = arith.constant dense<0.000000e+00> : vector<384x128xf32>
    %43 = tpu.matmul %40, %42, %cst_59 {dimension_numbers = #tpu.dot_dimension_numbers<[1], [0], [0], [1], [0, 0, 1, 1], [], []>} : vector<384x384xbf16>, vector<384x128xbf16>, vector<384x128xf32> -> vector<384x128xf32>
    %c1_60 = arith.constant 1 : index
    %c0_61 = arith.constant 0 : index
    %c0_62 = arith.constant 0 : index
    %44 = vector.load %arg7[%c1_60, %c0_61, %c0_62] : memref<18x24x384xbf16, #tpu.memory_space<vmem>>, vector<16x24x384xbf16>
    %45 = vector.shape_cast %44 : vector<16x24x384xbf16> to vector<384x384xbf16>
    %c1_63 = arith.constant 1 : index
    %c0_64 = arith.constant 0 : index
    %c0_65 = arith.constant 0 : index
    %46 = vector.load %arg4[%c1_63, %c0_64, %c0_65] : memref<3x384x128xbf16, #tpu.memory_space<vmem>>, vector<1x384x128xbf16>
    %47 = vector.shape_cast %46 : vector<1x384x128xbf16> to vector<384x128xbf16>
    %cst_66 = arith.constant dense<0.000000e+00> : vector<384x128xf32>
    %48 = tpu.matmul %45, %47, %cst_66 {dimension_numbers = #tpu.dot_dimension_numbers<[1], [0], [0], [1], [0, 0, 1, 1], [], []>} : vector<384x384xbf16>, vector<384x128xbf16>, vector<384x128xf32> -> vector<384x128xf32>
    %49 = arith.addf %43, %48 : vector<384x128xf32>
    %c2_67 = arith.constant 2 : index
    %c0_68 = arith.constant 0 : index
    %c0_69 = arith.constant 0 : index
    %50 = vector.load %arg7[%c2_67, %c0_68, %c0_69] : memref<18x24x384xbf16, #tpu.memory_space<vmem>>, vector<16x24x384xbf16>
    %51 = vector.shape_cast %50 : vector<16x24x384xbf16> to vector<384x384xbf16>
    %c2_70 = arith.constant 2 : index
    %c0_71 = arith.constant 0 : index
    %c0_72 = arith.constant 0 : index
    %52 = vector.load %arg4[%c2_70, %c0_71, %c0_72] : memref<3x384x128xbf16, #tpu.memory_space<vmem>>, vector<1x384x128xbf16>
    %53 = vector.shape_cast %52 : vector<1x384x128xbf16> to vector<384x128xbf16>
    %cst_73 = arith.constant dense<0.000000e+00> : vector<384x128xf32>
    %54 = tpu.matmul %51, %53, %cst_73 {dimension_numbers = #tpu.dot_dimension_numbers<[1], [0], [0], [1], [0, 0, 1, 1], [], []>} : vector<384x384xbf16>, vector<384x128xbf16>, vector<384x128xf32> -> vector<384x128xf32>
    %55 = arith.addf %49, %54 : vector<384x128xf32>
    %56 = vector.shape_cast %55 : vector<384x128xf32> to vector<16x24x128xf32>
    %57 = vector.extract_strided_slice %56 {offsets = [0, 1, 0], sizes = [16, 16, 128], strides = [1, 1, 1]} : vector<16x24x128xf32> to vector<16x16x128xf32>
    %c0_74 = arith.constant 0 : index
    %c0_75 = arith.constant 0 : index
    %c0_76 = arith.constant 0 : index
    %58 = vector.load %arg5[%c0_74, %c0_75, %c0_76] : memref<1x1x128xf32, #tpu.memory_space<vmem>>, vector<1x1x128xf32>
    %59 = vector.broadcast %58 : vector<1x1x128xf32> to vector<16x16x128xf32>
    %60 = arith.addf %57, %59 : vector<16x16x128xf32>
    %61 = arith.extf %7 : vector<16x16x128xbf16> to vector<16x16x128xf32>
    %62 = arith.addf %60, %61 : vector<16x16x128xf32>
    %cst_77 = arith.constant 0.000000e+00 : f32
    %63 = vector.broadcast %cst_77 : f32 to vector<16x16x128xf32>
    %64 = arith.maximumf %62, %63 : vector<16x16x128xf32>
    %65 = arith.truncf %64 : vector<16x16x128xf32> to vector<16x16x128xbf16>
    %66 = vector.shape_cast %65 : vector<16x16x128xbf16> to vector<1x16x16x128xbf16>
    %c0_78 = arith.constant 0 : index
    %c0_79 = arith.constant 0 : index
    %c0_80 = arith.constant 0 : index
    %c0_81 = arith.constant 0 : index
    %67 = vector.load %arg6[%c0_78, %c0_79, %c0_80, %c0_81] : memref<1x16x16x128xbf16, #tpu.memory_space<vmem>>, vector<1x16x16x128xbf16>
    tpu.vector_store %arg6[%c0_78, %c0_79, %c0_80, %c0_81], %66 {strides = array<i32>} : memref<1x16x16x128xbf16, #tpu.memory_space<vmem>>, vector<1x16x16x128xbf16>,
    return
  }
  func.func @transform_0(%arg0: i32) -> (i32, i32, i32, i32) {
    %c0_i32 = arith.constant 0 : i32
    %c0_i32_0 = arith.constant 0 : i32
    %c0_i32_1 = arith.constant 0 : i32
    %c0_i32_2 = arith.constant 0 : i32
    return %arg0, %c0_i32, %c0_i32_0, %c0_i32_1 : i32, i32, i32, i32
  }
  func.func @transform_1(%arg0: i32) -> (i32, i32, i32) {
    %c0_i32 = arith.constant 0 : i32
    %c0_i32_0 = arith.constant 0 : i32
    %c0_i32_1 = arith.constant 0 : i32
    %c0_i32_2 = arith.constant 0 : i32
    return %c0_i32, %c0_i32_0, %c0_i32_1 : i32, i32, i32
  }
  func.func @transform_2(%arg0: i32) -> (i32, i32, i32) {
    %c0_i32 = arith.constant 0 : i32
    %c0_i32_0 = arith.constant 0 : i32
    %c0_i32_1 = arith.constant 0 : i32
    %c0_i32_2 = arith.constant 0 : i32
    return %c0_i32, %c0_i32_0, %c0_i32_1 : i32, i32, i32
  }
  func.func @transform_3(%arg0: i32) -> (i32, i32, i32) {
    %c0_i32 = arith.constant 0 : i32
    %c0_i32_0 = arith.constant 0 : i32
    %c0_i32_1 = arith.constant 0 : i32
    %c0_i32_2 = arith.constant 0 : i32
    return %c0_i32, %c0_i32_0, %c0_i32_1 : i32, i32, i32
  }
  func.func @transform_4(%arg0: i32) -> (i32, i32, i32) {
    %c0_i32 = arith.constant 0 : i32
    %c0_i32_0 = arith.constant 0 : i32
    %c0_i32_1 = arith.constant 0 : i32
    %c0_i32_2 = arith.constant 0 : i32
    return %c0_i32, %c0_i32_0, %c0_i32_1 : i32, i32, i32
  }
  func.func @transform_5(%arg0: i32) -> (i32, i32, i32, i32) {
    %c0_i32 = arith.constant 0 : i32
    %c0_i32_0 = arith.constant 0 : i32
    %c0_i32_1 = arith.constant 0 : i32
    %c0_i32_2 = arith.constant 0 : i32
    return %arg0, %c0_i32, %c0_i32_0, %c0_i32_1 : i32, i32, i32, i32
  }
}

</mosaic_0001>

<bundles_post_ra>
// kernel: tpu_custom_call.1
= control target key start
LH: loop header
LB: loop body
LE: loop exit
PB: predicated region body
PF: predicated region fallthrough
CT: control target
= control target key end

     0   :  { %10 = vsyncpa [#allocation4], 0  ;;  %s14762_s0 = inlined_call_operand.hbm [shape: bf16[2,16,16,128], index: 0, kind: input, shape index: {}]   ;;  %s14763_s1 = inlined_call_operand.hbm [shape: bf16[3,384,128], index: 1, kind: input, shape index: {}]   ;;  %s14764_s2 = inlined_call_operand.vmem [shape: f32[1,1,128], index: 2, kind: input, shape index: {}]   ;;  %s14765_s3 = inlined_call_operand.hbm [shape: bf16[3,384,128], index: 3, kind: input, shape index: {}]   ;;  %s14766_s4 = inlined_call_operand.vmem [shape: f32[1,1,128], index: 4, kind: input, shape index: {}]   ;;  %s14767_s5 = inlined_call_operand.hbm [shape: bf16[2,16,16,128], index: 5, kind: output, shape index: {}]  }
   0x1   :  { %12 = vsyncpa [#allocation4 + $0x1], 0 }
   0x2   :  { %13 = vsyncpa [#allocation7], 0 }
   0x3   :  { %14 = vsyncpa [#allocation5], 0 }
   0x4   :  { %16 = vsyncpa [#allocation5 + $0x1], 0  ;;  %s12599_s18 = smov 0   ;;  %s12601_s19 = smov 0  }
   0x5   :  { %s12603_s20 = smov 0   ;;  %s12605_s21 = smov 0  }
   0x6 LB: > { %s12620_s22 = sadd.s32 4294967295, %s12560_s21   ;;  %s9407_s23 = sadd.s32 4294967294, %s12560_s21   ;;  %s12560_s21 = sphi %s12605_s21, %s15045_s21   ;;  %s12556_s20 = sphi %s12603_s20, %s15044_s20   ;;  %s12552_s19 = sphi %s12601_s19, %s15043_s19   ;;  %s12548_s18 = sphi %s12599_s18, %s15042_s18  }
   0x7   : > { %p42_p0 = scmp.ne.s32.totalorder %s12552_s19, %s12548_s18  ;;  %p43_p1 = scmp.eq.s32.totalorder %s12620_s22, 0 }
   0x8   : > { %p150_p2 = scmp.eq.s32.totalorder %s12620_s22, 1  ;;  %p156_p3 = scmp.eq.s32.totalorder %s9407_s23, 1 }
   0x9   : > { %p12629_p4 = por %p43_p1, %p42_p0  ;;  %p9408_p5 = scmp.ge.s32.totalorder %s12560_s21, 1 }
   0xa   : > { %p12634_p6 = por %p156_p3, %p42_p0  ;;  %p163_p7 = scmp.lt.s32.totalorder %s12560_s21, 3 }
   0xb   : > { %s174_s28 = sshll.u32 %s14763_s1, 4  ;;  %s12562_s30 = smov [#allocation6]   ;;  %s175_s28 = int_to_ptr.hbm [resolvable:$true] %s174_s28 }
   0xc   : > { %p12642_p8 = pnand %p9408_p5, %p163_p7  ;;  %s176_s6 = sshll.u32 %s12562_s30, 4  ;;  %s177_s6 = int_to_ptr.vmem [resolvable:$true] %s176_s6 }
   0xd   : > { %s191_s9 = sshll.u32 %s14765_s3, 4  ;;  %s14768_s10 = smov 64   ;;  %s192_s9 = int_to_ptr.hbm [resolvable:$true] %s191_s9 }
   0xe   : > { %p12335_p9 = pneg %p12642_p8  ;;  %s12564_s11 = smov 4  }
   0xf   : > { %s12565_s12 = smov [#allocation8]   ;;  %s12661_s14 = sadd.s32 1, %s12560_s21  }
  0x10   : > { %p12336_p10 = pnand %p12335_p9, %p43_p1  ;;  %s193_s13 = sshll.u32 %s12565_s12, 4  ;;  %s194_s13 = int_to_ptr.vmem [resolvable:$true] %s193_s13 }
  0x11   : > { %s29_s15 = sadd.s32 1, %s12556_s20  ;;  %s26_s16 = ssub.s32 %s12560_s21, %s12661_s14 }
  0x12   : > { %12338 = dma.hbm_to_vmem [thread:$0]  (!%p12336_p10), %s175_s28, 9216, %s177_s6, [#allocation7], %s14768_s10, %s14768_s10, %s12564_s11  }
  0x13   : > { %12341 = dma.hbm_to_vmem [thread:$0]  (!%p12336_p10), %s192_s9, 9216, %s194_s13, [#allocation7], %s14768_s10, %s14768_s10, %s12564_s11  }
  0x14   : > { %p36_p12 = scmp.ne.s32.totalorder %s12556_s20, %s12552_s19  ;;  %p27_p13 = scmp.eq.s32.totalorder %s26_s16, 0 }
  0x15   : > { %p37_p0 = scmp.eq.s32.totalorder %s12560_s21, 0  ;;  %p12352_p5 = scmp.lt.s32.totalorder %s12560_s21, 2 }
  0x16   : > { %p12671_p3 = por %p150_p2, %p36_p12  ;;  %s210_s26 = sand.u32 1, %s12556_s20  }
  0x17   : > { %s12677_s23 = scalar_select %p27_p13, %s12556_s20, %s29_s15  }
  0x18   : > { %p38_p7 = por %p37_p0, %p36_p12  ;;  %s9412_s27 = sshll.u32 %s210_s26, 7 }
  0x19   : > { %s11729_s28 = sshll.u32 %s12560_s21, 7  ;;  %s214_s8 = scalar_lea.vmem [#allocation3], %s9412_s27 }
  0x1a   : > { %s219_s7 = scalar_lea.hbm %s14762_s0, %s11729_s28  ;;  %s222_s9 = sshll.u32 %s214_s8, 4  ;;  %s223_s9 = int_to_ptr.vmem [resolvable:$true] %s222_s9 }
  0x1b   : > { %s220_s12 = sshll.u32 %s219_s7, 4  ;;  %p12684_p2 = pnand %p12352_p5, %p38_p7  ;;  %s221_s12 = int_to_ptr.hbm [resolvable:$true] %s220_s12 }
  0x1c   : > { %s211_s15 = scalar_lea.sflag [#allocation4], %s210_s26  ;;  %s12460_s16 = sshra.s32 %s221_s12, 4  ;;  %s12461_s16 = int_to_ptr.hbm [resolvable:$true] %s12460_s16 }
  0x1d   : > { %s12462_s10 = scalar_lea.hbm %s12461_s16, 128  ;;  %p12464_p10 = pneg %p12684_p2 }
  0x1e   : > { %p12463_p9 = scmp.ne.s32.totalorder %s12461_s16, %s12462_s10  ;;  %s12467_s30 = scalar_lea.hbm %s14762_s0, 256 }
  0x1f   : > { %p12468_p0 = scmp.lt.s32.totalorder %s12461_s16, %s14762_s0  ;;  %p12469_p5 = scmp.lt.s32.totalorder %s12467_s30, %s12462_s10 }
  0x20   : > { %p12465_p12 = pnand %p12464_p10, %p12463_p9 }
  0x21   : > { %p12470_p7 = por %p12469_p5, %p12468_p0 }
  0x22   : > { %p12466_p13 = pneg %p12465_p12 }
  0x24   : > { %p12471_p11 = pnand %p12470_p7, %p12466_p13 }
  0x26   : > { %12474 = shalt.err (!%p12471_p11)
}
  0x27   : > { %s14812_s26 = smov 64   ;;  %234 = sbr.rel (%p12642_p8) target bundleno = 2127 (0x84f), region = 40 }
  0x28   : > { %12345 = dma.hbm_to_vmem [thread:$0]  (!%p12684_p2), %s221_s12, 2048, %s223_s9, %s211_s15, %s14812_s26, %s14812_s26, %s12564_s11  }
  0x2c   : > { %s12704_s8 = sand.u32 1, %s12552_s19  }
  0x2d   : > { %s9416_s10 = sshll.u32 %s12704_s8, 7  ;;  %s237_s16 = scalar_lea.sflag [#allocation4], %s12704_s8 }
  0x2e   : > { %s12710_s28 = scalar_lea.vmem [#allocation3], %s9416_s10 }
  0x2f   : > { %12535 = dma.done.wait (%p12629_p4), %s237_s16, 2048  }
  0x30   : > { %12537 = vsyncadd (%p12629_p4), %s237_s16, 4294965248 }
  0x31   : > { %12539 = dma.done.wait (%p43_p1), [#allocation7], 18432  }
  0x32   : > { %12541 = vsyncadd (%p43_p1), [#allocation7], 4294948864  ;;  %v11905_v0 = vld [vmem:[#allocation6 + $0xf8] sm:$0xff]  ;;  %vm293_vm0 = vcmask 1040384   ;;  %vm294_vm1 = vsmask.f32 7938 }
  0x33   : > { %v11913_v1 = vld [vmem:[#allocation6 + $0x138] sm:$0xff]  ;;  %1921 = vmatpush.bf16.msra.mxu0 %v11905_v0  ;;  %12307 = vmatpush.bf16.msra.mxu2 %v11905_v0  ;;  %v11904_v2 = vld [vmem:[#allocation6 + $0xf0] sm:$0xff]  ;;  %vm12722_vm2 = vmand %vm293_vm0, %vm294_vm1  ;;  %vm458_vm3 = vcmask 1044484   ;;  %vm344_vm4 = vsmask.f32 256  ;;  %vm958_vm6 = vcmask 1043456  }
  0x34   : > { %2050 = vmatpush.bf16.msra.mxu1 %v11913_v1  ;;  %12315 = vmatpush.bf16.msra.mxu3 %v11913_v1  ;;  %v11912_v3 = vld [vmem:[#allocation6 + $0x130] sm:$0xff]  ;;  %v11903_v5 = vld [vmem:[#allocation6 + $0xe8] sm:$0xff]  ;;  %vm636_vm5 = vsmask.f32 4368  ;;  %v296_v7 = vld [vmem:[#allocation2 + $0x24] sm:$0x1] }
  0x35   : > { %v11911_v6 = vld [vmem:[#allocation6 + $0x128] sm:$0xff]  ;;  %v12727_v8 = vld [vmem:[%s12710_s28] sm:$0xf]  ;;  %v297_v9 = vsel %vm12722_vm2, 0, %v296_v7  ;;  %v12732_v10 = vld [vmem:[%s12710_s28 + $0x4] sm:$0xf] }
  0x36   : > { %14815 = vst [vmem:[#allocation13_spill] sm:$0xff] %v12727_v8  ;;  %v460_v11 = vrot.slane %v12727_v8, 7  ;;  %vm12738_vm7 = vmor %vm293_vm0, %vm458_vm3  ;;  %v462_v13 = vrot.slane %v12732_v10, 7  ;;  %v320_v14 = vld [vmem:[#allocation2 + $0x144] sm:$0x1]  ;;  %v639_v15 = vshrl.u32 %v12727_v8, 16 }
  0x37   : > { %1922 = vmatpush.bf16.msra.mxu0 %v11904_v2  ;;  %12308 = vmatpush.bf16.msra.mxu2 %v11904_v2  ;;  %14816 = vst [vmem:[#allocation14_spill] sm:$0xff] %v12732_v10  ;;  %v11902_v16 = vld [vmem:[#allocation6 + $0xe0] sm:$0xff]  ;;  %v321_v18 = vsel %vm12722_vm2, 0, %v320_v14  ;;  %v642_v26 = vshll.u32 %v12727_v8, 16  ;;  %v647_v27 = vshrl.u32 %v12732_v10, 16  ;;  %vm12761_vm8 = vmand %vm958_vm6, %vm294_vm1  ;;  %v14821_v28 = vmov 0 }
  0x38   : > { %1072 = vst [vmem:[#allocation2 + $0x2c] sm:$0xf] %v12727_v8  ;;  %2051 = vmatpush.bf16.msra.mxu1 %v11912_v3  ;;  %12316 = vmatpush.bf16.msra.mxu3 %v11912_v3  ;;  %v461_v17 = vrot.slane %v460_v11, 4  ;;  %v12747_v19 = vld [vmem:[%s12710_s28 + $0x40] sm:$0xf]  ;;  %v641_v22 = vrot.slane %v639_v15, 7  ;;  %vm12777_vm9 = vmor %vm344_vm4, %vm636_vm5 }
  0x39   : > { %298 = vst [vmem:[#allocation2 + $0x24] sm:$0x1] %v297_v9  ;;  %v12751_v20 = vld [vmem:[%s12710_s28 + $0x44] sm:$0xf]  ;;  %v500_v21 = vrot.slane %v12747_v19, 7  ;;  %v14822_v28 = vsel %vm12761_vm8, 4294967295, %v14821_v28  ;;  %vm12815_vm10 = vmand %vm293_vm0, %vm344_vm4 }
  0x3a   : > { %588 = vst [vmem:[#allocation2 + $0x24] sm:$0xe] %v460_v11  ;;  %v11910_v23 = vld [vmem:[#allocation6 + $0x120] sm:$0xff]  ;;  %v463_v24 = vsel %vm12738_vm7, %v461_v17, %v462_v13  ;;  %v502_v25 = vrot.slane %v12751_v20, 7  ;;  %v645_v30 = vrot.slane %v641_v22, 4  ;;  %v650_v31 = vshll.u32 %v12732_v10, 16 }
  0x3b   : > { %14819 = vst [vmem:[#allocation15_spill] sm:$0xff] %v12747_v19  ;;  %1923 = vmatpush.bf16.msra.mxu0 %v11903_v5  ;;  %12309 = vmatpush.bf16.msra.mxu2 %v11903_v5  ;;  %v501_v29 = vrot.slane %v500_v21, 4  ;;  %v775_v32 = vshrl.u32 %v12747_v19, 16  ;;  %v644_v33 = vor.u32 %v642_v26, %v641_v22  ;;  %v12767_v34 = vrot.slane %v647_v27, 7  ;;  %v960_v35 = vld [vmem:[#allocation2 + $0x28] sm:$0xf] }
  0x3c   : > { %1073 = vst [vmem:[#allocation2 + $0x38] sm:$0xf] %v12732_v10  ;;  %2052 = vmatpush.bf16.msra.mxu1 %v11911_v6  ;;  %12317 = vmatpush.bf16.msra.mxu3 %v11911_v6  ;;  %v778_v36 = vshll.u32 %v12747_v19, 16  ;;  %v14824_v38 = vmov 0  ;;  %v783_v40 = vshrl.u32 %v12751_v20, 16  ;;  %v786_v41 = vshll.u32 %v12751_v20, 16 }
  0x3d   : > { %14820 = vst [vmem:[#allocation16_spill] sm:$0xff] %v12751_v20  ;;  %v503_v37 = vsel %vm12738_vm7, %v501_v29, %v502_v25  ;;  %v14825_v38 = vsel %vm12777_vm9, 4294967295, %v14824_v38  ;;  %v777_v39 = vrot.slane %v775_v32, 7  ;;  %v11901_v42 = vld [vmem:[#allocation6 + $0xd8] sm:$0xff]  ;;  %v652_v43 = vor.u32 %v650_v31, %v12767_v34  ;;  %v1016_v45 = vld [vmem:[#allocation2 + $0x148] sm:$0xf] }
  0x3e   : > { %322 = vst [vmem:[#allocation2 + $0x144] sm:$0x1] %v321_v18  ;;  %v961_v44 = vsel %vm12761_vm8, %v644_v33, %v960_v35  ;;  %v11909_v46 = vld [vmem:[#allocation6 + $0x118] sm:$0xff]  ;;  %v12787_v49 = vrot.slane %v783_v40, 7  ;;  %v299_v51 = vld [vmem:[#allocation2 + $0x48] sm:$0x1] }
  0x3f   : > { %589 = vst [vmem:[#allocation2 + $0x30] sm:$0xf] %v463_v24  ;;  %1924 = vmatpush.bf16.msra.mxu0 %v11902_v16  ;;  %12310 = vmatpush.bf16.msra.mxu2 %v11902_v16  ;;  %v780_v47 = vor.u32 %v778_v36, %v777_v39  ;;  %v781_v48 = vrot.slane %v777_v39, 4  ;;  %v653_v50 = vsel %vm12777_vm9, %v645_v30, %v652_v43  ;;  %v300_v54 = vsel %vm12722_vm2, 0, %v299_v51  ;;  %v12797_v55 = vld [vmem:[%s12710_s28 + $0x8] sm:$0xf] }
  0x40   : > { %14823 = vst [vmem:[#allocation17_spill] sm:$0xff] %v14822_v28  ;;  %2053 = vmatpush.bf16.msra.mxu1 %v11910_v23  ;;  %12318 = vmatpush.bf16.msra.mxu3 %v11910_v23  ;;  %v788_v52 = vor.u32 %v786_v41, %v12787_v49  ;;  %v464_v56 = vrot.slane %v462_v13, 4  ;;  %v11900_v57 = vld [vmem:[#allocation6 + $0xd0] sm:$0xff]  ;;  %v465_v58 = vrot.slane %v12797_v55, 7  ;;  %v323_v59 = vld [vmem:[#allocation2 + $0x168] sm:$0x1] }
  0x41   : > { %612 = vst [vmem:[#allocation2 + $0x144] sm:$0xe] %v500_v21  ;;  %v1017_v53 = vsel %vm12761_vm8, %v780_v47, %v1016_v45  ;;  %v11908_v60 = vld [vmem:[#allocation6 + $0x110] sm:$0xff]  ;;  %v11899_v62 = vld [vmem:[#allocation6 + $0xc8] sm:$0xff]  ;;  %v656_v0 = vshrl.u32 %v12797_v55, 16  ;;  %v659_v1 = vshll.u32 %v12797_v55, 16 }
  0x42   : > { %1088 = vst [vmem:[#allocation2 + $0x14c] sm:$0xf] %v12747_v19  ;;  %v789_v61 = vsel %vm12777_vm9, %v781_v48, %v788_v52  ;;  %v12803_v63 = vld [vmem:[%s12710_s28 + $0x48] sm:$0xf]  ;;  %v324_v3 = vsel %vm12722_vm2, 0, %v323_v59  ;;  %v504_v5 = vrot.slane %v502_v25, 4 }
  0x43   : > { %14826 = vst [vmem:[#allocation18_spill] sm:$0xff] %v14825_v38  ;;  %1925 = vmatpush.bf16.msra.mxu0 %v11901_v42  ;;  %12311 = vmatpush.bf16.msra.mxu2 %v11901_v42  ;;  %v11907_v2 = vld [vmem:[#allocation6 + $0x108] sm:$0xff]  ;;  %v505_v6 = vrot.slane %v12803_v63, 7  ;;  %v654_v7 = vrot.slane %v12767_v34, 4  ;;  %v12819_v11 = vrot.slane %v656_v0, 7  ;;  %v792_v14 = vshrl.u32 %v12803_v63, 16 }
  0x44   : > { %613 = vst [vmem:[#allocation2 + $0x150] sm:$0xf] %v503_v37  ;;  %2054 = vmatpush.bf16.msra.mxu1 %v11909_v46  ;;  %12319 = vmatpush.bf16.msra.mxu3 %v11909_v46  ;;  %v964_v13 = vld [vmem:[#allocation2 + $0x40] sm:$0x1]  ;;  %v12822_v15 = vld [vmem:[#allocation2 + $0x24] sm:$0xf] }
  0x45   : > { %1089 = vst [vmem:[#allocation2 + $0x158] sm:$0xf] %v12751_v20  ;;  %v790_v18 = vrot.slane %v12787_v49, 4  ;;  %v795_v21 = vshll.u32 %v12803_v63, 16  ;;  %v11898_v22 = vld [vmem:[#allocation6 + $0xc0] sm:$0xff]  ;;  %v661_v24 = vor.u32 %v659_v1, %v12819_v11  ;;  %v466_v30 = vrot.slane %v465_v58, 4 }
  0x46   : > { %962 = vst [vmem:[#allocation2 + $0x28] sm:$0xf] %v961_v44  ;;  %v11827_v16 = vld [vmem:[#allocation2 + $0x2c] sm:$0xf0]  ;;  %v967_v25 = vld [vmem:[#allocation2 + $0x4c] sm:$0xf]  ;;  %v965_v31 = vsel %vm12815_vm10, %v654_v7, %v964_v13 }
  0x47   : > { %963 = vst [vmem:[#allocation2 + $0x34] sm:$0xf] %v653_v50  ;;  %1926 = vmatpush.bf16.msra.mxu0 %v11900_v57  ;;  %12312 = vmatpush.bf16.msra.mxu2 %v11900_v57  ;;  %v11906_v26 = vld [vmem:[#allocation6 + $0x100] sm:$0xff]  ;;  %v12830_v32 = vrot.slane %v792_v14, 7  ;;  %v968_v33 = vsel %vm12761_vm8, %v661_v24, %v967_v25  ;;  %v1020_v34 = vld [vmem:[#allocation2 + $0x160] sm:$0x1]  ;;  %v9423_v41 = vor.u32 %v11827_v16, %v12822_v15 }
  0x48   : > { %14827 = vst [vmem:[#allocation19_spill] sm:$0xff] %v12797_v55  ;;  %2055 = vmatpush.bf16.msra.mxu1 %v11908_v60  ;;  %12320 = vmatpush.bf16.msra.mxu3 %v11908_v60  ;;  %v9566_v17 = vld [vmem:[#allocation2 + $0x144] sm:$0xf]  ;;  %v1023_v35 = vld [vmem:[#allocation2 + $0x16c] sm:$0xf]  ;;  %v1021_v40 = vsel %vm12815_vm10, %v790_v18, %v1020_v34  ;;  %v506_v46 = vrot.slane %v505_v6, 4 }
  0x49   : > { %1018 = vst [vmem:[#allocation2 + $0x148] sm:$0xf] %v1017_v53  ;;  %v797_v39 = vor.u32 %v795_v21, %v12830_v32  ;;  %v11921_v43 = vld [vmem:[#allocation6 + $0x178] sm:$0xff]  ;;  %v12840_v45 = vld [vmem:[%s12710_s28 + $0xc] sm:$0xf]  ;;  %v662_v53 = vrot.slane %v12819_v11, 4 }
  0x4a   : > { %301 = vst [vmem:[#allocation2 + $0x48] sm:$0x1] %v300_v54  ;;  %v11809_v44 = vld [vmem:[#allocation6 + $0x38] sm:$0xff]  ;;  %v467_v48 = vrot.slane %v12840_v45, 7  ;;  %v664_v49 = vshrl.u32 %v12840_v45, 16  ;;  %v667_v54 = vshll.u32 %v12840_v45, 16 }
  0x4b   : > { %1019 = vst [vmem:[#allocation2 + $0x154] sm:$0xf] %v789_v61  ;;  %v11863_v23 = vld [vmem:[#allocation2 + $0x14c] sm:$0xf0]  ;;  %1927 = vmatpush.bf16.msra.mxu0 %v11899_v62  ;;  %12313 = vmatpush.bf16.msra.mxu2 %v11899_v62  ;;  %v1024_v47 = vsel %vm12761_vm8, %v797_v39, %v1023_v35  ;;  %v12847_v52 = vld [vmem:[%s12710_s28 + $0x4c] sm:$0xf] }
  0x4c   : > { %14828 = vst [vmem:[#allocation20_spill] sm:$0xff] %v12803_v63  ;;  %2056 = vmatpush.bf16.msra.mxu1 %v11907_v2  ;;  %12321 = vmatpush.bf16.msra.mxu3 %v11907_v2  ;;  %v9567_v42 = vor.u32 %v11863_v23, %v9566_v17  ;;  %v468_v57 = vsel %vm12738_vm7, %v466_v30, %v467_v48  ;;  %v507_v59 = vrot.slane %v12847_v52, 7  ;;  %v666_v60 = vrot.slane %v664_v49, 7  ;;  %v11920_v61 = vld [vmem:[#allocation6 + $0x170] sm:$0xff]  ;;  %v1027_v17 = vld [vmem:[#allocation2 + $0x184] sm:$0x1] }
  0x4d   : > { %590 = vst [vmem:[#allocation2 + $0x3c] sm:$0x1] %v464_v56  ;;  %v11826_v27 = vld [vmem:[#allocation2 + $0x28] sm:$0xf]  ;;  %v11817_v56 = vld [vmem:[#allocation6 + $0x78] sm:$0xff]  ;;  %v11808_v62 = vld [vmem:[#allocation6 + $0x30] sm:$0xff] }
  0x4e   : > { %591 = vst [vmem:[#allocation2 + $0x48] sm:$0xe] %v465_v58  ;;  %v9424_v29 = vld [vmem:[#allocation2 + $0x30] sm:$0xf0]  ;;  %v469_v58 = vrot.slane %v467_v48, 4  ;;  %v508_v0 = vsel %vm12738_vm7, %v506_v46, %v507_v59  ;;  %v509_v1 = vrot.slane %v507_v59, 4  ;;  %v669_v2 = vor.u32 %v667_v54, %v666_v60 }
  0x4f   : > { %1074 = vst [vmem:[#allocation2 + $0x50] sm:$0xf] %v12797_v55  ;;  %1928 = vmatpush.bf16.msra.mxu0 %v11898_v22  ;;  %12314 = vmatpush.bf16.msra.mxu2 %v11898_v22  ;;  %v9427_v50 = vor.u32 %v11826_v27, %v9424_v29  ;;  %v803_v7 = vshll.u32 %v12847_v52, 16  ;;  %v11816_v13 = vld [vmem:[#allocation6 + $0x70] sm:$0xff]  ;;  %v798_v15 = vrot.slane %v12830_v32, 4  ;;  %v12006_v28 = vld [vmem:[#allocation6 + $0x1e0] sm:$0xff] }
  0x50   : > { %325 = vst [vmem:[#allocation2 + $0x168] sm:$0x1] %v324_v3  ;;  %v11862_v36 = vld [vmem:[#allocation2 + $0x148] sm:$0xf]  ;;  %2057 = vmatpush.bf16.msra.mxu1 %v11906_v26  ;;  %12322 = vmatpush.bf16.msra.mxu3 %v11906_v26  ;;  %v671_v3 = vrot.slane %v666_v60, 4  ;;  %v670_v11 = vsel %vm12777_vm9, %v662_v53, %v669_v2  ;;  %s14361_s30 = scalar_lea.vmem [#allocation9], %s9416_s10 }
  0x51   : > { %614 = vst [vmem:[#allocation2 + $0x15c] sm:$0x1] %v504_v5  ;;  %v971_v5 = vld [vmem:[#allocation2 + $0x64] sm:$0x1]  ;;  %v302_v18 = vld [vmem:[#allocation2 + $0x6c] sm:$0x1] }
  0x52   : > { %615 = vst [vmem:[#allocation2 + $0x168] sm:$0xe] %v505_v6  ;;  %v9568_v37 = vld [vmem:[#allocation2 + $0x150] sm:$0xf0]  ;;  %1929 = vmatmul.bf16.vlgmr.msra.gmra.mxu0 %v9423_v41  ;;  %1989 = vmatmul.bf16.vlgmr.msra.gmra.mxu2 %v9567_v42  ;;  %v800_v6 = vshrl.u32 %v12847_v52, 16  ;;  %v972_v14 = vsel %vm12815_vm10, %v671_v3, %v971_v5  ;;  %v303_v23 = vsel %vm12722_vm2, 0, %v302_v18 }
  0x53   : > { %1090 = vst [vmem:[#allocation2 + $0x170] sm:$0xf] %v12803_v63  ;;  %v9571_v51 = vor.u32 %v11862_v36, %v9568_v37  ;;  %2179 = vmatpush.bf16.msrb.mxu2 %v11921_v43  ;;  %2058 = vmatmul.bf16.vlgmr.msra.gmra.mxu1 %v9427_v50  ;;  %v12868_v26 = vld [vmem:[%s12710_s28 + $0x10] sm:$0xf]  ;;  %v12875_v32 = vld [vmem:[%s12710_s28 + $0x14] sm:$0xf] }
  0x54   : > { %966 = vst [vmem:[#allocation2 + $0x40] sm:$0x1] %v965_v31  ;;  %2836 = vmatpush.bf16.msrb.mxu3 %v11809_v44  ;;  %2965 = vmatpush.bf16.msrb.mxu0 %v11817_v56  ;;  %v802_v16 = vrot.slane %v800_v6, 7  ;;  %v9434_v24 = vld [vmem:[#allocation2 + $0x3c] sm:$0xf]  ;;  %v470_v36 = vrot.slane %v12868_v26, 7 }
  0x55   : > { %14831 = vst [vmem:[#allocation21_spill] sm:$0xff] %v12840_v45  ;;  %2118 = vmatmul.bf16.vlgmr.msra.gmra.mxu3 %v9571_v51  ;;  %v11830_v25 = vld [vmem:[#allocation2 + $0x44] sm:$0xf0]  ;;  %v472_v37 = vrot.slane %v12875_v32, 7  ;;  %v326_v39 = vld [vmem:[#allocation2 + $0x18c] sm:$0x1] }
  0x56   : > { %969 = vst [vmem:[#allocation2 + $0x4c] sm:$0xf] %v968_v33  ;;  %v805_v21 = vor.u32 %v803_v7, %v802_v16  ;;  %v807_v22 = vrot.slane %v802_v16, 4  ;;  %v673_v41 = vshrl.u32 %v12868_v26, 16  ;;  %v471_v42 = vrot.slane %v470_v36, 4  ;;  %v11919_v16 = vld [vmem:[#allocation6 + $0x168] sm:$0xff] }
  0x57   : > { %1022 = vst [vmem:[#allocation2 + $0x160] sm:$0x1] %v1021_v40  ;;  %2180 = vmatpush.bf16.msrb.mxu2 %v11920_v61  ;;  %v327_v43 = vsel %vm12722_vm2, 0, %v326_v39  ;;  %v676_v44 = vshll.u32 %v12868_v26, 16  ;;  %v9435_v46 = vor.u32 %v11830_v25, %v9434_v24  ;;  %v12888_v48 = vld [vmem:[%s12710_s28 + $0x54] sm:$0xf] }
  0x58   : > { %14832 = vst [vmem:[#allocation22_spill] sm:$0xff] %v12847_v52  ;;  %2837 = vmatpush.bf16.msrb.mxu3 %v11808_v62  ;;  %2966 = vmatpush.bf16.msrb.mxu0 %v11816_v13  ;;  %v9578_v27 = vld [vmem:[#allocation2 + $0x15c] sm:$0xf]  ;;  %v806_v30 = vsel %vm12777_vm9, %v798_v15, %v805_v21  ;;  %v1028_v31 = vsel %vm12815_vm10, %v807_v22, %v1027_v17  ;;  %v512_v53 = vrot.slane %v12888_v48, 7  ;;  %v684_v60 = vshll.u32 %v12875_v32, 16  ;;  %v11807_v18 = vld [vmem:[#allocation6 + $0x28] sm:$0xff] }
  0x59   : > { %1025 = vst [vmem:[#allocation2 + $0x16c] sm:$0xf] %v1024_v47  ;;  %v11866_v29 = vld [vmem:[#allocation2 + $0x164] sm:$0xf0]  ;;  %v12885_v47 = vld [vmem:[%s12710_s28 + $0x50] sm:$0xf]  ;;  %v473_v50 = vsel %vm12738_vm7, %v471_v42, %v472_v37 }
  0x5a   : > { %592 = vst [vmem:[#allocation2 + $0x54] sm:$0xf] %v468_v57  ;;  %v9579_v49 = vor.u32 %v11866_v29, %v9578_v27  ;;  %v510_v51 = vrot.slane %v12885_v47, 7  ;;  %v675_v57 = vrot.slane %v673_v41, 7  ;;  %v974_v61 = vld [vmem:[#allocation2 + $0x70] sm:$0xf] }
  0x5b   : > { %593 = vst [vmem:[#allocation2 + $0x60] sm:$0x1] %v469_v58  ;;  %v11829_v33 = vld [vmem:[#allocation2 + $0x40] sm:$0xf]  ;;  %v681_v58 = vshrl.u32 %v12875_v32, 16  ;;  %v809_v3 = vshrl.u32 %v12885_v47, 16  ;;  %2181 = vmatpush.bf16.msrb.mxu2 %v11919_v16 }
  0x5c   : > { %1075 = vst [vmem:[#allocation2 + $0x5c] sm:$0xf] %v12840_v45  ;;  %v511_v59 = vrot.slane %v510_v51, 4  ;;  %v678_v62 = vor.u32 %v676_v44, %v675_v57  ;;  %v812_v5 = vshll.u32 %v12885_v47, 16  ;;  %v820_v15 = vshll.u32 %v12888_v48, 16  ;;  %v11815_v21 = vld [vmem:[#allocation6 + $0x68] sm:$0xff]  ;;  %2838 = vmatpush.bf16.msrb.mxu3 %v11807_v18 }
  0x5d   : > { %616 = vst [vmem:[#allocation2 + $0x174] sm:$0xf] %v508_v0  ;;  %v9436_v34 = vld [vmem:[#allocation2 + $0x48] sm:$0xf0]  ;;  %v679_v0 = vrot.slane %v675_v57, 4  ;;  %v811_v13 = vrot.slane %v809_v3, 7  ;;  %2967 = vmatpush.bf16.msrb.mxu0 %v11815_v21 }
  0x5e   : > { %617 = vst [vmem:[#allocation2 + $0x180] sm:$0x1] %v509_v1  ;;  %v11865_v35 = vld [vmem:[#allocation2 + $0x160] sm:$0xf]  ;;  %v9439_v54 = vor.u32 %v11829_v33, %v9436_v34  ;;  %v12897_v1 = vrot.slane %v681_v58, 7  ;;  %v513_v2 = vsel %vm12738_vm7, %v511_v59, %v512_v53  ;;  %v975_v7 = vsel %vm12761_vm8, %v678_v62, %v974_v61  ;;  %s12306_s26 = sshll.u32 %s12620_s22, 7 }
  0x5f   : > { %1091 = vst [vmem:[#allocation2 + $0x17c] sm:$0xf] %v12847_v52  ;;  %v305_v22 = vld [vmem:[#allocation2 + $0x90] sm:$0x1]  ;;  %v815_v24 = vrot.slane %v811_v13, 4  ;;  %s9312_s24 = sshll.u32 %s14361_s30, 4  ;;  %s9313_s24 = int_to_ptr.vmem [resolvable:$true] %s9312_s24 }
  0x60   : > { %970 = vst [vmem:[#allocation2 + $0x58] sm:$0xf] %v670_v11  ;;  %v9580_v40 = vld [vmem:[#allocation2 + $0x168] sm:$0xf0]  ;;  %v686_v6 = vor.u32 %v684_v60, %v12897_v1  ;;  %v1030_v11 = vld [vmem:[#allocation2 + $0x190] sm:$0xf] }
  0x61   : > { %973 = vst [vmem:[#allocation2 + $0x64] sm:$0x1] %v972_v14  ;;  %v9583_v56 = vor.u32 %v11865_v35, %v9580_v40  ;;  %v817_v14 = vshrl.u32 %v12888_v48, 16  ;;  %v306_v27 = vsel %vm12722_vm2, 0, %v305_v22  ;;  %v12917_v29 = vld [vmem:[%s12710_s28 + $0x18] sm:$0xf] }
  0x62   : > { %14833 = vst [vmem:[#allocation23_spill] sm:$0xff] %v12868_v26  ;;  %1934 = vmatmul.bf16.gmra.mxu0 %v9435_v46  ;;  %1994 = vmatmul.bf16.gmra.mxu2 %v9579_v49  ;;  %v687_v17 = vsel %vm12777_vm9, %v679_v0, %v686_v6  ;;  %v475_v35 = vrot.slane %v12917_v29, 7  ;;  %v11833_v39 = vld [vmem:[#allocation2 + $0x5c] sm:$0xf0]  ;;  %v693_v57 = vshll.u32 %v12917_v29, 16  ;;  %s9300_s29 = scalar_lea.sflag [#allocation5], %s12704_s8 }
  0x63   : > { %304 = vst [vmem:[#allocation2 + $0x6c] sm:$0x1] %v303_v23  ;;  %2063 = vmatmul.bf16.gmra.mxu1 %v9439_v54  ;;  %v814_v23 = vor.u32 %v812_v5, %v811_v13  ;;  %v819_v25 = vrot.slane %v817_v14, 7  ;;  %v688_v54 = vrot.slane %v12897_v1, 4  ;;  %v978_v59 = vld [vmem:[#allocation2 + $0x88] sm:$0x1] }
  0x64   : > { %14834 = vst [vmem:[#allocation24_spill] sm:$0xff] %v12875_v32  ;;  %v9590_v40 = vld [vmem:[#allocation2 + $0x174] sm:$0xf]  ;;  %v1034_v3 = vld [vmem:[#allocation2 + $0x1a8] sm:$0x1]  ;;  %v476_v18 = vrot.slane %v475_v35, 4 }
  0x65   : > { %1026 = vst [vmem:[#allocation2 + $0x178] sm:$0xf] %v806_v30  ;;  %2123 = vmatmul.bf16.gmra.mxu3 %v9583_v56  ;;  %v474_v30 = vrot.slane %v472_v37, 4  ;;  %v822_v33 = vor.u32 %v820_v15, %v819_v25  ;;  %v1031_v34 = vsel %vm12761_vm8, %v814_v23, %v1030_v11  ;;  %v11869_v41 = vld [vmem:[#allocation2 + $0x17c] sm:$0xf0]  ;;  %v690_v56 = vshrl.u32 %v12917_v29, 16 }
  0x66   : > { %1029 = vst [vmem:[#allocation2 + $0x184] sm:$0x1] %v1028_v31  ;;  %v329_v31 = vld [vmem:[#allocation2 + $0x1b0] sm:$0x1]  ;;  %v981_v61 = vld [vmem:[#allocation2 + $0x94] sm:$0xf]  ;;  %v979_v11 = vsel %vm12815_vm10, %v688_v54, %v978_v59 }
  0x67   : > { %594 = vst [vmem:[#allocation2 + $0x6c] sm:$0xe] %v470_v36  ;;  %v9446_v36 = vld [vmem:[#allocation2 + $0x54] sm:$0xf]  ;;  %v11832_v42 = vld [vmem:[#allocation2 + $0x58] sm:$0xf]  ;;  %v823_v37 = vsel %vm12777_vm9, %v815_v24, %v822_v33 }
  0x68   : > { %1076 = vst [vmem:[#allocation2 + $0x74] sm:$0xf] %v12868_v26  ;;  %v330_v49 = vsel %vm12722_vm2, 0, %v329_v31  ;;  %v12936_v60 = vrot.slane %v690_v56, 7  ;;  %v824_v62 = vrot.slane %v819_v25, 4  ;;  %v9447_v0 = vor.u32 %v11833_v39, %v9446_v36  ;;  %v11918_v24 = vld [vmem:[#allocation6 + $0x160] sm:$0xff] }
  0x69   : > { %14835 = vst [vmem:[#allocation25_spill] sm:$0xff] %v12885_v47  ;;  %v1037_v16 = vld [vmem:[#allocation2 + $0x1b4] sm:$0xf]  ;;  %v11806_v25 = vld [vmem:[#allocation6 + $0x20] sm:$0xff]  ;;  %v12956_v31 = vld [vmem:[%s12710_s28 + $0x5c] sm:$0xf]  ;;  %2182 = vmatpush.bf16.msrb.mxu2 %v11918_v24 }
  0x6a   : > { %14836 = vst [vmem:[#allocation26_spill] sm:$0xff] %v12888_v48  ;;  %v1035_v15 = vsel %vm12815_vm10, %v824_v62, %v1034_v3  ;;  %2839 = vmatpush.bf16.msrb.mxu3 %v11806_v25  ;;  %v834_v36 = vshrl.u32 %v12956_v31, 16  ;;  %v361_v45 = vld [vmem:[#allocation2 + $0xf8] sm:$0x1]  ;;  %vm5024_vm11 = vsmask.f32 3328 }
  0x6b   : > { %1077 = vst [vmem:[#allocation2 + $0x80] sm:$0xf] %v12875_v32  ;;  %vm5025_vm12 = vsmask.f32 7440  ;;  %s12510_s15 = scalar_lea.hbm %s14767_s5, 256 }
  0x6c   : > { %595 = vst [vmem:[#allocation2 + $0x78] sm:$0xf] %v473_v50  ;;  %v11868_v44 = vld [vmem:[#allocation2 + $0x178] sm:$0xf]  ;;  %v12927_v50 = vld [vmem:[%s12710_s28 + $0x58] sm:$0xf]  ;;  %vm13524_vm13 = vmor %vm5024_vm11, %vm5025_vm12 }
  0x6d   : > { %328 = vst [vmem:[#allocation2 + $0x18c] sm:$0x1] %v327_v43  ;;  %v9448_v43 = vld [vmem:[#allocation2 + $0x60] sm:$0xf0]  ;;  %v515_v58 = vrot.slane %v12927_v50, 7  ;;  %v829_v1 = vshll.u32 %v12927_v50, 16 }
  0x6e   : > { %618 = vst [vmem:[#allocation2 + $0x18c] sm:$0xe] %v510_v51  ;;  %v9592_v46 = vld [vmem:[#allocation2 + $0x180] sm:$0xf0]  ;;  %v514_v51 = vrot.slane %v512_v53, 4  ;;  %v826_v53 = vshrl.u32 %v12927_v50, 16  ;;  %v9451_v5 = vor.u32 %v11832_v42, %v9448_v43 }
  0x6f   : > { %1092 = vst [vmem:[#allocation2 + $0x194] sm:$0xf] %v12885_v47  ;;  %v9595_v6 = vor.u32 %v11868_v44, %v9592_v46  ;;  %v516_v23 = vrot.slane %v515_v58, 4  ;;  %v837_v42 = vshll.u32 %v12956_v31, 16  ;;  %v836_v54 = vrot.slane %v834_v36, 7 }
  0x70   : > { %619 = vst [vmem:[#allocation2 + $0x198] sm:$0xf] %v513_v2  ;;  %v9591_v2 = vor.u32 %v11869_v41, %v9590_v40  ;;  %v828_v13 = vrot.slane %v826_v53, 7  ;;  %v696_v41 = vrot.slane %v12936_v60, 4  ;;  %v9458_v56 = vld [vmem:[#allocation2 + $0x6c] sm:$0xf] }
  0x71   : > { %1093 = vst [vmem:[#allocation2 + $0x1a0] sm:$0xf] %v12888_v48  ;;  %v841_v53 = vrot.slane %v836_v54, 4 }
  0x72   : > { %976 = vst [vmem:[#allocation2 + $0x70] sm:$0xf] %v975_v7  ;;  %v695_v7 = vor.u32 %v693_v57, %v12936_v60  ;;  %1939 = vmatmul.bf16.gmra.mxu0 %v9447_v0  ;;  %1999 = vmatmul.bf16.gmra.mxu2 %v9591_v2  ;;  %v831_v21 = vor.u32 %v829_v1, %v828_v13 }
  0x73   : > { %977 = vst [vmem:[#allocation2 + $0x7c] sm:$0xf] %v687_v17  ;;  %v12949_v17 = vld [vmem:[%s12710_s28 + $0x1c] sm:$0xf]  ;;  %2068 = vmatmul.bf16.gmra.mxu1 %v9451_v5  ;;  %v11836_v57 = vld [vmem:[#allocation2 + $0x74] sm:$0xf0]  ;;  %v839_v2 = vor.u32 %v837_v42, %v836_v54 }
  0x74   : > { %14837 = vst [vmem:[#allocation27_spill] sm:$0xff] %v12917_v29  ;;  %v982_v14 = vsel %vm12761_vm8, %v695_v7, %v981_v61  ;;  %v698_v22 = vshrl.u32 %v12949_v17, 16  ;;  %v1041_v61 = vld [vmem:[#allocation2 + $0x1cc] sm:$0x1] }
  0x75   : > { %307 = vst [vmem:[#allocation2 + $0x90] sm:$0x1] %v306_v27  ;;  %2128 = vmatmul.bf16.gmra.mxu3 %v9595_v6  ;;  %v1038_v27 = vsel %vm12761_vm8, %v831_v21, %v1037_v16  ;;  %v1042_v7 = vsel %vm12815_vm10, %v841_v53, %v1041_v61  ;;  %v12978_v16 = vld [vmem:[%s12710_s28 + $0x20] sm:$0xf]  ;;  %v308_v21 = vld [vmem:[#allocation2 + $0xb4] sm:$0x1] }
  0x76   : > { %1032 = vst [vmem:[#allocation2 + $0x190] sm:$0xf] %v1031_v34  ;;  %v700_v33 = vrot.slane %v698_v22, 7  ;;  %v517_v34 = vrot.slane %v12956_v31, 7  ;;  %v12982_v22 = vld [vmem:[%s12710_s28 + $0x24] sm:$0xf] }
  0x77   : > { %596 = vst [vmem:[#allocation2 + $0x84] sm:$0x1] %v474_v30  ;;  %v477_v30 = vrot.slane %v12949_v17, 7  ;;  %v11872_v59 = vld [vmem:[#allocation2 + $0x194] sm:$0xf0]  ;;  %v309_v24 = vsel %vm12722_vm2, 0, %v308_v21 }
  0x78   : > { %14838 = vst [vmem:[#allocation28_spill] sm:$0xff] %v12927_v50  ;;  %v519_v43 = vrot.slane %v517_v34, 4  ;;  %v705_v46 = vrot.slane %v700_v33, 4  ;;  %v482_v25 = vrot.slane %v12982_v22, 7  ;;  %v707_v36 = vshrl.u32 %v12978_v16, 16 }
  0x79   : > { %1033 = vst [vmem:[#allocation2 + $0x19c] sm:$0xf] %v823_v37  ;;  %v478_v39 = vsel %vm12738_vm7, %v476_v18, %v477_v30  ;;  %v479_v40 = vrot.slane %v477_v30, 4  ;;  %v518_v37 = vsel %vm12738_vm7, %v516_v23, %v517_v34  ;;  %v11835_v62 = vld [vmem:[#allocation2 + $0x70] sm:$0xf]  ;;  %v11814_v18 = vld [vmem:[#allocation6 + $0x60] sm:$0xff] }
  0x7a   : > { %597 = vst [vmem:[#allocation2 + $0x90] sm:$0xe] %v475_v35  ;;  %v701_v35 = vshll.u32 %v12949_v17, 16  ;;  %v9460_v1 = vld [vmem:[#allocation2 + $0x78] sm:$0xf0]  ;;  %v480_v23 = vrot.slane %v12978_v16, 7  ;;  %2968 = vmatpush.bf16.msrb.mxu0 %v11814_v18 }
  0x7b   : > { %1078 = vst [vmem:[#allocation2 + $0x98] sm:$0xf] %v12917_v29  ;;  %v710_v42 = vshll.u32 %v12978_v16, 16 }
  0x7c   : > { %331 = vst [vmem:[#allocation2 + $0x1b0] sm:$0x1] %v330_v49  ;;  %v703_v44 = vor.u32 %v701_v35, %v700_v33  ;;  %v985_v49 = vld [vmem:[#allocation2 + $0xac] sm:$0x1]  ;;  %v481_v30 = vrot.slane %v480_v23, 4 }
  0x7d   : > { %620 = vst [vmem:[#allocation2 + $0x1a4] sm:$0x1] %v514_v51  ;;  %v832_v51 = vrot.slane %v828_v13, 4  ;;  %v986_v0 = vsel %vm12815_vm10, %v705_v46, %v985_v49  ;;  %v11871_v3 = vld [vmem:[#allocation2 + $0x190] sm:$0xf]  ;;  %v715_v46 = vshrl.u32 %v12982_v22, 16 }
  0x7e   : > { %621 = vst [vmem:[#allocation2 + $0x1b0] sm:$0xe] %v515_v58  ;;  %v9602_v58 = vld [vmem:[#allocation2 + $0x18c] sm:$0xf]  ;;  %v704_v60 = vsel %vm12777_vm9, %v696_v41, %v703_v44  ;;  %v709_v44 = vrot.slane %v707_v36, 7 }
  0x7f   : > { %1094 = vst [vmem:[#allocation2 + $0x1b8] sm:$0xf] %v12927_v50  ;;  %v840_v6 = vsel %vm12777_vm9, %v832_v51, %v839_v2  ;;  %v9603_v13 = vor.u32 %v11872_v59, %v9602_v58  ;;  %v12993_v33 = vld [vmem:[%s12710_s28 + $0x64] sm:$0xf]  ;;  %v9470_v49 = vld [vmem:[#allocation2 + $0x84] sm:$0xf] }
  0x80   : > { %14839 = vst [vmem:[#allocation29_spill] sm:$0xff] %v12949_v17  ;;  %v9604_v5 = vld [vmem:[#allocation2 + $0x198] sm:$0xf0]  ;;  %v522_v35 = vrot.slane %v12993_v33, 7  ;;  %v988_v58 = vld [vmem:[#allocation2 + $0xb8] sm:$0xf]  ;;  %v712_v2 = vor.u32 %v710_v42, %v709_v44 }
  0x81   : > { %980 = vst [vmem:[#allocation2 + $0x88] sm:$0x1] %v979_v11  ;;  %v9459_v11 = vor.u32 %v11836_v57, %v9458_v56  ;;  %v11839_v51 = vld [vmem:[#allocation2 + $0x8c] sm:$0xf0]  ;;  %v713_v53 = vrot.slane %v709_v44, 4  ;;  %v12008_v50 = vld [vmem:[#allocation6 + $0x1f0] sm:$0xff] }
  0x82   : > { %983 = vst [vmem:[#allocation2 + $0x94] sm:$0xf] %v982_v14  ;;  %v9463_v14 = vor.u32 %v11835_v62, %v9460_v1  ;;  %2004 = vmatmul.bf16.gmra.mxu2 %v9603_v13  ;;  %v13013_v1 = vrot.slane %v715_v46, 7  ;;  %v989_v13 = vsel %vm12761_vm8, %v712_v2, %v988_v58  ;;  %v13032_v42 = vld [vmem:[%s12710_s28 + $0x28] sm:$0xf]  ;;  %v11917_v46 = vld [vmem:[#allocation6 + $0x158] sm:$0xff] }
  0x83   : > { %1036 = vst [vmem:[#allocation2 + $0x1a8] sm:$0x1] %v1035_v15  ;;  %v9607_v15 = vor.u32 %v11871_v3, %v9604_v5  ;;  %1944 = vmatmul.bf16.gmra.mxu0 %v9459_v11  ;;  %v851_v3 = vshrl.u32 %v12993_v33, 16  ;;  %v724_v44 = vshrl.u32 %v13032_v42, 16  ;;  %2183 = vmatpush.bf16.msrb.mxu2 %v11917_v46 }
  0x84   : > { %14840 = vst [vmem:[#allocation30_spill] sm:$0xff] %v12956_v31  ;;  %2073 = vmatmul.bf16.gmra.mxu1 %v9463_v14  ;;  %v9614_v54 = vld [vmem:[#allocation2 + $0x1a4] sm:$0xf] }
  0x85   : > { %1039 = vst [vmem:[#allocation2 + $0x1b4] sm:$0xf] %v1038_v27  ;;  %2133 = vmatmul.bf16.gmra.mxu3 %v9607_v15  ;;  %v12990_v27 = vld [vmem:[%s12710_s28 + $0x60] sm:$0xf]  ;;  %v11875_v56 = vld [vmem:[#allocation2 + $0x1ac] sm:$0xf0] }
  0x86   : > { %1079 = vst [vmem:[#allocation2 + $0xa4] sm:$0xf] %v12949_v17  ;;  %v520_v34 = vrot.slane %v12990_v27, 7  ;;  %v843_v59 = vshrl.u32 %v12990_v27, 16  ;;  %v13022_v14 = vrot.slane %v851_v3, 7 }
  0x87   : > { %598 = vst [vmem:[#allocation2 + $0x9c] sm:$0xf] %v478_v39  ;;  %v483_v39 = vsel %vm12738_vm7, %v481_v30, %v482_v25  ;;  %v1044_v15 = vld [vmem:[#allocation2 + $0x1d8] sm:$0xf] }
  0x88   : > { %599 = vst [vmem:[#allocation2 + $0xa8] sm:$0x1] %v479_v40  ;;  %v332_v40 = vld [vmem:[#allocation2 + $0x1d4] sm:$0x1]  ;;  %v521_v41 = vrot.slane %v520_v34, 4 }
  0x89   : > { %622 = vst [vmem:[#allocation2 + $0x1bc] sm:$0xf] %v518_v37  ;;  %v718_v37 = vshll.u32 %v12982_v22, 16  ;;  %v11838_v61 = vld [vmem:[#allocation2 + $0x88] sm:$0xf] }
  0x8a   : > { %623 = vst [vmem:[#allocation2 + $0x1c8] sm:$0x1] %v519_v43  ;;  %v333_v43 = vsel %vm12722_vm2, 0, %v332_v40  ;;  %v523_v57 = vsel %vm12738_vm7, %v521_v41, %v522_v35  ;;  %v9472_v62 = vld [vmem:[#allocation2 + $0x90] sm:$0xf0] }
  0x8b   : > { %1095 = vst [vmem:[#allocation2 + $0x1c4] sm:$0xf] %v12956_v31  ;;  %v720_v11 = vor.u32 %v718_v37, %v13013_v1  ;;  %v9475_v36 = vor.u32 %v11838_v61, %v9472_v62  ;;  %v11805_v37 = vld [vmem:[#allocation6 + $0x18] sm:$0xff]  ;;  %v335_v61 = vld [vmem:[#allocation2 + $0x1f8] sm:$0x1] }
  0x8c   : > { %984 = vst [vmem:[#allocation2 + $0xa0] sm:$0xf] %v704_v60  ;;  %v846_v60 = vshll.u32 %v12990_v27, 16  ;;  %v9616_v5 = vld [vmem:[#allocation2 + $0x1b0] sm:$0xf0]  ;;  %2840 = vmatpush.bf16.msrb.mxu3 %v11805_v37  ;;  %v336_v2 = vsel %vm12722_vm2, 0, %v335_v61 }
  0x8d   : > { %987 = vst [vmem:[#allocation2 + $0xac] sm:$0x1] %v986_v0  ;;  %v11874_v0 = vld [vmem:[#allocation2 + $0x1a8] sm:$0xf]  ;;  %v721_v30 = vsel %vm12777_vm9, %v713_v53, %v720_v11  ;;  %v524_v53 = vrot.slane %v522_v35, 4 }
  0x8e   : > { %1040 = vst [vmem:[#allocation2 + $0x1c0] sm:$0xf] %v840_v6  ;;  %v845_v6 = vrot.slane %v843_v59, 7  ;;  %v13046_v59 = vrot.slane %v724_v44, 7 }
  0x8f   : > { %1043 = vst [vmem:[#allocation2 + $0x1cc] sm:$0x1] %v1042_v7  ;;  %v854_v7 = vshll.u32 %v12993_v33, 16 }
  0x90   : > { %14841 = vst [vmem:[#allocation31_spill] sm:$0xff] %v12978_v16  ;;  %v848_v18 = vor.u32 %v846_v60, %v845_v6  ;;  %v849_v21 = vrot.slane %v845_v6, 4  ;;  %v727_v60 = vshll.u32 %v13032_v42, 16  ;;  %v9482_v6 = vld [vmem:[#allocation2 + $0x9c] sm:$0xf] }
  0x91   : > { %1080 = vst [vmem:[#allocation2 + $0xbc] sm:$0xf] %v12978_v16  ;;  %v9626_v11 = vld [vmem:[#allocation2 + $0x1bc] sm:$0xf] }
  0x92   : > { %14842 = vst [vmem:[#allocation32_spill] sm:$0xff] %v12982_v22  ;;  %v1045_v40 = vsel %vm12761_vm8, %v848_v18, %v1044_v15  ;;  %v729_v62 = vor.u32 %v727_v60, %v13046_v59  ;;  %v995_v15 = vld [vmem:[#allocation2 + $0xdc] sm:$0xf] }
  0x93   : > { %1081 = vst [vmem:[#allocation2 + $0xc8] sm:$0xf] %v12982_v22  ;;  %v11841_v18 = vld [vmem:[#allocation2 + $0xa0] sm:$0xf]  ;;  %v11916_v60 = vld [vmem:[#allocation6 + $0x150] sm:$0xff] }
  0x94   : > { %14843 = vst [vmem:[#allocation33_spill] sm:$0xff] %v12990_v27  ;;  %2078 = vmatmul.bf16.gmra.mxu1 %v9475_v36  ;;  %2184 = vmatpush.bf16.msrb.mxu2 %v11916_v60 }
  0x95   : > { %310 = vst [vmem:[#allocation2 + $0xb4] sm:$0x1] %v309_v24  ;;  %v9615_v24 = vor.u32 %v11875_v56, %v9614_v54  ;;  %v485_v54 = vrot.slane %v13032_v42, 7  ;;  %v311_v56 = vld [vmem:[#allocation2 + $0xd8] sm:$0x1] }
  0x96   : > { %14844 = vst [vmem:[#allocation34_spill] sm:$0xff] %v12993_v33  ;;  %v312_v58 = vsel %vm12722_vm2, 0, %v311_v56  ;;  %v11877_v36 = vld [vmem:[#allocation2 + $0x1c0] sm:$0xf]  ;;  %v13073_v56 = vld [vmem:[%s12710_s28 + $0x6c] sm:$0xf] }
  0x97   : > { %600 = vst [vmem:[#allocation2 + $0xb4] sm:$0xe] %v480_v23  ;;  %v9471_v23 = vor.u32 %v11839_v51, %v9470_v49  ;;  %2009 = vmatmul.bf16.gmra.mxu2 %v9615_v24  ;;  %v11813_v49 = vld [vmem:[#allocation6 + $0x58] sm:$0xff]  ;;  %v484_v51 = vrot.slane %v482_v25, 4  ;;  %v722_v25 = vrot.slane %v13013_v1, 4 }
  0x98   : > { %624 = vst [vmem:[#allocation2 + $0x1d4] sm:$0xe] %v520_v34  ;;  %v856_v34 = vor.u32 %v854_v7, %v13022_v14  ;;  %2969 = vmatpush.bf16.msrb.mxu0 %v11813_v49  ;;  %v11842_v7 = vld [vmem:[#allocation2 + $0xa4] sm:$0xf0]  ;;  %v9484_v24 = vld [vmem:[#allocation2 + $0xa8] sm:$0xf0] }
  0x99   : > { %601 = vst [vmem:[#allocation2 + $0xc0] sm:$0xf] %v483_v39  ;;  %v9619_v39 = vor.u32 %v11874_v0, %v9616_v5  ;;  %1949 = vmatmul.bf16.gmra.mxu0 %v9471_v23  ;;  %v858_v0 = vrot.slane %v13022_v14, 4  ;;  %v11878_v1 = vld [vmem:[#allocation2 + $0x1c4] sm:$0xf0]  ;;  %v9487_v37 = vor.u32 %v11841_v18, %v9484_v24 }
  0x9a   : > { %334 = vst [vmem:[#allocation2 + $0x1d4] sm:$0x1] %v333_v43  ;;  %v857_v41 = vsel %vm12777_vm9, %v849_v21, %v856_v34  ;;  %v13036_v43 = vld [vmem:[%s12710_s28 + $0x68] sm:$0xf]  ;;  %v996_v21 = vsel %vm12761_vm8, %v729_v62, %v995_v15  ;;  %v1051_v34 = vld [vmem:[#allocation2 + $0x1fc] sm:$0xf]  ;;  %v9627_v44 = vor.u32 %v11878_v1, %v9626_v11 }
  0x9b   : > { %625 = vst [vmem:[#allocation2 + $0x1e0] sm:$0xf] %v523_v57  ;;  %2138 = vmatmul.bf16.gmra.mxu3 %v9619_v39  ;;  %v860_v57 = vshrl.u32 %v13036_v43, 16  ;;  %v525_v3 = vrot.slane %v13036_v43, 7  ;;  %v863_v35 = vshll.u32 %v13036_v43, 16 }
  0x9c   : > { %1096 = vst [vmem:[#allocation2 + $0x1dc] sm:$0xf] %v12990_v27  ;;  %v1048_v23 = vld [vmem:[#allocation2 + $0x1f0] sm:$0x1]  ;;  %v9628_v39 = vld [vmem:[#allocation2 + $0x1c8] sm:$0xf0] }
  0x9d   : > { %1097 = vst [vmem:[#allocation2 + $0x1e8] sm:$0xf] %v12993_v33  ;;  %v13057_v5 = vrot.slane %v860_v57, 7  ;;  %v9631_v49 = vor.u32 %v11877_v36, %v9628_v39  ;;  %v526_v61 = vrot.slane %v525_v3, 4 }
  0x9e   : > { %990 = vst [vmem:[#allocation2 + $0xb8] sm:$0xf] %v989_v13  ;;  %v992_v13 = vld [vmem:[#allocation2 + $0xd0] sm:$0x1] }
  0x9f   : > { %991 = vst [vmem:[#allocation2 + $0xc4] sm:$0xf] %v721_v30  ;;  %v993_v14 = vsel %vm12815_vm10, %v722_v25, %v992_v13  ;;  %v1049_v30 = vsel %vm12815_vm10, %v858_v0, %v1048_v23  ;;  %v11804_v25 = vld [vmem:[#allocation6 + $0x10] sm:$0xff]  ;;  %v9494_v23 = vld [vmem:[#allocation2 + $0xb4] sm:$0xf] }
  0xa0   : > { %1046 = vst [vmem:[#allocation2 + $0x1d8] sm:$0xf] %v1045_v40  ;;  %v865_v40 = vor.u32 %v863_v35, %v13057_v5  ;;  %2841 = vmatpush.bf16.msrb.mxu3 %v11804_v25  ;;  %v866_v35 = vrot.slane %v13057_v5, 4  ;;  %v11845_v24 = vld [vmem:[#allocation2 + $0xbc] sm:$0xf0] }
  0xa1   : > { %1047 = vst [vmem:[#allocation2 + $0x1e4] sm:$0xf] %v857_v41  ;;  %v9483_v41 = vor.u32 %v11842_v7, %v9482_v6  ;;  %v527_v6 = vrot.slane %v13073_v56, 7  ;;  %v871_v7 = vshll.u32 %v13073_v56, 16 }
  0xa2   : > { %14845 = vst [vmem:[#allocation35_spill] sm:$0xff] %v13032_v42  ;;  %v1052_v46 = vsel %vm12761_vm8, %v865_v40, %v1051_v34  ;;  %v11881_v36 = vld [vmem:[#allocation2 + $0x1dc] sm:$0xf0]  ;;  %v1055_v40 = vld [vmem:[#allocation2 + $0x214] sm:$0x1] }
  0xa3   : > { %1082 = vst [vmem:[#allocation2 + $0xe0] sm:$0xf] %v13032_v42  ;;  %v528_v18 = vsel %vm12738_vm7, %v526_v61, %v527_v6  ;;  %v12007_v42 = vld [vmem:[#allocation6 + $0x1e8] sm:$0xff] }
  0xa4   : > { %14846 = vst [vmem:[#allocation36_spill] sm:$0xff] %v13036_v43  ;;  %2083 = vmatmul.bf16.gmra.mxu1 %v9487_v37 }
  0xa5   : > { %1098 = vst [vmem:[#allocation2 + $0x200] sm:$0xf] %v13036_v43 }
  0xa6   : > { %602 = vst [vmem:[#allocation2 + $0xcc] sm:$0x1] %v484_v51  ;;  %v13070_v51 = vld [vmem:[%s12710_s28 + $0x2c] sm:$0xf] }
  0xa7   : > { %313 = vst [vmem:[#allocation2 + $0xd8] sm:$0x1] %v312_v58  ;;  %2014 = vmatmul.bf16.gmra.mxu2 %v9627_v44  ;;  %v732_v57 = vshrl.u32 %v13070_v51, 16  ;;  %v486_v58 = vrot.slane %v485_v54, 4  ;;  %v735_v0 = vshll.u32 %v13070_v51, 16 }
  0xa8   : > { %603 = vst [vmem:[#allocation2 + $0xd8] sm:$0xe] %v485_v54  ;;  %v730_v54 = vrot.slane %v13046_v59, 4  ;;  %v9496_v44 = vld [vmem:[#allocation2 + $0xc0] sm:$0xf0] }
  0xa9   : > { %337 = vst [vmem:[#allocation2 + $0x1f8] sm:$0x1] %v336_v2  ;;  %1954 = vmatmul.bf16.gmra.mxu0 %v9483_v41  ;;  %v734_v62 = vrot.slane %v732_v57, 7  ;;  %v868_v2 = vshrl.u32 %v13073_v56, 16  ;;  %v11844_v41 = vld [vmem:[#allocation2 + $0xb8] sm:$0xf] }
  0xaa   : > { %626 = vst [vmem:[#allocation2 + $0x1ec] sm:$0x1] %v524_v53  ;;  %v487_v53 = vrot.slane %v13070_v51, 7  ;;  %v11880_v5 = vld [vmem:[#allocation2 + $0x1d8] sm:$0xf]  ;;  %v9499_v25 = vor.u32 %v11844_v41, %v9496_v44 }
  0xab   : > { %627 = vst [vmem:[#allocation2 + $0x1f8] sm:$0xe] %v525_v3  ;;  %2143 = vmatmul.bf16.gmra.mxu3 %v9631_v49  ;;  %v737_v11 = vor.u32 %v735_v0, %v734_v62  ;;  %v739_v13 = vrot.slane %v734_v62, 4  ;;  %v870_v15 = vrot.slane %v868_v2, 7  ;;  %v9640_v37 = vld [vmem:[#allocation2 + $0x1e0] sm:$0xf0] }
  0xac   : > { %994 = vst [vmem:[#allocation2 + $0xd0] sm:$0x1] %v993_v14  ;;  %v489_v1 = vrot.slane %v487_v53, 4  ;;  %v488_v3 = vsel %vm12738_vm7, %v486_v58, %v487_v53  ;;  %v529_v14 = vrot.slane %v527_v6, 4  ;;  %v9495_v58 = vor.u32 %v11845_v24, %v9494_v23  ;;  %v13098_v62 = vld [vmem:[%s12710_s28 + $0x30] sm:$0xf] }
  0xad   : > { %997 = vst [vmem:[#allocation2 + $0xdc] sm:$0xf] %v996_v21  ;;  %v999_v21 = vld [vmem:[#allocation2 + $0xf4] sm:$0x1]  ;;  %v873_v34 = vor.u32 %v871_v7, %v870_v15  ;;  %v875_v59 = vrot.slane %v870_v15, 4  ;;  %v738_v39 = vsel %vm12777_vm9, %v730_v54, %v737_v11  ;;  %v9643_v61 = vor.u32 %v11880_v5, %v9640_v37  ;;  %v11812_v2 = vld [vmem:[#allocation6 + $0x50] sm:$0xff] }
  0xae   : > { %1050 = vst [vmem:[#allocation2 + $0x1f0] sm:$0x1] %v1049_v30  ;;  %v9638_v30 = vld [vmem:[#allocation2 + $0x1d4] sm:$0xf]  ;;  %v13101_v0 = vld [vmem:[%s12710_s28 + $0x34] sm:$0xf]  ;;  %2970 = vmatpush.bf16.msrb.mxu0 %v11812_v2 }
  0xaf   : > { %1053 = vst [vmem:[#allocation2 + $0x1fc] sm:$0xf] %v1052_v46  ;;  %v1000_v46 = vsel %vm12815_vm10, %v739_v13, %v999_v21  ;;  %v874_v49 = vsel %vm12777_vm9, %v866_v35, %v873_v34  ;;  %v1056_v57 = vsel %vm12815_vm10, %v875_v59, %v1055_v40  ;;  %v9639_v60 = vor.u32 %v11881_v36, %v9638_v30  ;;  %v13108_v7 = vld [vmem:[%s12710_s28 + $0x70] sm:$0xf]  ;;  %v1002_v30 = vld [vmem:[#allocation2 + $0x100] sm:$0xf] }
  0xb0   : > { %14847 = vst [vmem:[#allocation37_spill] sm:$0xff] %v13070_v51  ;;  %v741_v53 = vshrl.u32 %v13098_v62, 16  ;;  %v490_v6 = vrot.slane %v13098_v62, 7  ;;  %v530_v54 = vrot.slane %v13108_v7, 7  ;;  %v492_v15 = vrot.slane %v13101_v0, 7 }
  0xb1   : > { %14848 = vst [vmem:[#allocation38_spill] sm:$0xff] %v13073_v56  ;;  %v9506_v34 = vld [vmem:[#allocation2 + $0xcc] sm:$0xf]  ;;  %v11848_v59 = vld [vmem:[#allocation2 + $0xd4] sm:$0xf0] }
  0xb2   : > { %1083 = vst [vmem:[#allocation2 + $0xec] sm:$0xf] %v13070_v51  ;;  %v743_v11 = vrot.slane %v741_v53, 7  ;;  %v491_v13 = vrot.slane %v490_v6, 4  ;;  %v9650_v36 = vld [vmem:[#allocation2 + $0x1ec] sm:$0xf] }
  0xb3   : > { %1099 = vst [vmem:[#allocation2 + $0x20c] sm:$0xf] %v13073_v56  ;;  %v531_v40 = vrot.slane %v530_v54, 4  ;;  %v11847_v5 = vld [vmem:[#allocation2 + $0xd0] sm:$0xf] }
  0xb4   : > { %604 = vst [vmem:[#allocation2 + $0xe4] sm:$0xf] %v488_v3  ;;  %2088 = vmatmul.bf16.gmra.mxu1 %v9499_v25  ;;  %v314_v3 = vld [vmem:[#allocation2 + $0xfc] sm:$0x1]  ;;  %v493_v23 = vsel %vm12738_vm7, %v491_v13, %v492_v15  ;;  %v747_v44 = vrot.slane %v743_v11, 4  ;;  %v880_v25 = vshll.u32 %v13108_v7, 16 }
  0xb5   : > { %605 = vst [vmem:[#allocation2 + $0xf0] sm:$0x1] %v489_v1  ;;  %v744_v1 = vshll.u32 %v13098_v62, 16  ;;  %v315_v35 = vsel %vm12722_vm2, 0, %v314_v3  ;;  %v9508_v37 = vld [vmem:[#allocation2 + $0xd8] sm:$0xf0] }
  0xb6   : > { %628 = vst [vmem:[#allocation2 + $0x204] sm:$0xf] %v528_v18  ;;  %v338_v18 = vld [vmem:[#allocation2 + $0x21c] sm:$0x1]  ;;  %v1058_v3 = vld [vmem:[#allocation2 + $0x220] sm:$0xf] }
  0xb7   : > { %629 = vst [vmem:[#allocation2 + $0x210] sm:$0x1] %v529_v14  ;;  %2019 = vmatmul.bf16.gmra.mxu2 %v9639_v60  ;;  %v13115_v14 = vld [vmem:[%s12710_s28 + $0x74] sm:$0xf]  ;;  %v746_v21 = vor.u32 %v744_v1, %v743_v11  ;;  %v339_v24 = vsel %vm12722_vm2, 0, %v338_v18  ;;  %v877_v60 = vshrl.u32 %v13108_v7, 16  ;;  %v9507_v18 = vor.u32 %v11848_v59, %v9506_v34 }
  0xb8   : > { %998 = vst [vmem:[#allocation2 + $0xe8] sm:$0xf] %v738_v39  ;;  %v11884_v39 = vld [vmem:[#allocation2 + $0x1f4] sm:$0xf0]  ;;  %v532_v41 = vrot.slane %v13115_v14, 7  ;;  %v885_v53 = vshrl.u32 %v13115_v14, 16 }
  0xb9   : > { %1001 = vst [vmem:[#allocation2 + $0xf4] sm:$0x1] %v1000_v46  ;;  %1959 = vmatmul.bf16.gmra.mxu0 %v9495_v58  ;;  %v749_v46 = vshrl.u32 %v13101_v0, 16  ;;  %v1003_v58 = vsel %vm12761_vm8, %v746_v21, %v1002_v30  ;;  %v879_v11 = vrot.slane %v877_v60, 7  ;;  %v9651_v21 = vor.u32 %v11884_v39, %v9650_v36  ;;  %v13152_v34 = vld [vmem:[%s12710_s28 + $0x38] sm:$0xf] }
  0xba   : > { %1054 = vst [vmem:[#allocation2 + $0x208] sm:$0xf] %v874_v49  ;;  %v11883_v49 = vld [vmem:[#allocation2 + $0x1f0] sm:$0xf]  ;;  %v13142_v13 = vrot.slane %v885_v53, 7 }
  0xbb   : > { %1057 = vst [vmem:[#allocation2 + $0x214] sm:$0x1] %v1056_v57  ;;  %2148 = vmatmul.bf16.gmra.mxu3 %v9643_v61  ;;  %v752_v57 = vshll.u32 %v13101_v0, 16  ;;  %v533_v61 = vsel %vm12738_vm7, %v531_v40, %v532_v41  ;;  %v13136_v2 = vrot.slane %v749_v46, 7  ;;  %v13155_v59 = vld [vmem:[%s12710_s28 + $0x78] sm:$0xf] }
  0xbc   : > { %14849 = vst [vmem:[#allocation39_spill] sm:$0xff] %v13098_v62  ;;  %v11915_v36 = vld [vmem:[#allocation6 + $0x148] sm:$0xff]  ;;  %v349_v56 = vld [vmem:[#allocation2 + $0x68] sm:$0x1] }
  0xbd   : > { %14850 = vst [vmem:[#allocation40_spill] sm:$0xff] %v13101_v0  ;;  %v754_v1 = vor.u32 %v752_v57, %v13136_v2  ;;  %v11803_v39 = vld [vmem:[#allocation6 + $0x8] sm:$0xff]  ;;  %2185 = vmatpush.bf16.msrb.mxu2 %v11915_v36  ;;  %v892_v36 = vrot.slane %v13142_v13, 4 }
  0xbe   : > { %1084 = vst [vmem:[#allocation2 + $0x104] sm:$0xf] %v13098_v62  ;;  %2842 = vmatpush.bf16.msrb.mxu3 %v11803_v39  ;;  %v1009_v39 = vld [vmem:[#allocation2 + $0x124] sm:$0xf] }
  0xbf   : > { %1085 = vst [vmem:[#allocation2 + $0x110] sm:$0xf] %v13101_v0  ;;  %v755_v40 = vsel %vm12777_vm9, %v747_v44, %v754_v1  ;;  %v758_v44 = vshrl.u32 %v13152_v34, 16  ;;  %v756_v1 = vrot.slane %v13136_v2, 4  ;;  %v535_v2 = vrot.slane %v13155_v59, 7 }
  0xc0   : > { %14851 = vst [vmem:[#allocation41_spill] sm:$0xff] %v13108_v7 }
  0xc1   : > { %1100 = vst [vmem:[#allocation2 + $0x224] sm:$0xf] %v13108_v7 }
  0xc2   : > { %606 = vst [vmem:[#allocation2 + $0xfc] sm:$0xe] %v490_v6  ;;  %v888_v6 = vshll.u32 %v13115_v14, 16 }
  0xc3   : > { %14852 = vst [vmem:[#allocation42_spill] sm:$0xff] %v13115_v14 }
  0xc4   : > { %630 = vst [vmem:[#allocation2 + $0x21c] sm:$0xe] %v530_v54  ;;  %v9652_v54 = vld [vmem:[#allocation2 + $0x1f8] sm:$0xf0]  ;;  %v890_v46 = vor.u32 %v888_v6, %v13142_v13  ;;  %v897_v6 = vshll.u32 %v13155_v59, 16 }
  0xc5   : > { %316 = vst [vmem:[#allocation2 + $0xfc] sm:$0x1] %v315_v35  ;;  %v882_v35 = vor.u32 %v880_v25, %v879_v11  ;;  %v9655_v30 = vor.u32 %v11883_v49, %v9652_v54  ;;  %v13162_v49 = vrot.slane %v758_v44, 7  ;;  %v494_v25 = vrot.slane %v492_v15, 4  ;;  %v1062_v44 = vld [vmem:[#allocation2 + $0x238] sm:$0x1] }
  0xc6   : > { %607 = vst [vmem:[#allocation2 + $0x108] sm:$0xf] %v493_v23  ;;  %v883_v23 = vrot.slane %v879_v11, 4  ;;  %v341_v11 = vld [vmem:[#allocation2 + $0x240] sm:$0x1]  ;;  %v1063_v13 = vsel %vm12815_vm10, %v892_v36, %v1062_v44 }
  0xc7   : > { %340 = vst [vmem:[#allocation2 + $0x21c] sm:$0x1] %v339_v24  ;;  %v9511_v24 = vor.u32 %v11847_v5, %v9508_v37  ;;  %v1059_v57 = vsel %vm12761_vm8, %v882_v35, %v1058_v3  ;;  %2024 = vmatmul.bf16.gmra.mxu2 %v9651_v21  ;;  %v894_v5 = vshrl.u32 %v13155_v59, 16  ;;  %v761_v37 = vshll.u32 %v13152_v34, 16  ;;  %v9518_v3 = vld [vmem:[#allocation2 + $0xe4] sm:$0xf] }
  0xc8   : > { %631 = vst [vmem:[#allocation2 + $0x228] sm:$0xf] %v533_v61  ;;  %v891_v60 = vsel %vm12777_vm9, %v883_v23, %v890_v46  ;;  %v495_v61 = vrot.slane %v13152_v34, 7  ;;  %v9662_v21 = vld [vmem:[#allocation2 + $0x204] sm:$0xf]  ;;  %v11811_v23 = vld [vmem:[#allocation6 + $0x48] sm:$0xff] }
  0xc9   : > { %1101 = vst [vmem:[#allocation2 + $0x230] sm:$0xf] %v13115_v14  ;;  %1964 = vmatmul.bf16.gmra.mxu0 %v9507_v18  ;;  %2093 = vmatmul.bf16.gmra.mxu1 %v9511_v24  ;;  %v13167_v53 = vrot.slane %v894_v5, 7  ;;  %v11851_v18 = vld [vmem:[#allocation2 + $0xec] sm:$0xf0]  ;;  %v342_v15 = vsel %vm12722_vm2, 0, %v341_v11 }
  0xca   : > { %1004 = vst [vmem:[#allocation2 + $0x100] sm:$0xf] %v1003_v58  ;;  %v317_v58 = vld [vmem:[#allocation2 + $0x120] sm:$0x1]  ;;  %v11887_v35 = vld [vmem:[#allocation2 + $0x20c] sm:$0xf0]  ;;  %2971 = vmatpush.bf16.msrb.mxu0 %v11811_v23 }
  0xcb   : > { %1005 = vst [vmem:[#allocation2 + $0x10c] sm:$0xf] %v755_v40  ;;  %2153 = vmatmul.bf16.gmra.mxu3 %v9655_v30  ;;  %v318_v54 = vsel %vm12722_vm2, 0, %v317_v58  ;;  %v534_v24 = vrot.slane %v532_v41, 4  ;;  %v763_v30 = vor.u32 %v761_v37, %v13162_v49  ;;  %v11850_v40 = vld [vmem:[#allocation2 + $0xe8] sm:$0xf]  ;;  %v899_v4 = vor.u32 %v897_v6, %v13167_v53 }
  0xcc   : > { %1060 = vst [vmem:[#allocation2 + $0x220] sm:$0xf] %v1059_v57  ;;  %v9520_v46 = vld [vmem:[#allocation2 + $0xf0] sm:$0xf0]  ;;  %v11886_v57 = vld [vmem:[#allocation2 + $0x208] sm:$0xf] }
  0xcd   : > { %14853 = vst [vmem:[#allocation43_spill] sm:$0xff] %v13152_v34  ;;  %v9664_v5 = vld [vmem:[#allocation2 + $0x210] sm:$0xf0]  ;;  %v1065_v37 = vld [vmem:[#allocation2 + $0x244] sm:$0xf]  ;;  %v1010_v58 = vsel %vm12761_vm8, %v763_v30, %v1009_v39  ;;  %v9523_v6 = vor.u32 %v11850_v40, %v9520_v46 }
  0xce   : > { %1061 = vst [vmem:[#allocation2 + $0x22c] sm:$0xf] %v891_v60  ;;  %v1006_v60 = vld [vmem:[#allocation2 + $0x118] sm:$0x1]  ;;  %v9667_v23 = vor.u32 %v11886_v57, %v9664_v5 }
  0xcf   : > { %14854 = vst [vmem:[#allocation44_spill] sm:$0xff] %v13155_v59  ;;  %v1007_v41 = vsel %vm12815_vm10, %v756_v1, %v1006_v60  ;;  %v1930_v11 = vpop.f32.mrf.mxu0  ;;  %v1066_v1 = vsel %vm12761_vm8, %v899_v4, %v1065_v37 }
  0xd0   : > { %1086 = vst [vmem:[#allocation2 + $0x128] sm:$0xf] %v13152_v34 }
  0xd1   : > { %1102 = vst [vmem:[#allocation2 + $0x248] sm:$0xf] %v13155_v59 }
  0xd2   : > { %319 = vst [vmem:[#allocation2 + $0x120] sm:$0x1] %v318_v54  ;;  %v9663_v54 = vor.u32 %v11887_v35, %v9662_v21  ;;  %v13192_v21 = vld [vmem:[%s12710_s28 + $0x3c] sm:$0xf] }
  0xd3   : > { %608 = vst [vmem:[#allocation2 + $0x114] sm:$0x1] %v494_v25  ;;  %v9519_v25 = vor.u32 %v11851_v18, %v9518_v3  ;;  %v496_v3 = vrot.slane %v495_v61, 4  ;;  %v536_v18 = vrot.slane %v535_v2, 4  ;;  %v13196_v35 = vld [vmem:[%s12710_s28 + $0x7c] sm:$0xf]  ;;  %s9311_s28 = scalar_lea.hbm %s14767_s5, %s12306_s26 }
  0xd4   : > { %609 = vst [vmem:[#allocation2 + $0x120] sm:$0xe] %v495_v61  ;;  %v766_v30 = vshrl.u32 %v13192_v21, 16  ;;  %v769_v40 = vshll.u32 %v13192_v21, 16  ;;  %v497_v57 = vrot.slane %v13192_v21, 7  ;;  %v537_v60 = vrot.slane %v13196_v35, 7 }
  0xd5   : > { %343 = vst [vmem:[#allocation2 + $0x240] sm:$0x1] %v342_v15  ;;  %v2059_v15 = vpop.f32.mrf.mxu1  ;;  %v1990_v46 = vpop.f32.mrf.mxu2  ;;  %v764_v61 = vrot.slane %v13162_v49, 4  ;;  %v11890_v49 = vld [vmem:[#allocation2 + $0x224] sm:$0xf0]  ;;  %s9314_s22 = sshll.u32 %s9311_s28, 4  ;;  %s9315_s22 = int_to_ptr.hbm [resolvable:$true] %s9314_s22 }
  0xd6   : > { %632 = vst [vmem:[#allocation2 + $0x234] sm:$0x1] %v534_v24  ;;  %v13189_v24 = vadd.f32 %v2059_v15, %v1930_v11  ;;  %v499_v44 = vrot.slane %v497_v57, 4  ;;  %v538_v37 = vsel %vm12738_vm7, %v536_v18, %v537_v60  ;;  %v11854_v11 = vld [vmem:[#allocation2 + $0x104] sm:$0xf0]  ;;  %v902_v18 = vshrl.u32 %v13196_v35, 16 }
  0xd7   : > { %633 = vst [vmem:[#allocation2 + $0x240] sm:$0xe] %v535_v2  ;;  %2029 = vmatmul.bf16.gmra.mxu2 %v9663_v54  ;;  %v768_v2 = vrot.slane %v766_v30, 7  ;;  %v1932_v4 = vpop.f32.mrf.mxu0  ;;  %v1013_v15 = vld [vmem:[#allocation2 + $0x13c] sm:$0x1]  ;;  %s12504_s11 = sshra.s32 %s9315_s22, 4  ;;  %s12505_s11 = int_to_ptr.hbm [resolvable:$true] %s12504_s11 }
  0xd8   : > { %1008 = vst [vmem:[#allocation2 + $0x118] sm:$0x1] %v1007_v41  ;;  %v2119_v36 = vpop.f32.mrf.mxu3  ;;  %v498_v41 = vsel %vm12738_vm7, %v496_v3, %v497_v57  ;;  %v11853_v30 = vld [vmem:[#allocation2 + $0x100] sm:$0xf]  ;;  %v905_v57 = vshll.u32 %v13196_v35, 16  ;;  %s12506_s9 = scalar_lea.hbm %s12505_s11, 128  ;;  %p12511_p11 = scmp.lt.s32.totalorder %s12505_s11, %s14767_s5 }
  0xd9   : > { %1011 = vst [vmem:[#allocation2 + $0x124] sm:$0xf] %v1010_v58  ;;  %1969 = vmatmul.bf16.gmra.mxu0 %v9519_v25  ;;  %2098 = vmatmul.bf16.gmra.mxu1 %v9523_v6  ;;  %v13204_v39 = vadd.f32 %v2119_v36, %v1990_v46  ;;  %v539_v58 = vrot.slane %v537_v60, 4  ;;  %v771_v25 = vor.u32 %v769_v40, %v768_v2  ;;  %v9674_v6 = vld [vmem:[#allocation2 + $0x21c] sm:$0xf]  ;;  %v11825_v36 = vld [vmem:[#allocation6 + $0xb8] sm:$0xff]  ;;  %p12507_p1 = scmp.ne.s32.totalorder %s12505_s11, %s12506_s9  ;;  %p12512_p2 = scmp.lt.s32.totalorder %s12510_s15, %s12506_s9 }
  0xda   : > { %1064 = vst [vmem:[#allocation2 + $0x238] sm:$0x1] %v1063_v13  ;;  %v9530_v13 = vld [vmem:[#allocation2 + $0xfc] sm:$0xf]  ;;  %v9532_v46 = vld [vmem:[#allocation2 + $0x108] sm:$0xf0]  ;;  %3094 = vmatpush.bf16.msrb.mxu1 %v11825_v36  ;;  %v9675_v59 = vor.u32 %v11890_v49, %v9674_v6 }
  0xdb   : > { %1067 = vst [vmem:[#allocation2 + $0x244] sm:$0xf] %v1066_v1  ;;  %2158 = vmatmul.bf16.gmra.mxu3 %v9667_v23  ;;  %v11914_v23 = vld [vmem:[#allocation6 + $0x140] sm:$0xff]  ;;  %v772_v12 = vsel %vm12777_vm9, %v764_v61, %v771_v25  ;;  %v773_v3 = vrot.slane %v768_v2, 4  ;;  %v11889_v40 = vld [vmem:[#allocation2 + $0x220] sm:$0xf]  ;;  %v9531_v25 = vor.u32 %v11854_v11, %v9530_v13  ;;  %v9535_v36 = vor.u32 %v11853_v30, %v9532_v46  ;;  %p12508_p4 = pnand %p12507_p1, %p12671_p3  ;;  %p12513_p9 = por %p12512_p2, %p12511_p11 }
  0xdc   : > { %14855 = vst [vmem:[#allocation45_spill] sm:$0xff] %v13192_v21  ;;  %v11802_v1 = vld [vmem:[#allocation6] sm:$0xff]  ;;  %2186 = vmatpush.bf16.msrb.mxu2 %v11914_v23  ;;  %v1069_v61 = vld [vmem:[#allocation2 + $0x25c] sm:$0x1]  ;;  %v11823_v30 = vld [vmem:[#allocation6 + $0xa8] sm:$0xff] }
  0xdd   : > { %1087 = vst [vmem:[#allocation2 + $0x134] sm:$0xf] %v13192_v21  ;;  %v2061_v5 = vpop.f32.mrf.mxu1  ;;  %2843 = vmatpush.bf16.msrb.mxu3 %v11802_v1  ;;  %v9676_v60 = vld [vmem:[#allocation2 + $0x228] sm:$0xf0]  ;;  %v11824_v13 = vld [vmem:[#allocation6 + $0xb0] sm:$0xff]  ;;  %p12509_p8 = pneg %p12508_p4 }
  0xde   : > { %14856 = vst [vmem:[#allocation46_spill] sm:$0xff] %v13196_v35  ;;  %v13210_v54 = vadd.f32 %v2061_v5, %v1932_v4  ;;  %v1014_v4 = vsel %vm12815_vm10, %v773_v3, %v1013_v15  ;;  %v904_v5 = vrot.slane %v902_v18, 7  ;;  %v11810_v11 = vld [vmem:[#allocation6 + $0x40] sm:$0xff]  ;;  %3095 = vmatpush.bf16.msrb.mxu1 %v11824_v13  ;;  %v355_v21 = vld [vmem:[#allocation2 + $0xb0] sm:$0x1] }
  0xdf   : > { %1103 = vst [vmem:[#allocation2 + $0x254] sm:$0xf] %v13196_v35  ;;  %v1935_v35 = vpop.f32.mrf.mxu0  ;;  %2972 = vmatpush.bf16.msrb.mxu0 %v11810_v11  ;;  %p12514_p10 = pnand %p12513_p9, %p12509_p8 }
  0xe0   : > { %610 = vst [vmem:[#allocation2 + $0x12c] sm:$0xf] %v498_v41  ;;  %v1992_v41 = vpop.f32.mrf.mxu2  ;;  %v2121_v2 = vpop.f32.mrf.mxu3  ;;  %v907_v23 = vor.u32 %v905_v57, %v904_v5  ;;  %v12566_v57 = vmov 0  }
  0xe1   : > { %611 = vst [vmem:[#allocation2 + $0x138] sm:$0x1] %v499_v44  ;;  %v900_v44 = vrot.slane %v13167_v53, 4  ;;  %v13219_v1 = vadd.f32 %v2121_v2, %v1992_v41  ;;  %v11892_v41 = vld [vmem:[#allocation2 + $0x238] sm:$0xf] }
  0xe2   : > { %634 = vst [vmem:[#allocation2 + $0x24c] sm:$0xf] %v538_v37  ;;  %v909_v37 = vrot.slane %v904_v5, 4  ;;  %3096 = vmatpush.bf16.msrb.mxu1 %v11823_v30  ;;  %v9544_v5 = vld [vmem:[#allocation2 + $0x120] sm:$0xf0] }
  0xe3   : > { %635 = vst [vmem:[#allocation2 + $0x258] sm:$0x1] %v539_v58  ;;  %v9679_v58 = vor.u32 %v11889_v40, %v9676_v60  ;;  %v908_v15 = vsel %vm12777_vm9, %v900_v44, %v907_v23  ;;  %v11857_v40 = vld [vmem:[#allocation2 + $0x11c] sm:$0xf0]  ;;  %v9686_v60 = vld [vmem:[#allocation2 + $0x234] sm:$0xf] }
  0xe4   : > { %1012 = vst [vmem:[#allocation2 + $0x130] sm:$0xf] %v772_v12  ;;  %v1070_v53 = vsel %vm12815_vm10, %v909_v37, %v1069_v61  ;;  %v11856_v44 = vld [vmem:[#allocation2 + $0x118] sm:$0xf]  ;;  %v9688_v61 = vld [vmem:[#allocation2 + $0x240] sm:$0xf0] }
  0xe5   : > { %1015 = vst [vmem:[#allocation2 + $0x13c] sm:$0x1] %v1014_v4  ;;  %v2064_v14 = vpop.f32.mrf.mxu1  ;;  %v11893_v4 = vld [vmem:[#allocation2 + $0x23c] sm:$0xf0]  ;;  %v9691_v13 = vor.u32 %v11892_v41, %v9688_v61 }
  0xe6   : > { %v13225_v12 = vadd.f32 %v2064_v14, %v1935_v35  ;;  %1068 = vst [vmem:[#allocation2 + $0x250] sm:$0xf] %v908_v15  ;;  %v9542_v35 = vld [vmem:[#allocation2 + $0x114] sm:$0xf]  ;;  %v9687_v37 = vor.u32 %v11893_v4, %v9686_v60  ;;  %v12001_v30 = vld [vmem:[#allocation6 + $0x1b8] sm:$0xff] }
  0xe7   : > { %2034 = vmatmul.bf16.gmra.mxu2 %v9675_v59  ;;  %1071 = vst [vmem:[#allocation2 + $0x25c] sm:$0x1] %v1070_v53  ;;  %v1937_v3 = vpop.f32.mrf.mxu0  ;;  %v11822_v59 = vld [vmem:[#allocation6 + $0xa0] sm:$0xff]  ;;  %v9543_v23 = vor.u32 %v11857_v40, %v9542_v35  ;;  %v9547_v53 = vor.u32 %v11856_v44, %v9544_v5  ;;  %v11819_v40 = vld [vmem:[#allocation6 + $0x88] sm:$0xff]  ;;  %v346_v4 = vld [vmem:[#allocation2 + $0x44] sm:$0x1] }
  0xe8   : > { %v1995_v6 = vpop.f32.mrf.mxu2  ;;  %v2124_v49 = vpop.f32.mrf.mxu3  ;;  %279 = vst [vmem:[#allocation2] sm:$0xff] %v12566_v57  ;;  %3097 = vmatpush.bf16.msrb.mxu1 %v11822_v59  ;;  %3897 = vmatpush.bf16.msra.mxu2 %v12001_v30  ;;  %v347_v5 = vsel %vm12815_vm10, 0, %v346_v4  ;;  %v12017_v61 = vld [vmem:[#allocation6 + $0x238] sm:$0xff] }
  0xe9   : > { %1974 = vmatmul.bf16.gmra.mxu0 %v9531_v25  ;;  %2103 = vmatmul.bf16.gmra.mxu1 %v9535_v36  ;;  %v13227_v46 = vadd.f32 %v2124_v49, %v1995_v6  ;;  %281 = vst [vmem:[#allocation2 + $0xc] sm:$0xff] %v12566_v57  ;;  %v11821_v36 = vld [vmem:[#allocation6 + $0x98] sm:$0xff]  ;;  %v11820_v49 = vld [vmem:[#allocation6 + $0x90] sm:$0xff] }
  0xea   : > { %280 = vst [vmem:[#allocation2 + $0x8] sm:$0xf] %v12566_v57  ;;  %4155 = vmatpush.bf16.msra.mxu0 %v12017_v61 }
  0xeb   : > { %2163 = vmatmul.bf16.gmra.mxu3 %v9679_v58  ;;  %282 = vst [vmem:[#allocation2 + $0x14] sm:$0xf] %v12566_v57 }
  0xec   : > { %283 = vst [vmem:[#allocation2 + $0x18] sm:$0xff] %v12566_v57  ;;  %3098 = vmatpush.bf16.msrb.mxu1 %v11821_v36  ;;  %v11859_v36 = vld [vmem:[#allocation2 + $0x130] sm:$0xf] }
  0xed   : > { %v2066_v18 = vpop.f32.mrf.mxu1  ;;  %284 = vst [vmem:[#allocation2 + $0x20] sm:$0xf] %v12566_v57 }
  0xee   : > { %v13229_v14 = vadd.f32 %v2066_v18, %v1937_v3  ;;  %286 = vst [vmem:[#allocation2 + $0x264] sm:$0xff] %v12566_v57  ;;  %v12009_v3 = vld [vmem:[#allocation6 + $0x1f8] sm:$0xff] }
  0xef   : > { %v1940_v15 = vpop.f32.mrf.mxu0  ;;  %287 = vst [vmem:[#allocation2 + $0x26c] sm:$0xf] %v12566_v57  ;;  %4026 = vmatpush.bf16.msra.mxu3 %v12009_v3 }
  0xf0   : > { %v1997_v2 = vpop.f32.mrf.mxu2  ;;  %v2126_v25 = vpop.f32.mrf.mxu3  ;;  %288 = vst [vmem:[#allocation2 + $0x270] sm:$0xff] %v12566_v57  ;;  %3099 = vmatpush.bf16.msrb.mxu1 %v11820_v49 }
  0xf1   : > { %v13231_v58 = vadd.f32 %v2126_v25, %v1997_v2  ;;  %289 = vst [vmem:[#allocation2 + $0x278] sm:$0xf] %v12566_v57  ;;  %v11818_v2 = vld [vmem:[#allocation6 + $0x80] sm:$0xff] }
  0xf2   : > { %290 = vst [vmem:[#allocation2 + $0x27c] sm:$0xff] %v12566_v57  ;;  %v9554_v25 = vld [vmem:[#allocation2 + $0x12c] sm:$0xf] }
  0xf3   : > { %291 = vst [vmem:[#allocation2 + $0x284] sm:$0xf] %v12566_v57  ;;  %v11860_v57 = vld [vmem:[#allocation2 + $0x134] sm:$0xf0]  ;;  %4027 = vmatpush.bf16.msra.mxu3 %v12008_v50  ;;  %v11737_v50 = vld [vmem:[#allocation2 + $0x38] sm:$0xf0] }
  0xf4   : > { %3100 = vmatpush.bf16.msrb.mxu1 %v11819_v40  ;;  %348 = vst [vmem:[#allocation2 + $0x44] sm:$0x1] %v347_v5  ;;  %v9555_v30 = vor.u32 %v11860_v57, %v9554_v25  ;;  %v350_v57 = vsel %vm12815_vm10, 0, %v349_v56 }
  0xf5   : > { %v2069_v11 = vpop.f32.mrf.mxu1  ;;  %351 = vst [vmem:[#allocation2 + $0x68] sm:$0x1] %v350_v57 }
  0xf6   : > { %v13233_v6 = vadd.f32 %v2069_v11, %v1940_v15  ;;  %v9556_v15 = vld [vmem:[#allocation2 + $0x138] sm:$0xf0] }
  0xf7   : > { %2039 = vmatmul.bf16.gmra.mxu2 %v9687_v37  ;;  %v1942_v60 = vpop.f32.mrf.mxu0  ;;  %v11896_v37 = vld [vmem:[#allocation2 + $0x254] sm:$0xf0]  ;;  %v9559_v40 = vor.u32 %v11859_v36, %v9556_v15  ;;  %v9806_v15 = vld [vmem:[#allocation2] sm:$0xf]  ;;  %4028 = vmatpush.bf16.msra.mxu3 %v12007_v42  ;;  %v11746_v42 = vld [vmem:[#allocation2 + $0x80] sm:$0xf0] }
  0xf8   : > { %v2000_v18 = vpop.f32.mrf.mxu2  ;;  %v2129_v35 = vpop.f32.mrf.mxu3  ;;  %3101 = vmatpush.bf16.msrb.mxu1 %v11818_v2  ;;  %v11828_v36 = vld [vmem:[#allocation2 + $0x34] sm:$0xf0] }
  0xf9   : > { %1979 = vmatmul.bf16.gmra.mxu0 %v9543_v23  ;;  %2108 = vmatmul.bf16.gmra.mxu1 %v9547_v53  ;;  %v13235_v59 = vadd.f32 %v2129_v35, %v2000_v18  ;;  %v9698_v23 = vld [vmem:[#allocation2 + $0x24c] sm:$0xf]  ;;  %v11895_v53 = vld [vmem:[#allocation2 + $0x250] sm:$0xf] }
  0xfa   : > { %v9699_v3 = vor.u32 %v11896_v37, %v9698_v23  ;;  %v9430_v37 = vld [vmem:[#allocation2 + $0x2c] sm:$0xf] }
  0xfb   : > { %2168 = vmatmul.bf16.gmra.mxu3 %v9691_v13  ;;  %v9700_v13 = vld [vmem:[#allocation2 + $0x258] sm:$0xf0] }
  0xfc   : > { %4029 = vmatpush.bf16.msra.mxu3 %v12006_v28  ;;  %v11755_v28 = vld [vmem:[#allocation2 + $0xc8] sm:$0xf0] }
  0xfd   : > { %v2071_v44 = vpop.f32.mrf.mxu1 }
  0xfe   : > { %v13239_v41 = vadd.f32 %v2071_v44, %v1942_v60  ;;  %v9703_v60 = vor.u32 %v11895_v53, %v9700_v13  ;;  %v11730_v53 = vld [vmem:[#allocation2 + $0x4] sm:$0xf]  ;;  %v9808_v13 = vld [vmem:[#allocation2 + $0xc] sm:$0xf0] }
 0x100   : > { %v2002_v11 = vpop.f32.mrf.mxu2  ;;  %v2131_v49 = vpop.f32.mrf.mxu3 }
 0x101   : > { %v13241_v18 = vadd.f32 %v2131_v49, %v2002_v11  ;;  %v1945_v35 = vpop.f32.mrf.mxu0  ;;  %v11731_v11 = vld [vmem:[#allocation2 + $0x8] sm:$0xf0]  ;;  %v9814_v49 = vld [vmem:[#allocation2 + $0x8] sm:$0xf] }
 0x105   : > { %v2074_v4 = vpop.f32.mrf.mxu1 }
 0x106   : > { %v13243_v44 = vadd.f32 %v2074_v4, %v1945_v35 }
 0x107   : > { %2044 = vmatmul.bf16.gmra.mxu2 %v9699_v3 }
 0x108   : > { %v2005_v5 = vpop.f32.mrf.mxu2  ;;  %v2134_v61 = vpop.f32.mrf.mxu3 }
 0x109   : > { %1984 = vmatmul.bf16.gmra.mxu0 %v9555_v30  ;;  %2113 = vmatmul.bf16.gmra.mxu1 %v9559_v40  ;;  %v13245_v7 = vadd.f32 %v2134_v61, %v2005_v5  ;;  %v1947_v2 = vpop.f32.mrf.mxu0  ;;  %v11732_v30 = vld [vmem:[#allocation2 + $0x10] sm:$0xf0]  ;;  %v9431_v40 = vor.u32 %v11828_v36, %v9430_v37  ;;  %v9807_v61 = vor.u32 %v11731_v11, %v9806_v15  ;;  %v9442_v36 = vld [vmem:[#allocation2 + $0x44] sm:$0xf]  ;;  %v11733_v15 = vld [vmem:[#allocation2 + $0x1c] sm:$0xf] }
 0x10a   : > { %v9815_v56 = vor.u32 %v11732_v30, %v9814_v49  ;;  %v9820_v11 = vld [vmem:[#allocation2 + $0x24] sm:$0xf0]  ;;  %v11734_v49 = vld [vmem:[#allocation2 + $0x20] sm:$0xf0]  ;;  %v9826_v30 = vld [vmem:[#allocation2 + $0x20] sm:$0xf] }
 0x10b   : > { %2173 = vmatmul.bf16.gmra.mxu3 %v9703_v60  ;;  %v9811_v60 = vor.u32 %v11730_v53, %v9808_v13  ;;  %v11831_v53 = vld [vmem:[#allocation2 + $0x4c] sm:$0xf0]  ;;  %v9818_v13 = vld [vmem:[#allocation2 + $0x18] sm:$0xf] }
 0x10d   : > { %v2076_v25 = vpop.f32.mrf.mxu1 }
 0x10e   : > { %v13249_v23 = vadd.f32 %v2076_v25, %v1947_v2 }
 0x110   : > { %v2007_v3 = vpop.f32.mrf.mxu2  ;;  %v2136_v35 = vpop.f32.mrf.mxu3 }
 0x111   : > { %v13251_v4 = vadd.f32 %v2136_v35, %v2007_v3  ;;  %v11735_v3 = vld [vmem:[#allocation2 + $0x28] sm:$0xf0] }
 0x115   : > { %v2079_v2 = vpop.f32.mrf.mxu1 }
 0x116   : > { %v1950_v5 = vpop.f32.mrf.mxu0 }
 0x117   : > { %v13253_v25 = vadd.f32 %v2079_v2, %v1950_v5  ;;  %2187 = vmatmul.bf16.vlgmr.msrb.gmra.mxu2 %v9431_v40  ;;  %v9823_v5 = vor.u32 %v11733_v15, %v9820_v11  ;;  %v9827_v2 = vor.u32 %v11735_v3, %v9826_v30  ;;  %v352_v15 = vld [vmem:[#allocation2 + $0x8c] sm:$0x1]  ;;  %v12016_v30 = vld [vmem:[#allocation6 + $0x230] sm:$0xff] }
 0x118   : > { %v9454_v3 = vld [vmem:[#allocation2 + $0x5c] sm:$0xf]  ;;  %4156 = vmatpush.bf16.msra.mxu0 %v12016_v30 }
 0x119   : > { %2973 = vmatmul.bf16.vlgmr.msrb.gmra.mxu0 %v9811_v60  ;;  %3102 = vmatmul.bf16.vlgmr.msrb.gmra.mxu1 %v9815_v56  ;;  %v9443_v60 = vor.u32 %v11831_v53, %v9442_v36  ;;  %v9819_v56 = vor.u32 %v11734_v49, %v9818_v13  ;;  %v353_v13 = vsel %vm12815_vm10, 0, %v352_v15 }
 0x11a   : > { %v2010_v57 = vpop.f32.mrf.mxu2  ;;  %354 = vst [vmem:[#allocation2 + $0x8c] sm:$0x1] %v353_v13 }
 0x11b   : > { %2844 = vmatmul.bf16.vlgmr.msrb.gmra.mxu3 %v9807_v61 }
 0x11d   : > { %v2081_v31 = vpop.f32.mrf.mxu1 }
 0x11e   : > { %v2139_v43 = vpop.f32.mrf.mxu3  ;;  %v1952_v27 = vpop.f32.mrf.mxu0 }
 0x11f   : > { %v13255_v33 = vadd.f32 %v2139_v43, %v2010_v57  ;;  %v13257_v37 = vadd.f32 %v2081_v31, %v1952_v27  ;;  %v12000_v27 = vld [vmem:[#allocation6 + $0x1b0] sm:$0xff] }
 0x120   : > { %3898 = vmatpush.bf16.msra.mxu2 %v12000_v27 }
 0x122   : > { %v2012_v35 = vpop.f32.mrf.mxu2 }
 0x125   : > { %v2084_v57 = vpop.f32.mrf.mxu1 }
 0x126   : > { %v2141_v40 = vpop.f32.mrf.mxu3  ;;  %v1955_v43 = vpop.f32.mrf.mxu0 }
 0x127   : > { %v13259_v61 = vadd.f32 %v2141_v40, %v2012_v35  ;;  %v13261_v31 = vadd.f32 %v2084_v57, %v1955_v43  ;;  %2192 = vmatmul.bf16.gmra.mxu2 %v9443_v60  ;;  %v11834_v35 = vld [vmem:[#allocation2 + $0x64] sm:$0xf0]  ;;  %v9830_v40 = vld [vmem:[#allocation2 + $0x30] sm:$0xf]  ;;  %v11736_v60 = vld [vmem:[#allocation2 + $0x34] sm:$0xf] }
 0x128   : > { %v9838_v43 = vld [vmem:[#allocation2 + $0x38] sm:$0xf] }
 0x129   : > { %2978 = vmatmul.bf16.gmra.mxu0 %v9823_v5  ;;  %3107 = vmatmul.bf16.gmra.mxu1 %v9827_v2  ;;  %v9832_v5 = vld [vmem:[#allocation2 + $0x3c] sm:$0xf0]  ;;  %v9455_v2 = vor.u32 %v11834_v35, %v9454_v3  ;;  %v356_v35 = vsel %vm12815_vm10, 0, %v355_v21 }
 0x12a   : > { %v2015_v48 = vpop.f32.mrf.mxu2  ;;  %v9835_v57 = vor.u32 %v11736_v60, %v9832_v5  ;;  %357 = vst [vmem:[#allocation2 + $0xb0] sm:$0x1] %v356_v35  ;;  %v9842_v5 = vld [vmem:[#allocation2 + $0x48] sm:$0xf] }
 0x12b   : > { %2849 = vmatmul.bf16.gmra.mxu3 %v9819_v56 }
 0x12d   : > { %v2086_v11 = vpop.f32.mrf.mxu1 }
 0x12e   : > { %v2144_v47 = vpop.f32.mrf.mxu3  ;;  %v1957_v53 = vpop.f32.mrf.mxu0 }
 0x12f   : > { %v13263_v36 = vadd.f32 %v2144_v47, %v2015_v48  ;;  %v13267_v49 = vadd.f32 %v2086_v11, %v1957_v53  ;;  %v11738_v47 = vld [vmem:[#allocation2 + $0x40] sm:$0xf0]  ;;  %v9831_v53 = vor.u32 %v11737_v50, %v9830_v40  ;;  %v9466_v40 = vld [vmem:[#allocation2 + $0x74] sm:$0xf]  ;;  %v11739_v50 = vld [vmem:[#allocation2 + $0x4c] sm:$0xf] }
 0x130   : > { %v9839_v11 = vor.u32 %v11738_v47, %v9838_v43  ;;  %v9844_v43 = vld [vmem:[#allocation2 + $0x54] sm:$0xf0]  ;;  %v11740_v47 = vld [vmem:[#allocation2 + $0x50] sm:$0xf0] }
 0x132   : > { %v2017_v48 = vpop.f32.mrf.mxu2 }
 0x135   : > { %v2089_v52 = vpop.f32.mrf.mxu1 }
 0x136   : > { %v2146_v56 = vpop.f32.mrf.mxu3  ;;  %v1960_v15 = vpop.f32.mrf.mxu0 }
 0x137   : > { %v13269_v27 = vadd.f32 %v2146_v56, %v2017_v48  ;;  %v13271_v13 = vadd.f32 %v2089_v52, %v1960_v15  ;;  %2197 = vmatmul.bf16.gmra.mxu2 %v9455_v2  ;;  %v11837_v52 = vld [vmem:[#allocation2 + $0x7c] sm:$0xf0]  ;;  %v9850_v48 = vld [vmem:[#allocation2 + $0x50] sm:$0xf]  ;;  %v11741_v56 = vld [vmem:[#allocation2 + $0x58] sm:$0xf0]  ;;  %v9847_v15 = vor.u32 %v11739_v50, %v9844_v43 }
 0x138   : > { %v9851_v21 = vor.u32 %v11741_v56, %v9850_v48  ;;  %v11840_v50 = vld [vmem:[#allocation2 + $0x94] sm:$0xf0]  ;;  %v9854_v43 = vld [vmem:[#allocation2 + $0x60] sm:$0xf]  ;;  %v11743_v48 = vld [vmem:[#allocation2 + $0x68] sm:$0xf0] }
 0x139   : > { %2983 = vmatmul.bf16.gmra.mxu0 %v9835_v57  ;;  %3112 = vmatmul.bf16.gmra.mxu1 %v9839_v11  ;;  %v9467_v57 = vor.u32 %v11837_v52, %v9466_v40  ;;  %v9478_v52 = vld [vmem:[#allocation2 + $0x8c] sm:$0xf]  ;;  %v9862_v56 = vld [vmem:[#allocation2 + $0x68] sm:$0xf] }
 0x13a   : > { %v2020_v30 = vpop.f32.mrf.mxu2 }
 0x13b   : > { %2854 = vmatmul.bf16.gmra.mxu3 %v9831_v53 }
 0x13d   : > { %v2091_v3 = vpop.f32.mrf.mxu1 }
 0x13e   : > { %v2149_v63 = vpop.f32.mrf.mxu3  ;;  %v1962_v19 = vpop.f32.mrf.mxu0 }
 0x13f   : > { %v13273_v20 = vadd.f32 %v2149_v63, %v2020_v30  ;;  %v13277_v60 = vadd.f32 %v2091_v3, %v1962_v19  ;;  %v9843_v30 = vor.u32 %v11740_v47, %v9842_v5  ;;  %v11742_v5 = vld [vmem:[#allocation2 + $0x64] sm:$0xf]  ;;  %v9856_v47 = vld [vmem:[#allocation2 + $0x6c] sm:$0xf0] }
 0x142   : > { %v2022_v2 = vpop.f32.mrf.mxu2 }
 0x146   : > { %v2151_v63 = vpop.f32.mrf.mxu3  ;;  %v1965_v11 = vpop.f32.mrf.mxu0 }
 0x147   : > { %v13279_v53 = vadd.f32 %v2151_v63, %v2022_v2  ;;  %v2094_v19 = vpop.f32.mrf.mxu1  ;;  %2202 = vmatmul.bf16.gmra.mxu2 %v9467_v57  ;;  %v11744_v2 = vld [vmem:[#allocation2 + $0x70] sm:$0xf0] }
 0x148   : > { %v13281_v3 = vadd.f32 %v2094_v19, %v1965_v11  ;;  %v9859_v11 = vor.u32 %v11742_v5, %v9856_v47  ;;  %v9863_v19 = vor.u32 %v11744_v2, %v9862_v56  ;;  %v358_v5 = vld [vmem:[#allocation2 + $0xd4] sm:$0x1]  ;;  %v9490_v2 = vld [vmem:[#allocation2 + $0xa4] sm:$0xf] }
 0x149   : > { %2988 = vmatmul.bf16.gmra.mxu0 %v9847_v15  ;;  %3117 = vmatmul.bf16.gmra.mxu1 %v9851_v21  ;;  %v9479_v15 = vor.u32 %v11840_v50, %v9478_v52  ;;  %v9855_v21 = vor.u32 %v11743_v48, %v9854_v43  ;;  %v359_v43 = vsel %vm12815_vm10, 0, %v358_v5  ;;  %v12015_v56 = vld [vmem:[#allocation6 + $0x228] sm:$0xff] }
 0x14a   : > { %v2025_v35 = vpop.f32.mrf.mxu2  ;;  %360 = vst [vmem:[#allocation2 + $0xd4] sm:$0x1] %v359_v43  ;;  %4157 = vmatpush.bf16.msra.mxu0 %v12015_v56 }
 0x14b   : > { %2859 = vmatmul.bf16.gmra.mxu3 %v9843_v30 }
 0x14e   : > { %v2154_v34 = vpop.f32.mrf.mxu3  ;;  %v1967_v62 = vpop.f32.mrf.mxu0 }
 0x14f   : > { %v13283_v0 = vadd.f32 %v2154_v34, %v2025_v35  ;;  %v2096_v51 = vpop.f32.mrf.mxu1 }
 0x150   : > { %v13285_v40 = vadd.f32 %v2096_v51, %v1967_v62  ;;  %v11999_v62 = vld [vmem:[#allocation6 + $0x1a8] sm:$0xff] }
 0x151   : > { %3899 = vmatpush.bf16.msra.mxu2 %v11999_v62 }
 0x152   : > { %v2027_v63 = vpop.f32.mrf.mxu2 }
 0x156   : > { %v2156_v57 = vpop.f32.mrf.mxu3  ;;  %v1970_v34 = vpop.f32.mrf.mxu0 }
 0x157   : > { %v13287_v30 = vadd.f32 %v2156_v57, %v2027_v63  ;;  %v2099_v35 = vpop.f32.mrf.mxu1  ;;  %2207 = vmatmul.bf16.gmra.mxu2 %v9479_v15  ;;  %v11843_v63 = vld [vmem:[#allocation2 + $0xac] sm:$0xf0]  ;;  %v9866_v57 = vld [vmem:[#allocation2 + $0x78] sm:$0xf]  ;;  %v11745_v15 = vld [vmem:[#allocation2 + $0x7c] sm:$0xf] }
 0x158   : > { %v13289_v51 = vadd.f32 %v2099_v35, %v1970_v34  ;;  %v9874_v34 = vld [vmem:[#allocation2 + $0x80] sm:$0xf] }
 0x159   : > { %14857 = vst [vmem:[#allocation47_spill] sm:$0xff] %v13287_v30  ;;  %2993 = vmatmul.bf16.gmra.mxu0 %v9859_v11  ;;  %3122 = vmatmul.bf16.gmra.mxu1 %v9863_v19  ;;  %v9868_v11 = vld [vmem:[#allocation2 + $0x84] sm:$0xf0]  ;;  %v9491_v19 = vor.u32 %v11843_v63, %v9490_v2  ;;  %v362_v63 = vsel %vm12815_vm10, 0, %v361_v45 }
 0x15a   : > { %v2030_v22 = vpop.f32.mrf.mxu2  ;;  %v9871_v35 = vor.u32 %v11745_v15, %v9868_v11  ;;  %363 = vst [vmem:[#allocation2 + $0xf8] sm:$0x1] %v362_v63  ;;  %v9878_v11 = vld [vmem:[#allocation2 + $0x90] sm:$0xf] }
 0x15b   : > { %2864 = vmatmul.bf16.gmra.mxu3 %v9855_v21 }
 0x15e   : > { %v2159_v16 = vpop.f32.mrf.mxu3  ;;  %v1972_v50 = vpop.f32.mrf.mxu0 }
 0x15f   : > { %v13291_v52 = vadd.f32 %v2159_v16, %v2030_v22  ;;  %v2101_v47 = vpop.f32.mrf.mxu1  ;;  %v11747_v16 = vld [vmem:[#allocation2 + $0x88] sm:$0xf0] }
 0x160   : > { %v13295_v48 = vadd.f32 %v2101_v47, %v1972_v50  ;;  %v9867_v50 = vor.u32 %v11746_v42, %v9866_v57  ;;  %v9875_v47 = vor.u32 %v11747_v16, %v9874_v34  ;;  %v9502_v57 = vld [vmem:[#allocation2 + $0xbc] sm:$0xf]  ;;  %v11748_v42 = vld [vmem:[#allocation2 + $0x94] sm:$0xf]  ;;  %v9880_v34 = vld [vmem:[#allocation2 + $0x9c] sm:$0xf0] }
 0x161   : > { %14858 = vst [vmem:[#allocation48_spill] sm:$0xff] %v13291_v52  ;;  %v11749_v16 = vld [vmem:[#allocation2 + $0x98] sm:$0xf0] }
 0x162   : > { %v2032_v22 = vpop.f32.mrf.mxu2 }
 0x166   : > { %v2161_v21 = vpop.f32.mrf.mxu3  ;;  %v1975_v5 = vpop.f32.mrf.mxu0 }
 0x167   : > { %v13297_v62 = vadd.f32 %v2161_v21, %v2032_v22  ;;  %v2104_v17 = vpop.f32.mrf.mxu1  ;;  %2212 = vmatmul.bf16.gmra.mxu2 %v9491_v19  ;;  %v9886_v22 = vld [vmem:[#allocation2 + $0x98] sm:$0xf]  ;;  %v11750_v21 = vld [vmem:[#allocation2 + $0xa0] sm:$0xf0] }
 0x168   : > { %v13299_v43 = vadd.f32 %v2104_v17, %v1975_v5  ;;  %v11846_v17 = vld [vmem:[#allocation2 + $0xc4] sm:$0xf0]  ;;  %v9883_v5 = vor.u32 %v11748_v42, %v9880_v34  ;;  %v9887_v45 = vor.u32 %v11750_v21, %v9886_v22  ;;  %v11849_v42 = vld [vmem:[#allocation2 + $0xdc] sm:$0xf0]  ;;  %v11752_v22 = vld [vmem:[#allocation2 + $0xb0] sm:$0xf0] }
 0x169   : > { %14859 = vst [vmem:[#allocation49_spill] sm:$0xff] %v13297_v62  ;;  %2998 = vmatmul.bf16.gmra.mxu0 %v9871_v35  ;;  %3127 = vmatmul.bf16.gmra.mxu1 %v9875_v47  ;;  %v9503_v35 = vor.u32 %v11846_v17, %v9502_v57  ;;  %v9514_v17 = vld [vmem:[#allocation2 + $0xd4] sm:$0xf]  ;;  %v9890_v34 = vld [vmem:[#allocation2 + $0xa8] sm:$0xf] }
 0x16a   : > { %v2035_v56 = vpop.f32.mrf.mxu2  ;;  %v9898_v21 = vld [vmem:[#allocation2 + $0xb0] sm:$0xf]  ;;  %v367_v62 = vld [vmem:[#allocation2 + $0x140] sm:$0x1] }
 0x16b   : > { %2869 = vmatmul.bf16.gmra.mxu3 %v9867_v50 }
 0x16e   : > { %v2164_v29 = vpop.f32.mrf.mxu3  ;;  %v1977_v26 = vpop.f32.mrf.mxu0 }
 0x16f   : > { %v13301_v32 = vadd.f32 %v2164_v29, %v2035_v56  ;;  %v2106_v2 = vpop.f32.mrf.mxu1  ;;  %v9879_v56 = vor.u32 %v11749_v16, %v9878_v11  ;;  %v11751_v11 = vld [vmem:[#allocation2 + $0xac] sm:$0xf]  ;;  %v9892_v16 = vld [vmem:[#allocation2 + $0xb4] sm:$0xf0] }
 0x170   : > { %v13305_v15 = vadd.f32 %v2106_v2, %v1977_v26 }
 0x171   : > { %14860 = vst [vmem:[#allocation50_spill] sm:$0xff] %v13301_v32 }
 0x172   : > { %v2037_v19 = vpop.f32.mrf.mxu2 }
 0x176   : > { %v2166_v29 = vpop.f32.mrf.mxu3  ;;  %v1980_v47 = vpop.f32.mrf.mxu0 }
 0x177   : > { %v13307_v50 = vadd.f32 %v2166_v29, %v2037_v19  ;;  %v2109_v26 = vpop.f32.mrf.mxu1  ;;  %2217 = vmatmul.bf16.gmra.mxu2 %v9503_v35  ;;  %v11753_v19 = vld [vmem:[#allocation2 + $0xb8] sm:$0xf0] }
 0x178   : > { %v13309_v2 = vadd.f32 %v2109_v26, %v1980_v47  ;;  %v9895_v47 = vor.u32 %v11751_v11, %v9892_v16  ;;  %v9899_v26 = vor.u32 %v11753_v19, %v9898_v21  ;;  %v364_v11 = vld [vmem:[#allocation2 + $0x11c] sm:$0x1]  ;;  %v9526_v19 = vld [vmem:[#allocation2 + $0xec] sm:$0xf] }
 0x179   : > { %14861 = vst [vmem:[#allocation51_spill] sm:$0xff] %v13307_v50  ;;  %3003 = vmatmul.bf16.gmra.mxu0 %v9883_v5  ;;  %3132 = vmatmul.bf16.gmra.mxu1 %v9887_v45  ;;  %v9515_v5 = vor.u32 %v11849_v42, %v9514_v17  ;;  %v9891_v45 = vor.u32 %v11752_v22, %v9890_v34  ;;  %v12014_v34 = vld [vmem:[#allocation6 + $0x220] sm:$0xff]  ;;  %v365_v22 = vsel %vm12815_vm10, 0, %v364_v11 }
 0x17a   : > { %v2040_v63 = vpop.f32.mrf.mxu2  ;;  %366 = vst [vmem:[#allocation2 + $0x11c] sm:$0x1] %v365_v22  ;;  %4158 = vmatpush.bf16.msra.mxu0 %v12014_v34 }
 0x17b   : > { %2874 = vmatmul.bf16.gmra.mxu3 %v9879_v56 }
 0x17e   : > { %v2169_v55 = vpop.f32.mrf.mxu3  ;;  %v1982_v8 = vpop.f32.mrf.mxu0 }
 0x17f   : > { %v13311_v10 = vadd.f32 %v2169_v55, %v2040_v63  ;;  %v2111_v38 = vpop.f32.mrf.mxu1 }
 0x180   : > { %v13313_v57 = vadd.f32 %v2111_v38, %v1982_v8  ;;  %v11998_v38 = vld [vmem:[#allocation6 + $0x1a0] sm:$0xff] }
 0x181   : > { %14862 = vst [vmem:[#allocation52_spill] sm:$0xff] %v13311_v10  ;;  %3900 = vmatpush.bf16.msra.mxu2 %v11998_v38 }
 0x182   : > { %v2042_v29 = vpop.f32.mrf.mxu2 }
 0x186   : > { %v2171_v35 = vpop.f32.mrf.mxu3  ;;  %v1985_v55 = vpop.f32.mrf.mxu0 }
 0x187   : > { %v13315_v56 = vadd.f32 %v2171_v35, %v2042_v29  ;;  %v2114_v63 = vpop.f32.mrf.mxu1  ;;  %2222 = vmatmul.bf16.gmra.mxu2 %v9515_v5  ;;  %v11852_v29 = vld [vmem:[#allocation2 + $0xf4] sm:$0xf0]  ;;  %v9902_v35 = vld [vmem:[#allocation2 + $0xc0] sm:$0xf]  ;;  %v11754_v5 = vld [vmem:[#allocation2 + $0xc4] sm:$0xf] }
 0x188   : > { %v13317_v8 = vadd.f32 %v2114_v63, %v1985_v55  ;;  %v9910_v55 = vld [vmem:[#allocation2 + $0xc8] sm:$0xf]  ;;  %v9903_v11 = vor.u32 %v11755_v28, %v9902_v35  ;;  %v9538_v35 = vld [vmem:[#allocation2 + $0x104] sm:$0xf] }
 0x189   : > { %14863 = vst [vmem:[#allocation53_spill] sm:$0xff] %v13315_v56  ;;  %3008 = vmatmul.bf16.gmra.mxu0 %v9895_v47  ;;  %3137 = vmatmul.bf16.gmra.mxu1 %v9899_v26  ;;  %v9904_v47 = vld [vmem:[#allocation2 + $0xcc] sm:$0xf0]  ;;  %v9527_v26 = vor.u32 %v11852_v29, %v9526_v19  ;;  %v368_v19 = vsel %vm12815_vm10, 0, %v367_v62  ;;  %v11758_v28 = vld [vmem:[#allocation2 + $0xe0] sm:$0xf0] }
 0x18a   : > { %v2045_v10 = vpop.f32.mrf.mxu2  ;;  %v9907_v63 = vor.u32 %v11754_v5, %v9904_v47  ;;  %369 = vst [vmem:[#allocation2 + $0x140] sm:$0x1] %v368_v19  ;;  %v11855_v5 = vld [vmem:[#allocation2 + $0x10c] sm:$0xf0]  ;;  %v9914_v47 = vld [vmem:[#allocation2 + $0xd8] sm:$0xf] }
 0x18b   : > { %2879 = vmatmul.bf16.gmra.mxu3 %v9891_v45 }
 0x18e   : > { %v2174_v50 = vpop.f32.mrf.mxu3  ;;  %v1987_v42 = vpop.f32.mrf.mxu0 }
 0x18f   : > { %v13319_v17 = vadd.f32 %v2174_v50, %v2045_v10  ;;  %v2116_v16 = vpop.f32.mrf.mxu1  ;;  %v11756_v10 = vld [vmem:[#allocation2 + $0xd0] sm:$0xf0] }
 0x190   : > { %v13323_v21 = vadd.f32 %v2116_v16, %v1987_v42  ;;  %v9911_v42 = vor.u32 %v11756_v10, %v9910_v55  ;;  %v11757_v55 = vld [vmem:[#allocation2 + $0xdc] sm:$0xf]  ;;  %v9916_v10 = vld [vmem:[#allocation2 + $0xe4] sm:$0xf0] }
 0x191   : > { %14864 = vst [vmem:[#allocation54_spill] sm:$0xff] %v13319_v17 }
 0x192   : > { %v2047_v50 = vpop.f32.mrf.mxu2 }
 0x196   : > { %v2176_v45 = vpop.f32.mrf.mxu3  ;;  %v2974_v17 = vpop.f32.mrf.mxu0 }
 0x197   : > { %v13325_v38 = vadd.f32 %v2176_v45, %v2047_v50  ;;  %v3103_v16 = vpop.f32.mrf.mxu1  ;;  %2227 = vmatmul.bf16.gmra.mxu2 %v9527_v26  ;;  %v9922_v45 = vld [vmem:[#allocation2 + $0xe0] sm:$0xf] }
 0x198   : > { %v12193_v26 = vld [vmem:[#allocation8 + $0xf8] sm:$0xff] }
 0x199   : > { %14865 = vst [vmem:[#allocation55_spill] sm:$0xff] %v13325_v38  ;;  %3013 = vmatmul.bf16.gmra.mxu0 %v9907_v63  ;;  %3142 = vmatmul.bf16.gmra.mxu1 %v9911_v42  ;;  %v9539_v42 = vor.u32 %v11855_v5, %v9538_v35 }
 0x19a   : > { %v2188_v34 = vpop.f32.mrf.mxu2  ;;  %6084 = vmatpush.bf16.msra.mxu1 %v12193_v26 }
 0x19b   : > { %2884 = vmatmul.bf16.gmra.mxu3 %v9903_v11  ;;  %v2189_v22 = vadd.f32 %v2188_v34, %v13189_v24  ;;  %v11759_v24 = vld [vmem:[#allocation2 + $0xe8] sm:$0xf0]  ;;  %v9919_v34 = vor.u32 %v11757_v55, %v9916_v10  ;;  %v9550_v10 = vld [vmem:[#allocation2 + $0x11c] sm:$0xf] }
 0x19e   : > { %v2845_v56 = vpop.f32.mrf.mxu3  ;;  %v2976_v32 = vpop.f32.mrf.mxu0 }
 0x19f   : > { %v2846_v52 = vadd.f32 %v2845_v56, %v2189_v22  ;;  %v3105_v30 = vpop.f32.mrf.mxu1 }
 0x1a1   : > { %v2975_v29 = vadd.f32 %v2974_v17, %v2846_v52  ;;  %v9915_v52 = vor.u32 %v11758_v28, %v9914_v47  ;;  %v9923_v17 = vor.u32 %v11759_v24, %v9922_v45  ;;  %v11858_v47 = vld [vmem:[#allocation2 + $0x124] sm:$0xf0]  ;;  %v9926_v28 = vld [vmem:[#allocation2 + $0xf0] sm:$0xf]  ;;  %v11760_v45 = vld [vmem:[#allocation2 + $0xf4] sm:$0xf] }
 0x1a2   : > { %v2190_v63 = vpop.f32.mrf.mxu2  ;;  %v9928_v24 = vld [vmem:[#allocation2 + $0xfc] sm:$0xf0] }
 0x1a3   : > { %v13330_v50 = vadd.f32 %v3103_v16, %v2975_v29  ;;  %v2191_v56 = vadd.f32 %v2190_v63, %v13210_v54 }
 0x1a5   : > { %14866 = vst [vmem:[#allocation56_spill] sm:$0xff] %v13330_v50 }
 0x1a6   : > { %v2847_v11 = vpop.f32.mrf.mxu3  ;;  %v2979_v62 = vpop.f32.mrf.mxu0 }
 0x1a7   : > { %v2848_v22 = vadd.f32 %v2847_v11, %v2191_v56  ;;  %v3108_v19 = vpop.f32.mrf.mxu1  ;;  %2232 = vmatmul.bf16.gmra.mxu2 %v9539_v42  ;;  %v9934_v56 = vld [vmem:[#allocation2 + $0xf8] sm:$0xf]  ;;  %v11762_v11 = vld [vmem:[#allocation2 + $0x100] sm:$0xf0] }
 0x1a9   : > { %3018 = vmatmul.bf16.gmra.mxu0 %v9919_v34  ;;  %v2977_v38 = vadd.f32 %v2976_v32, %v2848_v22  ;;  %3147 = vmatmul.bf16.gmra.mxu1 %v9923_v17  ;;  %v11761_v32 = vld [vmem:[#allocation2 + $0xf8] sm:$0xf0]  ;;  %v9931_v34 = vor.u32 %v11760_v45, %v9928_v24  ;;  %v9935_v17 = vor.u32 %v11762_v11, %v9934_v56  ;;  %v9562_v11 = vld [vmem:[#allocation2 + $0x134] sm:$0xf] }
 0x1aa   : > { %v2193_v29 = vpop.f32.mrf.mxu2 }
 0x1ab   : > { %2889 = vmatmul.bf16.gmra.mxu3 %v9915_v52  ;;  %v13333_v16 = vadd.f32 %v3105_v30, %v2977_v38  ;;  %v2194_v50 = vadd.f32 %v2193_v29, %v13225_v12  ;;  %v9551_v12 = vor.u32 %v11858_v47, %v9550_v10 }
 0x1ae   : > { %v2850_v54 = vpop.f32.mrf.mxu3  ;;  %v2981_v63 = vpop.f32.mrf.mxu0 }
 0x1af   : > { %v2851_v35 = vadd.f32 %v2850_v54, %v2194_v50  ;;  %v3110_v5 = vpop.f32.mrf.mxu1  ;;  %v9927_v50 = vor.u32 %v11761_v32, %v9926_v28  ;;  %v12005_v54 = vld [vmem:[#allocation6 + $0x1d8] sm:$0xff] }
 0x1b0   : > { %4030 = vmatpush.bf16.msra.mxu3 %v12005_v54  ;;  %v370_v28 = vld [vmem:[#allocation2 + $0x164] sm:$0x1] }
 0x1b1   : > { %v2980_v55 = vadd.f32 %v2979_v62, %v2851_v35  ;;  %v12013_v32 = vld [vmem:[#allocation6 + $0x218] sm:$0xff] }
 0x1b2   : > { %v2195_v30 = vpop.f32.mrf.mxu2  ;;  %4159 = vmatpush.bf16.msra.mxu0 %v12013_v32 }
 0x1b3   : > { %v13336_v26 = vadd.f32 %v3108_v19, %v2980_v55  ;;  %v2196_v38 = vadd.f32 %v2195_v30, %v13229_v14  ;;  %v11997_v19 = vld [vmem:[#allocation6 + $0x198] sm:$0xff] }
 0x1b4   : > { %3901 = vmatpush.bf16.msra.mxu2 %v11997_v19  ;;  %v11861_v30 = vld [vmem:[#allocation2 + $0x13c] sm:$0xf0] }
 0x1b5   : > { %v9563_v19 = vor.u32 %v11861_v30, %v9562_v11 }
 0x1b6   : > { %v2852_v42 = vpop.f32.mrf.mxu3  ;;  %v2984_v52 = vpop.f32.mrf.mxu0 }
 0x1b7   : > { %v2853_v62 = vadd.f32 %v2852_v42, %v2196_v38  ;;  %v3113_v22 = vpop.f32.mrf.mxu1  ;;  %2237 = vmatmul.bf16.gmra.mxu2 %v9551_v12  ;;  %v11763_v38 = vld [vmem:[#allocation2 + $0x10c] sm:$0xf]  ;;  %v9940_v42 = vld [vmem:[#allocation2 + $0x114] sm:$0xf0] }
 0x1b8   : > { %v9943_v54 = vor.u32 %v11763_v38, %v9940_v42  ;;  %v9574_v42 = vld [vmem:[#allocation2 + $0x14c] sm:$0xf] }
 0x1b9   : > { %3023 = vmatmul.bf16.gmra.mxu0 %v9931_v34  ;;  %v2982_v29 = vadd.f32 %v2981_v63, %v2853_v62  ;;  %3152 = vmatmul.bf16.gmra.mxu1 %v9935_v17  ;;  %v371_v63 = vsel %vm12815_vm10, 0, %v370_v28  ;;  %v9946_v34 = vld [vmem:[#allocation2 + $0x110] sm:$0xf] }
 0x1ba   : > { %v2198_v55 = vpop.f32.mrf.mxu2  ;;  %372 = vst [vmem:[#allocation2 + $0x164] sm:$0x1] %v371_v63 }
 0x1bb   : > { %2894 = vmatmul.bf16.gmra.mxu3 %v9927_v50  ;;  %v13339_v35 = vadd.f32 %v3110_v5, %v2982_v29  ;;  %v2199_v14 = vadd.f32 %v2198_v55, %v13233_v6  ;;  %v9938_v5 = vld [vmem:[#allocation2 + $0x108] sm:$0xf]  ;;  %v11764_v6 = vld [vmem:[#allocation2 + $0x110] sm:$0xf0]  ;;  %v11765_v50 = vld [vmem:[#allocation2 + $0x118] sm:$0xf0] }
 0x1be   : > { %v2855_v10 = vpop.f32.mrf.mxu3  ;;  %v2986_v47 = vpop.f32.mrf.mxu0 }
 0x1bf   : > { %v2856_v45 = vadd.f32 %v2855_v10, %v2199_v14  ;;  %v3115_v24 = vpop.f32.mrf.mxu1  ;;  %v9939_v14 = vor.u32 %v11764_v6, %v9938_v5  ;;  %v11864_v6 = vld [vmem:[#allocation2 + $0x154] sm:$0xf0] }
 0x1c1   : > { %v2985_v56 = vadd.f32 %v2984_v52, %v2856_v45  ;;  %v9947_v52 = vor.u32 %v11765_v50, %v9946_v34  ;;  %v11767_v34 = vld [vmem:[#allocation2 + $0x128] sm:$0xf0]  ;;  %v11766_v50 = vld [vmem:[#allocation2 + $0x124] sm:$0xf] }
 0x1c2   : > { %v2200_v17 = vpop.f32.mrf.mxu2 }
 0x1c3   : > { %v13344_v12 = vadd.f32 %v3113_v22, %v2985_v56  ;;  %v2201_v62 = vadd.f32 %v2200_v17, %v13239_v41  ;;  %v373_v17 = vld [vmem:[#allocation2 + $0x188] sm:$0x1] }
 0x1c4   : > { %v374_v5 = vsel %vm12815_vm10, 0, %v373_v17 }
 0x1c5   : > { %375 = vst [vmem:[#allocation2 + $0x188] sm:$0x1] %v374_v5 }
 0x1c6   : > { %v2857_v29 = vpop.f32.mrf.mxu3  ;;  %v2989_v55 = vpop.f32.mrf.mxu0 }
 0x1c7   : > { %v2858_v10 = vadd.f32 %v2857_v29, %v2201_v62  ;;  %v3118_v28 = vpop.f32.mrf.mxu1  ;;  %2242 = vmatmul.bf16.gmra.mxu2 %v9563_v19  ;;  %v9958_v29 = vld [vmem:[#allocation2 + $0x128] sm:$0xf]  ;;  %v12192_v19 = vld [vmem:[#allocation8 + $0xf0] sm:$0xff] }
 0x1c8   : > { %6085 = vmatpush.bf16.msra.mxu1 %v12192_v19 }
 0x1c9   : > { %3028 = vmatmul.bf16.gmra.mxu0 %v9943_v54  ;;  %v2987_v45 = vadd.f32 %v2986_v47, %v2858_v10  ;;  %3157 = vmatmul.bf16.gmra.mxu1 %v9947_v52  ;;  %v9950_v47 = vld [vmem:[#allocation2 + $0x120] sm:$0xf]  ;;  %v9575_v10 = vor.u32 %v11864_v6, %v9574_v42 }
 0x1ca   : > { %v2203_v32 = vpop.f32.mrf.mxu2 }
 0x1cb   : > { %2899 = vmatmul.bf16.gmra.mxu3 %v9939_v14  ;;  %v13347_v22 = vadd.f32 %v3115_v24, %v2987_v45  ;;  %v2204_v63 = vadd.f32 %v2203_v32, %v13243_v44  ;;  %v9952_v24 = vld [vmem:[#allocation2 + $0x12c] sm:$0xf0]  ;;  %v11768_v44 = vld [vmem:[#allocation2 + $0x130] sm:$0xf0] }
 0x1cc   : > { %v9955_v45 = vor.u32 %v11766_v50, %v9952_v24  ;;  %v9586_v24 = vld [vmem:[#allocation2 + $0x164] sm:$0xf] }
 0x1ce   : > { %v2860_v56 = vpop.f32.mrf.mxu3  ;;  %v2991_v41 = vpop.f32.mrf.mxu0 }
 0x1cf   : > { %v2861_v11 = vadd.f32 %v2860_v56, %v2204_v63  ;;  %v3120_v30 = vpop.f32.mrf.mxu1  ;;  %v9959_v63 = vor.u32 %v11768_v44, %v9958_v29  ;;  %v11769_v29 = vld [vmem:[#allocation2 + $0x13c] sm:$0xf]  ;;  %v9964_v44 = vld [vmem:[#allocation2 + $0x144] sm:$0xf0] }
 0x1d1   : > { %v2990_v38 = vadd.f32 %v2989_v55, %v2861_v11  ;;  %v9951_v55 = vor.u32 %v11767_v34, %v9950_v47  ;;  %v11867_v47 = vld [vmem:[#allocation2 + $0x16c] sm:$0xf0]  ;;  %v9962_v34 = vld [vmem:[#allocation2 + $0x138] sm:$0xf] }
 0x1d2   : > { %v2205_v54 = vpop.f32.mrf.mxu2 }
 0x1d3   : > { %v13352_v62 = vadd.f32 %v3118_v28, %v2990_v38  ;;  %v2206_v14 = vadd.f32 %v2205_v54, %v13249_v23 }
 0x1d6   : > { %v2862_v52 = vpop.f32.mrf.mxu3  ;;  %v2994_v32 = vpop.f32.mrf.mxu0 }
 0x1d7   : > { %v2863_v56 = vadd.f32 %v2862_v52, %v2206_v14  ;;  %v3123_v17 = vpop.f32.mrf.mxu1  ;;  %2247 = vmatmul.bf16.gmra.mxu2 %v9575_v10  ;;  %v9970_v14 = vld [vmem:[#allocation2 + $0x140] sm:$0xf]  ;;  %v11771_v52 = vld [vmem:[#allocation2 + $0x148] sm:$0xf0] }
 0x1d9   : > { %3033 = vmatmul.bf16.gmra.mxu0 %v9955_v45  ;;  %v2992_v11 = vadd.f32 %v2991_v41, %v2863_v56  ;;  %3162 = vmatmul.bf16.gmra.mxu1 %v9959_v63  ;;  %v11770_v41 = vld [vmem:[#allocation2 + $0x140] sm:$0xf0] }
 0x1da   : > { %v2208_v5 = vpop.f32.mrf.mxu2  ;;  %v9963_v56 = vor.u32 %v11770_v41, %v9962_v34  ;;  %v376_v34 = vld [vmem:[#allocation2 + $0x1ac] sm:$0x1]  ;;  %v12012_v41 = vld [vmem:[#allocation6 + $0x210] sm:$0xff] }
 0x1db   : > { %2904 = vmatmul.bf16.gmra.mxu3 %v9951_v55  ;;  %v13355_v28 = vadd.f32 %v3120_v30, %v2992_v11  ;;  %v2209_v38 = vadd.f32 %v2208_v5, %v13253_v25  ;;  %v9587_v25 = vor.u32 %v11867_v47, %v9586_v24  ;;  %v9967_v55 = vor.u32 %v11769_v29, %v9964_v44 }
 0x1dc   : > { %v9971_v11 = vor.u32 %v11771_v52, %v9970_v14  ;;  %v9598_v52 = vld [vmem:[#allocation2 + $0x17c] sm:$0xf]  ;;  %4160 = vmatpush.bf16.msra.mxu0 %v12012_v41 }
 0x1de   : > { %v2865_v23 = vpop.f32.mrf.mxu3  ;;  %v2996_v54 = vpop.f32.mrf.mxu0 }
 0x1df   : > { %v2866_v42 = vadd.f32 %v2865_v23, %v2209_v38  ;;  %v3125_v6 = vpop.f32.mrf.mxu1  ;;  %v12004_v23 = vld [vmem:[#allocation6 + $0x1d0] sm:$0xff] }
 0x1e0   : > { %4031 = vmatpush.bf16.msra.mxu3 %v12004_v23 }
 0x1e1   : > { %v2995_v50 = vadd.f32 %v2994_v32, %v2866_v42 }
 0x1e2   : > { %v2210_v30 = vpop.f32.mrf.mxu2 }
 0x1e3   : > { %v13358_v19 = vadd.f32 %v3123_v17, %v2995_v50  ;;  %v2211_v10 = vadd.f32 %v2210_v30, %v13257_v37  ;;  %v11996_v17 = vld [vmem:[#allocation6 + $0x190] sm:$0xff]  ;;  %v11870_v30 = vld [vmem:[#allocation2 + $0x184] sm:$0xf0] }
 0x1e4   : > { %3902 = vmatpush.bf16.msra.mxu2 %v11996_v17  ;;  %v9599_v17 = vor.u32 %v11870_v30, %v9598_v52 }
 0x1e6   : > { %v2867_v45 = vpop.f32.mrf.mxu3  ;;  %v2999_v63 = vpop.f32.mrf.mxu0 }
 0x1e7   : > { %v2868_v32 = vadd.f32 %v2867_v45, %v2211_v10  ;;  %v3128_v5 = vpop.f32.mrf.mxu1  ;;  %2252 = vmatmul.bf16.gmra.mxu2 %v9587_v25  ;;  %v11772_v10 = vld [vmem:[#allocation2 + $0x154] sm:$0xf]  ;;  %v9976_v45 = vld [vmem:[#allocation2 + $0x15c] sm:$0xf0] }
 0x1e8   : > { %v9979_v23 = vor.u32 %v11772_v10, %v9976_v45  ;;  %v9610_v45 = vld [vmem:[#allocation2 + $0x194] sm:$0xf] }
 0x1e9   : > { %3038 = vmatmul.bf16.gmra.mxu0 %v9967_v55  ;;  %v2997_v38 = vadd.f32 %v2996_v54, %v2868_v32  ;;  %3167 = vmatmul.bf16.gmra.mxu1 %v9971_v11  ;;  %v377_v54 = vsel %vm12815_vm10, 0, %v376_v34  ;;  %v9982_v55 = vld [vmem:[#allocation2 + $0x158] sm:$0xf] }
 0x1ea   : > { %v2213_v50 = vpop.f32.mrf.mxu2  ;;  %378 = vst [vmem:[#allocation2 + $0x1ac] sm:$0x1] %v377_v54 }
 0x1eb   : > { %2909 = vmatmul.bf16.gmra.mxu3 %v9963_v56  ;;  %v13361_v42 = vadd.f32 %v3125_v6, %v2997_v38  ;;  %v2214_v37 = vadd.f32 %v2213_v50, %v13261_v31  ;;  %v9974_v6 = vld [vmem:[#allocation2 + $0x150] sm:$0xf]  ;;  %v11773_v31 = vld [vmem:[#allocation2 + $0x158] sm:$0xf0]  ;;  %v11774_v56 = vld [vmem:[#allocation2 + $0x160] sm:$0xf0] }
 0x1ee   : > { %v2870_v24 = vpop.f32.mrf.mxu3  ;;  %v3001_v47 = vpop.f32.mrf.mxu0 }
 0x1ef   : > { %v2871_v29 = vadd.f32 %v2870_v24, %v2214_v37  ;;  %v3130_v44 = vpop.f32.mrf.mxu1  ;;  %v9975_v37 = vor.u32 %v11773_v31, %v9974_v6  ;;  %v11873_v31 = vld [vmem:[#allocation2 + $0x19c] sm:$0xf0] }
 0x1f1   : > { %v3000_v14 = vadd.f32 %v2999_v63, %v2871_v29  ;;  %v9983_v63 = vor.u32 %v11774_v56, %v9982_v55  ;;  %v11776_v55 = vld [vmem:[#allocation2 + $0x170] sm:$0xf0]  ;;  %v11775_v56 = vld [vmem:[#allocation2 + $0x16c] sm:$0xf] }
 0x1f2   : > { %v2215_v11 = vpop.f32.mrf.mxu2 }
 0x1f3   : > { %v13366_v25 = vadd.f32 %v3128_v5, %v3000_v14  ;;  %v2216_v32 = vadd.f32 %v2215_v11, %v13267_v49  ;;  %v379_v11 = vld [vmem:[#allocation2 + $0x1d0] sm:$0x1] }
 0x1f4   : > { %v380_v6 = vsel %vm12815_vm10, 0, %v379_v11 }
 0x1f5   : > { %381 = vst [vmem:[#allocation2 + $0x1d0] sm:$0x1] %v380_v6 }
 0x1f6   : > { %v2872_v38 = vpop.f32.mrf.mxu3  ;;  %v3004_v50 = vpop.f32.mrf.mxu0 }
 0x1f7   : > { %v2873_v24 = vadd.f32 %v2872_v38, %v2216_v32  ;;  %v3133_v34 = vpop.f32.mrf.mxu1  ;;  %2257 = vmatmul.bf16.gmra.mxu2 %v9599_v17  ;;  %v9994_v38 = vld [vmem:[#allocation2 + $0x170] sm:$0xf] }
 0x1f8   : > { %v12191_v17 = vld [vmem:[#allocation8 + $0xe8] sm:$0xff] }
 0x1f9   : > { %3043 = vmatmul.bf16.gmra.mxu0 %v9979_v23  ;;  %v3002_v29 = vadd.f32 %v3001_v47, %v2873_v24  ;;  %3172 = vmatmul.bf16.gmra.mxu1 %v9983_v63  ;;  %v9986_v47 = vld [vmem:[#allocation2 + $0x168] sm:$0xf]  ;;  %v9611_v24 = vor.u32 %v11873_v31, %v9610_v45 }
 0x1fa   : > { %v2218_v41 = vpop.f32.mrf.mxu2  ;;  %6086 = vmatpush.bf16.msra.mxu1 %v12191_v17 }
 0x1fb   : > { %2914 = vmatmul.bf16.gmra.mxu3 %v9975_v37  ;;  %v13369_v5 = vadd.f32 %v3130_v44, %v3002_v29  ;;  %v2219_v54 = vadd.f32 %v2218_v41, %v13271_v13  ;;  %v9988_v44 = vld [vmem:[#allocation2 + $0x174] sm:$0xf0]  ;;  %v11777_v13 = vld [vmem:[#allocation2 + $0x178] sm:$0xf0] }
 0x1fc   : > { %v9991_v29 = vor.u32 %v11775_v56, %v9988_v44  ;;  %v9622_v44 = vld [vmem:[#allocation2 + $0x1ac] sm:$0xf] }
 0x1fe   : > { %v2875_v14 = vpop.f32.mrf.mxu3  ;;  %v3006_v49 = vpop.f32.mrf.mxu0 }
 0x1ff   : > { %v2876_v52 = vadd.f32 %v2875_v14, %v2219_v54  ;;  %v3135_v30 = vpop.f32.mrf.mxu1  ;;  %v9995_v54 = vor.u32 %v11777_v13, %v9994_v38  ;;  %v11778_v38 = vld [vmem:[#allocation2 + $0x184] sm:$0xf]  ;;  %v10000_v13 = vld [vmem:[#allocation2 + $0x18c] sm:$0xf0] }
 0x201   : > { %v3005_v10 = vadd.f32 %v3004_v50, %v2876_v52  ;;  %v9987_v50 = vor.u32 %v11776_v55, %v9986_v47  ;;  %v11876_v47 = vld [vmem:[#allocation2 + $0x1b4] sm:$0xf0]  ;;  %v9998_v55 = vld [vmem:[#allocation2 + $0x180] sm:$0xf] }
 0x202   : > { %v2220_v23 = vpop.f32.mrf.mxu2 }
 0x203   : > { %v13374_v32 = vadd.f32 %v3133_v34, %v3005_v10  ;;  %v2221_v37 = vadd.f32 %v2220_v23, %v13277_v60 }
 0x206   : > { %v2877_v63 = vpop.f32.mrf.mxu3  ;;  %v3009_v41 = vpop.f32.mrf.mxu0 }
 0x207   : > { %v2878_v14 = vadd.f32 %v2877_v63, %v2221_v37  ;;  %v3138_v11 = vpop.f32.mrf.mxu1  ;;  %2262 = vmatmul.bf16.gmra.mxu2 %v9611_v24  ;;  %v10006_v37 = vld [vmem:[#allocation2 + $0x188] sm:$0xf]  ;;  %v11780_v63 = vld [vmem:[#allocation2 + $0x190] sm:$0xf0] }
 0x209   : > { %3048 = vmatmul.bf16.gmra.mxu0 %v9991_v29  ;;  %v3007_v52 = vadd.f32 %v3006_v49, %v2878_v14  ;;  %3177 = vmatmul.bf16.gmra.mxu1 %v9995_v54  ;;  %v11779_v49 = vld [vmem:[#allocation2 + $0x188] sm:$0xf0] }
 0x20a   : > { %v2223_v6 = vpop.f32.mrf.mxu2  ;;  %v9999_v14 = vor.u32 %v11779_v49, %v9998_v55  ;;  %v382_v55 = vld [vmem:[#allocation2 + $0x1f4] sm:$0x1] }
 0x20b   : > { %2919 = vmatmul.bf16.gmra.mxu3 %v9987_v50  ;;  %v13377_v34 = vadd.f32 %v3135_v30, %v3007_v52  ;;  %v2224_v10 = vadd.f32 %v2223_v6, %v13281_v3  ;;  %v9623_v3 = vor.u32 %v11876_v47, %v9622_v44  ;;  %v10003_v50 = vor.u32 %v11778_v38, %v10000_v13  ;;  %v12011_v49 = vld [vmem:[#allocation6 + $0x208] sm:$0xff] }
 0x20c   : > { %v10007_v52 = vor.u32 %v11780_v63, %v10006_v37  ;;  %v9634_v63 = vld [vmem:[#allocation2 + $0x1c4] sm:$0xf]  ;;  %4161 = vmatpush.bf16.msra.mxu0 %v12011_v49 }
 0x20e   : > { %v2880_v60 = vpop.f32.mrf.mxu3  ;;  %v3011_v23 = vpop.f32.mrf.mxu0 }
 0x20f   : > { %v2881_v45 = vadd.f32 %v2880_v60, %v2224_v10  ;;  %v3140_v31 = vpop.f32.mrf.mxu1  ;;  %v12003_v60 = vld [vmem:[#allocation6 + $0x1c8] sm:$0xff] }
 0x210   : > { %4032 = vmatpush.bf16.msra.mxu3 %v12003_v60 }
 0x211   : > { %v3010_v56 = vadd.f32 %v3009_v41, %v2881_v45 }
 0x212   : > { %v2225_v30 = vpop.f32.mrf.mxu2 }
 0x213   : > { %v13380_v17 = vadd.f32 %v3138_v11, %v3010_v56  ;;  %v2226_v24 = vadd.f32 %v2225_v30, %v13285_v40  ;;  %v11995_v11 = vld [vmem:[#allocation6 + $0x188] sm:$0xff] }
 0x214   : > { %3903 = vmatpush.bf16.msra.mxu2 %v11995_v11  ;;  %v11879_v30 = vld [vmem:[#allocation2 + $0x1cc] sm:$0xf0] }
 0x215   : > { %v9635_v11 = vor.u32 %v11879_v30, %v9634_v63 }
 0x216   : > { %v2882_v29 = vpop.f32.mrf.mxu3  ;;  %v3014_v54 = vpop.f32.mrf.mxu0 }
 0x217   : > { %v2883_v41 = vadd.f32 %v2882_v29, %v2226_v24  ;;  %v3143_v6 = vpop.f32.mrf.mxu1  ;;  %2267 = vmatmul.bf16.gmra.mxu2 %v9623_v3  ;;  %v11781_v24 = vld [vmem:[#allocation2 + $0x19c] sm:$0xf]  ;;  %v10012_v29 = vld [vmem:[#allocation2 + $0x1a4] sm:$0xf0] }
 0x218   : > { %v10015_v60 = vor.u32 %v11781_v24, %v10012_v29  ;;  %v9646_v29 = vld [vmem:[#allocation2 + $0x1dc] sm:$0xf] }
 0x219   : > { %3053 = vmatmul.bf16.gmra.mxu0 %v10003_v50  ;;  %v3012_v10 = vadd.f32 %v3011_v23, %v2883_v41  ;;  %3182 = vmatmul.bf16.gmra.mxu1 %v10007_v52  ;;  %v383_v23 = vsel %vm12815_vm10, 0, %v382_v55  ;;  %v10018_v50 = vld [vmem:[#allocation2 + $0x1a0] sm:$0xf] }
 0x21a   : > { %v2228_v56 = vpop.f32.mrf.mxu2  ;;  %384 = vst [vmem:[#allocation2 + $0x1f4] sm:$0x1] %v383_v23 }
 0x21b   : > { %2924 = vmatmul.bf16.gmra.mxu3 %v9999_v14  ;;  %v13383_v45 = vadd.f32 %v3140_v31, %v3012_v10  ;;  %v2229_v40 = vadd.f32 %v2228_v56, %v13289_v51  ;;  %v10010_v31 = vld [vmem:[#allocation2 + $0x198] sm:$0xf]  ;;  %v11782_v51 = vld [vmem:[#allocation2 + $0x1a0] sm:$0xf0]  ;;  %v11783_v14 = vld [vmem:[#allocation2 + $0x1a8] sm:$0xf0] }
 0x21e   : > { %v2885_v44 = vpop.f32.mrf.mxu3  ;;  %v3016_v47 = vpop.f32.mrf.mxu0 }
 0x21f   : > { %v2886_v38 = vadd.f32 %v2885_v44, %v2229_v40  ;;  %v3145_v13 = vpop.f32.mrf.mxu1  ;;  %v10011_v40 = vor.u32 %v11782_v51, %v10010_v31  ;;  %v11882_v51 = vld [vmem:[#allocation2 + $0x1e4] sm:$0xf0] }
 0x221   : > { %v3015_v37 = vadd.f32 %v3014_v54, %v2886_v38  ;;  %v10019_v54 = vor.u32 %v11783_v14, %v10018_v50  ;;  %v11785_v50 = vld [vmem:[#allocation2 + $0x1b8] sm:$0xf0]  ;;  %v11784_v14 = vld [vmem:[#allocation2 + $0x1b4] sm:$0xf] }
 0x222   : > { %v2230_v52 = vpop.f32.mrf.mxu2 }
 0x223   : > { %v13388_v3 = vadd.f32 %v3143_v6, %v3015_v37  ;;  %v2231_v41 = vadd.f32 %v2230_v52, %v13295_v48  ;;  %v385_v52 = vld [vmem:[#allocation2 + $0x218] sm:$0x1] }
 0x224   : > { %v386_v31 = vsel %vm12815_vm10, 0, %v385_v52 }
 0x225   : > { %387 = vst [vmem:[#allocation2 + $0x218] sm:$0x1] %v386_v31 }
 0x226   : > { %v2887_v10 = vpop.f32.mrf.mxu3  ;;  %v3019_v56 = vpop.f32.mrf.mxu0 }
 0x227   : > { %v2888_v44 = vadd.f32 %v2887_v10, %v2231_v41  ;;  %v3148_v55 = vpop.f32.mrf.mxu1  ;;  %2272 = vmatmul.bf16.gmra.mxu2 %v9635_v11  ;;  %v10030_v10 = vld [vmem:[#allocation2 + $0x1b8] sm:$0xf]  ;;  %v12190_v11 = vld [vmem:[#allocation8 + $0xe0] sm:$0xff] }
 0x228   : > { %6087 = vmatpush.bf16.msra.mxu1 %v12190_v11 }
 0x229   : > { %3058 = vmatmul.bf16.gmra.mxu0 %v10015_v60  ;;  %v3017_v38 = vadd.f32 %v3016_v47, %v2888_v44  ;;  %3187 = vmatmul.bf16.gmra.mxu1 %v10019_v54  ;;  %v10022_v47 = vld [vmem:[#allocation2 + $0x1b0] sm:$0xf]  ;;  %v9647_v44 = vor.u32 %v11882_v51, %v9646_v29 }
 0x22a   : > { %v2233_v49 = vpop.f32.mrf.mxu2 }
 0x22b   : > { %2929 = vmatmul.bf16.gmra.mxu3 %v10011_v40  ;;  %v13391_v6 = vadd.f32 %v3145_v13, %v3017_v38  ;;  %v2234_v23 = vadd.f32 %v2233_v49, %v13299_v43  ;;  %v10024_v13 = vld [vmem:[#allocation2 + $0x1bc] sm:$0xf0]  ;;  %v11786_v43 = vld [vmem:[#allocation2 + $0x1c0] sm:$0xf0] }
 0x22c   : > { %v10027_v38 = vor.u32 %v11784_v14, %v10024_v13  ;;  %v9658_v13 = vld [vmem:[#allocation2 + $0x1f4] sm:$0xf] }
 0x22e   : > { %v2890_v37 = vpop.f32.mrf.mxu3  ;;  %v3021_v48 = vpop.f32.mrf.mxu0 }
 0x22f   : > { %v2891_v63 = vadd.f32 %v2890_v37, %v2234_v23  ;;  %v3150_v30 = vpop.f32.mrf.mxu1  ;;  %v10031_v23 = vor.u32 %v11786_v43, %v10030_v10  ;;  %v11787_v10 = vld [vmem:[#allocation2 + $0x1cc] sm:$0xf]  ;;  %v10036_v43 = vld [vmem:[#allocation2 + $0x1d4] sm:$0xf0] }
 0x231   : > { %v3020_v24 = vadd.f32 %v3019_v56, %v2891_v63  ;;  %v10023_v56 = vor.u32 %v11785_v50, %v10022_v47  ;;  %v11885_v47 = vld [vmem:[#allocation2 + $0x1fc] sm:$0xf0]  ;;  %v10034_v50 = vld [vmem:[#allocation2 + $0x1c8] sm:$0xf] }
 0x232   : > { %v2235_v60 = vpop.f32.mrf.mxu2 }
 0x233   : > { %v13396_v41 = vadd.f32 %v3148_v55, %v3020_v24  ;;  %v2236_v40 = vadd.f32 %v2235_v60, %v13305_v15 }
 0x236   : > { %v2892_v54 = vpop.f32.mrf.mxu3  ;;  %v3024_v49 = vpop.f32.mrf.mxu0 }
 0x237   : > { %v2893_v37 = vadd.f32 %v2892_v54, %v2236_v40  ;;  %v3153_v52 = vpop.f32.mrf.mxu1  ;;  %2277 = vmatmul.bf16.gmra.mxu2 %v9647_v44  ;;  %v10042_v40 = vld [vmem:[#allocation2 + $0x1d0] sm:$0xf]  ;;  %v11789_v54 = vld [vmem:[#allocation2 + $0x1d8] sm:$0xf0] }
 0x239   : > { %3063 = vmatmul.bf16.gmra.mxu0 %v10027_v38  ;;  %v3022_v63 = vadd.f32 %v3021_v48, %v2893_v37  ;;  %3192 = vmatmul.bf16.gmra.mxu1 %v10031_v23  ;;  %v11788_v48 = vld [vmem:[#allocation2 + $0x1d0] sm:$0xf0] }
 0x23a   : > { %v2238_v31 = vpop.f32.mrf.mxu2  ;;  %v10035_v37 = vor.u32 %v11788_v48, %v10034_v50  ;;  %v388_v50 = vld [vmem:[#allocation2 + $0x23c] sm:$0x1]  ;;  %v12010_v48 = vld [vmem:[#allocation6 + $0x200] sm:$0xff] }
 0x23b   : > { %2934 = vmatmul.bf16.gmra.mxu3 %v10023_v56  ;;  %v13399_v55 = vadd.f32 %v3150_v30, %v3022_v63  ;;  %v2239_v24 = vadd.f32 %v2238_v31, %v13309_v2  ;;  %v9659_v2 = vor.u32 %v11885_v47, %v9658_v13  ;;  %v10039_v56 = vor.u32 %v11787_v10, %v10036_v43 }
 0x23c   : > { %v10043_v63 = vor.u32 %v11789_v54, %v10042_v40  ;;  %v9670_v54 = vld [vmem:[#allocation2 + $0x20c] sm:$0xf]  ;;  %4162 = vmatpush.bf16.msra.mxu0 %v12010_v48 }
 0x23e   : > { %v2895_v15 = vpop.f32.mrf.mxu3  ;;  %v3026_v60 = vpop.f32.mrf.mxu0 }
 0x23f   : > { %v2896_v29 = vadd.f32 %v2895_v15, %v2239_v24  ;;  %v3155_v51 = vpop.f32.mrf.mxu1  ;;  %v12002_v15 = vld [vmem:[#allocation6 + $0x1c0] sm:$0xff] }
 0x240   : > { %4033 = vmatpush.bf16.msra.mxu3 %v12002_v15 }
 0x241   : > { %v3025_v14 = vadd.f32 %v3024_v49, %v2896_v29 }
 0x242   : > { %v2240_v30 = vpop.f32.mrf.mxu2 }
 0x243   : > { %v13402_v11 = vadd.f32 %v3153_v52, %v3025_v14  ;;  %v2241_v44 = vadd.f32 %v2240_v30, %v13313_v57  ;;  %v11994_v52 = vld [vmem:[#allocation6 + $0x180] sm:$0xff]  ;;  %v11888_v30 = vld [vmem:[#allocation2 + $0x214] sm:$0xf0] }
 0x244   : > { %3904 = vmatpush.bf16.msra.mxu2 %v11994_v52  ;;  %v9671_v52 = vor.u32 %v11888_v30, %v9670_v54 }
 0x246   : > { %v2897_v38 = vpop.f32.mrf.mxu3  ;;  %v3029_v23 = vpop.f32.mrf.mxu0 }
 0x247   : > { %v2898_v49 = vadd.f32 %v2897_v38, %v2241_v44  ;;  %v3158_v31 = vpop.f32.mrf.mxu1  ;;  %2282 = vmatmul.bf16.gmra.mxu2 %v9659_v2  ;;  %v11790_v44 = vld [vmem:[#allocation2 + $0x1e4] sm:$0xf]  ;;  %v10048_v38 = vld [vmem:[#allocation2 + $0x1ec] sm:$0xf0] }
 0x248   : > { %v10051_v15 = vor.u32 %v11790_v44, %v10048_v38  ;;  %v9682_v38 = vld [vmem:[#allocation2 + $0x224] sm:$0xf] }
 0x249   : > { %3068 = vmatmul.bf16.gmra.mxu0 %v10039_v56  ;;  %v3027_v24 = vadd.f32 %v3026_v60, %v2898_v49  ;;  %3197 = vmatmul.bf16.gmra.mxu1 %v10043_v63  ;;  %v389_v60 = vsel %vm12815_vm10, 0, %v388_v50  ;;  %v10054_v56 = vld [vmem:[#allocation2 + $0x1e8] sm:$0xf] }
 0x24a   : > { %v2243_v14 = vpop.f32.mrf.mxu2  ;;  %390 = vst [vmem:[#allocation2 + $0x23c] sm:$0x1] %v389_v60 }
 0x24b   : > { %2939 = vmatmul.bf16.gmra.mxu3 %v10035_v37  ;;  %v13405_v29 = vadd.f32 %v3155_v51, %v3027_v24  ;;  %v2244_v57 = vadd.f32 %v2243_v14, %v13317_v8  ;;  %v10046_v51 = vld [vmem:[#allocation2 + $0x1e0] sm:$0xf]  ;;  %v11791_v8 = vld [vmem:[#allocation2 + $0x1e8] sm:$0xf0]  ;;  %v11792_v37 = vld [vmem:[#allocation2 + $0x1f0] sm:$0xf0] }
 0x24e   : > { %v2900_v13 = vpop.f32.mrf.mxu3  ;;  %v3031_v47 = vpop.f32.mrf.mxu0 }
 0x24f   : > { %v2901_v10 = vadd.f32 %v2900_v13, %v2244_v57  ;;  %v3160_v43 = vpop.f32.mrf.mxu1  ;;  %v10047_v57 = vor.u32 %v11791_v8, %v10046_v51  ;;  %v10058_v8 = vld [vmem:[#allocation2 + $0x1f8] sm:$0xf] }
 0x251   : > { %v3030_v40 = vadd.f32 %v3029_v23, %v2901_v10  ;;  %v10055_v23 = vor.u32 %v11792_v37, %v10054_v56  ;;  %v11794_v56 = vld [vmem:[#allocation2 + $0x200] sm:$0xf0]  ;;  %v10060_v37 = vld [vmem:[#allocation2 + $0x204] sm:$0xf0] }
 0x252   : > { %v2245_v63 = vpop.f32.mrf.mxu2 }
 0x253   : > { %v13410_v2 = vadd.f32 %v3158_v31, %v3030_v40  ;;  %v2246_v49 = vadd.f32 %v2245_v63, %v13323_v21  ;;  %v391_v63 = vld [vmem:[#allocation2 + $0x260] sm:$0x1] }
 0x254   : > { %v392_v51 = vsel %vm12815_vm10, 0, %v391_v63 }
 0x255   : > { %393 = vst [vmem:[#allocation2 + $0x260] sm:$0x1] %v392_v51 }
 0x256   : > { %v2902_v24 = vpop.f32.mrf.mxu3  ;;  %v3034_v14 = vpop.f32.mrf.mxu0 }
 0x257   : > { %v2903_v13 = vadd.f32 %v2902_v24, %v2246_v49  ;;  %v3163_v50 = vpop.f32.mrf.mxu1  ;;  %2287 = vmatmul.bf16.gmra.mxu2 %v9671_v52  ;;  %v11795_v24 = vld [vmem:[#allocation2 + $0x208] sm:$0xf0]  ;;  %v12189_v52 = vld [vmem:[#allocation8 + $0xd8] sm:$0xff] }
 0x258   : > { %6088 = vmatpush.bf16.msra.mxu1 %v12189_v52  ;;  %v10078_v52 = vld [vmem:[#allocation2 + $0x218] sm:$0xf] }
 0x259   : > { %3073 = vmatmul.bf16.gmra.mxu0 %v10051_v15  ;;  %v3032_v10 = vadd.f32 %v3031_v47, %v2903_v13  ;;  %3202 = vmatmul.bf16.gmra.mxu1 %v10055_v23  ;;  %v11891_v47 = vld [vmem:[#allocation2 + $0x22c] sm:$0xf0] }
 0x25a   : > { %v2248_v48 = vpop.f32.mrf.mxu2  ;;  %v9683_v13 = vor.u32 %v11891_v47, %v9682_v38 }
 0x25b   : > { %2944 = vmatmul.bf16.gmra.mxu3 %v10047_v57  ;;  %v13413_v31 = vadd.f32 %v3160_v43, %v3032_v10  ;;  %v2249_v60 = vadd.f32 %v2248_v48, %v13204_v39  ;;  %v11793_v43 = vld [vmem:[#allocation2 + $0x1fc] sm:$0xf]  ;;  %v10066_v39 = vld [vmem:[#allocation2 + $0x200] sm:$0xf] }
 0x25c   : > { %v10063_v10 = vor.u32 %v11793_v43, %v10060_v37  ;;  %v9694_v43 = vld [vmem:[#allocation2 + $0x23c] sm:$0xf]  ;;  %v11796_v37 = vld [vmem:[#allocation2 + $0x214] sm:$0xf] }
 0x25e   : > { %v2905_v40 = vpop.f32.mrf.mxu3  ;;  %v3036_v21 = vpop.f32.mrf.mxu0 }
 0x25f   : > { %v2906_v54 = vadd.f32 %v2905_v40, %v2249_v60  ;;  %v13416_v30 = vpop.f32.mrf.mxu1  ;;  %v10067_v60 = vor.u32 %v11795_v24, %v10066_v39  ;;  %v10072_v39 = vld [vmem:[#allocation2 + $0x21c] sm:$0xf0] }
 0x261   : > { %v3035_v44 = vadd.f32 %v3034_v14, %v2906_v54  ;;  %v10059_v14 = vor.u32 %v11794_v56, %v10058_v8  ;;  %v11894_v8 = vld [vmem:[#allocation2 + $0x244] sm:$0xf0]  ;;  %v10070_v56 = vld [vmem:[#allocation2 + $0x210] sm:$0xf] }
 0x262   : > { %v2250_v15 = vpop.f32.mrf.mxu2 }
 0x263   : > { %v13420_v49 = vadd.f32 %v3163_v50, %v3035_v44  ;;  %v2251_v57 = vadd.f32 %v2250_v15, %v13219_v1 }
 0x266   : > { %v2907_v23 = vpop.f32.mrf.mxu3  ;;  %v3039_v48 = vpop.f32.mrf.mxu0 }
 0x267   : > { %v2908_v40 = vadd.f32 %v2907_v23, %v2251_v57  ;;  %v3168_v63 = vpop.f32.mrf.mxu1  ;;  %2292 = vmatmul.bf16.gmra.mxu2 %v9683_v13  ;;  %v11798_v57 = vld [vmem:[#allocation2 + $0x220] sm:$0xf0] }
 0x269   : > { %3078 = vmatmul.bf16.gmra.mxu0 %v10063_v10  ;;  %v13423_v54 = vadd.f32 %v3036_v21, %v2908_v40  ;;  %3207 = vmatmul.bf16.gmra.mxu1 %v10067_v60  ;;  %v11797_v21 = vld [vmem:[#allocation2 + $0x218] sm:$0xf0]  ;;  %v9695_v10 = vor.u32 %v11894_v8, %v9694_v43  ;;  %v9706_v8 = vld [vmem:[#allocation2 + $0x254] sm:$0xf] }
 0x26a   : > { %v2253_v50 = vpop.f32.mrf.mxu2  ;;  %v10071_v40 = vor.u32 %v11797_v21, %v10070_v56  ;;  %v11897_v56 = vld [vmem:[#allocation2 + $0x25c] sm:$0xf0]  ;;  %v10084_v21 = vld [vmem:[#allocation2 + $0x234] sm:$0xf0] }
 0x26b   : > { %2949 = vmatmul.bf16.gmra.mxu3 %v10059_v14  ;;  %v2254_v51 = vadd.f32 %v2253_v50, %v13227_v46  ;;  %v10075_v14 = vor.u32 %v11796_v37, %v10072_v39  ;;  %v10079_v50 = vor.u32 %v11798_v57, %v10078_v52  ;;  %v10082_v37 = vld [vmem:[#allocation2 + $0x228] sm:$0xf]  ;;  %v11799_v39 = vld [vmem:[#allocation2 + $0x22c] sm:$0xf]  ;;  %v10090_v57 = vld [vmem:[#allocation2 + $0x230] sm:$0xf] }
 0x26e   : > { %v2910_v44 = vpop.f32.mrf.mxu3  ;;  %v3041_v1 = vpop.f32.mrf.mxu0 }
 0x26f   : > { %v2911_v15 = vadd.f32 %v2910_v44, %v2254_v51  ;;  %v13426_v38 = vpop.f32.mrf.mxu1 }
 0x270   : > { %14867 = vst [vmem:[#allocation57_spill] sm:$0xff] %v13426_v38 }
 0x271   : > { %v3040_v47 = vadd.f32 %v3039_v48, %v2911_v15 }
 0x272   : > { %v2255_v23 = vpop.f32.mrf.mxu2 }
 0x273   : > { %v13428_v24 = vadd.f32 %v3168_v63, %v3040_v47  ;;  %v2256_v13 = vadd.f32 %v2255_v23, %v13231_v58 }
 0x276   : > { %v2912_v46 = vpop.f32.mrf.mxu3  ;;  %v3044_v60 = vpop.f32.mrf.mxu0 }
 0x277   : > { %v2913_v48 = vadd.f32 %v2912_v46, %v2256_v13  ;;  %v3173_v51 = vpop.f32.mrf.mxu1  ;;  %2297 = vmatmul.bf16.gmra.mxu2 %v9695_v10  ;;  %v11801_v13 = vld [vmem:[#allocation2 + $0x238] sm:$0xf0] }
 0x279   : > { %3083 = vmatmul.bf16.gmra.mxu0 %v10075_v14  ;;  %v13431_v44 = vadd.f32 %v3041_v1, %v2913_v48  ;;  %3212 = vmatmul.bf16.gmra.mxu1 %v10079_v50  ;;  %v11800_v1 = vld [vmem:[#allocation2 + $0x230] sm:$0xf0]  ;;  %v9707_v14 = vor.u32 %v11897_v56, %v9706_v8  ;;  %v10190_v56 = vld [vmem:[#allocation2 + $0x48] sm:$0xf] }
 0x27a   : > { %v2258_v63 = vpop.f32.mrf.mxu2  ;;  %v10083_v48 = vor.u32 %v11800_v1, %v10082_v37  ;;  %v11923_v37 = vld [vmem:[#allocation2 + $0x50] sm:$0xf0] }
 0x27b   : > { %2954 = vmatmul.bf16.gmra.mxu3 %v10071_v40  ;;  %v2259_v15 = vadd.f32 %v2258_v63, %v13235_v59  ;;  %v10087_v40 = vor.u32 %v11799_v39, %v10084_v21  ;;  %v10091_v63 = vor.u32 %v11801_v13, %v10090_v57  ;;  %v10198_v39 = vld [vmem:[#allocation2 + $0x50] sm:$0xf]  ;;  %v11924_v21 = vld [vmem:[#allocation2 + $0x58] sm:$0xf0]  ;;  %v11922_v57 = vld [vmem:[#allocation2 + $0x4c] sm:$0xf] }
 0x27c   : > { %v12188_v13 = vld [vmem:[#allocation8 + $0xd0] sm:$0xff] }
 0x27d   : > { %6089 = vmatpush.bf16.msra.mxu1 %v12188_v13  ;;  %v11925_v13 = vld [vmem:[#allocation2 + $0x64] sm:$0xf] }
 0x27e   : > { %v2915_v47 = vpop.f32.mrf.mxu3  ;;  %v3046_v38 = vpop.f32.mrf.mxu0 }
 0x27f   : > { %v2916_v58 = vadd.f32 %v2915_v47, %v2259_v15  ;;  %v13434_v23 = vpop.f32.mrf.mxu1 }
 0x280   : > { %14868 = vst [vmem:[#allocation58_spill] sm:$0xff] %v13434_v23 }
 0x281   : > { %v3045_v43 = vadd.f32 %v3044_v60, %v2916_v58 }
 0x282   : > { %v2260_v46 = vpop.f32.mrf.mxu2 }
 0x283   : > { %v13436_v52 = vadd.f32 %v3173_v51, %v3045_v43  ;;  %v2261_v10 = vadd.f32 %v2260_v46, %v13241_v18 }
 0x286   : > { %v2917_v59 = vpop.f32.mrf.mxu3  ;;  %v3049_v50 = vpop.f32.mrf.mxu0 }
 0x287   : > { %v2918_v60 = vadd.f32 %v2917_v59, %v2261_v10  ;;  %v3178_v15 = vpop.f32.mrf.mxu1  ;;  %2302 = vmatmul.bf16.gmra.mxu2 %v9707_v14 }
 0x289   : > { %3088 = vmatmul.bf16.gmra.mxu0 %v10087_v40  ;;  %v13439_v47 = vadd.f32 %v3046_v38, %v2918_v60  ;;  %3217 = vmatmul.bf16.gmra.mxu1 %v10091_v63  ;;  %v10192_v38 = vld [vmem:[#allocation2 + $0x54] sm:$0xf0]  ;;  %v10199_v40 = vor.u32 %v11924_v21, %v10198_v39  ;;  %v11926_v39 = vld [vmem:[#allocation2 + $0x68] sm:$0xf0]  ;;  %v10210_v21 = vld [vmem:[#allocation2 + $0x68] sm:$0xf] }
 0x28a   : > { %v2263_v51 = vpop.f32.mrf.mxu2  ;;  %v10195_v63 = vor.u32 %v11922_v57, %v10192_v38  ;;  %v11927_v57 = vld [vmem:[#allocation2 + $0x70] sm:$0xf0] }
 0x28b   : > { %2959 = vmatmul.bf16.gmra.mxu3 %v10083_v48  ;;  %v2264_v58 = vadd.f32 %v2263_v51, %v13245_v7  ;;  %v10191_v7 = vor.u32 %v11923_v37, %v10190_v56  ;;  %v10202_v37 = vld [vmem:[#allocation2 + $0x60] sm:$0xf] }
 0x28e   : > { %v2920_v43 = vpop.f32.mrf.mxu3  ;;  %v3051_v23 = vpop.f32.mrf.mxu0 }
 0x28f   : > { %v2921_v18 = vadd.f32 %v2920_v43, %v2264_v58  ;;  %v13442_v46 = vpop.f32.mrf.mxu1 }
 0x290   : > { %14869 = vst [vmem:[#allocation59_spill] sm:$0xff] %v13442_v46 }
 0x291   : > { %v3050_v8 = vadd.f32 %v3049_v50, %v2921_v18 }
 0x292   : > { %v2265_v10 = vpop.f32.mrf.mxu2 }
 0x293   : > { %v13444_v1 = vadd.f32 %v3178_v15, %v3050_v8  ;;  %v2266_v59 = vadd.f32 %v2265_v10, %v13251_v4  ;;  %v10204_v10 = vld [vmem:[#allocation2 + $0x6c] sm:$0xf0] }
 0x296   : > { %v2922_v14 = vpop.f32.mrf.mxu3  ;;  %v3054_v48 = vpop.f32.mrf.mxu0 }
 0x297   : > { %v2923_v60 = vadd.f32 %v2922_v14, %v2266_v59  ;;  %v3183_v50 = vpop.f32.mrf.mxu1  ;;  %3905 = vmatmul.bf16.vlgmr.msra.gmra.mxu2 %v10191_v7  ;;  %v10203_v7 = vor.u32 %v11926_v39, %v10202_v37  ;;  %v10214_v37 = vld [vmem:[#allocation2 + $0x78] sm:$0xf]  ;;  %v11929_v39 = vld [vmem:[#allocation2 + $0x80] sm:$0xf0] }
 0x299   : > { %4163 = vmatmul.bf16.vlgmr.msra.gmra.mxu0 %v10199_v40  ;;  %v13447_v51 = vadd.f32 %v3051_v23, %v2923_v60 }
 0x29a   : > { %v2268_v15 = vpop.f32.mrf.mxu2 }
 0x29b   : > { %14870 = vst [vmem:[#allocation60_spill] sm:$0xff] %v13447_v51  ;;  %4034 = vmatmul.bf16.vlgmr.msra.gmra.mxu3 %v10195_v63  ;;  %v2269_v58 = vadd.f32 %v2268_v15, %v13255_v33  ;;  %v10211_v33 = vor.u32 %v11927_v57, %v10210_v21  ;;  %v10207_v63 = vor.u32 %v11925_v13, %v10204_v10  ;;  %v10222_v21 = vld [vmem:[#allocation2 + $0x80] sm:$0xf]  ;;  %v11930_v57 = vld [vmem:[#allocation2 + $0x88] sm:$0xf0] }
 0x29c   : > { %v11928_v10 = vld [vmem:[#allocation2 + $0x7c] sm:$0xf] }
 0x29e   : > { %v2925_v43 = vpop.f32.mrf.mxu3  ;;  %v3056_v18 = vpop.f32.mrf.mxu0 }
 0x29f   : > { %v2926_v8 = vadd.f32 %v2925_v43, %v2269_v58  ;;  %v13450_v4 = vpop.f32.mrf.mxu1 }
 0x2a0   : > { %14871 = vst [vmem:[#allocation61_spill] sm:$0xff] %v13450_v4 }
 0x2a1   : > { %v3055_v56 = vadd.f32 %v3054_v48, %v2926_v8 }
 0x2a2   : > { %v2270_v23 = vpop.f32.mrf.mxu2 }
 0x2a3   : > { %v13452_v38 = vadd.f32 %v3183_v50, %v3055_v56  ;;  %v2271_v59 = vadd.f32 %v2270_v23, %v13259_v61  ;;  %v10216_v23 = vld [vmem:[#allocation2 + $0x84] sm:$0xf0] }
 0x2a5   : > { %14872 = vst [vmem:[#allocation62_spill] sm:$0xff] %v13452_v38 }
 0x2a6   : > { %v2927_v14 = vpop.f32.mrf.mxu3  ;;  %v3059_v40 = vpop.f32.mrf.mxu0 }
 0x2a7   : > { %v2928_v60 = vadd.f32 %v2927_v14, %v2271_v59  ;;  %v3188_v15 = vpop.f32.mrf.mxu1  ;;  %3910 = vmatmul.bf16.gmra.mxu2 %v10203_v7  ;;  %v10215_v7 = vor.u32 %v11929_v39, %v10214_v37  ;;  %v10226_v37 = vld [vmem:[#allocation2 + $0x90] sm:$0xf]  ;;  %v11932_v39 = vld [vmem:[#allocation2 + $0x98] sm:$0xf0] }
 0x2a9   : > { %4168 = vmatmul.bf16.gmra.mxu0 %v10211_v33  ;;  %v13455_v48 = vadd.f32 %v3056_v18, %v2928_v60 }
 0x2aa   : > { %v2273_v58 = vpop.f32.mrf.mxu2 }
 0x2ab   : > { %14873 = vst [vmem:[#allocation63_spill] sm:$0xff] %v13455_v48  ;;  %4039 = vmatmul.bf16.gmra.mxu3 %v10207_v63  ;;  %v2274_v50 = vadd.f32 %v2273_v58, %v13263_v36  ;;  %v10223_v36 = vor.u32 %v11930_v57, %v10222_v21  ;;  %v10219_v63 = vor.u32 %v11928_v10, %v10216_v23  ;;  %v10234_v21 = vld [vmem:[#allocation2 + $0x98] sm:$0xf]  ;;  %v11933_v57 = vld [vmem:[#allocation2 + $0xa0] sm:$0xf0] }
 0x2ac   : > { %v11931_v23 = vld [vmem:[#allocation2 + $0x94] sm:$0xf] }
 0x2ae   : > { %v2930_v43 = vpop.f32.mrf.mxu3  ;;  %v3061_v8 = vpop.f32.mrf.mxu0 }
 0x2af   : > { %v2931_v56 = vadd.f32 %v2930_v43, %v2274_v50  ;;  %v13458_v4 = vpop.f32.mrf.mxu1 }
 0x2b0   : > { %14874 = vst [vmem:[#allocation64_spill] sm:$0xff] %v13458_v4 }
 0x2b1   : > { %v3060_v61 = vadd.f32 %v3059_v40, %v2931_v56 }
 0x2b2   : > { %v2275_v18 = vpop.f32.mrf.mxu2 }
 0x2b3   : > { %v13460_v13 = vadd.f32 %v3188_v15, %v3060_v61  ;;  %v2276_v59 = vadd.f32 %v2275_v18, %v13269_v27  ;;  %v10228_v18 = vld [vmem:[#allocation2 + $0x9c] sm:$0xf0] }
 0x2b5   : > { %14875 = vst [vmem:[#allocation65_spill] sm:$0xff] %v13460_v13 }
 0x2b6   : > { %v2932_v14 = vpop.f32.mrf.mxu3  ;;  %v3064_v33 = vpop.f32.mrf.mxu0 }
 0x2b7   : > { %v2933_v60 = vadd.f32 %v2932_v14, %v2276_v59  ;;  %v3193_v58 = vpop.f32.mrf.mxu1  ;;  %3915 = vmatmul.bf16.gmra.mxu2 %v10215_v7 }
 0x2b9   : > { %4173 = vmatmul.bf16.gmra.mxu0 %v10223_v36  ;;  %v13463_v40 = vadd.f32 %v3061_v8, %v2933_v60  ;;  %v12187_v8 = vld [vmem:[#allocation8 + $0xc8] sm:$0xff]  ;;  %v10235_v36 = vor.u32 %v11933_v57, %v10234_v21  ;;  %v10231_v60 = vor.u32 %v11931_v23, %v10228_v18  ;;  %v11936_v23 = vld [vmem:[#allocation2 + $0xb8] sm:$0xf0] }
 0x2ba   : > { %v2278_v50 = vpop.f32.mrf.mxu2  ;;  %6090 = vmatpush.bf16.msra.mxu1 %v12187_v8  ;;  %v11935_v21 = vld [vmem:[#allocation2 + $0xb0] sm:$0xf0]  ;;  %v10246_v57 = vld [vmem:[#allocation2 + $0xb0] sm:$0xf]  ;;  %v11934_v8 = vld [vmem:[#allocation2 + $0xac] sm:$0xf] }
 0x2bb   : > { %14876 = vst [vmem:[#allocation66_spill] sm:$0xff] %v13463_v40  ;;  %4044 = vmatmul.bf16.gmra.mxu3 %v10219_v63  ;;  %v2279_v15 = vadd.f32 %v2278_v50, %v13273_v20  ;;  %v10227_v20 = vor.u32 %v11932_v39, %v10226_v37  ;;  %v10238_v39 = vld [vmem:[#allocation2 + $0xa8] sm:$0xf] }
 0x2be   : > { %v2935_v43 = vpop.f32.mrf.mxu3  ;;  %v3066_v56 = vpop.f32.mrf.mxu0 }
 0x2bf   : > { %v2936_v61 = vadd.f32 %v2935_v43, %v2279_v15  ;;  %v13466_v4 = vpop.f32.mrf.mxu1 }
 0x2c0   : > { %14877 = vst [vmem:[#allocation67_spill] sm:$0xff] %v13466_v4 }
 0x2c1   : > { %v3065_v27 = vadd.f32 %v3064_v33, %v2936_v61 }
 0x2c2   : > { %v2280_v59 = vpop.f32.mrf.mxu2 }
 0x2c3   : > { %v13468_v10 = vadd.f32 %v3193_v58, %v3065_v27  ;;  %v2281_v14 = vadd.f32 %v2280_v59, %v13279_v53  ;;  %v10240_v59 = vld [vmem:[#allocation2 + $0xb4] sm:$0xf0] }
 0x2c5   : > { %14878 = vst [vmem:[#allocation68_spill] sm:$0xff] %v13468_v10 }
 0x2c6   : > { %v2937_v7 = vpop.f32.mrf.mxu3  ;;  %v3069_v63 = vpop.f32.mrf.mxu0 }
 0x2c7   : > { %v2938_v50 = vadd.f32 %v2937_v7, %v2281_v14  ;;  %v3198_v33 = vpop.f32.mrf.mxu1  ;;  %3920 = vmatmul.bf16.gmra.mxu2 %v10227_v20  ;;  %v14882_v14 = vld [vmem:[#allocation47_spill] sm:$0xff] }
 0x2c9   : > { %4178 = vmatmul.bf16.gmra.mxu0 %v10235_v36  ;;  %v13471_v15 = vadd.f32 %v3066_v56, %v2938_v50  ;;  %v10239_v36 = vor.u32 %v11935_v21, %v10238_v39  ;;  %v10243_v50 = vor.u32 %v11934_v8, %v10240_v59  ;;  %v10250_v39 = vld [vmem:[#allocation2 + $0xc0] sm:$0xf]  ;;  %v11938_v21 = vld [vmem:[#allocation2 + $0xc8] sm:$0xf0]  ;;  %v11937_v59 = vld [vmem:[#allocation2 + $0xc4] sm:$0xf] }
 0x2ca   : > { %v2283_v58 = vpop.f32.mrf.mxu2 }
 0x2cb   : > { %14879 = vst [vmem:[#allocation69_spill] sm:$0xff] %v13471_v15  ;;  %4049 = vmatmul.bf16.gmra.mxu3 %v10231_v60  ;;  %v2284_v43 = vadd.f32 %v2283_v58, %v13283_v0  ;;  %v10247_v0 = vor.u32 %v11936_v23, %v10246_v57  ;;  %v10258_v57 = vld [vmem:[#allocation2 + $0xc8] sm:$0xf]  ;;  %v11939_v23 = vld [vmem:[#allocation2 + $0xd0] sm:$0xf0] }
 0x2ce   : > { %v2940_v61 = vpop.f32.mrf.mxu3  ;;  %v3071_v27 = vpop.f32.mrf.mxu0 }
 0x2cf   : > { %v2941_v4 = vadd.f32 %v2940_v61, %v2284_v43  ;;  %v13474_v53 = vpop.f32.mrf.mxu1 }
 0x2d0   : > { %14880 = vst [vmem:[#allocation70_spill] sm:$0xff] %v13474_v53 }
 0x2d1   : > { %v3070_v37 = vadd.f32 %v3069_v63, %v2941_v4 }
 0x2d2   : > { %v2285_v56 = vpop.f32.mrf.mxu2 }
 0x2d3   : > { %v13476_v18 = vadd.f32 %v3198_v33, %v3070_v37  ;;  %v2286_v7 = vadd.f32 %v2285_v56, %v14882_v14  ;;  %v14884_v33 = vld [vmem:[#allocation48_spill] sm:$0xff]  ;;  %v10252_v14 = vld [vmem:[#allocation2 + $0xcc] sm:$0xf0] }
 0x2d5   : > { %14881 = vst [vmem:[#allocation71_spill] sm:$0xff] %v13476_v18 }
 0x2d6   : > { %v2942_v20 = vpop.f32.mrf.mxu3  ;;  %v3074_v60 = vpop.f32.mrf.mxu0 }
 0x2d7   : > { %v2943_v58 = vadd.f32 %v2942_v20, %v2286_v7  ;;  %v3203_v43 = vpop.f32.mrf.mxu1  ;;  %3925 = vmatmul.bf16.gmra.mxu2 %v10239_v36  ;;  %v14887_v7 = vld [vmem:[#allocation49_spill] sm:$0xff] }
 0x2d9   : > { %4183 = vmatmul.bf16.gmra.mxu0 %v10247_v0  ;;  %v13479_v4 = vadd.f32 %v3071_v27, %v2943_v58  ;;  %v10251_v0 = vor.u32 %v11938_v21, %v10250_v39  ;;  %v10270_v39 = vld [vmem:[#allocation2 + $0xe0] sm:$0xf]  ;;  %v11942_v21 = vld [vmem:[#allocation2 + $0xe8] sm:$0xf0] }
 0x2da   : > { %v2288_v63 = vpop.f32.mrf.mxu2 }
 0x2db   : > { %14883 = vst [vmem:[#allocation47_spill] sm:$0xff] %v13479_v4  ;;  %4054 = vmatmul.bf16.gmra.mxu3 %v10243_v50  ;;  %v2289_v61 = vadd.f32 %v2288_v63, %v14884_v33  ;;  %v10259_v50 = vor.u32 %v11939_v23, %v10258_v57  ;;  %v10255_v63 = vor.u32 %v11937_v59, %v10252_v14  ;;  %v11940_v59 = vld [vmem:[#allocation2 + $0xdc] sm:$0xf]  ;;  %v10264_v14 = vld [vmem:[#allocation2 + $0xe4] sm:$0xf0] }
 0x2de   : > { %v2945_v37 = vpop.f32.mrf.mxu3  ;;  %v3076_v53 = vpop.f32.mrf.mxu0 }
 0x2df   : > { %v2946_v18 = vadd.f32 %v2945_v37, %v2289_v61  ;;  %v13482_v15 = vpop.f32.mrf.mxu1 }
 0x2e0   : > { %14885 = vst [vmem:[#allocation48_spill] sm:$0xff] %v13482_v15 }
 0x2e1   : > { %v3075_v56 = vadd.f32 %v3074_v60, %v2946_v18 }
 0x2e2   : > { %v2290_v27 = vpop.f32.mrf.mxu2 }
 0x2e3   : > { %v13484_v8 = vadd.f32 %v3203_v43, %v3075_v56  ;;  %v2291_v20 = vadd.f32 %v2290_v27, %v14887_v7  ;;  %v14889_v43 = vld [vmem:[#allocation50_spill] sm:$0xff]  ;;  %v10262_v27 = vld [vmem:[#allocation2 + $0xd8] sm:$0xf]  ;;  %v11941_v7 = vld [vmem:[#allocation2 + $0xe0] sm:$0xf0] }
 0x2e5   : > { %14886 = vst [vmem:[#allocation72_spill] sm:$0xff] %v13484_v8 }
 0x2e6   : > { %v2947_v36 = vpop.f32.mrf.mxu3  ;;  %v3079_v58 = vpop.f32.mrf.mxu0 }
 0x2e7   : > { %v2948_v33 = vadd.f32 %v2947_v36, %v2291_v20  ;;  %v3208_v61 = vpop.f32.mrf.mxu1  ;;  %3930 = vmatmul.bf16.gmra.mxu2 %v10251_v0  ;;  %v14892_v36 = vld [vmem:[#allocation51_spill] sm:$0xff] }
 0x2e9   : > { %4188 = vmatmul.bf16.gmra.mxu0 %v10259_v50  ;;  %v13487_v18 = vadd.f32 %v3076_v53, %v2948_v33  ;;  %v12186_v53 = vld [vmem:[#allocation8 + $0xc0] sm:$0xff]  ;;  %v10271_v33 = vor.u32 %v11942_v21, %v10270_v39  ;;  %v11945_v39 = vld [vmem:[#allocation2 + $0x100] sm:$0xf0] }
 0x2ea   : > { %v2293_v60 = vpop.f32.mrf.mxu2  ;;  %6091 = vmatpush.bf16.msra.mxu1 %v12186_v53 }
 0x2eb   : > { %14888 = vst [vmem:[#allocation49_spill] sm:$0xff] %v13487_v18  ;;  %4059 = vmatmul.bf16.gmra.mxu3 %v10255_v63  ;;  %v2294_v37 = vadd.f32 %v2293_v60, %v14889_v43  ;;  %v10263_v63 = vor.u32 %v11941_v7, %v10262_v27  ;;  %v11944_v27 = vld [vmem:[#allocation2 + $0xf8] sm:$0xf0]  ;;  %v10282_v7 = vld [vmem:[#allocation2 + $0xf8] sm:$0xf] }
 0x2ee   : > { %v2950_v56 = vpop.f32.mrf.mxu3  ;;  %v3081_v15 = vpop.f32.mrf.mxu0 }
 0x2ef   : > { %v2951_v8 = vadd.f32 %v2950_v56, %v2294_v37  ;;  %v13490_v57 = vpop.f32.mrf.mxu1  ;;  %v14894_v37 = vld [vmem:[#allocation52_spill] sm:$0xff] }
 0x2f0   : > { %14890 = vst [vmem:[#allocation50_spill] sm:$0xff] %v13490_v57 }
 0x2f1   : > { %v3080_v4 = vadd.f32 %v3079_v58, %v2951_v8  ;;  %v10267_v8 = vor.u32 %v11940_v59, %v10264_v14  ;;  %v11943_v59 = vld [vmem:[#allocation2 + $0xf4] sm:$0xf]  ;;  %v10276_v14 = vld [vmem:[#allocation2 + $0xfc] sm:$0xf0] }
 0x2f2   : > { %v2295_v20 = vpop.f32.mrf.mxu2 }
 0x2f3   : > { %v13492_v23 = vadd.f32 %v3208_v61, %v3080_v4  ;;  %v2296_v0 = vadd.f32 %v2295_v20, %v14892_v36  ;;  %v10274_v36 = vld [vmem:[#allocation2 + $0xf0] sm:$0xf] }
 0x2f5   : > { %14891 = vst [vmem:[#allocation73_spill] sm:$0xff] %v13492_v23 }
 0x2f6   : > { %v2952_v50 = vpop.f32.mrf.mxu3  ;;  %v3084_v60 = vpop.f32.mrf.mxu0 }
 0x2f7   : > { %v2953_v58 = vadd.f32 %v2952_v50, %v2296_v0  ;;  %3935 = vmatmul.bf16.gmra.mxu2 %v10263_v63  ;;  %v3213_v61 = vpop.f32.mrf.mxu1  ;;  %v10275_v63 = vor.u32 %v11944_v27, %v10274_v36  ;;  %v10286_v36 = vld [vmem:[#allocation2 + $0x108] sm:$0xf]  ;;  %v11947_v27 = vld [vmem:[#allocation2 + $0x110] sm:$0xf0] }
 0x2f9   : > { %4193 = vmatmul.bf16.gmra.mxu0 %v10271_v33  ;;  %v13495_v43 = vadd.f32 %v3081_v15, %v2953_v58  ;;  %v14896_v15 = vld [vmem:[#allocation53_spill] sm:$0xff]  ;;  %v10283_v33 = vor.u32 %v11945_v39, %v10282_v7  ;;  %v10279_v58 = vor.u32 %v11943_v59, %v10276_v14  ;;  %v10294_v7 = vld [vmem:[#allocation2 + $0x110] sm:$0xf]  ;;  %v11948_v39 = vld [vmem:[#allocation2 + $0x118] sm:$0xf0] }
 0x2fa   : > { %v2298_v4 = vpop.f32.mrf.mxu2  ;;  %v11946_v14 = vld [vmem:[#allocation2 + $0x10c] sm:$0xf] }
 0x2fb   : > { %14893 = vst [vmem:[#allocation51_spill] sm:$0xff] %v13495_v43  ;;  %4064 = vmatmul.bf16.gmra.mxu3 %v10267_v8  ;;  %v2299_v56 = vadd.f32 %v2298_v4, %v14894_v37 }
 0x2fe   : > { %v2955_v57 = vpop.f32.mrf.mxu3  ;;  %v3086_v23 = vpop.f32.mrf.mxu0 }
 0x2ff   : > { %v2956_v18 = vadd.f32 %v2955_v57, %v2299_v56  ;;  %v13501_v4 = vpop.f32.mrf.mxu1 }
 0x300   : > { %14897 = vst [vmem:[#allocation53_spill] sm:$0xff] %v13501_v4 }
 0x301   : > { %v3085_v20 = vadd.f32 %v3084_v60, %v2956_v18 }
 0x302   : > { %v2300_v53 = vpop.f32.mrf.mxu2 }
 0x303   : > { %v13498_v21 = vadd.f32 %v3213_v61, %v3085_v20  ;;  %v2301_v0 = vadd.f32 %v2300_v53, %v14896_v15  ;;  %v14899_v61 = vld [vmem:[#allocation54_spill] sm:$0xff] }
 0x305   : > { %14895 = vst [vmem:[#allocation52_spill] sm:$0xff] %v13498_v21 }
 0x306   : > { %v2957_v50 = vpop.f32.mrf.mxu3  ;;  %v3089_v8 = vpop.f32.mrf.mxu0 }
 0x307   : > { %v2958_v57 = vadd.f32 %v2957_v50, %v2301_v0  ;;  %3940 = vmatmul.bf16.gmra.mxu2 %v10275_v63  ;;  %v3218_v53 = vpop.f32.mrf.mxu1  ;;  %v10288_v0 = vld [vmem:[#allocation2 + $0x114] sm:$0xf0] }
 0x309   : > { %4198 = vmatmul.bf16.gmra.mxu0 %v10283_v33  ;;  %v13503_v18 = vadd.f32 %v3086_v23, %v2958_v57  ;;  %v14901_v23 = vld [vmem:[#allocation55_spill] sm:$0xff]  ;;  %v10295_v57 = vor.u32 %v11948_v39, %v10294_v7  ;;  %v11950_v39 = vld [vmem:[#allocation2 + $0x128] sm:$0xf0] }
 0x30a   : > { %v2303_v60 = vpop.f32.mrf.mxu2 }
 0x30b   : > { %14898 = vst [vmem:[#allocation74_spill] sm:$0xff] %v13503_v18  ;;  %4069 = vmatmul.bf16.gmra.mxu3 %v10279_v58  ;;  %v2304_v37 = vadd.f32 %v2303_v60, %v14899_v61  ;;  %v10287_v58 = vor.u32 %v11947_v27, %v10286_v36  ;;  %v10291_v61 = vor.u32 %v11946_v14, %v10288_v0  ;;  %v10298_v36 = vld [vmem:[#allocation2 + $0x120] sm:$0xf]  ;;  %v10306_v14 = vld [vmem:[#allocation2 + $0x128] sm:$0xf] }
 0x30c   : > { %v14903_v27 = vld [vmem:[#allocation56_spill] sm:$0xff]  ;;  %v11951_v0 = vld [vmem:[#allocation2 + $0x130] sm:$0xf0] }
 0x30e   : > { %v2960_v56 = vpop.f32.mrf.mxu3  ;;  %v3091_v20 = vpop.f32.mrf.mxu0 }
 0x30f   : > { %v2961_v21 = vadd.f32 %v2960_v56, %v2304_v37 }
 0x311   : > { %v3090_v15 = vadd.f32 %v3089_v8, %v2961_v21 }
 0x312   : > { %v2305_v50 = vpop.f32.mrf.mxu2 }
 0x313   : > { %v13506_v59 = vadd.f32 %v3218_v53, %v3090_v15  ;;  %v2306_v63 = vadd.f32 %v2305_v50, %v14901_v23  ;;  %v13514_v50 = vld [vmem:[%s14764_s2] ss:$0 sm:$0xff]  ;;  %v11949_v23 = vld [vmem:[#allocation2 + $0x124] sm:$0xf] }
 0x315   : > { %14900 = vst [vmem:[#allocation54_spill] sm:$0xff] %v13506_v59 }
 0x316   : > { %v2962_v33 = vpop.f32.mrf.mxu3  ;;  %v4164_v60 = vpop.f32.mrf.mxu0 }
 0x317   : > { %v2963_v4 = vadd.f32 %v2962_v33, %v2306_v63  ;;  %3945 = vmatmul.bf16.gmra.mxu2 %v10287_v58  ;;  %v10299_v58 = vor.u32 %v11950_v39, %v10298_v36 }
 0x319   : > { %4203 = vmatmul.bf16.gmra.mxu0 %v10295_v57  ;;  %v13509_v21 = vadd.f32 %v3091_v20, %v2963_v4  ;;  %v10300_v4 = vld [vmem:[#allocation2 + $0x12c] sm:$0xf0]  ;;  %v10307_v57 = vor.u32 %v11951_v0, %v10306_v14 }
 0x31a   : > { %v3906_v8 = vpop.f32.mrf.mxu2 }
 0x31b   : > { %14902 = vst [vmem:[#allocation55_spill] sm:$0xff] %v13509_v21  ;;  %4074 = vmatmul.bf16.gmra.mxu3 %v10291_v61 }
 0x31e   : > { %v4035_v37 = vpop.f32.mrf.mxu3  ;;  %v4166_v53 = vpop.f32.mrf.mxu0 }
 0x31f   : > { %v4036_v56 = vadd.f32 %v4035_v37, %v3906_v8  ;;  %v10303_v37 = vor.u32 %v11949_v23, %v10300_v4 }
 0x321   : > { %v4165_v15 = vadd.f32 %v4164_v60, %v4036_v56  ;;  %v4912_v56 = vld [vmem:[#allocation2 + $0x28] sm:$0xf] }
 0x322   : > { %v3908_v63 = vpop.f32.mrf.mxu2 }
 0x323   : > { %v4284_v7 = vadd.f32 %v4165_v15, %v14903_v27  ;;  %v12209_v15 = vld [vmem:[#allocation8 + $0x178] sm:$0xff] }
 0x324   : > { %6342 = vmatpush.bf16.msrb.mxu3 %v12209_v15 }
 0x325   : > { %v4336_v20 = vadd.f32 %v13514_v50, %v4284_v7 }
 0x326   : > { %v4037_v33 = vpop.f32.mrf.mxu3  ;;  %v4169_v8 = vpop.f32.mrf.mxu0 }
 0x327   : > { %v4384_v60 = vmax.f32 %v4336_v20, 0.0  ;;  %v4038_v61 = vadd.f32 %v4037_v33, %v3908_v63  ;;  %3950 = vmatmul.bf16.gmra.mxu2 %v10299_v58 }
 0x329   : > { %v4432_v21 = vpack.c.bf16 %v4384_v60, %v4384_v60  ;;  %v4167_v59 = vadd.f32 %v4166_v53, %v4038_v61  ;;  %4208 = vmatmul.bf16.gmra.mxu0 %v10307_v57  ;;  %v12201_v60 = vld [vmem:[#allocation8 + $0x138] sm:$0xff] }
 0x32a   : > { %v3911_v23 = vpop.f32.mrf.mxu2  ;;  %v12097_v61 = vld [vmem:[#allocation8 + $0x38] sm:$0xff]  ;;  %6213 = vmatpush.bf16.msrb.mxu2 %v12201_v60 }
 0x32b   : > { %v4481_v27 = vshrl.u32 %v4432_v21, 16  ;;  %v4484_v18 = vshll.u32 %v4432_v21, 16  ;;  %v4913_v10 = vsel %vm12761_vm8, %v4432_v21, %v4912_v56  ;;  %v4285_v7 = vadd.f32 %v4167_v59, %v13333_v16  ;;  %4079 = vmatmul.bf16.gmra.mxu3 %v10303_v37  ;;  %v10310_v16 = vld [vmem:[#allocation2 + $0x138] sm:$0xf]  ;;  %v11953_v59 = vld [vmem:[#allocation2 + $0x140] sm:$0xf0]  ;;  %6999 = vmatpush.bf16.msrb.mxu0 %v12097_v61 }
 0x32c   : > { %4914 = vst [vmem:[#allocation2 + $0x28] sm:$0xf] %v4913_v10  ;;  %v10318_v10 = vld [vmem:[#allocation2 + $0x140] sm:$0xf] }
 0x32d   : > { %v4483_v36 = vrot.slane %v4481_v27, 7  ;;  %v5027_v39 = vrot.slane %v4481_v27, 4  ;;  %v5028_v14 = vrot.slane %v4484_v18, 5  ;;  %v4337_v0 = vadd.f32 %v13514_v50, %v4285_v7  ;;  %v12105_v37 = vld [vmem:[#allocation8 + $0x78] sm:$0xff]  ;;  %v11954_v27 = vld [vmem:[#allocation2 + $0x148] sm:$0xf0] }
 0x32e   : > { %v4040_v53 = vpop.f32.mrf.mxu3  ;;  %v4171_v63 = vpop.f32.mrf.mxu0  ;;  %7128 = vmatpush.bf16.msrb.mxu1 %v12105_v37  ;;  %v10319_v40 = vor.u32 %v11954_v27, %v10318_v10  ;;  %v4916_v37 = vld [vmem:[#allocation2 + $0x40] sm:$0x1] }
 0x32f   : > { %v4486_v4 = vor.u32 %v4484_v18, %v4483_v36  ;;  %v4385_v20 = vmax.f32 %v4337_v0, 0.0  ;;  %v4041_v33 = vadd.f32 %v4040_v53, %v3911_v23  ;;  %v5029_v21 = vor.u32 %v5028_v14, %v5027_v39  ;;  %v11952_v39 = vld [vmem:[#allocation2 + $0x13c] sm:$0xf]  ;;  %v10312_v14 = vld [vmem:[#allocation2 + $0x144] sm:$0xf0] }
 0x330   : > { %v14905_v18 = vmov 0  ;;  %v4487_v13 = vrot.slane %v4483_v36, 4  ;;  %v10315_v38 = vor.u32 %v11952_v39, %v10312_v14 }
 0x331   : > { %4864 = vst [vmem:[#allocation2 + $0x24] sm:$0xe] %v4486_v4  ;;  %v4433_v58 = vpack.c.bf16 %v4385_v20, %v4385_v20  ;;  %v4170_v57 = vadd.f32 %v4169_v8, %v4041_v33  ;;  %v14906_v18 = vsel %vm13524_vm13, 4294967295, %v14905_v18  ;;  %v5030_v8 = vrot.slane %v5029_v21, 4 }
 0x332   : > { %14907 = vst [vmem:[#allocation56_spill] sm:$0xff] %v14906_v18  ;;  %v3913_v53 = vpop.f32.mrf.mxu2 }
 0x333   : > { %v4489_v56 = vshrl.u32 %v4433_v58, 16  ;;  %v4492_v15 = vshll.u32 %v4433_v58, 16  ;;  %4915 = vst [vmem:[#allocation2 + $0x34] sm:$0xf] %v4433_v58  ;;  %v4286_v7 = vadd.f32 %v4170_v57, %v13336_v26  ;;  %v10311_v58 = vor.u32 %v11953_v59, %v10310_v16 }
 0x335   : > { %v4491_v0 = vrot.slane %v4489_v56, 7  ;;  %v5031_v23 = vrot.slane %v4492_v15, 5  ;;  %v5033_v4 = vrot.slane %v4489_v56, 4  ;;  %v4338_v20 = vadd.f32 %v13514_v50, %v4286_v7 }
 0x336   : > { %v4042_v33 = vpop.f32.mrf.mxu3  ;;  %v4174_v57 = vpop.f32.mrf.mxu0 }
 0x337   : > { %v4494_v48 = vor.u32 %v4492_v15, %v4491_v0  ;;  %v5032_v26 = vsel %vm13524_vm13, %v5030_v8, %v5031_v23  ;;  %v4386_v60 = vmax.f32 %v4338_v20, 0.0  ;;  %v4043_v21 = vadd.f32 %v4042_v33, %v3913_v53  ;;  %3955 = vmatmul.bf16.gmra.mxu2 %v10311_v58  ;;  %v4919_v8 = vld [vmem:[#allocation2 + $0x4c] sm:$0xf]  ;;  %v11956_v20 = vld [vmem:[#allocation2 + $0x158] sm:$0xf0] }
 0x338   : > { %5235 = vst [vmem:[#allocation2 + $0x2c] sm:$0xf] %v5032_v26  ;;  %v5034_v56 = vor.u32 %v5033_v4, %v5031_v23  ;;  %v4496_v36 = vrot.slane %v4491_v0, 4  ;;  %v10322_v4 = vld [vmem:[#allocation2 + $0x150] sm:$0xf] }
 0x339   : > { %v4495_v46 = vsel %vm12777_vm9, %v4487_v13, %v4494_v48  ;;  %v4434_v7 = vpack.c.bf16 %v4386_v60, %v4386_v60  ;;  %v4172_v51 = vadd.f32 %v4171_v63, %v4043_v21  ;;  %4213 = vmatmul.bf16.gmra.mxu0 %v10319_v40  ;;  %v10330_v58 = vld [vmem:[#allocation2 + $0x158] sm:$0xf]  ;;  %v11957_v26 = vld [vmem:[#allocation2 + $0x160] sm:$0xf0] }
 0x33a   : > { %4865 = vst [vmem:[#allocation2 + $0x30] sm:$0xf] %v4495_v46  ;;  %v3916_v15 = vpop.f32.mrf.mxu2  ;;  %v5035_v27 = vrot.slane %v5034_v56, 4  ;;  %v11955_v56 = vld [vmem:[#allocation2 + $0x154] sm:$0xf] }
 0x33b   : > { %4084 = vmatmul.bf16.gmra.mxu3 %v10315_v38  ;;  %v4498_v16 = vshll.u32 %v4434_v7, 16  ;;  %v4917_v59 = vsel %vm12815_vm10, %v4434_v7, %v4916_v37  ;;  %v4287_v10 = vadd.f32 %v4172_v51, %v13339_v35  ;;  %v10574_v51 = vld [vmem:[#allocation2 + $0x24] sm:$0xf]  ;;  %v10324_v7 = vld [vmem:[#allocation2 + $0x15c] sm:$0xf0] }
 0x33c   : > { %4918 = vst [vmem:[#allocation2 + $0x40] sm:$0x1] %v4917_v59 }
 0x33d   : > { %v4500_v48 = vsel %vm12777_vm9, %v4496_v36, %v4498_v16  ;;  %v5036_v46 = vrot.slane %v4498_v16, 5  ;;  %v4339_v13 = vadd.f32 %v13514_v50, %v4287_v10  ;;  %v10323_v16 = vor.u32 %v11956_v20, %v10322_v4 }
 0x33e   : > { %v4045_v63 = vpop.f32.mrf.mxu3  ;;  %4866 = vst [vmem:[#allocation2 + $0x3c] sm:$0x1] %v4500_v48  ;;  %v4176_v38 = vpop.f32.mrf.mxu0 }
 0x33f   : > { %v4046_v40 = vadd.f32 %v4045_v63, %v3916_v15  ;;  %v5037_v39 = vsel %vm13524_vm13, %v5035_v27, %v5036_v46  ;;  %v4387_v14 = vmax.f32 %v4339_v13, 0.0  ;;  %v10327_v63 = vor.u32 %v11955_v56, %v10324_v7 }
 0x340   : > { %5236 = vst [vmem:[#allocation2 + $0x38] sm:$0xf] %v5037_v39 }
 0x341   : > { %v4175_v35 = vadd.f32 %v4174_v57, %v4046_v40  ;;  %v12115_v0 = vld [vmem:[#allocation2 + $0x2c] sm:$0xf0]  ;;  %v4435_v23 = vpack.c.bf16 %v4387_v14, %v4387_v14 }
 0x342   : > { %v10575_v53 = vor.u32 %v12115_v0, %v10574_v51  ;;  %v3918_v36 = vpop.f32.mrf.mxu2 }
 0x343   : > { %v4288_v33 = vadd.f32 %v4175_v35, %v13344_v12  ;;  %v4502_v60 = vshrl.u32 %v4435_v23, 16  ;;  %v4505_v21 = vshll.u32 %v4435_v23, 16  ;;  %v4920_v37 = vsel %vm12761_vm8, %v4435_v23, %v4919_v8 }
 0x344   : > { %6092 = vmatmul.bf16.vlgmr.msra.gmra.mxu1 %v10575_v53  ;;  %4921 = vst [vmem:[#allocation2 + $0x4c] sm:$0xf] %v4920_v37  ;;  %v10331_v12 = vor.u32 %v11957_v26, %v10330_v58  ;;  %v4923_v37 = vld [vmem:[#allocation2 + $0x64] sm:$0x1] }
 0x345   : > { %v4340_v57 = vadd.f32 %v13514_v50, %v4288_v33  ;;  %v4504_v59 = vrot.slane %v4502_v60, 7  ;;  %v5038_v10 = vrot.slane %v4502_v60, 4  ;;  %v5039_v15 = vrot.slane %v4505_v21, 5 }
 0x346   : > { %v4047_v27 = vpop.f32.mrf.mxu3  ;;  %v4179_v13 = vpop.f32.mrf.mxu0 }
 0x347   : > { %v4388_v48 = vmax.f32 %v4340_v57, 0.0  ;;  %v4048_v46 = vadd.f32 %v4047_v27, %v3918_v36  ;;  %v4507_v40 = vor.u32 %v4505_v21, %v4504_v59  ;;  %v5040_v39 = vor.u32 %v5039_v15, %v5038_v10  ;;  %3960 = vmatmul.bf16.gmra.mxu2 %v10323_v16  ;;  %v10586_v16 = vld [vmem:[#allocation2 + $0x3c] sm:$0xf]  ;;  %v11959_v15 = vld [vmem:[#allocation2 + $0x170] sm:$0xf0] }
 0x348   : > { %v4508_v60 = vrot.slane %v4504_v59, 4 }
 0x349   : > { %v4436_v14 = vpack.c.bf16 %v4388_v48, %v4388_v48  ;;  %v4177_v8 = vadd.f32 %v4176_v38, %v4048_v46  ;;  %4867 = vst [vmem:[#allocation2 + $0x48] sm:$0xe] %v4507_v40  ;;  %4218 = vmatmul.bf16.gmra.mxu0 %v10331_v12  ;;  %v5041_v23 = vrot.slane %v5040_v39, 4  ;;  %v10342_v46 = vld [vmem:[#allocation2 + $0x170] sm:$0xf] }
 0x34a   : > { %v3921_v33 = vpop.f32.mrf.mxu2 }
 0x34b   : > { %v4510_v35 = vshrl.u32 %v4436_v14, 16  ;;  %v4513_v51 = vshll.u32 %v4436_v14, 16  ;;  %4922 = vst [vmem:[#allocation2 + $0x58] sm:$0xf] %v4436_v14  ;;  %v4289_v0 = vadd.f32 %v4177_v8, %v13347_v22  ;;  %4089 = vmatmul.bf16.gmra.mxu3 %v10327_v63  ;;  %v10334_v22 = vld [vmem:[#allocation2 + $0x168] sm:$0xf] }
 0x34c   : > { %v11960_v63 = vld [vmem:[#allocation2 + $0x178] sm:$0xf0] }
 0x34d   : > { %v4512_v53 = vrot.slane %v4510_v35, 7  ;;  %v5042_v4 = vrot.slane %v4513_v51, 5  ;;  %v4341_v20 = vadd.f32 %v13514_v50, %v4289_v0  ;;  %v5044_v58 = vrot.slane %v4510_v35, 4  ;;  %v11958_v35 = vld [vmem:[#allocation2 + $0x16c] sm:$0xf] }
 0x34e   : > { %v4050_v26 = vpop.f32.mrf.mxu3  ;;  %v4181_v56 = vpop.f32.mrf.mxu0 }
 0x34f   : > { %v4515_v21 = vor.u32 %v4513_v51, %v4512_v53  ;;  %v5043_v38 = vsel %vm13524_vm13, %v5041_v23, %v5042_v4  ;;  %v4389_v7 = vmax.f32 %v4341_v20, 0.0  ;;  %v4051_v57 = vadd.f32 %v4050_v26, %v3921_v33  ;;  %v10336_v51 = vld [vmem:[#allocation2 + $0x174] sm:$0xf0] }
 0x350   : > { %5237 = vst [vmem:[#allocation2 + $0x50] sm:$0xf] %v5043_v38  ;;  %v12118_v10 = vld [vmem:[#allocation2 + $0x44] sm:$0xf0]  ;;  %v5045_v27 = vor.u32 %v5044_v58, %v5042_v4  ;;  %v4517_v40 = vrot.slane %v4512_v53, 4  ;;  %v10335_v23 = vor.u32 %v11959_v15, %v10334_v22  ;;  %v10343_v20 = vor.u32 %v11960_v63, %v10342_v46  ;;  %v12208_v22 = vld [vmem:[#allocation8 + $0x170] sm:$0xff] }
 0x351   : > { %v4516_v36 = vsel %vm12777_vm9, %v4508_v60, %v4515_v21  ;;  %v4437_v12 = vpack.c.bf16 %v4389_v7, %v4389_v7  ;;  %v4180_v59 = vadd.f32 %v4179_v13, %v4051_v57  ;;  %v10587_v48 = vor.u32 %v12118_v10, %v10586_v16  ;;  %6343 = vmatpush.bf16.msrb.mxu3 %v12208_v22 }
 0x352   : > { %4868 = vst [vmem:[#allocation2 + $0x54] sm:$0xf] %v4516_v36  ;;  %v3923_v0 = vpop.f32.mrf.mxu2  ;;  %v5046_v4 = vrot.slane %v5045_v27, 4  ;;  %v10339_v21 = vor.u32 %v11958_v35, %v10336_v51 }
 0x353   : > { %v4519_v39 = vshll.u32 %v4437_v12, 16  ;;  %v4924_v14 = vsel %vm12815_vm10, %v4437_v12, %v4923_v37  ;;  %v4290_v8 = vadd.f32 %v4180_v59, %v13352_v62  ;;  %v4926_v37 = vld [vmem:[#allocation2 + $0x70] sm:$0xf] }
 0x354   : > { %6097 = vmatmul.bf16.gmra.mxu1 %v10587_v48  ;;  %4925 = vst [vmem:[#allocation2 + $0x64] sm:$0x1] %v4924_v14 }
 0x355   : > { %v4521_v13 = vsel %vm12777_vm9, %v4517_v40, %v4519_v39  ;;  %v5047_v33 = vrot.slane %v4519_v39, 5  ;;  %v4342_v53 = vadd.f32 %v13514_v50, %v4290_v8 }
 0x356   : > { %v4052_v58 = vpop.f32.mrf.mxu3  ;;  %4869 = vst [vmem:[#allocation2 + $0x60] sm:$0x1] %v4521_v13  ;;  %v4184_v60 = vpop.f32.mrf.mxu0 }
 0x357   : > { %v4053_v26 = vadd.f32 %v4052_v58, %v3923_v0  ;;  %v5048_v62 = vsel %vm13524_vm13, %v5046_v4, %v5047_v33  ;;  %v4390_v38 = vmax.f32 %v4342_v53, 0.0  ;;  %3965 = vmatmul.bf16.gmra.mxu2 %v10335_v23  ;;  %v10346_v23 = vld [vmem:[#allocation2 + $0x180] sm:$0xf]  ;;  %v10354_v4 = vld [vmem:[#allocation2 + $0x188] sm:$0xf]  ;;  %v12200_v33 = vld [vmem:[#allocation8 + $0x130] sm:$0xff] }
 0x358   : > { %5238 = vst [vmem:[#allocation2 + $0x5c] sm:$0xf] %v5048_v62  ;;  %v12096_v53 = vld [vmem:[#allocation8 + $0x30] sm:$0xff]  ;;  %6214 = vmatpush.bf16.msrb.mxu2 %v12200_v33 }
 0x359   : > { %v4182_v7 = vadd.f32 %v4181_v56, %v4053_v26  ;;  %v4438_v57 = vpack.c.bf16 %v4390_v38, %v4390_v38  ;;  %4223 = vmatmul.bf16.gmra.mxu0 %v10343_v20  ;;  %v10598_v0 = vld [vmem:[#allocation2 + $0x54] sm:$0xf]  ;;  %v11962_v20 = vld [vmem:[#allocation2 + $0x188] sm:$0xf0]  ;;  %v12104_v58 = vld [vmem:[#allocation8 + $0x70] sm:$0xff] }
 0x35a   : > { %v3926_v12 = vpop.f32.mrf.mxu2  ;;  %v11963_v38 = vld [vmem:[#allocation2 + $0x190] sm:$0xf0]  ;;  %7000 = vmatpush.bf16.msrb.mxu0 %v12096_v53  ;;  %7129 = vmatpush.bf16.msrb.mxu1 %v12104_v58 }
 0x35b   : > { %v4291_v36 = vadd.f32 %v4182_v7, %v13355_v28  ;;  %4094 = vmatmul.bf16.gmra.mxu3 %v10339_v21  ;;  %v4523_v16 = vshrl.u32 %v4438_v57, 16  ;;  %v4526_v10 = vshll.u32 %v4438_v57, 16  ;;  %v4927_v15 = vsel %vm12761_vm8, %v4438_v57, %v4926_v37  ;;  %v11961_v37 = vld [vmem:[#allocation2 + $0x184] sm:$0xf]  ;;  %v10348_v7 = vld [vmem:[#allocation2 + $0x18c] sm:$0xf0] }
 0x35c   : > { %4928 = vst [vmem:[#allocation2 + $0x70] sm:$0xf] %v4927_v15 }
 0x35d   : > { %v4343_v27 = vadd.f32 %v13514_v50, %v4291_v36  ;;  %v4525_v59 = vrot.slane %v4523_v16, 7  ;;  %v5049_v48 = vrot.slane %v4523_v16, 4  ;;  %v5050_v56 = vrot.slane %v4526_v10, 5  ;;  %v12121_v14 = vld [vmem:[#allocation2 + $0x5c] sm:$0xf0] }
 0x35e   : > { %v4055_v46 = vpop.f32.mrf.mxu3  ;;  %v4186_v39 = vpop.f32.mrf.mxu0  ;;  %v10599_v13 = vor.u32 %v12121_v14, %v10598_v0 }
 0x35f   : > { %v4391_v63 = vmax.f32 %v4343_v27, 0.0  ;;  %v4056_v40 = vadd.f32 %v4055_v46, %v3926_v12  ;;  %v4528_v28 = vor.u32 %v4526_v10, %v4525_v59  ;;  %v5051_v8 = vor.u32 %v5050_v56, %v5049_v48 }
 0x360   : > { %v10347_v27 = vor.u32 %v11962_v20, %v10346_v23  ;;  %v10355_v12 = vor.u32 %v11963_v38, %v10354_v4  ;;  %v4529_v48 = vrot.slane %v4525_v59, 4 }
 0x361   : > { %v4439_v35 = vpack.c.bf16 %v4391_v63, %v4391_v63  ;;  %v4185_v51 = vadd.f32 %v4184_v60, %v4056_v40  ;;  %4870 = vst [vmem:[#allocation2 + $0x6c] sm:$0xe] %v4528_v28  ;;  %v5052_v60 = vrot.slane %v5051_v8, 4  ;;  %v10351_v63 = vor.u32 %v11961_v37, %v10348_v7  ;;  %v4930_v8 = vld [vmem:[#allocation2 + $0x88] sm:$0x1] }
 0x362   : > { %v3928_v16 = vpop.f32.mrf.mxu2  ;;  %v4933_v7 = vld [vmem:[#allocation2 + $0x94] sm:$0xf] }
 0x363   : > { %v4531_v26 = vshrl.u32 %v4439_v35, 16  ;;  %v4534_v21 = vshll.u32 %v4439_v35, 16  ;;  %4929 = vst [vmem:[#allocation2 + $0x7c] sm:$0xf] %v4439_v35  ;;  %v4292_v62 = vadd.f32 %v4185_v51, %v13358_v19 }
 0x364   : > { %6102 = vmatmul.bf16.gmra.mxu1 %v10599_v13 }
 0x365   : > { %v4533_v57 = vrot.slane %v4531_v26, 7  ;;  %v5053_v22 = vrot.slane %v4534_v21, 5  ;;  %v4344_v36 = vadd.f32 %v13514_v50, %v4292_v62  ;;  %v5055_v10 = vrot.slane %v4531_v26, 4 }
 0x366   : > { %v4057_v15 = vpop.f32.mrf.mxu3  ;;  %v4189_v46 = vpop.f32.mrf.mxu0 }
 0x367   : > { %v4536_v56 = vor.u32 %v4534_v21, %v4533_v57  ;;  %v5054_v19 = vsel %vm13524_vm13, %v5052_v60, %v5053_v22  ;;  %v4392_v40 = vmax.f32 %v4344_v36, 0.0  ;;  %v4058_v14 = vadd.f32 %v4057_v15, %v3928_v16  ;;  %3970 = vmatmul.bf16.gmra.mxu2 %v10347_v27  ;;  %v10358_v16 = vld [vmem:[#allocation2 + $0x198] sm:$0xf]  ;;  %v10366_v27 = vld [vmem:[#allocation2 + $0x1a0] sm:$0xf] }
 0x368   : > { %5239 = vst [vmem:[#allocation2 + $0x74] sm:$0xf] %v5054_v19  ;;  %v5056_v35 = vor.u32 %v5055_v10, %v5053_v22  ;;  %v4538_v59 = vrot.slane %v4533_v57, 4  ;;  %v10610_v60 = vld [vmem:[#allocation2 + $0x6c] sm:$0xf] }
 0x369   : > { %v4537_v28 = vsel %vm12777_vm9, %v4529_v48, %v4536_v56  ;;  %v4440_v51 = vpack.c.bf16 %v4392_v40, %v4392_v40  ;;  %v4187_v0 = vadd.f32 %v4186_v39, %v4058_v14  ;;  %4228 = vmatmul.bf16.gmra.mxu0 %v10355_v12  ;;  %v11965_v10 = vld [vmem:[#allocation2 + $0x1a0] sm:$0xf0]  ;;  %v11966_v12 = vld [vmem:[#allocation2 + $0x1a8] sm:$0xf0]  ;;  %v10360_v40 = vld [vmem:[#allocation2 + $0x1a4] sm:$0xf0] }
 0x36a   : > { %4871 = vst [vmem:[#allocation2 + $0x78] sm:$0xf] %v4537_v28  ;;  %v3931_v13 = vpop.f32.mrf.mxu2  ;;  %v5057_v33 = vrot.slane %v5056_v35, 4  ;;  %v10359_v28 = vor.u32 %v11965_v10, %v10358_v16  ;;  %v4937_v10 = vld [vmem:[#allocation2 + $0xac] sm:$0x1] }
 0x36b   : > { %4099 = vmatmul.bf16.gmra.mxu3 %v10351_v63  ;;  %v4540_v23 = vshll.u32 %v4440_v51, 16  ;;  %v4931_v20 = vsel %vm12815_vm10, %v4440_v51, %v4930_v8  ;;  %v4293_v4 = vadd.f32 %v4187_v0, %v13361_v42  ;;  %v11964_v63 = vld [vmem:[#allocation2 + $0x19c] sm:$0xf] }
 0x36c   : > { %4932 = vst [vmem:[#allocation2 + $0x88] sm:$0x1] %v4931_v20 }
 0x36d   : > { %v4542_v53 = vsel %vm12777_vm9, %v4538_v59, %v4540_v23  ;;  %v5058_v58 = vrot.slane %v4540_v23, 5  ;;  %v4345_v26 = vadd.f32 %v13514_v50, %v4293_v4  ;;  %v10363_v4 = vor.u32 %v11964_v63, %v10360_v40  ;;  %v11968_v63 = vld [vmem:[#allocation2 + $0x1b8] sm:$0xf0] }
 0x36e   : > { %v4060_v39 = vpop.f32.mrf.mxu3  ;;  %4872 = vst [vmem:[#allocation2 + $0x84] sm:$0x1] %v4542_v53  ;;  %v4191_v62 = vpop.f32.mrf.mxu0 }
 0x36f   : > { %v4061_v21 = vadd.f32 %v4060_v39, %v3931_v13  ;;  %v5059_v38 = vsel %vm13524_vm13, %v5057_v33, %v5058_v58  ;;  %v4393_v37 = vmax.f32 %v4345_v26, 0.0 }
 0x370   : > { %5240 = vst [vmem:[#allocation2 + $0x80] sm:$0xf] %v5059_v38 }
 0x371   : > { %v4190_v42 = vadd.f32 %v4189_v46, %v4061_v21  ;;  %v12124_v57 = vld [vmem:[#allocation2 + $0x74] sm:$0xf0]  ;;  %v4441_v22 = vpack.c.bf16 %v4393_v37, %v4393_v37 }
 0x372   : > { %v10611_v36 = vor.u32 %v12124_v57, %v10610_v60  ;;  %v3933_v14 = vpop.f32.mrf.mxu2 }
 0x373   : > { %v4294_v15 = vadd.f32 %v4190_v42, %v13366_v25  ;;  %v4544_v48 = vshrl.u32 %v4441_v22, 16  ;;  %v4547_v56 = vshll.u32 %v4441_v22, 16  ;;  %v4934_v19 = vsel %vm12761_vm8, %v4441_v22, %v4933_v7 }
 0x374   : > { %6107 = vmatmul.bf16.gmra.mxu1 %v10611_v36  ;;  %4935 = vst [vmem:[#allocation2 + $0x94] sm:$0xf] %v4934_v19  ;;  %v10367_v25 = vor.u32 %v11966_v12, %v10366_v27 }
 0x375   : > { %v4346_v46 = vadd.f32 %v13514_v50, %v4294_v15  ;;  %v4546_v8 = vrot.slane %v4544_v48, 7  ;;  %v5060_v35 = vrot.slane %v4544_v48, 4  ;;  %v5061_v51 = vrot.slane %v4547_v56, 5 }
 0x376   : > { %v4062_v0 = vpop.f32.mrf.mxu3  ;;  %v4194_v20 = vpop.f32.mrf.mxu0 }
 0x377   : > { %v4394_v59 = vmax.f32 %v4346_v46, 0.0  ;;  %v4063_v23 = vadd.f32 %v4062_v0, %v3933_v14  ;;  %v4549_v13 = vor.u32 %v4547_v56, %v4546_v8  ;;  %v5062_v33 = vor.u32 %v5061_v51, %v5060_v35  ;;  %3975 = vmatmul.bf16.gmra.mxu2 %v10359_v28  ;;  %v10622_v56 = vld [vmem:[#allocation2 + $0x84] sm:$0xf] }
 0x378   : > { %v4550_v36 = vrot.slane %v4546_v8, 4  ;;  %v10378_v8 = vld [vmem:[#allocation2 + $0x1b8] sm:$0xf]  ;;  %v11969_v35 = vld [vmem:[#allocation2 + $0x1c0] sm:$0xf0] }
 0x379   : > { %v4442_v53 = vpack.c.bf16 %v4394_v59, %v4394_v59  ;;  %v4192_v58 = vadd.f32 %v4191_v62, %v4063_v23  ;;  %4873 = vst [vmem:[#allocation2 + $0x90] sm:$0xe] %v4549_v13  ;;  %4233 = vmatmul.bf16.gmra.mxu0 %v10367_v25  ;;  %v5063_v38 = vrot.slane %v5062_v33, 4  ;;  %v11967_v23 = vld [vmem:[#allocation2 + $0x1b4] sm:$0xf] }
 0x37a   : > { %v3936_v60 = vpop.f32.mrf.mxu2 }
 0x37b   : > { %v4552_v26 = vshrl.u32 %v4442_v53, 16  ;;  %v4555_v39 = vshll.u32 %v4442_v53, 16  ;;  %4936 = vst [vmem:[#allocation2 + $0xa0] sm:$0xf] %v4442_v53  ;;  %v4295_v21 = vadd.f32 %v4192_v58, %v13369_v5  ;;  %4104 = vmatmul.bf16.gmra.mxu3 %v10363_v4  ;;  %v10370_v5 = vld [vmem:[#allocation2 + $0x1b0] sm:$0xf]  ;;  %v10379_v53 = vor.u32 %v11969_v35, %v10378_v8 }
 0x37c   : > { %v10372_v4 = vld [vmem:[#allocation2 + $0x1bc] sm:$0xf0]  ;;  %v10371_v33 = vor.u32 %v11968_v63, %v10370_v5 }
 0x37d   : > { %v4554_v37 = vrot.slane %v4552_v26, 7  ;;  %v5064_v7 = vrot.slane %v4555_v39, 5  ;;  %v4347_v42 = vadd.f32 %v13514_v50, %v4295_v21  ;;  %v5066_v57 = vrot.slane %v4552_v26, 4 }
 0x37e   : > { %v4065_v22 = vpop.f32.mrf.mxu3  ;;  %v4196_v15 = vpop.f32.mrf.mxu0 }
 0x37f   : > { %v4557_v16 = vor.u32 %v4555_v39, %v4554_v37  ;;  %v5065_v62 = vsel %vm13524_vm13, %v5063_v38, %v5064_v7  ;;  %v4395_v27 = vmax.f32 %v4347_v42, 0.0  ;;  %v4066_v12 = vadd.f32 %v4065_v22, %v3936_v60  ;;  %v4940_v60 = vld [vmem:[#allocation2 + $0xb8] sm:$0xf] }
 0x380   : > { %5241 = vst [vmem:[#allocation2 + $0x98] sm:$0xf] %v5065_v62  ;;  %v12127_v19 = vld [vmem:[#allocation2 + $0x8c] sm:$0xf0]  ;;  %v5067_v40 = vor.u32 %v5066_v57, %v5064_v7  ;;  %v4559_v51 = vrot.slane %v4554_v37, 4  ;;  %v10375_v7 = vor.u32 %v11967_v23, %v10372_v4 }
 0x381   : > { %v4558_v48 = vsel %vm12777_vm9, %v4550_v36, %v4557_v16  ;;  %v4443_v46 = vpack.c.bf16 %v4395_v27, %v4395_v27  ;;  %v4195_v14 = vadd.f32 %v4194_v20, %v4066_v12  ;;  %v10623_v28 = vor.u32 %v12127_v19, %v10622_v56  ;;  %v12207_v36 = vld [vmem:[#allocation8 + $0x168] sm:$0xff] }
 0x382   : > { %4874 = vst [vmem:[#allocation2 + $0x9c] sm:$0xf] %v4558_v48  ;;  %v3938_v13 = vpop.f32.mrf.mxu2  ;;  %v5068_v58 = vrot.slane %v5067_v40, 4  ;;  %6344 = vmatpush.bf16.msrb.mxu3 %v12207_v36  ;;  %v12199_v4 = vld [vmem:[#allocation8 + $0x128] sm:$0xff] }
 0x383   : > { %v4561_v0 = vshll.u32 %v4443_v46, 16  ;;  %v4938_v25 = vsel %vm12815_vm10, %v4443_v46, %v4937_v10  ;;  %v4296_v59 = vadd.f32 %v4195_v14, %v13374_v32  ;;  %6215 = vmatpush.bf16.msrb.mxu2 %v12199_v4 }
 0x384   : > { %6112 = vmatmul.bf16.gmra.mxu1 %v10623_v28  ;;  %4939 = vst [vmem:[#allocation2 + $0xac] sm:$0x1] %v4938_v25  ;;  %v11971_v25 = vld [vmem:[#allocation2 + $0x1d0] sm:$0xf0] }
 0x385   : > { %v4563_v20 = vsel %vm12777_vm9, %v4559_v51, %v4561_v0  ;;  %v5069_v26 = vrot.slane %v4561_v0, 5  ;;  %v4348_v39 = vadd.f32 %v13514_v50, %v4296_v59  ;;  %v10382_v0 = vld [vmem:[#allocation2 + $0x1c8] sm:$0xf]  ;;  %v10390_v59 = vld [vmem:[#allocation2 + $0x1d0] sm:$0xf] }
 0x386   : > { %v4067_v21 = vpop.f32.mrf.mxu3  ;;  %4875 = vst [vmem:[#allocation2 + $0xa8] sm:$0x1] %v4563_v20  ;;  %v4199_v37 = vpop.f32.mrf.mxu0 }
 0x387   : > { %v4068_v38 = vadd.f32 %v4067_v21, %v3938_v13  ;;  %v5070_v32 = vsel %vm13524_vm13, %v5068_v58, %v5069_v26  ;;  %v4396_v42 = vmax.f32 %v4348_v39, 0.0  ;;  %3980 = vmatmul.bf16.gmra.mxu2 %v10371_v33  ;;  %v12095_v13 = vld [vmem:[#allocation8 + $0x28] sm:$0xff]  ;;  %v11972_v26 = vld [vmem:[#allocation2 + $0x1d8] sm:$0xf0]  ;;  %v11970_v39 = vld [vmem:[#allocation2 + $0x1cc] sm:$0xf] }
 0x388   : > { %5242 = vst [vmem:[#allocation2 + $0xa4] sm:$0xf] %v5070_v32  ;;  %v12103_v33 = vld [vmem:[#allocation8 + $0x68] sm:$0xff]  ;;  %v10384_v21 = vld [vmem:[#allocation2 + $0x1d4] sm:$0xf0]  ;;  %7001 = vmatpush.bf16.msrb.mxu0 %v12095_v13  ;;  %v10391_v36 = vor.u32 %v11972_v26, %v10390_v59 }
 0x389   : > { %v4197_v57 = vadd.f32 %v4196_v15, %v4068_v38  ;;  %v4444_v22 = vpack.c.bf16 %v4396_v42, %v4396_v42  ;;  %4238 = vmatmul.bf16.gmra.mxu0 %v10379_v53  ;;  %v10634_v51 = vld [vmem:[#allocation2 + $0x9c] sm:$0xf]  ;;  %7130 = vmatpush.bf16.msrb.mxu1 %v12103_v33 }
 0x38a   : > { %v3941_v5 = vpop.f32.mrf.mxu2  ;;  %v4947_v33 = vld [vmem:[#allocation2 + $0xdc] sm:$0xf] }
 0x38b   : > { %v4297_v16 = vadd.f32 %v4197_v57, %v13377_v34  ;;  %4109 = vmatmul.bf16.gmra.mxu3 %v10375_v7  ;;  %v4565_v62 = vshrl.u32 %v4444_v22, 16  ;;  %v4568_v10 = vshll.u32 %v4444_v22, 16  ;;  %v4941_v27 = vsel %vm12761_vm8, %v4444_v22, %v4940_v60 }
 0x38c   : > { %4942 = vst [vmem:[#allocation2 + $0xb8] sm:$0xf] %v4941_v27  ;;  %v10383_v22 = vor.u32 %v11971_v25, %v10382_v0  ;;  %v10387_v27 = vor.u32 %v11970_v39, %v10384_v21  ;;  %v10394_v39 = vld [vmem:[#allocation2 + $0x1e0] sm:$0xf]  ;;  %v11974_v21 = vld [vmem:[#allocation2 + $0x1e8] sm:$0xf0] }
 0x38d   : > { %v4349_v12 = vadd.f32 %v13514_v50, %v4297_v16  ;;  %v4567_v48 = vrot.slane %v4565_v62, 7  ;;  %v5071_v56 = vrot.slane %v4565_v62, 4  ;;  %v5072_v15 = vrot.slane %v4568_v10, 5  ;;  %v12130_v14 = vld [vmem:[#allocation2 + $0xa4] sm:$0xf0] }
 0x38e   : > { %v4070_v19 = vpop.f32.mrf.mxu3  ;;  %v4201_v46 = vpop.f32.mrf.mxu0  ;;  %v10635_v23 = vor.u32 %v12130_v14, %v10634_v51 }
 0x38f   : > { %v4397_v63 = vmax.f32 %v4349_v12, 0.0  ;;  %v4071_v40 = vadd.f32 %v4070_v19, %v3941_v5  ;;  %v4570_v34 = vor.u32 %v4568_v10, %v4567_v48  ;;  %v5073_v28 = vor.u32 %v5072_v15, %v5071_v56  ;;  %v4944_v15 = vld [vmem:[#allocation2 + $0xd0] sm:$0x1] }
 0x390   : > { %v4571_v16 = vrot.slane %v4567_v48, 4 }
 0x391   : > { %v4445_v8 = vpack.c.bf16 %v4397_v63, %v4397_v63  ;;  %v4200_v35 = vadd.f32 %v4199_v37, %v4071_v40  ;;  %4876 = vst [vmem:[#allocation2 + $0xb4] sm:$0xe] %v4570_v34  ;;  %v5074_v38 = vrot.slane %v5073_v28, 4 }
 0x392   : > { %v3943_v42 = vpop.f32.mrf.mxu2 }
 0x393   : > { %v4573_v53 = vshrl.u32 %v4445_v8, 16  ;;  %v4576_v58 = vshll.u32 %v4445_v8, 16  ;;  %4943 = vst [vmem:[#allocation2 + $0xc4] sm:$0xf] %v4445_v8  ;;  %v4298_v20 = vadd.f32 %v4200_v35, %v13380_v17 }
 0x394   : > { %6117 = vmatmul.bf16.gmra.mxu1 %v10635_v23 }
 0x395   : > { %v4575_v37 = vrot.slane %v4573_v53, 7  ;;  %v5075_v7 = vrot.slane %v4576_v58, 5  ;;  %v4350_v32 = vadd.f32 %v13514_v50, %v4298_v20  ;;  %v5077_v60 = vrot.slane %v4573_v53, 4 }
 0x396   : > { %v4072_v57 = vpop.f32.mrf.mxu3  ;;  %v4204_v10 = vpop.f32.mrf.mxu0 }
 0x397   : > { %v4578_v62 = vor.u32 %v4576_v58, %v4575_v37  ;;  %v5076_v17 = vsel %vm13524_vm13, %v5074_v38, %v5075_v7  ;;  %v4398_v12 = vmax.f32 %v4350_v32, 0.0  ;;  %v4073_v5 = vadd.f32 %v4072_v57, %v3943_v42  ;;  %3985 = vmatmul.bf16.gmra.mxu2 %v10383_v22  ;;  %v11973_v57 = vld [vmem:[#allocation2 + $0x1e4] sm:$0xf]  ;;  %v10396_v22 = vld [vmem:[#allocation2 + $0x1ec] sm:$0xf0] }
 0x398   : > { %5243 = vst [vmem:[#allocation2 + $0xbc] sm:$0xf] %v5076_v17  ;;  %v5078_v19 = vor.u32 %v5077_v60, %v5075_v7  ;;  %v4580_v48 = vrot.slane %v4575_v37, 4  ;;  %v10646_v53 = vld [vmem:[#allocation2 + $0xb4] sm:$0xf] }
 0x399   : > { %v4579_v56 = vsel %vm12777_vm9, %v4571_v16, %v4578_v62  ;;  %v4446_v63 = vpack.c.bf16 %v4398_v12, %v4398_v12  ;;  %v4202_v40 = vadd.f32 %v4201_v46, %v4073_v5  ;;  %4243 = vmatmul.bf16.gmra.mxu0 %v10391_v36  ;;  %v10402_v37 = vld [vmem:[#allocation2 + $0x1e8] sm:$0xf]  ;;  %v11975_v7 = vld [vmem:[#allocation2 + $0x1f0] sm:$0xf0]  ;;  %v10395_v62 = vor.u32 %v11974_v21, %v10394_v39 }
 0x39a   : > { %4877 = vst [vmem:[#allocation2 + $0xc0] sm:$0xf] %v4579_v56  ;;  %v3946_v8 = vpop.f32.mrf.mxu2  ;;  %v5079_v35 = vrot.slane %v5078_v19, 4  ;;  %v10399_v19 = vor.u32 %v11973_v57, %v10396_v22  ;;  %v11978_v57 = vld [vmem:[#allocation2 + $0x208] sm:$0xf0] }
 0x39b   : > { %4114 = vmatmul.bf16.gmra.mxu3 %v10387_v27  ;;  %v4582_v14 = vshll.u32 %v4446_v63, 16  ;;  %v4945_v34 = vsel %vm12815_vm10, %v4446_v63, %v4944_v15  ;;  %v4299_v28 = vadd.f32 %v4202_v40, %v13383_v45 }
 0x39c   : > { %4946 = vst [vmem:[#allocation2 + $0xd0] sm:$0x1] %v4945_v34 }
 0x39d   : > { %v4584_v51 = vsel %vm12777_vm9, %v4580_v48, %v4582_v14  ;;  %v5080_v0 = vrot.slane %v4582_v14, 5  ;;  %v4351_v25 = vadd.f32 %v13514_v50, %v4299_v28 }
 0x39e   : > { %v4075_v46 = vpop.f32.mrf.mxu3  ;;  %4878 = vst [vmem:[#allocation2 + $0xcc] sm:$0x1] %v4584_v51  ;;  %v4206_v23 = vpop.f32.mrf.mxu0 }
 0x39f   : > { %v4076_v59 = vadd.f32 %v4075_v46, %v3946_v8  ;;  %v5081_v4 = vsel %vm13524_vm13, %v5079_v35, %v5080_v0  ;;  %v4399_v13 = vmax.f32 %v4351_v25, 0.0  ;;  %v13622_v0 = vld [vmem:[%s14764_s2] ss:$0 sm:$0xff] }
 0x3a0   : > { %5244 = vst [vmem:[#allocation2 + $0xc8] sm:$0xf] %v5081_v4 }
 0x3a1   : > { %v4205_v45 = vadd.f32 %v4204_v10, %v4076_v59  ;;  %v12133_v58 = vld [vmem:[#allocation2 + $0xbc] sm:$0xf0]  ;;  %v4447_v20 = vpack.c.bf16 %v4399_v13, %v4399_v13 }
 0x3a2   : > { %v10647_v26 = vor.u32 %v12133_v58, %v10646_v53  ;;  %v3948_v16 = vpop.f32.mrf.mxu2 }
 0x3a3   : > { %v4300_v38 = vadd.f32 %v4205_v45, %v13388_v3  ;;  %v4586_v32 = vshrl.u32 %v4447_v20, 16  ;;  %v4589_v42 = vshll.u32 %v4447_v20, 16  ;;  %v4948_v60 = vsel %vm12761_vm8, %v4447_v20, %v4947_v33  ;;  %v10406_v20 = vld [vmem:[#allocation2 + $0x1f8] sm:$0xf] }
 0x3a4   : > { %6122 = vmatmul.bf16.gmra.mxu1 %v10647_v26  ;;  %4949 = vst [vmem:[#allocation2 + $0xdc] sm:$0xf] %v4948_v60  ;;  %v10403_v3 = vor.u32 %v11975_v7, %v10402_v37  ;;  %v10414_v60 = vld [vmem:[#allocation2 + $0x200] sm:$0xf] }
 0x3a5   : > { %v4352_v36 = vadd.f32 %v13514_v50, %v4300_v38  ;;  %v4588_v17 = vrot.slane %v4586_v32, 7  ;;  %v5082_v10 = vrot.slane %v4586_v32, 4  ;;  %v5083_v27 = vrot.slane %v4589_v42, 5  ;;  %v10658_v39 = vld [vmem:[#allocation2 + $0xcc] sm:$0xf] }
 0x3a6   : > { %v4077_v12 = vpop.f32.mrf.mxu3  ;;  %v4209_v15 = vpop.f32.mrf.mxu0  ;;  %v11977_v38 = vld [vmem:[#allocation2 + $0x200] sm:$0xf0] }
 0x3a7   : > { %v4400_v5 = vmax.f32 %v4352_v36, 0.0  ;;  %v4078_v56 = vadd.f32 %v4077_v12, %v3948_v16  ;;  %v4591_v63 = vor.u32 %v4589_v42, %v4588_v17  ;;  %v5084_v40 = vor.u32 %v5083_v27, %v5082_v10  ;;  %3990 = vmatmul.bf16.gmra.mxu2 %v10395_v62  ;;  %v10408_v10 = vld [vmem:[#allocation2 + $0x204] sm:$0xf0] }
 0x3a8   : > { %v4592_v4 = vrot.slane %v4588_v17, 4  ;;  %v11976_v17 = vld [vmem:[#allocation2 + $0x1fc] sm:$0xf]  ;;  %v10407_v12 = vor.u32 %v11977_v38, %v10406_v20 }
 0x3a9   : > { %v4448_v48 = vpack.c.bf16 %v4400_v5, %v4400_v5  ;;  %v4207_v14 = vadd.f32 %v4206_v23, %v4078_v56  ;;  %4879 = vst [vmem:[#allocation2 + $0xd8] sm:$0xe] %v4591_v63  ;;  %4248 = vmatmul.bf16.gmra.mxu0 %v10403_v3  ;;  %v5085_v8 = vrot.slane %v5084_v40, 4  ;;  %v10415_v3 = vor.u32 %v11978_v57, %v10414_v60  ;;  %v11980_v60 = vld [vmem:[#allocation2 + $0x218] sm:$0xf0] }
 0x3aa   : > { %v3951_v46 = vpop.f32.mrf.mxu2  ;;  %v10426_v57 = vld [vmem:[#allocation2 + $0x218] sm:$0xf] }
 0x3ab   : > { %v4594_v34 = vshrl.u32 %v4448_v48, 16  ;;  %v4597_v50 = vshll.u32 %v4448_v48, 16  ;;  %4950 = vst [vmem:[#allocation2 + $0xe8] sm:$0xf] %v4448_v48  ;;  %v4301_v28 = vadd.f32 %v4207_v14, %v13391_v6  ;;  %4119 = vmatmul.bf16.gmra.mxu3 %v10399_v19  ;;  %v4951_v6 = vld [vmem:[#allocation2 + $0xf4] sm:$0x1]  ;;  %v10411_v14 = vor.u32 %v11976_v17, %v10408_v10 }
 0x3ad   : > { %v4596_v35 = vrot.slane %v4594_v34, 7  ;;  %v5086_v51 = vrot.slane %v4597_v50, 5  ;;  %v4353_v25 = vadd.f32 %v13622_v0, %v4301_v28  ;;  %v5088_v59 = vrot.slane %v4594_v34, 4  ;;  %v4954_v28 = vld [vmem:[#allocation2 + $0x100] sm:$0xf] }
 0x3ae   : > { %v4080_v23 = vpop.f32.mrf.mxu3  ;;  %v4211_v45 = vpop.f32.mrf.mxu0 }
 0x3af   : > { %v4599_v13 = vor.u32 %v4597_v50, %v4596_v35  ;;  %v5087_v33 = vsel %vm13524_vm13, %v5085_v8, %v5086_v51  ;;  %v4401_v53 = vmax.f32 %v4353_v25, 0.0  ;;  %v4081_v58 = vadd.f32 %v4080_v23, %v3951_v46  ;;  %v13637_v50 = vpop.f32.mrf.mxu1 }
 0x3b0   : > { %5245 = vst [vmem:[#allocation2 + $0xe0] sm:$0xf] %v5087_v33  ;;  %v12136_v21 = vld [vmem:[#allocation2 + $0xd4] sm:$0xf0]  ;;  %v5089_v37 = vor.u32 %v5088_v59, %v5086_v51  ;;  %v4601_v22 = vrot.slane %v4596_v35, 4  ;;  %v12206_v51 = vld [vmem:[#allocation8 + $0x160] sm:$0xff] }
 0x3b1   : > { %v4600_v26 = vsel %vm12777_vm9, %v4592_v4, %v4599_v13  ;;  %v4449_v7 = vpack.c.bf16 %v4401_v53, %v4401_v53  ;;  %v4210_v32 = vadd.f32 %v4209_v15, %v4081_v58  ;;  %v10659_v42 = vor.u32 %v12136_v21, %v10658_v39  ;;  %6345 = vmatpush.bf16.msrb.mxu3 %v12206_v51 }
 0x3b2   : > { %4880 = vst [vmem:[#allocation2 + $0xe4] sm:$0xf] %v4600_v26  ;;  %v3953_v27 = vpop.f32.mrf.mxu2  ;;  %v5090_v5 = vrot.slane %v5089_v37, 4 }
 0x3b3   : > { %v4603_v36 = vshll.u32 %v4449_v7, 16  ;;  %v4952_v16 = vsel %vm12815_vm10, %v4449_v7, %v4951_v6  ;;  %v4302_v62 = vadd.f32 %v4210_v32, %v13396_v41 }
 0x3b4   : > { %6127 = vmatmul.bf16.gmra.mxu1 %v10659_v42  ;;  %4953 = vst [vmem:[#allocation2 + $0xf4] sm:$0x1] %v4952_v16  ;;  %v10418_v42 = vld [vmem:[#allocation2 + $0x210] sm:$0xf]  ;;  %v12094_v16 = vld [vmem:[#allocation8 + $0x20] sm:$0xff] }
 0x3b5   : > { %v4605_v56 = vsel %vm12777_vm9, %v4601_v22, %v4603_v36  ;;  %v5091_v15 = vrot.slane %v4603_v36, 5  ;;  %v4354_v19 = vadd.f32 %v13622_v0, %v4302_v62  ;;  %v12198_v36 = vld [vmem:[#allocation8 + $0x120] sm:$0xff]  ;;  %7002 = vmatpush.bf16.msrb.mxu0 %v12094_v16 }
 0x3b6   : > { %v4082_v63 = vpop.f32.mrf.mxu3  ;;  %4881 = vst [vmem:[#allocation2 + $0xf0] sm:$0x1] %v4605_v56  ;;  %v4214_v48 = vpop.f32.mrf.mxu0  ;;  %v12102_v62 = vld [vmem:[#allocation8 + $0x60] sm:$0xff]  ;;  %6216 = vmatpush.bf16.msrb.mxu2 %v12198_v36 }
 0x3b7   : > { %v4083_v40 = vadd.f32 %v4082_v63, %v3953_v27  ;;  %v5092_v41 = vsel %vm13524_vm13, %v5090_v5, %v5091_v15  ;;  %v4402_v34 = vmax.f32 %v4354_v19, 0.0  ;;  %3995 = vmatmul.bf16.gmra.mxu2 %v10407_v12  ;;  %v11981_v12 = vld [vmem:[#allocation2 + $0x220] sm:$0xf0]  ;;  %v10420_v5 = vld [vmem:[#allocation2 + $0x21c] sm:$0xf0]  ;;  %7131 = vmatpush.bf16.msrb.mxu1 %v12102_v62 }
 0x3b8   : > { %5246 = vst [vmem:[#allocation2 + $0xec] sm:$0xf] %v5092_v41  ;;  %v10419_v41 = vor.u32 %v11980_v60, %v10418_v42 }
 0x3b9   : > { %v4212_v8 = vadd.f32 %v4211_v45, %v4083_v40  ;;  %v4450_v35 = vpack.c.bf16 %v4402_v34, %v4402_v34  ;;  %4253 = vmatmul.bf16.gmra.mxu0 %v10415_v3  ;;  %v10670_v32 = vld [vmem:[#allocation2 + $0xe4] sm:$0xf]  ;;  %v11979_v3 = vld [vmem:[#allocation2 + $0x214] sm:$0xf]  ;;  %v10427_v34 = vor.u32 %v11981_v12, %v10426_v57 }
 0x3ba   : > { %v3956_v13 = vpop.f32.mrf.mxu2  ;;  %v10423_v51 = vor.u32 %v11979_v3, %v10420_v5  ;;  %v11983_v12 = vld [vmem:[#allocation2 + $0x230] sm:$0xf0]  ;;  %v10438_v5 = vld [vmem:[#allocation2 + $0x230] sm:$0xf] }
 0x3bb   : > { %v4303_v25 = vadd.f32 %v4212_v8, %v13399_v55  ;;  %4124 = vmatmul.bf16.gmra.mxu3 %v10411_v14  ;;  %v4607_v46 = vshrl.u32 %v4450_v35, 16  ;;  %v4610_v59 = vshll.u32 %v4450_v35, 16  ;;  %v4955_v23 = vsel %vm12761_vm8, %v4450_v35, %v4954_v28 }
 0x3bc   : > { %4956 = vst [vmem:[#allocation2 + $0x100] sm:$0xf] %v4955_v23  ;;  %v4958_v23 = vld [vmem:[#allocation2 + $0x118] sm:$0x1] }
 0x3bd   : > { %v4355_v4 = vadd.f32 %v13622_v0, %v4303_v25  ;;  %v4609_v33 = vrot.slane %v4607_v46, 7  ;;  %v5093_v6 = vrot.slane %v4607_v46, 4  ;;  %v5094_v45 = vrot.slane %v4610_v59, 5  ;;  %v12139_v39 = vld [vmem:[#allocation2 + $0xec] sm:$0xf0] }
 0x3be   : > { %v4085_v53 = vpop.f32.mrf.mxu3  ;;  %v4216_v26 = vpop.f32.mrf.mxu0  ;;  %v10671_v22 = vor.u32 %v12139_v39, %v10670_v32 }
 0x3bf   : > { %v4403_v58 = vmax.f32 %v4355_v4, 0.0  ;;  %v4086_v20 = vadd.f32 %v4085_v53, %v3956_v13  ;;  %v4612_v55 = vor.u32 %v4610_v59, %v4609_v33  ;;  %v5095_v21 = vor.u32 %v5094_v45, %v5093_v6 }
 0x3c0   : > { %v4613_v28 = vrot.slane %v4609_v33, 4 }
 0x3c1   : > { %v4451_v38 = vpack.c.bf16 %v4403_v58, %v4403_v58  ;;  %v4215_v37 = vadd.f32 %v4214_v48, %v4086_v20  ;;  %v13643_v7 = vpop.f32.mrf.mxu1  ;;  %4882 = vst [vmem:[#allocation2 + $0xfc] sm:$0xe] %v4612_v55  ;;  %v5096_v56 = vrot.slane %v5095_v21, 4 }
 0x3c2   : > { %v3958_v40 = vpop.f32.mrf.mxu2 }
 0x3c3   : > { %v4615_v17 = vshrl.u32 %v4451_v38, 16  ;;  %v4618_v10 = vshll.u32 %v4451_v38, 16  ;;  %4957 = vst [vmem:[#allocation2 + $0x10c] sm:$0xf] %v4451_v38  ;;  %v4304_v27 = vadd.f32 %v4215_v37, %v13402_v11  ;;  %v12141_v9 = vld [vmem:[#allocation2 + $0x100] sm:$0xf] }
 0x3c4   : > { %6132 = vmatmul.bf16.gmra.mxu1 %v10671_v22  ;;  %v4961_v22 = vld [vmem:[#allocation2 + $0x124] sm:$0xf] }
 0x3c5   : > { %v4617_v15 = vrot.slane %v4615_v17, 7  ;;  %v5097_v19 = vrot.slane %v4618_v10, 5  ;;  %v4356_v63 = vadd.f32 %v13622_v0, %v4304_v27  ;;  %v5099_v48 = vrot.slane %v4615_v17, 4  ;;  %v10430_v27 = vld [vmem:[#allocation2 + $0x228] sm:$0xf] }
 0x3c6   : > { %v4087_v14 = vpop.f32.mrf.mxu3  ;;  %v4219_v35 = vpop.f32.mrf.mxu0 }
 0x3c7   : > { %v4620_v8 = vor.u32 %v4618_v10, %v4617_v15  ;;  %v5098_v11 = vsel %vm13524_vm13, %v5096_v56, %v5097_v19  ;;  %v4404_v25 = vmax.f32 %v4356_v63, 0.0  ;;  %v4088_v46 = vadd.f32 %v4087_v14, %v3958_v40  ;;  %4000 = vmatmul.bf16.gmra.mxu2 %v10419_v41  ;;  %v11984_v56 = vld [vmem:[#allocation2 + $0x238] sm:$0xf0]  ;;  %v11982_v40 = vld [vmem:[#allocation2 + $0x22c] sm:$0xf] }
 0x3c8   : > { %5247 = vst [vmem:[#allocation2 + $0x104] sm:$0xf] %v5098_v11  ;;  %v5100_v13 = vor.u32 %v5099_v48, %v5097_v19  ;;  %v4622_v33 = vrot.slane %v4617_v15, 4  ;;  %v10682_v16 = vld [vmem:[#allocation2 + $0xfc] sm:$0xf] }
 0x3c9   : > { %v4621_v59 = vsel %vm12777_vm9, %v4613_v28, %v4620_v8  ;;  %v13651_v4 = vpop.f32.mrf.mxu1  ;;  %v4452_v6 = vpack.c.bf16 %v4404_v25, %v4404_v25  ;;  %v4217_v45 = vadd.f32 %v4216_v26, %v4088_v46  ;;  %4258 = vmatmul.bf16.gmra.mxu0 %v10427_v34  ;;  %v10432_v48 = vld [vmem:[#allocation2 + $0x234] sm:$0xf0]  ;;  %v10431_v34 = vor.u32 %v11983_v12, %v10430_v27 }
 0x3ca   : > { %4883 = vst [vmem:[#allocation2 + $0x108] sm:$0xf] %v4621_v59  ;;  %v3961_v39 = vpop.f32.mrf.mxu2  ;;  %v5101_v55 = vrot.slane %v5100_v13, 4  ;;  %v10435_v59 = vor.u32 %v11982_v40, %v10432_v48  ;;  %v11987_v40 = vld [vmem:[#allocation2 + $0x250] sm:$0xf0] }
 0x3cb   : > { %4129 = vmatmul.bf16.gmra.mxu3 %v10423_v51  ;;  %v4624_v53 = vshll.u32 %v4452_v6, 16  ;;  %v4959_v58 = vsel %vm12815_vm10, %v4452_v6, %v4958_v23  ;;  %v4305_v20 = vadd.f32 %v4217_v45, %v13405_v29 }
 0x3cc   : > { %4960 = vst [vmem:[#allocation2 + $0x118] sm:$0x1] %v4959_v58 }
 0x3cd   : > { %v4626_v21 = vsel %vm12777_vm9, %v4622_v33, %v4624_v53  ;;  %v5102_v38 = vrot.slane %v4624_v53, 5  ;;  %v4357_v37 = vadd.f32 %v13622_v0, %v4305_v20 }
 0x3ce   : > { %v4090_v26 = vpop.f32.mrf.mxu3  ;;  %4884 = vst [vmem:[#allocation2 + $0x114] sm:$0x1] %v4626_v21  ;;  %v4221_v42 = vpop.f32.mrf.mxu0 }
 0x3cf   : > { %v4091_v32 = vadd.f32 %v4090_v26, %v3961_v39  ;;  %v5103_v60 = vsel %vm13524_vm13, %v5101_v55, %v5102_v38  ;;  %v4405_v57 = vmax.f32 %v4357_v37, 0.0 }
 0x3d0   : > { %5248 = vst [vmem:[#allocation2 + $0x110] sm:$0xf] %v5103_v60 }
 0x3d1   : > { %v4220_v29 = vadd.f32 %v4219_v35, %v4091_v32  ;;  %v13661_v36 = vpop.f32.mrf.mxu1  ;;  %v12142_v62 = vld [vmem:[#allocation2 + $0x104] sm:$0xf0]  ;;  %v4453_v17 = vpack.c.bf16 %v4405_v57, %v4405_v57 }
 0x3d2   : > { %v10683_v10 = vor.u32 %v12142_v62, %v10682_v16  ;;  %v3963_v41 = vpop.f32.mrf.mxu2 }
 0x3d3   : > { %v4306_v3 = vadd.f32 %v4220_v29, %v13410_v2  ;;  %v4628_v15 = vshrl.u32 %v4453_v17, 16  ;;  %v4631_v19 = vshll.u32 %v4453_v17, 16  ;;  %v4962_v63 = vsel %vm12761_vm8, %v4453_v17, %v4961_v22  ;;  %v4965_v22 = vld [vmem:[#allocation2 + $0x13c] sm:$0x1] }
 0x3d4   : > { %6137 = vmatmul.bf16.gmra.mxu1 %v10683_v10  ;;  %4963 = vst [vmem:[#allocation2 + $0x124] sm:$0xf] %v4962_v63  ;;  %v10439_v2 = vor.u32 %v11984_v56, %v10438_v5  ;;  %v10450_v63 = vld [vmem:[#allocation2 + $0x248] sm:$0xf] }
 0x3d5   : > { %v4358_v14 = vadd.f32 %v13622_v0, %v4306_v3  ;;  %v4630_v28 = vrot.slane %v4628_v15, 7  ;;  %v5104_v8 = vrot.slane %v4628_v15, 4  ;;  %v5105_v11 = vrot.slane %v4631_v19, 5  ;;  %v10694_v27 = vld [vmem:[#allocation2 + $0x114] sm:$0xf] }
 0x3d6   : > { %v4092_v35 = vpop.f32.mrf.mxu3  ;;  %v4224_v46 = vpop.f32.mrf.mxu0  ;;  %v11986_v3 = vld [vmem:[#allocation2 + $0x248] sm:$0xf0] }
 0x3d7   : > { %v4406_v51 = vmax.f32 %v4358_v14, 0.0  ;;  %v4093_v25 = vadd.f32 %v4092_v35, %v3963_v41  ;;  %v4633_v23 = vor.u32 %v4631_v19, %v4630_v28  ;;  %v5106_v13 = vor.u32 %v5105_v11, %v5104_v8  ;;  %4005 = vmatmul.bf16.gmra.mxu2 %v10431_v34  ;;  %v10444_v8 = vld [vmem:[#allocation2 + $0x24c] sm:$0xf0] }
 0x3d9   : > { %v4454_v6 = vpack.c.bf16 %v4406_v51, %v4406_v51  ;;  %v4222_v45 = vadd.f32 %v4221_v42, %v4093_v25  ;;  %v13667_v33 = vpop.f32.mrf.mxu1  ;;  %4885 = vst [vmem:[#allocation2 + $0x120] sm:$0xe] %v4633_v23  ;;  %4263 = vmatmul.bf16.gmra.mxu0 %v10439_v2  ;;  %v5107_v39 = vrot.slane %v5106_v13, 4  ;;  %v4634_v42 = vrot.slane %v4630_v28, 4  ;;  %v11985_v28 = vld [vmem:[#allocation2 + $0x244] sm:$0xf] }
 0x3da   : > { %v3966_v37 = vpop.f32.mrf.mxu2  ;;  %v10451_v2 = vor.u32 %v11987_v40, %v10450_v63 }
 0x3db   : > { %v4636_v53 = vshrl.u32 %v4454_v6, 16  ;;  %v4639_v58 = vshll.u32 %v4454_v6, 16  ;;  %4964 = vst [vmem:[#allocation2 + $0x130] sm:$0xf] %v4454_v6  ;;  %v4307_v20 = vadd.f32 %v4222_v45, %v13413_v31  ;;  %4134 = vmatmul.bf16.gmra.mxu3 %v10435_v59  ;;  %v10442_v31 = vld [vmem:[#allocation2 + $0x240] sm:$0xf]  ;;  %v10447_v45 = vor.u32 %v11985_v28, %v10444_v8 }
 0x3dc   : > { %v10443_v35 = vor.u32 %v11986_v3, %v10442_v31  ;;  %v12196_v3 = vld [vmem:[#allocation8 + $0x110] sm:$0xff] }
 0x3dd   : > { %v4638_v55 = vrot.slane %v4636_v53, 7  ;;  %v5108_v21 = vrot.slane %v4639_v58, 5  ;;  %v4359_v38 = vadd.f32 %v13622_v0, %v4307_v20  ;;  %v5110_v26 = vrot.slane %v4636_v53, 4  ;;  %v4968_v20 = vld [vmem:[#allocation2 + $0x148] sm:$0xf] }
 0x3de   : > { %v4095_v32 = vpop.f32.mrf.mxu3  ;;  %v4226_v29 = vpop.f32.mrf.mxu0  ;;  %v11988_v8 = vld [vmem:[#allocation2 + $0x25c] sm:$0xf] }
 0x3df   : > { %v4641_v60 = vor.u32 %v4639_v58, %v4638_v55  ;;  %v5109_v57 = vsel %vm13524_vm13, %v5107_v39, %v5108_v21  ;;  %v4407_v16 = vmax.f32 %v4359_v38, 0.0  ;;  %v4096_v62 = vadd.f32 %v4095_v32, %v3966_v37  ;;  %v12205_v38 = vld [vmem:[#allocation8 + $0x158] sm:$0xff] }
 0x3e0   : > { %5249 = vst [vmem:[#allocation2 + $0x128] sm:$0xf] %v5109_v57  ;;  %v12145_v12 = vld [vmem:[#allocation2 + $0x11c] sm:$0xf0]  ;;  %v5111_v5 = vor.u32 %v5110_v26, %v5108_v21  ;;  %v4643_v48 = vrot.slane %v4638_v55, 4  ;;  %v3166_v58 = vadd.f32 %v13416_v30, %v13423_v54  ;;  %6346 = vmatpush.bf16.msrb.mxu3 %v12205_v38 }
 0x3e1   : > { %v4642_v17 = vsel %vm12777_vm9, %v4634_v42, %v4641_v60  ;;  %v13675_v10 = vpop.f32.mrf.mxu1  ;;  %v4455_v56 = vpack.c.bf16 %v4407_v16, %v4407_v16  ;;  %v4225_v15 = vadd.f32 %v4224_v46, %v4096_v62  ;;  %v10695_v19 = vor.u32 %v12145_v12, %v10694_v27  ;;  %v12197_v26 = vld [vmem:[#allocation8 + $0x118] sm:$0xff] }
 0x3e2   : > { %4886 = vst [vmem:[#allocation2 + $0x12c] sm:$0xf] %v4642_v17  ;;  %v3968_v11 = vpop.f32.mrf.mxu2  ;;  %v5112_v51 = vrot.slane %v5111_v5, 4  ;;  %v12093_v32 = vld [vmem:[#allocation8 + $0x18] sm:$0xff]  ;;  %6217 = vmatpush.bf16.msrb.mxu2 %v12197_v26  ;;  %v12204_v5 = vld [vmem:[#allocation8 + $0x150] sm:$0xff] }
 0x3e3   : > { %v4645_v14 = vshll.u32 %v4455_v56, 16  ;;  %v4966_v41 = vsel %vm12815_vm10, %v4455_v56, %v4965_v22  ;;  %v4308_v34 = vadd.f32 %v4225_v15, %v13420_v49  ;;  %7003 = vmatpush.bf16.msrb.mxu0 %v12093_v32  ;;  %v12092_v56 = vld [vmem:[#allocation8 + $0x10] sm:$0xff] }
 0x3e4   : > { %6142 = vmatmul.bf16.gmra.mxu1 %v10695_v19  ;;  %4967 = vst [vmem:[#allocation2 + $0x13c] sm:$0x1] %v4966_v41  ;;  %v10454_v41 = vld [vmem:[#allocation2 + $0x258] sm:$0xf]  ;;  %6347 = vmatpush.bf16.msrb.mxu3 %v12204_v5 }
 0x3e5   : > { %v4647_v25 = vsel %vm12777_vm9, %v4643_v48, %v4645_v14  ;;  %v5113_v46 = vrot.slane %v4645_v14, 5  ;;  %v4360_v59 = vadd.f32 %v13622_v0, %v4308_v34  ;;  %v11989_v34 = vld [vmem:[#allocation2 + $0x260] sm:$0xf0] }
 0x3e6   : > { %v4097_v23 = vpop.f32.mrf.mxu3  ;;  %4887 = vst [vmem:[#allocation2 + $0x138] sm:$0x1] %v4647_v25  ;;  %v4229_v6 = vpop.f32.mrf.mxu0  ;;  %6218 = vmatpush.bf16.msrb.mxu2 %v12196_v3  ;;  %v10455_v38 = vor.u32 %v11989_v34, %v10454_v41 }
 0x3e7   : > { %v4098_v13 = vadd.f32 %v4097_v23, %v3968_v11  ;;  %v5114_v49 = vsel %vm13524_vm13, %v5112_v51, %v5113_v46  ;;  %v4408_v53 = vmax.f32 %v4360_v59, 0.0  ;;  %4010 = vmatmul.bf16.gmra.mxu2 %v10443_v35  ;;  %v10456_v11 = vld [vmem:[#allocation2 + $0x264] sm:$0xf0]  ;;  %v10462_v35 = vld [vmem:[#allocation2 + $0x260] sm:$0xf]  ;;  %7004 = vmatpush.bf16.msrb.mxu0 %v12092_v56  ;;  %v12195_v23 = vld [vmem:[#allocation8 + $0x108] sm:$0xff] }
 0x3e8   : > { %5250 = vst [vmem:[#allocation2 + $0x134] sm:$0xf] %v5114_v49  ;;  %v11990_v59 = vld [vmem:[#allocation2 + $0x268] sm:$0xf0] }
 0x3e9   : > { %v4227_v39 = vadd.f32 %v4226_v29, %v4098_v13  ;;  %v13687_v55 = vpop.f32.mrf.mxu1  ;;  %v4456_v21 = vpack.c.bf16 %v4408_v53, %v4408_v53  ;;  %4268 = vmatmul.bf16.gmra.mxu0 %v10451_v2  ;;  %v10706_v14 = vld [vmem:[#allocation2 + $0x12c] sm:$0xf]  ;;  %v12101_v2 = vld [vmem:[#allocation8 + $0x58] sm:$0xff]  ;;  %v12203_v13 = vld [vmem:[#allocation8 + $0x148] sm:$0xff] }
 0x3ea   : > { %v3971_v54 = vpop.f32.mrf.mxu2  ;;  %7132 = vmatpush.bf16.msrb.mxu1 %v12101_v2  ;;  %6219 = vmatpush.bf16.msrb.mxu2 %v12195_v23 }
 0x3eb   : > { %v4309_v37 = vadd.f32 %v4227_v39, %v3166_v58  ;;  %4139 = vmatmul.bf16.gmra.mxu3 %v10447_v45  ;;  %v4649_v42 = vshrl.u32 %v4456_v21, 16  ;;  %v4652_v60 = vshll.u32 %v4456_v21, 16  ;;  %v4969_v57 = vsel %vm12761_vm8, %v4456_v21, %v4968_v20 }
 0x3ec   : > { %4970 = vst [vmem:[#allocation2 + $0x148] sm:$0xf] %v4969_v57  ;;  %6348 = vmatpush.bf16.msrb.mxu3 %v12203_v13  ;;  %v12194_v57 = vld [vmem:[#allocation8 + $0x100] sm:$0xff] }
 0x3ed   : > { %v4361_v30 = vadd.f32 %v13622_v0, %v4309_v37  ;;  %v13692_v22 = vrot.slane %v4649_v42, 7  ;;  %v5115_v29 = vrot.slane %v4649_v42, 4  ;;  %v5116_v16 = vrot.slane %v4652_v60, 5  ;;  %v12148_v31 = vld [vmem:[#allocation2 + $0x134] sm:$0xf0] }
 0x3ee   : > { %v4100_v62 = vpop.f32.mrf.mxu3  ;;  %v4231_v12 = vpop.f32.mrf.mxu0  ;;  %v10707_v28 = vor.u32 %v12148_v31, %v10706_v14  ;;  %v10463_v37 = vor.u32 %v11990_v59, %v10462_v35  ;;  %6220 = vmatpush.bf16.msrb.mxu2 %v12194_v57 }
 0x3ef   : > { %v4409_v17 = vmax.f32 %v4361_v30, 0.0  ;;  %v4101_v27 = vadd.f32 %v4100_v62, %v3971_v54  ;;  %v4654_v15 = vor.u32 %v4652_v60, %v13692_v22  ;;  %v5117_v19 = vor.u32 %v5116_v16, %v5115_v29  ;;  %v12202_v29 = vld [vmem:[#allocation8 + $0x140] sm:$0xff] }
 0x3f0   : > { %v10459_v60 = vor.u32 %v11988_v8, %v10456_v11  ;;  %v12090_v16 = vld [vmem:[#allocation8] sm:$0xff]  ;;  %6349 = vmatpush.bf16.msrb.mxu3 %v12202_v29 }
 0x3f1   : > { %v4457_v63 = vpack.c.bf16 %v4409_v17, %v4409_v17  ;;  %v4230_v40 = vadd.f32 %v4229_v6, %v4101_v27  ;;  %v13695_v48 = vpop.f32.mrf.mxu1  ;;  %4888 = vst [vmem:[#allocation2 + $0x144] sm:$0xe] %v4654_v15  ;;  %v12091_v6 = vld [vmem:[#allocation8 + $0x8] sm:$0xff]  ;;  %v5118_v45 = vrot.slane %v5117_v19, 4  ;;  %v14909_v62 = vld [vmem:[#allocation57_spill] sm:$0xff] }
 0x3f2   : > { %v3973_v20 = vpop.f32.mrf.mxu2  ;;  %7005 = vmatpush.bf16.msrb.mxu0 %v12091_v6  ;;  %v3171_v31 = vadd.f32 %v14909_v62, %v13431_v44 }
 0x3f3   : > { %v4657_v51 = vshrl.u32 %v4457_v63, 16  ;;  %v4660_v25 = vshll.u32 %v4457_v63, 16  ;;  %4971 = vst [vmem:[#allocation2 + $0x154] sm:$0xf] %v4457_v63  ;;  %v4310_v46 = vadd.f32 %v4230_v40, %v13428_v24  ;;  %v4655_v24 = vrot.slane %v13692_v22, 4 }
 0x3f4   : > { %6147 = vmatmul.bf16.gmra.mxu1 %v10707_v28  ;;  %v4972_v22 = vld [vmem:[#allocation2 + $0x160] sm:$0x1] }
 0x3f5   : > { %v4659_v49 = vrot.slane %v4657_v51, 7  ;;  %v5119_v53 = vrot.slane %v4660_v25, 5  ;;  %v4362_v58 = vadd.f32 %v13622_v0, %v4310_v46  ;;  %v5121_v39 = vrot.slane %v4657_v51, 4  ;;  %v4975_v51 = vld [vmem:[#allocation2 + $0x16c] sm:$0xf] }
 0x3f6   : > { %v4102_v21 = vpop.f32.mrf.mxu3  ;;  %v4234_v42 = vpop.f32.mrf.mxu0  ;;  %7006 = vmatpush.bf16.msrb.mxu0 %v12090_v16 }
 0x3f7   : > { %v4662_v26 = vor.u32 %v4660_v25, %v4659_v49  ;;  %v5120_v32 = vsel %vm13524_vm13, %v5118_v45, %v5119_v53  ;;  %v4410_v30 = vmax.f32 %v4362_v58, 0.0  ;;  %v4103_v54 = vadd.f32 %v4102_v21, %v3973_v20  ;;  %4015 = vmatmul.bf16.gmra.mxu2 %v10455_v38  ;;  %v10466_v45 = vld [vmem:[#allocation2 + $0x270] sm:$0xf]  ;;  %v10474_v58 = vld [vmem:[#allocation2 + $0x278] sm:$0xf] }
 0x3f8   : > { %5251 = vst [vmem:[#allocation2 + $0x14c] sm:$0xf] %v5120_v32  ;;  %v5122_v3 = vor.u32 %v5121_v39, %v5119_v53  ;;  %v4664_v15 = vrot.slane %v4659_v49, 4  ;;  %v10718_v59 = vld [vmem:[#allocation2 + $0x144] sm:$0xf] }
 0x3f9   : > { %v4663_v17 = vsel %vm12777_vm9, %v4655_v24, %v4662_v26  ;;  %v13706_v27 = vpop.f32.mrf.mxu1  ;;  %v4458_v5 = vpack.c.bf16 %v4410_v30, %v4410_v30  ;;  %v4232_v56 = vadd.f32 %v4231_v12, %v4103_v54  ;;  %4273 = vmatmul.bf16.gmra.mxu0 %v10463_v37  ;;  %v11992_v49 = vld [vmem:[#allocation2 + $0x278] sm:$0xf0]  ;;  %v11993_v20 = vld [vmem:[#allocation2 + $0x280] sm:$0xf0]  ;;  %v11991_v37 = vld [vmem:[#allocation2 + $0x274] sm:$0xf] }
 0x3fa   : > { %4889 = vst [vmem:[#allocation2 + $0x150] sm:$0xf] %v4663_v17  ;;  %v3976_v40 = vpop.f32.mrf.mxu2  ;;  %v5123_v14 = vrot.slane %v5122_v3, 4  ;;  %v10468_v24 = vld [vmem:[#allocation2 + $0x27c] sm:$0xf0] }
 0x3fb   : > { %4144 = vmatmul.bf16.gmra.mxu3 %v10459_v60  ;;  %v4666_v19 = vshll.u32 %v4458_v5, 16  ;;  %v4973_v63 = vsel %vm12815_vm10, %v4458_v5, %v4972_v22  ;;  %v4311_v44 = vadd.f32 %v4232_v56, %v3171_v31  ;;  %v10471_v31 = vor.u32 %v11991_v37, %v10468_v24  ;;  %v14910_v22 = vld [vmem:[#allocation58_spill] sm:$0xff] }
 0x3fc   : > { %4974 = vst [vmem:[#allocation2 + $0x160] sm:$0x1] %v4973_v63  ;;  %v3176_v3 = vadd.f32 %v14910_v22, %v13439_v47  ;;  %v12114_v22 = vld [vmem:[#allocation2 + $0x28] sm:$0xf] }
 0x3fd   : > { %v4668_v41 = vsel %vm12777_vm9, %v4664_v15, %v4666_v19  ;;  %v5124_v34 = vrot.slane %v4666_v19, 5  ;;  %v4363_v12 = vadd.f32 %v13622_v0, %v4311_v44 }
 0x3fe   : > { %v4105_v28 = vpop.f32.mrf.mxu3  ;;  %4890 = vst [vmem:[#allocation2 + $0x15c] sm:$0x1] %v4668_v41  ;;  %v4236_v11 = vpop.f32.mrf.mxu0 }
 0x3ff   : > { %v4106_v8 = vadd.f32 %v4105_v28, %v3976_v40  ;;  %v5125_v35 = vsel %vm13524_vm13, %v5123_v14, %v5124_v34  ;;  %v4411_v2 = vmax.f32 %v4363_v12, 0.0 }
 0x400   : > { %5252 = vst [vmem:[#allocation2 + $0x158] sm:$0xf] %v5125_v35 }
 0x401   : > { %v4235_v25 = vadd.f32 %v4234_v42, %v4106_v8  ;;  %v13715_v46 = vpop.f32.mrf.mxu1  ;;  %v12151_v23 = vld [vmem:[#allocation2 + $0x14c] sm:$0xf0]  ;;  %v4459_v13 = vpack.c.bf16 %v4411_v2, %v4411_v2  ;;  %v10467_v42 = vor.u32 %v11992_v49, %v10466_v45 }
 0x402   : > { %v10719_v6 = vor.u32 %v12151_v23, %v10718_v59  ;;  %v3978_v32 = vpop.f32.mrf.mxu2 }
 0x403   : > { %v4312_v53 = vadd.f32 %v4235_v25, %v13436_v52  ;;  %v4670_v39 = vshrl.u32 %v4459_v13, 16  ;;  %v4673_v21 = vshll.u32 %v4459_v13, 16  ;;  %v4976_v38 = vsel %vm12761_vm8, %v4459_v13, %v4975_v51  ;;  %v4979_v13 = vld [vmem:[#allocation2 + $0x184] sm:$0x1] }
 0x404   : > { %6152 = vmatmul.bf16.gmra.mxu1 %v10719_v6  ;;  %4977 = vst [vmem:[#allocation2 + $0x16c] sm:$0xf] %v4976_v38  ;;  %v10475_v52 = vor.u32 %v11993_v20, %v10474_v58  ;;  %v12019_v38 = vld [vmem:[#allocation2 + $0x8] sm:$0xf0] }
 0x405   : > { %v4364_v26 = vadd.f32 %v13622_v0, %v4312_v53  ;;  %v4672_v60 = vrot.slane %v4670_v39, 7  ;;  %v5126_v57 = vrot.slane %v4670_v39, 4  ;;  %v5127_v30 = vrot.slane %v4673_v21, 5  ;;  %v10730_v45 = vld [vmem:[#allocation2 + $0x15c] sm:$0xf] }
 0x406   : > { %v4107_v54 = vpop.f32.mrf.mxu3  ;;  %v4239_v62 = vpop.f32.mrf.mxu0 }
 0x407   : > { %v4412_v29 = vmax.f32 %v4364_v26, 0.0  ;;  %v4108_v16 = vadd.f32 %v4107_v54, %v3978_v32  ;;  %v4675_v17 = vor.u32 %v4673_v21, %v4672_v60  ;;  %v5128_v5 = vor.u32 %v5127_v30, %v5126_v57  ;;  %4020 = vmatmul.bf16.gmra.mxu2 %v10467_v42  ;;  %v10958_v21 = vld [vmem:[#allocation2] sm:$0xf] }
 0x408   : > { %v4676_v35 = vrot.slane %v4672_v60, 4  ;;  %v10576_v60 = vld [vmem:[#allocation2 + $0x30] sm:$0xf0]  ;;  %v10959_v57 = vor.u32 %v12019_v38, %v10958_v21 }
 0x409   : > { %v4460_v56 = vpack.c.bf16 %v4412_v29, %v4412_v29  ;;  %v4237_v15 = vadd.f32 %v4236_v11, %v4108_v16  ;;  %v13723_v19 = vpop.f32.mrf.mxu1  ;;  %4891 = vst [vmem:[#allocation2 + $0x168] sm:$0xe] %v4675_v17  ;;  %4278 = vmatmul.bf16.gmra.mxu0 %v10475_v52  ;;  %v5129_v14 = vrot.slane %v5128_v5, 4  ;;  %v10579_v5 = vor.u32 %v12114_v22, %v10576_v60  ;;  %v14913_v60 = vld [vmem:[#allocation62_spill] sm:$0xff] }
 0x40a   : > { %v3981_v28 = vpop.f32.mrf.mxu2 }
 0x40b   : > { %v4678_v63 = vshrl.u32 %v4460_v56, 16  ;;  %v4681_v44 = vshll.u32 %v4460_v56, 16  ;;  %4978 = vst [vmem:[#allocation2 + $0x178] sm:$0xf] %v4460_v56  ;;  %v4313_v40 = vadd.f32 %v4237_v15, %v3176_v3  ;;  %4149 = vmatmul.bf16.gmra.mxu3 %v10471_v31  ;;  %v10582_v56 = vld [vmem:[#allocation2 + $0x2c] sm:$0xf] }
 0x40c   : > { %v14911_v15 = vld [vmem:[#allocation60_spill] sm:$0xff] }
 0x40d   : > { %v4680_v41 = vrot.slane %v4678_v63, 7  ;;  %v5130_v34 = vrot.slane %v4681_v44, 5  ;;  %v4365_v12 = vadd.f32 %v13622_v0, %v4313_v40  ;;  %v5132_v47 = vrot.slane %v4678_v63, 4  ;;  %v14912_v63 = vld [vmem:[#allocation59_spill] sm:$0xff]  ;;  %v4982_v40 = vld [vmem:[#allocation2 + $0x190] sm:$0xf] }
 0x40e   : > { %v4110_v8 = vpop.f32.mrf.mxu3  ;;  %v4241_v51 = vpop.f32.mrf.mxu0 }
 0x40f   : > { %v4683_v11 = vor.u32 %v4681_v44, %v4680_v41  ;;  %v5131_v2 = vsel %vm13524_vm13, %v5129_v14, %v5130_v34  ;;  %v4413_v25 = vmax.f32 %v4365_v12, 0.0  ;;  %v4111_v59 = vadd.f32 %v4110_v8, %v3981_v28 }
 0x410   : > { %5253 = vst [vmem:[#allocation2 + $0x170] sm:$0xf] %v5131_v2  ;;  %v12154_v49 = vld [vmem:[#allocation2 + $0x164] sm:$0xf0]  ;;  %v5133_v53 = vor.u32 %v5132_v47, %v5130_v34  ;;  %v4685_v37 = vrot.slane %v4680_v41, 4  ;;  %v3181_v44 = vadd.f32 %v14912_v63, %v14911_v15 }
 0x411   : > { %v4684_v23 = vsel %vm12777_vm9, %v4676_v35, %v4683_v11  ;;  %v13730_v6 = vpop.f32.mrf.mxu1  ;;  %v4461_v58 = vpack.c.bf16 %v4413_v25, %v4413_v25  ;;  %v4240_v20 = vadd.f32 %v4239_v62, %v4111_v59  ;;  %v10731_v39 = vor.u32 %v12154_v49, %v10730_v45  ;;  %v12116_v62 = vld [vmem:[#allocation2 + $0x34] sm:$0xf0] }
 0x412   : > { %4892 = vst [vmem:[#allocation2 + $0x174] sm:$0xf] %v4684_v23  ;;  %v3983_v42 = vpop.f32.mrf.mxu2  ;;  %v5134_v30 = vrot.slane %v5133_v53, 4  ;;  %v10583_v34 = vor.u32 %v12116_v62, %v10582_v56 }
 0x413   : > { %v4687_v24 = vshll.u32 %v4461_v58, 16  ;;  %v4980_v26 = vsel %vm12815_vm10, %v4461_v58, %v4979_v13  ;;  %v4314_v32 = vadd.f32 %v4240_v20, %v13444_v1 }
 0x414   : > { %6157 = vmatmul.bf16.gmra.mxu1 %v10731_v39  ;;  %4981 = vst [vmem:[#allocation2 + $0x184] sm:$0x1] %v4980_v26  ;;  %v12100_v26 = vld [vmem:[#allocation8 + $0x50] sm:$0xff] }
 0x415   : > { %v4689_v54 = vsel %vm12777_vm9, %v4685_v37, %v4687_v24  ;;  %v5135_v52 = vrot.slane %v4687_v24, 5  ;;  %v4366_v29 = vadd.f32 %v13622_v0, %v4314_v32  ;;  %7133 = vmatpush.bf16.msrb.mxu1 %v12100_v26 }
 0x416   : > { %v4112_v16 = vpop.f32.mrf.mxu3  ;;  %4893 = vst [vmem:[#allocation2 + $0x180] sm:$0x1] %v4689_v54  ;;  %v4244_v17 = vpop.f32.mrf.mxu0  ;;  %v12022_v54 = vld [vmem:[#allocation2 + $0x20] sm:$0xf0] }
 0x417   : > { %v4113_v31 = vadd.f32 %v4112_v16, %v3983_v42  ;;  %v5136_v1 = vsel %vm13524_vm13, %v5134_v30, %v5135_v52  ;;  %v4414_v3 = vmax.f32 %v4366_v29, 0.0  ;;  %6221 = vmatmul.bf16.vlgmr.msrb.gmra.mxu2 %v10579_v5  ;;  %v10970_v30 = vld [vmem:[#allocation2 + $0x18] sm:$0xf]  ;;  %v12119_v5 = vld [vmem:[#allocation2 + $0x4c] sm:$0xf0] }
 0x418   : > { %5254 = vst [vmem:[#allocation2 + $0x17c] sm:$0xf] %v5136_v1 }
 0x419   : > { %v4242_v14 = vadd.f32 %v4241_v51, %v4113_v31  ;;  %v13742_v41 = vpop.f32.mrf.mxu1  ;;  %v4462_v12 = vpack.c.bf16 %v4414_v3, %v4414_v3  ;;  %7007 = vmatmul.bf16.vlgmr.msrb.gmra.mxu0 %v10959_v57  ;;  %v10742_v37 = vld [vmem:[#allocation2 + $0x174] sm:$0xf]  ;;  %v10594_v3 = vld [vmem:[#allocation2 + $0x44] sm:$0xf] }
 0x41a   : > { %v3986_v2 = vpop.f32.mrf.mxu2 }
 0x41b   : > { %v4315_v28 = vadd.f32 %v4242_v14, %v3181_v44  ;;  %6350 = vmatmul.bf16.vlgmr.msrb.gmra.mxu3 %v10583_v34  ;;  %v4691_v47 = vshrl.u32 %v4462_v12, 16  ;;  %v4694_v8 = vshll.u32 %v4462_v12, 16  ;;  %v4983_v35 = vsel %vm12761_vm8, %v4462_v12, %v4982_v40  ;;  %v12117_v40 = vld [vmem:[#allocation2 + $0x40] sm:$0xf] }
 0x41c   : > { %4984 = vst [vmem:[#allocation2 + $0x190] sm:$0xf] %v4983_v35 }
 0x41d   : > { %v4367_v11 = vadd.f32 %v13622_v0, %v4315_v28  ;;  %v4693_v25 = vrot.slane %v4691_v47, 7  ;;  %v5137_v59 = vrot.slane %v4691_v47, 4  ;;  %v5138_v51 = vrot.slane %v4694_v8, 5  ;;  %v12157_v53 = vld [vmem:[#allocation2 + $0x17c] sm:$0xf0]  ;;  %v14915_v47 = vld [vmem:[#allocation61_spill] sm:$0xff] }
 0x41e   : > { %v4115_v23 = vpop.f32.mrf.mxu3  ;;  %v4246_v49 = vpop.f32.mrf.mxu0  ;;  %v10743_v24 = vor.u32 %v12157_v53, %v10742_v37  ;;  %v10971_v28 = vor.u32 %v12022_v54, %v10970_v30  ;;  %v4989_v30 = vld [vmem:[#allocation2 + $0x1b4] sm:$0xf] }
 0x41f   : > { %v4415_v13 = vmax.f32 %v4367_v11, 0.0  ;;  %v4116_v45 = vadd.f32 %v4115_v23, %v3986_v2  ;;  %v4696_v58 = vor.u32 %v4694_v8, %v4693_v25  ;;  %v5139_v20 = vor.u32 %v5138_v51, %v5137_v59  ;;  %v4986_v11 = vld [vmem:[#allocation2 + $0x1a8] sm:$0x1] }
 0x420   : > { %v4697_v56 = vrot.slane %v4693_v25, 4  ;;  %v10595_v25 = vor.u32 %v12119_v5, %v10594_v3 }
 0x421   : > { %v4463_v39 = vpack.c.bf16 %v4415_v13, %v4415_v13  ;;  %v4245_v21 = vadd.f32 %v4244_v17, %v4116_v45  ;;  %v13747_v38 = vpop.f32.mrf.mxu1  ;;  %4894 = vst [vmem:[#allocation2 + $0x18c] sm:$0xe] %v4696_v58  ;;  %v5140_v52 = vrot.slane %v5139_v20, 4  ;;  %v10588_v17 = vld [vmem:[#allocation2 + $0x48] sm:$0xf0] }
 0x422   : > { %v3988_v31 = vpop.f32.mrf.mxu2  ;;  %v10591_v12 = vor.u32 %v12117_v40, %v10588_v17  ;;  %v14916_v17 = vld [vmem:[#allocation65_spill] sm:$0xff]  ;;  %v12025_v40 = vld [vmem:[#allocation2 + $0x38] sm:$0xf0] }
 0x423   : > { %v4699_v32 = vshrl.u32 %v4463_v39, 16  ;;  %v4702_v42 = vshll.u32 %v4463_v39, 16  ;;  %4985 = vst [vmem:[#allocation2 + $0x19c] sm:$0xf] %v4463_v39  ;;  %v4316_v57 = vadd.f32 %v4245_v21, %v14913_v60 }
 0x424   : > { %6162 = vmatmul.bf16.gmra.mxu1 %v10743_v24 }
 0x425   : > { %v4701_v29 = vrot.slane %v4699_v32, 7  ;;  %v5141_v16 = vrot.slane %v4702_v42, 5  ;;  %v4368_v62 = vadd.f32 %v13622_v0, %v4316_v57  ;;  %v5143_v22 = vrot.slane %v4699_v32, 4  ;;  %v14914_v0 = vld [vmem:[#allocation63_spill] sm:$0xff] }
 0x426   : > { %v4117_v1 = vpop.f32.mrf.mxu3  ;;  %v4249_v44 = vpop.f32.mrf.mxu0  ;;  %v3186_v8 = vadd.f32 %v14915_v47, %v14914_v0  ;;  %v10606_v0 = vld [vmem:[#allocation2 + $0x5c] sm:$0xf] }
 0x427   : > { %v4704_v15 = vor.u32 %v4702_v42, %v4701_v29  ;;  %v5142_v63 = vsel %vm13524_vm13, %v5140_v52, %v5141_v16  ;;  %v4416_v14 = vmax.f32 %v4368_v62, 0.0  ;;  %v4118_v34 = vadd.f32 %v4117_v1, %v3988_v31  ;;  %6226 = vmatmul.bf16.gmra.mxu2 %v10591_v12 }
 0x428   : > { %5255 = vst [vmem:[#allocation2 + $0x194] sm:$0xf] %v5142_v63  ;;  %v5144_v59 = vor.u32 %v5143_v22, %v5141_v16  ;;  %v4706_v13 = vrot.slane %v4701_v29, 4  ;;  %v10754_v29 = vld [vmem:[#allocation2 + $0x18c] sm:$0xf] }
 0x429   : > { %v4705_v35 = vsel %vm12777_vm9, %v4697_v56, %v4704_v15  ;;  %v13757_v2 = vpop.f32.mrf.mxu1  ;;  %v4464_v51 = vpack.c.bf16 %v4416_v14, %v4416_v14  ;;  %v4247_v23 = vadd.f32 %v4246_v49, %v4118_v34  ;;  %7012 = vmatmul.bf16.gmra.mxu0 %v10971_v28  ;;  %v13766_v49 = vld [vmem:[%s14764_s2] ss:$0 sm:$0xff]  ;;  %v12122_v56 = vld [vmem:[#allocation2 + $0x64] sm:$0xf0] }
 0x42a   : > { %4895 = vst [vmem:[#allocation2 + $0x198] sm:$0xf] %v4705_v35  ;;  %v3991_v20 = vpop.f32.mrf.mxu2  ;;  %v5145_v39 = vrot.slane %v5144_v59, 4  ;;  %v14917_v59 = vld [vmem:[#allocation66_spill] sm:$0xff] }
 0x42b   : > { %6355 = vmatmul.bf16.gmra.mxu3 %v10595_v25  ;;  %v4708_v45 = vshll.u32 %v4464_v51, 16  ;;  %v4987_v53 = vsel %vm12815_vm10, %v4464_v51, %v4986_v11  ;;  %v4317_v58 = vadd.f32 %v4247_v23, %v3186_v8  ;;  %v12120_v11 = vld [vmem:[#allocation2 + $0x58] sm:$0xf]  ;;  %v10982_v25 = vld [vmem:[#allocation2 + $0x30] sm:$0xf]  ;;  %v14918_v51 = vld [vmem:[#allocation64_spill] sm:$0xff] }
 0x42c   : > { %4988 = vst [vmem:[#allocation2 + $0x1a8] sm:$0x1] %v4987_v53  ;;  %v3191_v23 = vadd.f32 %v14918_v51, %v14917_v59  ;;  %v10983_v53 = vor.u32 %v12025_v40, %v10982_v25  ;;  %v10612_v59 = vld [vmem:[#allocation2 + $0x78] sm:$0xf0]  ;;  %v12028_v51 = vld [vmem:[#allocation2 + $0x50] sm:$0xf0] }
 0x42d   : > { %v4710_v21 = vsel %vm12777_vm9, %v4706_v13, %v4708_v45  ;;  %v5146_v37 = vrot.slane %v4708_v45, 5  ;;  %v4369_v24 = vadd.f32 %v13766_v49, %v4317_v58 }
 0x42e   : > { %v4120_v26 = vpop.f32.mrf.mxu3  ;;  %4896 = vst [vmem:[#allocation2 + $0x1a4] sm:$0x1] %v4710_v21  ;;  %v4251_v42 = vpop.f32.mrf.mxu0 }
 0x42f   : > { %v4121_v32 = vadd.f32 %v4120_v26, %v3991_v20  ;;  %v5147_v60 = vsel %vm13524_vm13, %v5145_v39, %v5146_v37  ;;  %v4417_v57 = vmax.f32 %v4369_v24, 0.0  ;;  %v10607_v37 = vor.u32 %v12122_v56, %v10606_v0  ;;  %v4993_v56 = vld [vmem:[#allocation2 + $0x1cc] sm:$0x1] }
 0x430   : > { %5256 = vst [vmem:[#allocation2 + $0x1a0] sm:$0xf] %v5147_v60 }
 0x431   : > { %v4250_v54 = vadd.f32 %v4249_v44, %v4121_v32  ;;  %v13771_v52 = vpop.f32.mrf.mxu1  ;;  %v12160_v16 = vld [vmem:[#allocation2 + $0x194] sm:$0xf0]  ;;  %v4465_v62 = vpack.c.bf16 %v4417_v57, %v4417_v57  ;;  %v10600_v44 = vld [vmem:[#allocation2 + $0x60] sm:$0xf0] }
 0x432   : > { %v10755_v31 = vor.u32 %v12160_v16, %v10754_v29  ;;  %v3993_v63 = vpop.f32.mrf.mxu2  ;;  %v10603_v45 = vor.u32 %v12120_v11, %v10600_v44 }
 0x433   : > { %v4318_v22 = vadd.f32 %v4250_v54, %v14916_v17  ;;  %v4712_v1 = vshrl.u32 %v4465_v62, 16  ;;  %v4715_v3 = vshll.u32 %v4465_v62, 16  ;;  %v4990_v5 = vsel %vm12761_vm8, %v4465_v62, %v4989_v30 }
 0x434   : > { %6167 = vmatmul.bf16.gmra.mxu1 %v10755_v31  ;;  %4991 = vst [vmem:[#allocation2 + $0x1b4] sm:$0xf] %v4990_v5 }
 0x435   : > { %v4370_v15 = vadd.f32 %v13766_v49, %v4318_v22  ;;  %v4714_v14 = vrot.slane %v4712_v1, 7  ;;  %v5148_v34 = vrot.slane %v4712_v1, 4  ;;  %v5149_v12 = vrot.slane %v4715_v3, 5 }
 0x436   : > { %v4122_v28 = vpop.f32.mrf.mxu3  ;;  %v4254_v35 = vpop.f32.mrf.mxu0 }
 0x437   : > { %v4418_v47 = vmax.f32 %v4370_v15, 0.0  ;;  %v4123_v8 = vadd.f32 %v4122_v28, %v3993_v63  ;;  %v4717_v13 = vor.u32 %v4715_v3, %v4714_v14  ;;  %v5150_v58 = vor.u32 %v5149_v12, %v5148_v34  ;;  %6231 = vmatmul.bf16.gmra.mxu2 %v10603_v45  ;;  %v10766_v63 = vld [vmem:[#allocation2 + $0x1a4] sm:$0xf] }
 0x439   : > { %v4466_v20 = vpack.c.bf16 %v4418_v47, %v4418_v47  ;;  %v4252_v39 = vadd.f32 %v4251_v42, %v4123_v8  ;;  %v13779_v21 = vpop.f32.mrf.mxu1  ;;  %4897 = vst [vmem:[#allocation2 + $0x1b0] sm:$0xe] %v4717_v13  ;;  %7017 = vmatmul.bf16.gmra.mxu0 %v10983_v53  ;;  %v5151_v60 = vrot.slane %v5150_v58, 4  ;;  %v4718_v42 = vrot.slane %v4714_v14, 4  ;;  %v14919_v8 = vld [vmem:[#allocation68_spill] sm:$0xff] }
 0x43a   : > { %v3996_v29 = vpop.f32.mrf.mxu2  ;;  %v12125_v58 = vld [vmem:[#allocation2 + $0x7c] sm:$0xf0] }
 0x43b   : > { %v4720_v24 = vshrl.u32 %v4466_v20, 16  ;;  %v4723_v26 = vshll.u32 %v4466_v20, 16  ;;  %4992 = vst [vmem:[#allocation2 + $0x1c0] sm:$0xf] %v4466_v20  ;;  %v4319_v32 = vadd.f32 %v4252_v39, %v3191_v23  ;;  %6360 = vmatmul.bf16.gmra.mxu3 %v10607_v37  ;;  %v12123_v37 = vld [vmem:[#allocation2 + $0x70] sm:$0xf] }
 0x43d   : > { %v4722_v57 = vrot.slane %v4720_v24, 7  ;;  %v5152_v30 = vrot.slane %v4723_v26, 5  ;;  %v4371_v54 = vadd.f32 %v13766_v49, %v4319_v32  ;;  %v5154_v16 = vrot.slane %v4720_v24, 4  ;;  %v10994_v24 = vld [vmem:[#allocation2 + $0x48] sm:$0xf] }
 0x43e   : > { %v4125_v62 = vpop.f32.mrf.mxu3  ;;  %v4256_v22 = vpop.f32.mrf.mxu0 }
 0x43f   : > { %v4725_v31 = vor.u32 %v4723_v26, %v4722_v57  ;;  %v5153_v17 = vsel %vm13524_vm13, %v5151_v60, %v5152_v30  ;;  %v4419_v1 = vmax.f32 %v4371_v54, 0.0  ;;  %v4126_v3 = vadd.f32 %v4125_v62, %v3996_v29  ;;  %v14920_v54 = vld [vmem:[#allocation69_spill] sm:$0xff]  ;;  %v14921_v29 = vld [vmem:[#allocation67_spill] sm:$0xff] }
 0x440   : > { %5257 = vst [vmem:[#allocation2 + $0x1b8] sm:$0xf] %v5153_v17  ;;  %v12163_v44 = vld [vmem:[#allocation2 + $0x1ac] sm:$0xf0]  ;;  %v5155_v40 = vor.u32 %v5154_v16, %v5152_v30  ;;  %v4727_v28 = vrot.slane %v4722_v57, 4  ;;  %v10615_v60 = vor.u32 %v12123_v37, %v10612_v59  ;;  %v10995_v30 = vor.u32 %v12028_v51, %v10994_v24 }
 0x441   : > { %v4726_v5 = vsel %vm12777_vm9, %v4718_v42, %v4725_v31  ;;  %v13786_v15 = vpop.f32.mrf.mxu1  ;;  %v4467_v34 = vpack.c.bf16 %v4419_v1, %v4419_v1  ;;  %v4255_v14 = vadd.f32 %v4254_v35, %v4126_v3  ;;  %v10767_v12 = vor.u32 %v12163_v44, %v10766_v63  ;;  %v10618_v57 = vld [vmem:[#allocation2 + $0x74] sm:$0xf]  ;;  %v4996_v62 = vld [vmem:[#allocation2 + $0x1d8] sm:$0xf]  ;;  %v12031_v24 = vld [vmem:[#allocation2 + $0x68] sm:$0xf0] }
 0x442   : > { %4898 = vst [vmem:[#allocation2 + $0x1bc] sm:$0xf] %v4726_v5  ;;  %v3998_v25 = vpop.f32.mrf.mxu2  ;;  %v5156_v23 = vrot.slane %v5155_v40, 4  ;;  %v3196_v16 = vadd.f32 %v14921_v29, %v14920_v54  ;;  %v10619_v17 = vor.u32 %v12125_v58, %v10618_v57 }
 0x443   : > { %v4729_v0 = vshll.u32 %v4467_v34, 16  ;;  %v4994_v47 = vsel %vm12815_vm10, %v4467_v34, %v4993_v56  ;;  %v4320_v11 = vadd.f32 %v4255_v14, %v14919_v8 }
 0x444   : > { %6172 = vmatmul.bf16.gmra.mxu1 %v10767_v12  ;;  %4995 = vst [vmem:[#allocation2 + $0x1cc] sm:$0x1] %v4994_v47 }
 0x445   : > { %v4731_v13 = vsel %vm12777_vm9, %v4727_v28, %v4729_v0  ;;  %v5157_v45 = vrot.slane %v4729_v0, 5  ;;  %v4372_v35 = vadd.f32 %v13766_v49, %v4320_v11 }
 0x446   : > { %v4127_v53 = vpop.f32.mrf.mxu3  ;;  %4899 = vst [vmem:[#allocation2 + $0x1c8] sm:$0x1] %v4731_v13  ;;  %v4259_v39 = vpop.f32.mrf.mxu0 }
 0x447   : > { %v4128_v20 = vadd.f32 %v4127_v53, %v3998_v25  ;;  %v5158_v26 = vsel %vm13524_vm13, %v5156_v23, %v5157_v45  ;;  %v4420_v32 = vmax.f32 %v4372_v35, 0.0  ;;  %6236 = vmatmul.bf16.gmra.mxu2 %v10615_v60  ;;  %v12099_v35 = vld [vmem:[#allocation8 + $0x48] sm:$0xff] }
 0x448   : > { %5258 = vst [vmem:[#allocation2 + $0x1c4] sm:$0xf] %v5158_v26  ;;  %7134 = vmatpush.bf16.msrb.mxu1 %v12099_v35 }
 0x449   : > { %v4257_v42 = vadd.f32 %v4256_v22, %v4128_v20  ;;  %v13798_v31 = vpop.f32.mrf.mxu1  ;;  %v4468_v1 = vpack.c.bf16 %v4420_v32, %v4420_v32  ;;  %7022 = vmatmul.bf16.gmra.mxu0 %v10995_v30  ;;  %v10778_v13 = vld [vmem:[#allocation2 + $0x1bc] sm:$0xf] }
 0x44a   : > { %v4001_v40 = vpop.f32.mrf.mxu2  ;;  %v14922_v20 = vld [vmem:[#allocation71_spill] sm:$0xff] }
 0x44b   : > { %v4321_v3 = vadd.f32 %v4257_v42, %v3196_v16  ;;  %6365 = vmatmul.bf16.gmra.mxu3 %v10619_v17  ;;  %v4733_v5 = vshrl.u32 %v4468_v1, 16  ;;  %v4736_v56 = vshll.u32 %v4468_v1, 16  ;;  %v4997_v63 = vsel %vm12761_vm8, %v4468_v1, %v4996_v62  ;;  %v10630_v16 = vld [vmem:[#allocation2 + $0x8c] sm:$0xf]  ;;  %v12128_v62 = vld [vmem:[#allocation2 + $0x94] sm:$0xf0] }
 0x44c   : > { %4998 = vst [vmem:[#allocation2 + $0x1d8] sm:$0xf] %v4997_v63 }
 0x44d   : > { %v4373_v44 = vadd.f32 %v13766_v49, %v4321_v3  ;;  %v4735_v34 = vrot.slane %v4733_v5, 7  ;;  %v5159_v14 = vrot.slane %v4733_v5, 4  ;;  %v5160_v22 = vrot.slane %v4736_v56, 5  ;;  %v12166_v8 = vld [vmem:[#allocation2 + $0x1c4] sm:$0xf0] }
 0x44e   : > { %v4130_v12 = vpop.f32.mrf.mxu3  ;;  %v4261_v47 = vpop.f32.mrf.mxu0  ;;  %v10779_v45 = vor.u32 %v12166_v8, %v10778_v13  ;;  %v12126_v5 = vld [vmem:[#allocation2 + $0x88] sm:$0xf]  ;;  %v5000_v8 = vld [vmem:[#allocation2 + $0x1f0] sm:$0x1] }
 0x44f   : > { %v4421_v28 = vmax.f32 %v4373_v44, 0.0  ;;  %v4131_v0 = vadd.f32 %v4130_v12, %v4001_v40  ;;  %v4738_v11 = vor.u32 %v4736_v56, %v4735_v34  ;;  %v5161_v25 = vor.u32 %v5160_v22, %v5159_v14  ;;  %v11006_v56 = vld [vmem:[#allocation2 + $0x60] sm:$0xf]  ;;  %v14923_v22 = vld [vmem:[#allocation47_spill] sm:$0xff]  ;;  %v14924_v12 = vld [vmem:[#allocation70_spill] sm:$0xff] }
 0x450   : > { %v4739_v42 = vrot.slane %v4735_v34, 4  ;;  %v11007_v14 = vor.u32 %v12031_v24, %v11006_v56 }
 0x451   : > { %v4469_v59 = vpack.c.bf16 %v4421_v28, %v4421_v28  ;;  %v4260_v51 = vadd.f32 %v4259_v39, %v4131_v0  ;;  %v13803_v23 = vpop.f32.mrf.mxu1  ;;  %4900 = vst [vmem:[#allocation2 + $0x1d4] sm:$0xe] %v4738_v11  ;;  %v5162_v26 = vrot.slane %v5161_v25, 4  ;;  %v10624_v39 = vld [vmem:[#allocation2 + $0x90] sm:$0xf0]  ;;  %v3201_v28 = vadd.f32 %v14924_v12, %v14923_v22 }
 0x452   : > { %v4003_v30 = vpop.f32.mrf.mxu2  ;;  %v10627_v40 = vor.u32 %v12126_v5, %v10624_v39  ;;  %v10631_v11 = vor.u32 %v12128_v62, %v10630_v16  ;;  %v5003_v39 = vld [vmem:[#allocation2 + $0x1fc] sm:$0xf]  ;;  %v12034_v12 = vld [vmem:[#allocation2 + $0x80] sm:$0xf0] }
 0x453   : > { %v4741_v53 = vshrl.u32 %v4469_v59, 16  ;;  %v4744_v58 = vshll.u32 %v4469_v59, 16  ;;  %4999 = vst [vmem:[#allocation2 + $0x1e4] sm:$0xf] %v4469_v59  ;;  %v4322_v37 = vadd.f32 %v4260_v51, %v14922_v20 }
 0x454   : > { %6177 = vmatmul.bf16.gmra.mxu1 %v10779_v45 }
 0x455   : > { %v4743_v32 = vrot.slane %v4741_v53, 7  ;;  %v5163_v60 = vrot.slane %v4744_v58, 5  ;;  %v4374_v57 = vadd.f32 %v13766_v49, %v4322_v37  ;;  %v5165_v54 = vrot.slane %v4741_v53, 4 }
 0x456   : > { %v4132_v29 = vpop.f32.mrf.mxu3  ;;  %v4264_v3 = vpop.f32.mrf.mxu0 }
 0x457   : > { %v4746_v17 = vor.u32 %v4744_v58, %v4743_v32  ;;  %v5164_v1 = vsel %vm13524_vm13, %v5162_v26, %v5163_v60  ;;  %v4422_v63 = vmax.f32 %v4374_v57, 0.0  ;;  %v4133_v44 = vadd.f32 %v4132_v29, %v4003_v30  ;;  %6241 = vmatmul.bf16.gmra.mxu2 %v10627_v40  ;;  %v12131_v40 = vld [vmem:[#allocation2 + $0xac] sm:$0xf0] }
 0x458   : > { %5259 = vst [vmem:[#allocation2 + $0x1dc] sm:$0xf] %v5164_v1  ;;  %v5166_v25 = vor.u32 %v5165_v54, %v5163_v60  ;;  %v4748_v13 = vrot.slane %v4743_v32, 4  ;;  %v10790_v16 = vld [vmem:[#allocation2 + $0x1d4] sm:$0xf]  ;;  %v14925_v1 = vld [vmem:[#allocation72_spill] sm:$0xff] }
 0x459   : > { %v4747_v0 = vsel %vm12777_vm9, %v4739_v42, %v4746_v17  ;;  %v13813_v34 = vpop.f32.mrf.mxu1  ;;  %v4470_v59 = vpack.c.bf16 %v4422_v63, %v4422_v63  ;;  %v4262_v51 = vadd.f32 %v4261_v47, %v4133_v44  ;;  %7027 = vmatmul.bf16.gmra.mxu0 %v11007_v14 }
 0x45a   : > { %4901 = vst [vmem:[#allocation2 + $0x1e0] sm:$0xf] %v4747_v0  ;;  %v4006_v58 = vpop.f32.mrf.mxu2  ;;  %v5167_v20 = vrot.slane %v5166_v25, 4  ;;  %v10642_v25 = vld [vmem:[#allocation2 + $0xa4] sm:$0xf] }
 0x45b   : > { %6370 = vmatmul.bf16.gmra.mxu3 %v10631_v11  ;;  %v4750_v45 = vshll.u32 %v4470_v59, 16  ;;  %v5001_v35 = vsel %vm12815_vm10, %v4470_v59, %v5000_v8  ;;  %v4323_v53 = vadd.f32 %v4262_v51, %v3201_v28 }
 0x45c   : > { %5002 = vst [vmem:[#allocation2 + $0x1f0] sm:$0x1] %v5001_v35  ;;  %v11018_v35 = vld [vmem:[#allocation2 + $0x78] sm:$0xf] }
 0x45d   : > { %v4752_v37 = vsel %vm12777_vm9, %v4748_v13, %v4750_v45  ;;  %v5168_v24 = vrot.slane %v4750_v45, 5  ;;  %v4375_v26 = vadd.f32 %v13766_v49, %v4323_v53  ;;  %v12129_v45 = vld [vmem:[#allocation2 + $0xa0] sm:$0xf]  ;;  %v14926_v53 = vld [vmem:[#allocation49_spill] sm:$0xff] }
 0x45e   : > { %v4135_v60 = vpop.f32.mrf.mxu3  ;;  %4902 = vst [vmem:[#allocation2 + $0x1ec] sm:$0x1] %v4752_v37  ;;  %v4266_v57 = vpop.f32.mrf.mxu0 }
 0x45f   : > { %v4136_v47 = vadd.f32 %v4135_v60, %v4006_v58  ;;  %v5169_v32 = vsel %vm13524_vm13, %v5167_v20, %v5168_v24  ;;  %v4423_v30 = vmax.f32 %v4375_v26, 0.0  ;;  %v14927_v58 = vld [vmem:[#allocation48_spill] sm:$0xff]  ;;  %v11019_v26 = vor.u32 %v12034_v12, %v11018_v35 }
 0x460   : > { %5260 = vst [vmem:[#allocation2 + $0x1e8] sm:$0xf] %v5169_v32  ;;  %v3206_v20 = vadd.f32 %v14927_v58, %v14926_v53 }
 0x461   : > { %v4265_v54 = vadd.f32 %v4264_v3, %v4136_v47  ;;  %v13822_v29 = vpop.f32.mrf.mxu1  ;;  %v12169_v62 = vld [vmem:[#allocation2 + $0x1dc] sm:$0xf0]  ;;  %v4471_v42 = vpack.c.bf16 %v4423_v30, %v4423_v30  ;;  %v10636_v3 = vld [vmem:[#allocation2 + $0xa8] sm:$0xf0] }
 0x462   : > { %v10791_v17 = vor.u32 %v12169_v62, %v10790_v16  ;;  %v4008_v22 = vpop.f32.mrf.mxu2  ;;  %v10639_v24 = vor.u32 %v12129_v45, %v10636_v3 }
 0x463   : > { %v4324_v5 = vadd.f32 %v4265_v54, %v14925_v1  ;;  %v4754_v56 = vshrl.u32 %v4471_v42, 16  ;;  %v4757_v63 = vshll.u32 %v4471_v42, 16  ;;  %v5004_v44 = vsel %vm12761_vm8, %v4471_v42, %v5003_v39 }
 0x464   : > { %6182 = vmatmul.bf16.gmra.mxu1 %v10791_v17  ;;  %5005 = vst [vmem:[#allocation2 + $0x1fc] sm:$0xf] %v5004_v44  ;;  %v10643_v39 = vor.u32 %v12131_v40, %v10642_v25 }
 0x465   : > { %v4376_v14 = vadd.f32 %v13766_v49, %v4324_v5  ;;  %v4756_v28 = vrot.slane %v4754_v56, 7  ;;  %v5170_v0 = vrot.slane %v4754_v56, 4  ;;  %v5171_v8 = vrot.slane %v4757_v63, 5  ;;  %v10802_v25 = vld [vmem:[#allocation2 + $0x1ec] sm:$0xf] }
 0x466   : > { %v4137_v11 = vpop.f32.mrf.mxu3  ;;  %v4269_v13 = vpop.f32.mrf.mxu0 }
 0x467   : > { %v4424_v59 = vmax.f32 %v4376_v14, 0.0  ;;  %v4138_v51 = vadd.f32 %v4137_v11, %v4008_v22  ;;  %v4759_v37 = vor.u32 %v4757_v63, %v4756_v28  ;;  %v5172_v60 = vor.u32 %v5171_v8, %v5170_v0  ;;  %6246 = vmatmul.bf16.gmra.mxu2 %v10639_v24  ;;  %v5007_v8 = vld [vmem:[#allocation2 + $0x214] sm:$0x1] }
 0x469   : > { %v4472_v47 = vpack.c.bf16 %v4424_v59, %v4424_v59  ;;  %v4267_v32 = vadd.f32 %v4266_v57, %v4138_v51  ;;  %v13830_v30 = vpop.f32.mrf.mxu1  ;;  %4903 = vst [vmem:[#allocation2 + $0x1f8] sm:$0xe] %v4759_v37  ;;  %7032 = vmatmul.bf16.gmra.mxu0 %v11019_v26  ;;  %v5173_v42 = vrot.slane %v5172_v60, 4  ;;  %v4760_v57 = vrot.slane %v4756_v28, 4  ;;  %v14928_v37 = vld [vmem:[#allocation73_spill] sm:$0xff] }
 0x46a   : > { %v4011_v56 = vpop.f32.mrf.mxu2  ;;  %v10648_v60 = vld [vmem:[#allocation2 + $0xc0] sm:$0xf0] }
 0x46b   : > { %v4762_v54 = vshrl.u32 %v4472_v47, 16  ;;  %v4765_v16 = vshll.u32 %v4472_v47, 16  ;;  %5006 = vst [vmem:[#allocation2 + $0x208] sm:$0xf] %v4472_v47  ;;  %v4325_v62 = vadd.f32 %v4267_v32, %v3206_v20  ;;  %6375 = vmatmul.bf16.gmra.mxu3 %v10643_v39  ;;  %v12037_v47 = vld [vmem:[#allocation2 + $0x98] sm:$0xf0] }
 0x46d   : > { %v4764_v17 = vrot.slane %v4762_v54, 7  ;;  %v5174_v1 = vrot.slane %v4765_v16, 5  ;;  %v4377_v5 = vadd.f32 %v13766_v49, %v4325_v62  ;;  %v5176_v63 = vrot.slane %v4762_v54, 4  ;;  %v12134_v62 = vld [vmem:[#allocation2 + $0xc4] sm:$0xf0] }
 0x46e   : > { %v4140_v44 = vpop.f32.mrf.mxu3  ;;  %v4271_v22 = vpop.f32.mrf.mxu0 }
 0x46f   : > { %v4767_v14 = vor.u32 %v4765_v16, %v4764_v17  ;;  %v5175_v40 = vsel %vm13524_vm13, %v5173_v42, %v5174_v1  ;;  %v4425_v3 = vmax.f32 %v4377_v5, 0.0  ;;  %v4141_v12 = vadd.f32 %v4140_v44, %v4011_v56  ;;  %v11030_v5 = vld [vmem:[#allocation2 + $0x90] sm:$0xf] }
 0x470   : > { %5261 = vst [vmem:[#allocation2 + $0x200] sm:$0xf] %v5175_v40  ;;  %v12172_v59 = vld [vmem:[#allocation2 + $0x1f4] sm:$0xf0]  ;;  %v5177_v51 = vor.u32 %v5176_v63, %v5174_v1  ;;  %v4769_v53 = vrot.slane %v4764_v17, 4 }
 0x471   : > { %v4768_v0 = vsel %vm12777_vm9, %v4760_v57, %v4767_v14  ;;  %v13837_v11 = vpop.f32.mrf.mxu1  ;;  %v4473_v45 = vpack.c.bf16 %v4425_v3, %v4425_v3  ;;  %v4270_v28 = vadd.f32 %v4269_v13, %v4141_v12  ;;  %v10803_v35 = vor.u32 %v12172_v59, %v10802_v25  ;;  %v12132_v1 = vld [vmem:[#allocation2 + $0xb8] sm:$0xf]  ;;  %v10654_v57 = vld [vmem:[#allocation2 + $0xbc] sm:$0xf]  ;;  %v14930_v3 = vld [vmem:[#allocation50_spill] sm:$0xff] }
 0x472   : > { %4904 = vst [vmem:[#allocation2 + $0x204] sm:$0xf] %v4768_v0  ;;  %v4013_v26 = vpop.f32.mrf.mxu2  ;;  %v5178_v32 = vrot.slane %v5177_v51, 4  ;;  %v10651_v44 = vor.u32 %v12132_v1, %v10648_v60  ;;  %v11031_v14 = vor.u32 %v12037_v47, %v11030_v5  ;;  %v14929_v40 = vld [vmem:[#allocation51_spill] sm:$0xff]  ;;  %v5010_v0 = vld [vmem:[#allocation2 + $0x220] sm:$0xf]  ;;  %v10655_v59 = vor.u32 %v12134_v62, %v10654_v57 }
 0x473   : > { %v4771_v58 = vshll.u32 %v4473_v45, 16  ;;  %v5008_v20 = vsel %vm12815_vm10, %v4473_v45, %v5007_v8  ;;  %v4326_v24 = vadd.f32 %v4270_v28, %v14928_v37  ;;  %v3211_v12 = vadd.f32 %v14930_v3, %v14929_v40  ;;  %v14931_v57 = vld [vmem:[#allocation52_spill] sm:$0xff]  ;;  %v12040_v40 = vld [vmem:[#allocation2 + $0xb0] sm:$0xf0] }
 0x474   : > { %6187 = vmatmul.bf16.gmra.mxu1 %v10803_v35  ;;  %5009 = vst [vmem:[#allocation2 + $0x214] sm:$0x1] %v5008_v20 }
 0x475   : > { %v4773_v39 = vsel %vm12777_vm9, %v4769_v53, %v4771_v58  ;;  %v5179_v54 = vrot.slane %v4771_v58, 5  ;;  %v4378_v13 = vadd.f32 %v13766_v49, %v4326_v24 }
 0x476   : > { %v4142_v16 = vpop.f32.mrf.mxu3  ;;  %4905 = vst [vmem:[#allocation2 + $0x210] sm:$0x1] %v4773_v39  ;;  %v4274_v17 = vpop.f32.mrf.mxu0 }
 0x477   : > { %v4143_v42 = vadd.f32 %v4142_v16, %v4013_v26  ;;  %v5180_v56 = vsel %vm13524_vm13, %v5178_v32, %v5179_v54  ;;  %v4426_v63 = vmax.f32 %v4378_v13, 0.0  ;;  %6251 = vmatmul.bf16.gmra.mxu2 %v10651_v44 }
 0x478   : > { %5262 = vst [vmem:[#allocation2 + $0x20c] sm:$0xf] %v5180_v56  ;;  %v12098_v56 = vld [vmem:[#allocation8 + $0x40] sm:$0xff] }
 0x479   : > { %v4272_v8 = vadd.f32 %v4271_v22, %v4143_v42  ;;  %v13849_v25 = vpop.f32.mrf.mxu1  ;;  %v4474_v51 = vpack.c.bf16 %v4426_v63, %v4426_v63  ;;  %7037 = vmatmul.bf16.gmra.mxu0 %v11031_v14  ;;  %v10814_v1 = vld [vmem:[#allocation2 + $0x204] sm:$0xf]  ;;  %7135 = vmatpush.bf16.msrb.mxu1 %v12098_v56 }
 0x47a   : > { %v4016_v20 = vpop.f32.mrf.mxu2 }
 0x47b   : > { %v4327_v45 = vadd.f32 %v4272_v8, %v3211_v12  ;;  %6380 = vmatmul.bf16.gmra.mxu3 %v10655_v59  ;;  %v4775_v28 = vshrl.u32 %v4474_v51, 16  ;;  %v4778_v35 = vshll.u32 %v4474_v51, 16  ;;  %v5011_v53 = vsel %vm12761_vm8, %v4474_v51, %v5010_v0 }
 0x47c   : > { %5012 = vst [vmem:[#allocation2 + $0x220] sm:$0xf] %v5011_v53 }
 0x47d   : > { %v4379_v58 = vadd.f32 %v13766_v49, %v4327_v45  ;;  %v4777_v37 = vrot.slane %v4775_v28, 7  ;;  %v5181_v24 = vrot.slane %v4775_v28, 4  ;;  %v5182_v22 = vrot.slane %v4778_v35, 5  ;;  %v12175_v39 = vld [vmem:[#allocation2 + $0x20c] sm:$0xf0] }
 0x47e   : > { %v4145_v26 = vpop.f32.mrf.mxu3  ;;  %v4276_v32 = vpop.f32.mrf.mxu0  ;;  %v10815_v5 = vor.u32 %v12175_v39, %v10814_v1  ;;  %v10666_v28 = vld [vmem:[#allocation2 + $0xd4] sm:$0xf] }
 0x47f   : > { %v4427_v60 = vmax.f32 %v4379_v58, 0.0  ;;  %v4146_v47 = vadd.f32 %v4145_v26, %v4016_v20  ;;  %v4780_v54 = vor.u32 %v4778_v35, %v4777_v37  ;;  %v5183_v13 = vor.u32 %v5182_v22, %v5181_v24  ;;  %v12137_v35 = vld [vmem:[#allocation2 + $0xdc] sm:$0xf0]  ;;  %v12135_v22 = vld [vmem:[#allocation2 + $0xd0] sm:$0xf] }
 0x480   : > { %v4781_v53 = vrot.slane %v4777_v37, 4  ;;  %v11042_v26 = vld [vmem:[#allocation2 + $0xa8] sm:$0xf]  ;;  %v10667_v56 = vor.u32 %v12137_v35, %v10666_v28 }
 0x481   : > { %v4475_v16 = vpack.c.bf16 %v4427_v60, %v4427_v60  ;;  %v4275_v62 = vadd.f32 %v4274_v17, %v4146_v47  ;;  %v13854_v42 = vpop.f32.mrf.mxu1  ;;  %4906 = vst [vmem:[#allocation2 + $0x21c] sm:$0xe] %v4780_v54  ;;  %v5184_v3 = vrot.slane %v5183_v13, 4  ;;  %v10660_v17 = vld [vmem:[#allocation2 + $0xd8] sm:$0xf0]  ;;  %v11043_v54 = vor.u32 %v12040_v40, %v11042_v26  ;;  %v14932_v13 = vld [vmem:[#allocation74_spill] sm:$0xff] }
 0x482   : > { %v4018_v59 = vpop.f32.mrf.mxu2  ;;  %v10663_v39 = vor.u32 %v12135_v22, %v10660_v17 }
 0x483   : > { %v4783_v63 = vshrl.u32 %v4475_v16, 16  ;;  %v4786_v44 = vshll.u32 %v4475_v16, 16  ;;  %5013 = vst [vmem:[#allocation2 + $0x22c] sm:$0xf] %v4475_v16  ;;  %v4328_v14 = vadd.f32 %v4275_v62, %v14931_v57  ;;  %v14933_v16 = vld [vmem:[#allocation53_spill] sm:$0xff] }
 0x484   : > { %6192 = vmatmul.bf16.gmra.mxu1 %v10815_v5  ;;  %v3216_v62 = vadd.f32 %v14933_v16, %v14932_v13  ;;  %v5014_v5 = vld [vmem:[#allocation2 + $0x238] sm:$0x1] }
 0x485   : > { %v4785_v12 = vrot.slane %v4783_v63, 7  ;;  %v5185_v0 = vrot.slane %v4786_v44, 5  ;;  %v4380_v8 = vadd.f32 %v13766_v49, %v4328_v14  ;;  %v5187_v51 = vrot.slane %v4783_v63, 4 }
 0x486   : > { %v4147_v45 = vpop.f32.mrf.mxu3  ;;  %v4279_v24 = vpop.f32.mrf.mxu0 }
 0x487   : > { %v4788_v58 = vor.u32 %v4786_v44, %v4785_v12  ;;  %v5186_v20 = vsel %vm13524_vm13, %v5184_v3, %v5185_v0  ;;  %v4428_v60 = vmax.f32 %v4380_v8, 0.0  ;;  %v4148_v47 = vadd.f32 %v4147_v45, %v4018_v59  ;;  %6256 = vmatmul.bf16.gmra.mxu2 %v10663_v39 }
 0x488   : > { %5263 = vst [vmem:[#allocation2 + $0x224] sm:$0xf] %v5186_v20  ;;  %v5188_v63 = vor.u32 %v5187_v51, %v5185_v0  ;;  %v4790_v14 = vrot.slane %v4785_v12, 4  ;;  %v10826_v26 = vld [vmem:[#allocation2 + $0x21c] sm:$0xf] }
 0x489   : > { %v4789_v1 = vsel %vm12777_vm9, %v4781_v53, %v4788_v58  ;;  %v13864_v37 = vpop.f32.mrf.mxu1  ;;  %v4476_v44 = vpack.c.bf16 %v4428_v60, %v4428_v60  ;;  %v4277_v57 = vadd.f32 %v4276_v32, %v4148_v47  ;;  %7042 = vmatmul.bf16.gmra.mxu0 %v11043_v54  ;;  %v5017_v58 = vld [vmem:[#allocation2 + $0x244] sm:$0xf]  ;;  %v14934_v54 = vld [vmem:[#allocation54_spill] sm:$0xff] }
 0x48a   : > { %4907 = vst [vmem:[#allocation2 + $0x228] sm:$0xf] %v4789_v1  ;;  %v4021_v59 = vpop.f32.mrf.mxu2  ;;  %v5189_v17 = vrot.slane %v5188_v63, 4 }
 0x48b   : > { %6385 = vmatmul.bf16.gmra.mxu3 %v10667_v56  ;;  %v4792_v3 = vshll.u32 %v4476_v44, 16  ;;  %v5015_v40 = vsel %vm12815_vm10, %v4476_v44, %v5014_v5  ;;  %v4329_v8 = vadd.f32 %v4277_v57, %v3216_v62  ;;  %v12140_v5 = vld [vmem:[#allocation2 + $0xf4] sm:$0xf0]  ;;  %v12043_v44 = vld [vmem:[#allocation2 + $0xc8] sm:$0xf0] }
 0x48c   : > { %5016 = vst [vmem:[#allocation2 + $0x238] sm:$0x1] %v5015_v40 }
 0x48d   : > { %v4794_v45 = vsel %vm12777_vm9, %v4790_v14, %v4792_v3  ;;  %v5190_v28 = vrot.slane %v4792_v3, 5  ;;  %v4381_v0 = vadd.f32 %v13766_v49, %v4329_v8  ;;  %v10678_v8 = vld [vmem:[#allocation2 + $0xec] sm:$0xf] }
 0x48e   : > { %v4150_v51 = vpop.f32.mrf.mxu3  ;;  %4908 = vst [vmem:[#allocation2 + $0x234] sm:$0x1] %v4794_v45  ;;  %v4281_v35 = vpop.f32.mrf.mxu0 }
 0x48f   : > { %v4151_v32 = vadd.f32 %v4150_v51, %v4021_v59  ;;  %v5191_v12 = vsel %vm13524_vm13, %v5189_v17, %v5190_v28  ;;  %v4429_v53 = vmax.f32 %v4381_v0, 0.0  ;;  %v12138_v28 = vld [vmem:[#allocation2 + $0xe8] sm:$0xf]  ;;  %v11054_v0 = vld [vmem:[#allocation2 + $0xc0] sm:$0xf] }
 0x490   : > { %5264 = vst [vmem:[#allocation2 + $0x230] sm:$0xf] %v5191_v12  ;;  %v11055_v12 = vor.u32 %v12043_v44, %v11054_v0 }
 0x491   : > { %v4280_v20 = vadd.f32 %v4279_v24, %v4151_v32  ;;  %v13873_v22 = vpop.f32.mrf.mxu1  ;;  %v12178_v60 = vld [vmem:[#allocation2 + $0x224] sm:$0xf0]  ;;  %v4477_v47 = vpack.c.bf16 %v4429_v53, %v4429_v53  ;;  %v10672_v24 = vld [vmem:[#allocation2 + $0xf0] sm:$0xf0]  ;;  %v14935_v53 = vld [vmem:[#allocation55_spill] sm:$0xff] }
 0x492   : > { %v10827_v39 = vor.u32 %v12178_v60, %v10826_v26  ;;  %v4023_v63 = vpop.f32.mrf.mxu2  ;;  %v10675_v32 = vor.u32 %v12138_v28, %v10672_v24  ;;  %v12113_v28 = vld [vmem:[#allocation8 + $0xb8] sm:$0xff] }
 0x493   : > { %v4330_v13 = vadd.f32 %v4280_v20, %v14934_v54  ;;  %v4796_v16 = vshrl.u32 %v4477_v47, 16  ;;  %v4799_v62 = vshll.u32 %v4477_v47, 16  ;;  %v5018_v1 = vsel %vm12761_vm8, %v4477_v47, %v5017_v58  ;;  %7257 = vmatpush.bf16.msra.mxu2 %v12113_v28 }
 0x494   : > { %6197 = vmatmul.bf16.gmra.mxu1 %v10827_v39  ;;  %5019 = vst [vmem:[#allocation2 + $0x244] sm:$0xf] %v5018_v1  ;;  %v3221_v58 = vadd.f32 %v13637_v50, %v14935_v53  ;;  %v10679_v47 = vor.u32 %v12140_v5, %v10678_v8 }
 0x495   : > { %v4382_v56 = vadd.f32 %v13766_v49, %v4330_v13  ;;  %v4798_v57 = vrot.slane %v4796_v16, 7  ;;  %v5192_v14 = vrot.slane %v4796_v16, 4  ;;  %v5193_v3 = vrot.slane %v4799_v62, 5  ;;  %v12289_v16 = vld [vmem:[#allocation8 + $0x1b8] sm:$0xff] }
 0x496   : > { %v4152_v40 = vpop.f32.mrf.mxu3  ;;  %v7008_v45 = vpop.f32.mrf.mxu0  ;;  %8059 = vmatpush.bf16.msra.mxu3 %v12289_v16 }
 0x497   : > { %v4430_v59 = vmax.f32 %v4382_v56, 0.0  ;;  %v4153_v17 = vadd.f32 %v4152_v40, %v4023_v63  ;;  %v4801_v43 = vor.u32 %v4799_v62, %v4798_v57  ;;  %v5194_v51 = vor.u32 %v5193_v3, %v5192_v14  ;;  %6261 = vmatmul.bf16.gmra.mxu2 %v10675_v32  ;;  %v12297_v32 = vld [vmem:[#allocation8 + $0x1f8] sm:$0xff] }
 0x498   : > { %v4802_v44 = vrot.slane %v4798_v57, 4  ;;  %8188 = vmatpush.bf16.msra.mxu0 %v12297_v32 }
 0x499   : > { %v4478_v20 = vpack.c.bf16 %v4430_v59, %v4430_v59  ;;  %v4282_v26 = vadd.f32 %v4281_v35, %v4153_v17  ;;  %v13881_v60 = vpop.f32.mrf.mxu1  ;;  %4909 = vst [vmem:[#allocation2 + $0x240] sm:$0xe] %v4801_v43  ;;  %7047 = vmatmul.bf16.gmra.mxu0 %v11055_v12  ;;  %v5195_v62 = vrot.slane %v5194_v51, 4  ;;  %v5021_v59 = vld [vmem:[#allocation2 + $0x25c] sm:$0x1] }
 0x49a   : > { %v6222_v24 = vpop.f32.mrf.mxu2  ;;  %v10838_v51 = vld [vmem:[#allocation2 + $0x234] sm:$0xf] }
 0x49b   : > { %v4804_v39 = vshrl.u32 %v4478_v20, 16  ;;  %v4807_v54 = vshll.u32 %v4478_v20, 16  ;;  %5020 = vst [vmem:[#allocation2 + $0x250] sm:$0xf] %v4478_v20  ;;  %v4331_v13 = vadd.f32 %v4282_v26, %v3221_v58  ;;  %6390 = vmatmul.bf16.gmra.mxu3 %v10679_v47  ;;  %v6223_v35 = vadd.f32 %v6222_v24, %v13643_v7  ;;  %v12305_v47 = vld [vmem:[#allocation8 + $0x238] sm:$0xff] }
 0x49c   : > { %8317 = vmatpush.bf16.msra.mxu1 %v12305_v47  ;;  %v11066_v24 = vld [vmem:[#allocation2 + $0xd8] sm:$0xf] }
 0x49d   : > { %v4806_v1 = vrot.slane %v4804_v39, 7  ;;  %v5196_v56 = vrot.slane %v4807_v54, 5  ;;  %v5198_v63 = vrot.slane %v4804_v39, 4  ;;  %v4383_v50 = vadd.f32 %v13766_v49, %v4331_v13  ;;  %v12046_v13 = vld [vmem:[#allocation2 + $0xe0] sm:$0xf0] }
 0x49e   : > { %v6351_v5 = vpop.f32.mrf.mxu3  ;;  %v7010_v40 = vpop.f32.mrf.mxu0 }
 0x49f   : > { %v4809_v14 = vor.u32 %v4807_v54, %v4806_v1  ;;  %v5197_v3 = vsel %vm13524_vm13, %v5195_v62, %v5196_v56  ;;  %v4431_v8 = vmax.f32 %v4383_v50, 0.0  ;;  %v6352_v17 = vadd.f32 %v6351_v5, %v6223_v35  ;;  %v10684_v54 = vld [vmem:[#allocation2 + $0x108] sm:$0xf0]  ;;  %v12143_v50 = vld [vmem:[#allocation2 + $0x10c] sm:$0xf0] }
 0x4a0   : > { %5265 = vst [vmem:[#allocation2 + $0x248] sm:$0xf] %v5197_v3  ;;  %v5199_v49 = vor.u32 %v5198_v63, %v5196_v56  ;;  %v12181_v7 = vld [vmem:[#allocation2 + $0x23c] sm:$0xf0]  ;;  %v4811_v58 = vrot.slane %v4806_v1, 4  ;;  %v11067_v3 = vor.u32 %v12046_v13, %v11066_v24 }
 0x4a1   : > { %v4810_v0 = vsel %vm12777_vm9, %v4802_v44, %v4809_v14  ;;  %v13889_v43 = vpop.f32.mrf.mxu1  ;;  %v4479_v57 = vpack.c.bf16 %v4431_v8, %v4431_v8  ;;  %v10839_v12 = vor.u32 %v12181_v7, %v10838_v51  ;;  %v13891_v53 = vadd.f32 %v7008_v45, %v6352_v17  ;;  %v10690_v14 = vld [vmem:[#allocation2 + $0x104] sm:$0xf]  ;;  %v12144_v13 = vld [vmem:[#allocation2 + $0x118] sm:$0xf] }
 0x4a2   : > { %4910 = vst [vmem:[#allocation2 + $0x24c] sm:$0xf] %v4810_v0  ;;  %v6224_v39 = vpop.f32.mrf.mxu2  ;;  %v5200_v16 = vrot.slane %v5199_v49, 4  ;;  %v10687_v44 = vor.u32 %v12141_v9, %v10684_v54  ;;  %v10691_v8 = vor.u32 %v12143_v50, %v10690_v14  ;;  %v12146_v54 = vld [vmem:[#allocation2 + $0x124] sm:$0xf0] }
 0x4a3   : > { %v4813_v20 = vshll.u32 %v4479_v57, 16  ;;  %v5022_v26 = vsel %vm12815_vm10, %v4479_v57, %v5021_v59  ;;  %v6225_v45 = vadd.f32 %v6224_v39, %v13651_v4  ;;  %v10702_v39 = vld [vmem:[#allocation2 + $0x11c] sm:$0xf]  ;;  %v12018_v24 = vld [vmem:[#allocation2 + $0x4] sm:$0xf] }
 0x4a4   : > { %6202 = vmatmul.bf16.gmra.mxu1 %v10839_v12  ;;  %5023 = vst [vmem:[#allocation2 + $0x25c] sm:$0x1] %v5022_v26  ;;  %v12049_v26 = vld [vmem:[#allocation2 + $0xf8] sm:$0xf0]  ;;  %v10703_v50 = vor.u32 %v12146_v54, %v10702_v39 }
 0x4a5   : > { %v4815_v62 = vsel %vm12777_vm9, %v4811_v58, %v4813_v20  ;;  %v5201_v56 = vrot.slane %v4813_v20, 5  ;;  %v10696_v20 = vld [vmem:[#allocation2 + $0x120] sm:$0xf0] }
 0x4a6   : > { %v6353_v63 = vpop.f32.mrf.mxu3  ;;  %4911 = vst [vmem:[#allocation2 + $0x258] sm:$0x1] %v4815_v62  ;;  %v7013_v1 = vpop.f32.mrf.mxu0 }
 0x4a7   : > { %v5202_v35 = vsel %vm13524_vm13, %v5200_v16, %v5201_v56  ;;  %v6354_v5 = vadd.f32 %v6353_v63, %v6225_v45  ;;  %6266 = vmatmul.bf16.gmra.mxu2 %v10687_v44  ;;  %v11078_v16 = vld [vmem:[#allocation2 + $0xf0] sm:$0xf]  ;;  %v10699_v56 = vor.u32 %v12144_v13, %v10696_v20  ;;  %v12288_v13 = vld [vmem:[#allocation8 + $0x1b0] sm:$0xff] }
 0x4a8   : > { %5266 = vst [vmem:[#allocation2 + $0x254] sm:$0xf] %v5202_v35  ;;  %v11079_v45 = vor.u32 %v12049_v26, %v11078_v16  ;;  %v12147_v20 = vld [vmem:[#allocation2 + $0x130] sm:$0xf]  ;;  %8060 = vmatpush.bf16.msra.mxu3 %v12288_v13 }
 0x4a9   : > { %v13900_v61 = vpop.f32.mrf.mxu1  ;;  %7052 = vmatmul.bf16.gmra.mxu0 %v11067_v3  ;;  %v13902_v4 = vadd.f32 %v7010_v40, %v6354_v5  ;;  %v10850_v32 = vld [vmem:[#allocation2 + $0x24c] sm:$0xf] }
 0x4aa   : > { %v6227_v59 = vpop.f32.mrf.mxu2 }
 0x4ab   : > { %6395 = vmatmul.bf16.gmra.mxu3 %v10691_v8  ;;  %v6228_v17 = vadd.f32 %v6227_v59, %v13661_v36 }
 0x4ad   : > { %v12184_v49 = vld [vmem:[#allocation2 + $0x254] sm:$0xf0] }
 0x4ae   : > { %v6356_v28 = vpop.f32.mrf.mxu3  ;;  %v7015_v0 = vpop.f32.mrf.mxu0  ;;  %v10851_v57 = vor.u32 %v12184_v49, %v10850_v32  ;;  %v12052_v49 = vld [vmem:[#allocation2 + $0x110] sm:$0xf0] }
 0x4af   : > { %v6357_v51 = vadd.f32 %v6356_v28, %v6228_v17  ;;  %v10708_v28 = vld [vmem:[#allocation2 + $0x138] sm:$0xf0]  ;;  %v10714_v32 = vld [vmem:[#allocation2 + $0x134] sm:$0xf] }
 0x4b1   : > { %v13905_v7 = vpop.f32.mrf.mxu1  ;;  %v13907_v12 = vadd.f32 %v7013_v1, %v6357_v51 }
 0x4b2   : > { %v6229_v58 = vpop.f32.mrf.mxu2 }
 0x4b3   : > { %v6230_v40 = vadd.f32 %v6229_v58, %v13667_v33  ;;  %v10960_v33 = vld [vmem:[#allocation2 + $0xc] sm:$0xf0] }
 0x4b4   : > { %6207 = vmatmul.bf16.gmra.mxu1 %v10851_v57  ;;  %v10963_v3 = vor.u32 %v12018_v24, %v10960_v33  ;;  %v12149_v57 = vld [vmem:[#allocation2 + $0x13c] sm:$0xf0]  ;;  %v12112_v24 = vld [vmem:[#allocation8 + $0xb0] sm:$0xff] }
 0x4b5   : > { %v10715_v54 = vor.u32 %v12149_v57, %v10714_v32  ;;  %7258 = vmatpush.bf16.msra.mxu2 %v12112_v24  ;;  %v12150_v32 = vld [vmem:[#allocation2 + $0x148] sm:$0xf]  ;;  %v11102_v57 = vld [vmem:[#allocation2 + $0x120] sm:$0xf] }
 0x4b6   : > { %v6358_v47 = vpop.f32.mrf.mxu3  ;;  %v7018_v36 = vpop.f32.mrf.mxu0 }
 0x4b7   : > { %v6359_v62 = vadd.f32 %v6358_v47, %v6230_v40  ;;  %6271 = vmatmul.bf16.gmra.mxu2 %v10699_v56  ;;  %v10711_v40 = vor.u32 %v12147_v20, %v10708_v28  ;;  %v12055_v28 = vld [vmem:[#allocation2 + $0x128] sm:$0xf0] }
 0x4b9   : > { %v13910_v63 = vpop.f32.mrf.mxu1  ;;  %7057 = vmatmul.bf16.gmra.mxu0 %v11079_v45  ;;  %v13912_v1 = vadd.f32 %v7015_v0, %v6359_v62  ;;  %v12021_v45 = vld [vmem:[#allocation2 + $0x1c] sm:$0xf] }
 0x4ba   : > { %v6232_v9 = vpop.f32.mrf.mxu2 }
 0x4bb   : > { %6400 = vmatmul.bf16.gmra.mxu3 %v10703_v50  ;;  %v6233_v35 = vadd.f32 %v6232_v9, %v13675_v10  ;;  %v11090_v10 = vld [vmem:[#allocation2 + $0x108] sm:$0xf] }
 0x4bc   : > { %v11091_v47 = vor.u32 %v12052_v49, %v11090_v10  ;;  %v10972_v50 = vld [vmem:[#allocation2 + $0x24] sm:$0xf0] }
 0x4be   : > { %v6361_v5 = vpop.f32.mrf.mxu3  ;;  %v7020_v44 = vpop.f32.mrf.mxu0 }
 0x4bf   : > { %v6362_v14 = vadd.f32 %v6361_v5, %v6233_v35  ;;  %v12296_v35 = vld [vmem:[#allocation8 + $0x1f0] sm:$0xff]  ;;  %v10975_v5 = vor.u32 %v12021_v45, %v10972_v50 }
 0x4c0   : > { %8189 = vmatpush.bf16.msra.mxu0 %v12296_v35 }
 0x4c1   : > { %v13915_v8 = vpop.f32.mrf.mxu1  ;;  %v13917_v59 = vadd.f32 %v7018_v36, %v6362_v14 }
 0x4c2   : > { %v6234_v17 = vpop.f32.mrf.mxu2 }
 0x4c3   : > { %v6235_v0 = vadd.f32 %v6234_v17, %v13687_v55  ;;  %v10720_v17 = vld [vmem:[#allocation2 + $0x150] sm:$0xf0] }
 0x4c4   : > { %7136 = vmatmul.bf16.vlgmr.msrb.gmra.mxu1 %v10963_v3  ;;  %v10723_v10 = vor.u32 %v12150_v32, %v10720_v17 }
 0x4c6   : > { %v6363_v51 = vpop.f32.mrf.mxu3  ;;  %v7023_v58 = vpop.f32.mrf.mxu0 }
 0x4c7   : > { %v6364_v26 = vadd.f32 %v6363_v51, %v6235_v0  ;;  %6276 = vmatmul.bf16.gmra.mxu2 %v10711_v40  ;;  %v12152_v0 = vld [vmem:[#allocation2 + $0x154] sm:$0xf0]  ;;  %v11103_v40 = vor.u32 %v12055_v28, %v11102_v57  ;;  %v10738_v28 = vld [vmem:[#allocation2 + $0x164] sm:$0xf] }
 0x4c9   : > { %v13920_v39 = vpop.f32.mrf.mxu1  ;;  %7062 = vmatmul.bf16.gmra.mxu0 %v11091_v47  ;;  %v13922_v36 = vadd.f32 %v7020_v44, %v6364_v26  ;;  %v12304_v44 = vld [vmem:[#allocation8 + $0x230] sm:$0xff]  ;;  %v10726_v26 = vld [vmem:[#allocation2 + $0x14c] sm:$0xf] }
 0x4ca   : > { %v6237_v16 = vpop.f32.mrf.mxu2  ;;  %8318 = vmatpush.bf16.msra.mxu1 %v12304_v44  ;;  %v10727_v47 = vor.u32 %v12152_v0, %v10726_v26  ;;  %v10732_v44 = vld [vmem:[#allocation2 + $0x168] sm:$0xf0]  ;;  %v11114_v0 = vld [vmem:[#allocation2 + $0x138] sm:$0xf] }
 0x4cb   : > { %6405 = vmatmul.bf16.gmra.mxu3 %v10715_v54  ;;  %v6238_v55 = vadd.f32 %v6237_v16, %v13695_v48 }
 0x4ce   : > { %v6366_v62 = vpop.f32.mrf.mxu3  ;;  %v7025_v56 = vpop.f32.mrf.mxu0 }
 0x4cf   : > { %v6367_v9 = vadd.f32 %v6366_v62, %v6238_v55  ;;  %v10984_v62 = vld [vmem:[#allocation2 + $0x3c] sm:$0xf0] }
 0x4d1   : > { %v13925_v33 = vpop.f32.mrf.mxu1  ;;  %v13927_v14 = vadd.f32 %v7023_v58, %v6367_v9  ;;  %v12024_v9 = vld [vmem:[#allocation2 + $0x34] sm:$0xf] }
 0x4d2   : > { %v6239_v3 = vpop.f32.mrf.mxu2  ;;  %v10987_v24 = vor.u32 %v12024_v9, %v10984_v62 }
 0x4d3   : > { %v6240_v48 = vadd.f32 %v6239_v3, %v13706_v27  ;;  %v12058_v3 = vld [vmem:[#allocation2 + $0x140] sm:$0xf0] }
 0x4d4   : > { %7141 = vmatmul.bf16.gmra.mxu1 %v10975_v5 }
 0x4d6   : > { %v6368_v49 = vpop.f32.mrf.mxu3  ;;  %v7028_v51 = vpop.f32.mrf.mxu0 }
 0x4d7   : > { %v6369_v20 = vadd.f32 %v6368_v49, %v6240_v48  ;;  %6281 = vmatmul.bf16.gmra.mxu2 %v10723_v10  ;;  %v12155_v48 = vld [vmem:[#allocation2 + $0x16c] sm:$0xf0]  ;;  %v12153_v49 = vld [vmem:[#allocation2 + $0x160] sm:$0xf] }
 0x4d8   : > { %v10735_v57 = vor.u32 %v12153_v49, %v10732_v44  ;;  %v10739_v26 = vor.u32 %v12155_v48, %v10738_v28  ;;  %v10744_v44 = vld [vmem:[#allocation2 + $0x180] sm:$0xf0]  ;;  %v12158_v28 = vld [vmem:[#allocation2 + $0x184] sm:$0xf0]  ;;  %v12156_v48 = vld [vmem:[#allocation2 + $0x178] sm:$0xf] }
 0x4d9   : > { %v13930_v58 = vpop.f32.mrf.mxu1  ;;  %7067 = vmatmul.bf16.gmra.mxu0 %v11103_v40  ;;  %v13932_v54 = vadd.f32 %v7025_v56, %v6369_v20  ;;  %v11115_v20 = vor.u32 %v12058_v3, %v11114_v0  ;;  %v12061_v3 = vld [vmem:[#allocation2 + $0x158] sm:$0xf0]  ;;  %v11126_v49 = vld [vmem:[#allocation2 + $0x150] sm:$0xf] }
 0x4da   : > { %v6242_v13 = vpop.f32.mrf.mxu2 }
 0x4db   : > { %6410 = vmatmul.bf16.gmra.mxu3 %v10727_v47  ;;  %v6243_v27 = vadd.f32 %v6242_v13, %v13715_v46 }
 0x4de   : > { %v6371_v16 = vpop.f32.mrf.mxu3  ;;  %v7030_v55 = vpop.f32.mrf.mxu0 }
 0x4df   : > { %v6372_v45 = vadd.f32 %v6371_v16, %v6243_v27  ;;  %v10996_v27 = vld [vmem:[#allocation2 + $0x54] sm:$0xf0] }
 0x4e1   : > { %v13935_v50 = vpop.f32.mrf.mxu1  ;;  %v13937_v35 = vadd.f32 %v7028_v51, %v6372_v45  ;;  %v12027_v45 = vld [vmem:[#allocation2 + $0x4c] sm:$0xf] }
 0x4e2   : > { %v6244_v5 = vpop.f32.mrf.mxu2  ;;  %v10999_v9 = vor.u32 %v12027_v45, %v10996_v27 }
 0x4e3   : > { %v6245_v56 = vadd.f32 %v6244_v5, %v13723_v19 }
 0x4e4   : > { %7146 = vmatmul.bf16.gmra.mxu1 %v10987_v24 }
 0x4e6   : > { %v6373_v17 = vpop.f32.mrf.mxu3  ;;  %v7033_v46 = vpop.f32.mrf.mxu0 }
 0x4e7   : > { %v6374_v32 = vadd.f32 %v6373_v17, %v6245_v56  ;;  %6286 = vmatmul.bf16.gmra.mxu2 %v10735_v57  ;;  %v10750_v17 = vld [vmem:[#allocation2 + $0x17c] sm:$0xf]  ;;  %v11127_v57 = vor.u32 %v12061_v3, %v11126_v49  ;;  %v12295_v3 = vld [vmem:[#allocation8 + $0x1e8] sm:$0xff] }
 0x4e8   : > { %8190 = vmatpush.bf16.msra.mxu0 %v12295_v3 }
 0x4e9   : > { %v13940_v10 = vpop.f32.mrf.mxu1  ;;  %7072 = vmatmul.bf16.gmra.mxu0 %v11115_v20  ;;  %v13942_v51 = vadd.f32 %v7030_v55, %v6374_v32  ;;  %v10747_v32 = vor.u32 %v12156_v48, %v10744_v44  ;;  %v12030_v44 = vld [vmem:[#allocation2 + $0x64] sm:$0xf]  ;;  %v12064_v48 = vld [vmem:[#allocation2 + $0x170] sm:$0xf0] }
 0x4ea   : > { %v6247_v40 = vpop.f32.mrf.mxu2 }
 0x4eb   : > { %6415 = vmatmul.bf16.gmra.mxu3 %v10739_v26  ;;  %v6248_v19 = vadd.f32 %v6247_v40, %v13730_v6  ;;  %v10751_v26 = vor.u32 %v12158_v28, %v10750_v17  ;;  %v12287_v40 = vld [vmem:[#allocation8 + $0x1a8] sm:$0xff]  ;;  %v10756_v28 = vld [vmem:[#allocation2 + $0x198] sm:$0xf0] }
 0x4ec   : > { %8061 = vmatpush.bf16.msra.mxu3 %v12287_v40 }
 0x4ee   : > { %v6376_v47 = vpop.f32.mrf.mxu3  ;;  %v7035_v13 = vpop.f32.mrf.mxu0 }
 0x4ef   : > { %v6377_v16 = vadd.f32 %v6376_v47, %v6248_v19 }
 0x4f1   : > { %v13945_v62 = vpop.f32.mrf.mxu1  ;;  %v13947_v24 = vadd.f32 %v7033_v46, %v6377_v16  ;;  %v11008_v16 = vld [vmem:[#allocation2 + $0x6c] sm:$0xf0] }
 0x4f2   : > { %v6249_v5 = vpop.f32.mrf.mxu2 }
 0x4f3   : > { %v6250_v55 = vadd.f32 %v6249_v5, %v13742_v41 }
 0x4f4   : > { %7151 = vmatmul.bf16.gmra.mxu1 %v10999_v9  ;;  %v12111_v9 = vld [vmem:[#allocation8 + $0xa8] sm:$0xff] }
 0x4f5   : > { %7259 = vmatpush.bf16.msra.mxu2 %v12111_v9 }
 0x4f6   : > { %v6378_v56 = vpop.f32.mrf.mxu3  ;;  %v7038_v6 = vpop.f32.mrf.mxu0 }
 0x4f7   : > { %v6379_v0 = vadd.f32 %v6378_v56, %v6250_v55  ;;  %6291 = vmatmul.bf16.gmra.mxu2 %v10747_v32  ;;  %v11011_v55 = vor.u32 %v12030_v44, %v11008_v16 }
 0x4f9   : > { %v13950_v20 = vpop.f32.mrf.mxu1  ;;  %7077 = vmatmul.bf16.gmra.mxu0 %v11127_v57  ;;  %v13952_v46 = vadd.f32 %v7035_v13, %v6379_v0  ;;  %v12303_v13 = vld [vmem:[#allocation8 + $0x228] sm:$0xff]  ;;  %v12161_v0 = vld [vmem:[#allocation2 + $0x19c] sm:$0xf0] }
 0x4fa   : > { %v6252_v19 = vpop.f32.mrf.mxu2  ;;  %8319 = vmatpush.bf16.msra.mxu1 %v12303_v13  ;;  %v12159_v57 = vld [vmem:[#allocation2 + $0x190] sm:$0xf] }
 0x4fb   : > { %6420 = vmatmul.bf16.gmra.mxu3 %v10751_v26  ;;  %v6253_v41 = vadd.f32 %v6252_v19, %v13747_v38  ;;  %v11138_v26 = vld [vmem:[#allocation2 + $0x168] sm:$0xf]  ;;  %v10759_v19 = vor.u32 %v12159_v57, %v10756_v28  ;;  %v12033_v28 = vld [vmem:[#allocation2 + $0x7c] sm:$0xf]  ;;  %v12067_v57 = vld [vmem:[#allocation2 + $0x188] sm:$0xf0] }
 0x4fe   : > { %v6381_v47 = vpop.f32.mrf.mxu3  ;;  %v7040_v27 = vpop.f32.mrf.mxu0 }
 0x4ff   : > { %v6382_v45 = vadd.f32 %v6381_v47, %v6253_v41  ;;  %v10762_v41 = vld [vmem:[#allocation2 + $0x194] sm:$0xf]  ;;  %v11139_v47 = vor.u32 %v12064_v48, %v11138_v26 }
 0x500   : > { %v10763_v16 = vor.u32 %v12161_v0, %v10762_v41  ;;  %v10768_v0 = vld [vmem:[#allocation2 + $0x1b0] sm:$0xf0]  ;;  %v12162_v41 = vld [vmem:[#allocation2 + $0x1a8] sm:$0xf] }
 0x501   : > { %v13955_v5 = vpop.f32.mrf.mxu1  ;;  %v13957_v56 = vadd.f32 %v7038_v6, %v6382_v45 }
 0x502   : > { %v6254_v17 = vpop.f32.mrf.mxu2 }
 0x503   : > { %v6255_v38 = vadd.f32 %v6254_v17, %v13757_v2 }
 0x504   : > { %7156 = vmatmul.bf16.gmra.mxu1 %v11011_v55  ;;  %v11020_v55 = vld [vmem:[#allocation2 + $0x84] sm:$0xf0] }
 0x506   : > { %v6383_v49 = vpop.f32.mrf.mxu3  ;;  %v7043_v32 = vpop.f32.mrf.mxu0 }
 0x507   : > { %v6384_v40 = vadd.f32 %v6383_v49, %v6255_v38  ;;  %6296 = vmatmul.bf16.gmra.mxu2 %v10759_v19  ;;  %v11023_v38 = vor.u32 %v12033_v28, %v11020_v55  ;;  %v12164_v19 = vld [vmem:[#allocation2 + $0x1b4] sm:$0xf0] }
 0x509   : > { %v13960_v6 = vpop.f32.mrf.mxu1  ;;  %7082 = vmatmul.bf16.gmra.mxu0 %v11139_v47  ;;  %v13962_v45 = vadd.f32 %v7040_v27, %v6384_v40  ;;  %v10774_v40 = vld [vmem:[#allocation2 + $0x1ac] sm:$0xf]  ;;  %v11150_v47 = vld [vmem:[#allocation2 + $0x180] sm:$0xf] }
 0x50a   : > { %v6257_v9 = vpop.f32.mrf.mxu2  ;;  %v10775_v55 = vor.u32 %v12164_v19, %v10774_v40  ;;  %v10780_v40 = vld [vmem:[#allocation2 + $0x1c8] sm:$0xf0]  ;;  %v12070_v19 = vld [vmem:[#allocation2 + $0x1a0] sm:$0xf0] }
 0x50b   : > { %6425 = vmatmul.bf16.gmra.mxu3 %v10763_v16  ;;  %v6258_v2 = vadd.f32 %v6257_v9, %v13771_v52  ;;  %v10771_v9 = vor.u32 %v12162_v41, %v10768_v0 }
 0x50e   : > { %v6386_v44 = vpop.f32.mrf.mxu3  ;;  %v7045_v3 = vpop.f32.mrf.mxu0 }
 0x50f   : > { %v6387_v13 = vadd.f32 %v6386_v44, %v6258_v2  ;;  %v11151_v2 = vor.u32 %v12067_v57, %v11150_v47  ;;  %v10786_v47 = vld [vmem:[#allocation2 + $0x1c4] sm:$0xf] }
 0x511   : > { %v13965_v17 = vpop.f32.mrf.mxu1  ;;  %v13967_v48 = vadd.f32 %v7043_v32, %v6387_v13 }
 0x512   : > { %14936 = vst [vmem:[#allocation17_spill] sm:$0xff] %v13965_v17  ;;  %v6259_v49 = vpop.f32.mrf.mxu2 }
 0x513   : > { %v6260_v27 = vadd.f32 %v6259_v49, %v13779_v21  ;;  %v11032_v49 = vld [vmem:[#allocation2 + $0x9c] sm:$0xf0] }
 0x514   : > { %7161 = vmatmul.bf16.gmra.mxu1 %v11023_v38 }
 0x516   : > { %v6388_v26 = vpop.f32.mrf.mxu3  ;;  %v7048_v52 = vpop.f32.mrf.mxu0 }
 0x517   : > { %v6389_v16 = vadd.f32 %v6388_v26, %v6260_v27  ;;  %6301 = vmatmul.bf16.gmra.mxu2 %v10771_v9  ;;  %v12036_v27 = vld [vmem:[#allocation2 + $0x94] sm:$0xf]  ;;  %v12165_v9 = vld [vmem:[#allocation2 + $0x1c0] sm:$0xf] }
 0x518   : > { %v11035_v0 = vor.u32 %v12036_v27, %v11032_v49 }
 0x519   : > { %v13970_v44 = vpop.f32.mrf.mxu1  ;;  %7087 = vmatmul.bf16.gmra.mxu0 %v11151_v2  ;;  %v13972_v32 = vadd.f32 %v7045_v3, %v6389_v16  ;;  %v12167_v16 = vld [vmem:[#allocation2 + $0x1cc] sm:$0xf0]  ;;  %v11162_v2 = vld [vmem:[#allocation2 + $0x198] sm:$0xf] }
 0x51a   : > { %14937 = vst [vmem:[#allocation18_spill] sm:$0xff] %v13970_v44  ;;  %v6262_v13 = vpop.f32.mrf.mxu2  ;;  %v10787_v49 = vor.u32 %v12167_v16, %v10786_v47  ;;  %v12294_v47 = vld [vmem:[#allocation8 + $0x1e0] sm:$0xff] }
 0x51b   : > { %6430 = vmatmul.bf16.gmra.mxu3 %v10775_v55  ;;  %v6263_v21 = vadd.f32 %v6262_v13, %v13786_v15  ;;  %v10783_v13 = vor.u32 %v12165_v9, %v10780_v40  ;;  %8191 = vmatpush.bf16.msra.mxu0 %v12294_v47 }
 0x51e   : > { %v6391_v28 = vpop.f32.mrf.mxu3  ;;  %v7050_v38 = vpop.f32.mrf.mxu0 }
 0x51f   : > { %v6392_v18 = vadd.f32 %v6391_v28, %v6263_v21  ;;  %v11163_v21 = vor.u32 %v12070_v19, %v11162_v2  ;;  %v12039_v19 = vld [vmem:[#allocation2 + $0xac] sm:$0xf]  ;;  %v10792_v2 = vld [vmem:[#allocation2 + $0x1e0] sm:$0xf0] }
 0x521   : > { %v13975_v17 = vpop.f32.mrf.mxu1  ;;  %v13977_v57 = vadd.f32 %v7048_v52, %v6392_v18  ;;  %v12286_v52 = vld [vmem:[#allocation8 + $0x1a0] sm:$0xff] }
 0x522   : > { %14938 = vst [vmem:[#allocation57_spill] sm:$0xff] %v13975_v17  ;;  %v6264_v26 = vpop.f32.mrf.mxu2  ;;  %8062 = vmatpush.bf16.msra.mxu3 %v12286_v52  ;;  %v11044_v17 = vld [vmem:[#allocation2 + $0xb4] sm:$0xf0] }
 0x523   : > { %v6265_v3 = vadd.f32 %v6264_v26, %v13798_v31  ;;  %v12168_v52 = vld [vmem:[#allocation2 + $0x1d8] sm:$0xf] }
 0x524   : > { %7166 = vmatmul.bf16.gmra.mxu1 %v11035_v0 }
 0x526   : > { %v6393_v41 = vpop.f32.mrf.mxu3  ;;  %v7053_v15 = vpop.f32.mrf.mxu0 }
 0x527   : > { %v6394_v55 = vadd.f32 %v6393_v41, %v6265_v3  ;;  %6306 = vmatmul.bf16.gmra.mxu2 %v10783_v13  ;;  %v12110_v3 = vld [vmem:[#allocation8 + $0xa0] sm:$0xff]  ;;  %v11047_v41 = vor.u32 %v12039_v19, %v11044_v17  ;;  %v10795_v17 = vor.u32 %v12168_v52, %v10792_v2  ;;  %v12076_v52 = vld [vmem:[#allocation2 + $0x1d0] sm:$0xf0] }
 0x528   : > { %7260 = vmatpush.bf16.msra.mxu2 %v12110_v3 }
 0x529   : > { %v13980_v28 = vpop.f32.mrf.mxu1  ;;  %7092 = vmatmul.bf16.gmra.mxu0 %v11163_v21  ;;  %v13982_v18 = vadd.f32 %v7050_v38, %v6394_v55  ;;  %v12302_v38 = vld [vmem:[#allocation8 + $0x220] sm:$0xff]  ;;  %v12073_v55 = vld [vmem:[#allocation2 + $0x1b8] sm:$0xf0] }
 0x52a   : > { %14939 = vst [vmem:[#allocation58_spill] sm:$0xff] %v13980_v28  ;;  %v6267_v27 = vpop.f32.mrf.mxu2  ;;  %v12170_v21 = vld [vmem:[#allocation2 + $0x1e4] sm:$0xf0]  ;;  %8320 = vmatpush.bf16.msra.mxu1 %v12302_v38 }
 0x52b   : > { %6435 = vmatmul.bf16.gmra.mxu3 %v10787_v49  ;;  %v6268_v31 = vadd.f32 %v6267_v27, %v13803_v23  ;;  %v11174_v27 = vld [vmem:[#allocation2 + $0x1b0] sm:$0xf] }
 0x52c   : > { %v11175_v3 = vor.u32 %v12073_v55, %v11174_v27 }
 0x52e   : > { %v6396_v0 = vpop.f32.mrf.mxu3  ;;  %v7055_v26 = vpop.f32.mrf.mxu0 }
 0x52f   : > { %v6397_v44 = vadd.f32 %v6396_v0, %v6268_v31  ;;  %v10798_v0 = vld [vmem:[#allocation2 + $0x1dc] sm:$0xf] }
 0x531   : > { %v13985_v40 = vpop.f32.mrf.mxu1  ;;  %v13987_v16 = vadd.f32 %v7053_v15, %v6397_v44  ;;  %v10799_v15 = vor.u32 %v12170_v21, %v10798_v0 }
 0x532   : > { %14940 = vst [vmem:[#allocation60_spill] sm:$0xff] %v13985_v40  ;;  %v6269_v9 = vpop.f32.mrf.mxu2 }
 0x533   : > { %v6270_v23 = vadd.f32 %v6269_v9, %v13813_v34  ;;  %v11056_v9 = vld [vmem:[#allocation2 + $0xcc] sm:$0xf0] }
 0x534   : > { %7171 = vmatmul.bf16.gmra.mxu1 %v11047_v41 }
 0x536   : > { %v6398_v13 = vpop.f32.mrf.mxu3  ;;  %v7058_v49 = vpop.f32.mrf.mxu0 }
 0x537   : > { %v6399_v31 = vadd.f32 %v6398_v13, %v6270_v23  ;;  %6311 = vmatmul.bf16.gmra.mxu2 %v10795_v17  ;;  %v12042_v23 = vld [vmem:[#allocation2 + $0xc4] sm:$0xf]  ;;  %v12173_v17 = vld [vmem:[#allocation2 + $0x1fc] sm:$0xf0] }
 0x538   : > { %v11059_v55 = vor.u32 %v12042_v23, %v11056_v9 }
 0x539   : > { %v13990_v44 = vpop.f32.mrf.mxu1  ;;  %7097 = vmatmul.bf16.gmra.mxu0 %v11175_v3  ;;  %v13992_v19 = vadd.f32 %v7055_v26, %v6399_v31  ;;  %v10804_v26 = vld [vmem:[#allocation2 + $0x1f8] sm:$0xf0]  ;;  %v12171_v3 = vld [vmem:[#allocation2 + $0x1f0] sm:$0xf] }
 0x53a   : > { %v6272_v41 = vpop.f32.mrf.mxu2 }
 0x53b   : > { %6440 = vmatmul.bf16.gmra.mxu3 %v10799_v15  ;;  %v6273_v34 = vadd.f32 %v6272_v41, %v13822_v29  ;;  %v10810_v29 = vld [vmem:[#allocation2 + $0x1f4] sm:$0xf]  ;;  %v11186_v15 = vld [vmem:[#allocation2 + $0x1c8] sm:$0xf] }
 0x53e   : > { %v6401_v47 = vpop.f32.mrf.mxu3  ;;  %v7060_v38 = vpop.f32.mrf.mxu0 }
 0x53f   : > { %v6402_v40 = vadd.f32 %v6401_v47, %v6273_v34  ;;  %v10807_v34 = vor.u32 %v12171_v3, %v10804_v26  ;;  %v11187_v47 = vor.u32 %v12076_v52, %v11186_v15  ;;  %v12045_v26 = vld [vmem:[#allocation2 + $0xdc] sm:$0xf] }
 0x541   : > { %v7137_v28 = vpop.f32.mrf.mxu1  ;;  %v13998_v13 = vadd.f32 %v7058_v49, %v6402_v40 }
 0x542   : > { %v13996_v2 = vadd.f32 %v7137_v28, %v13891_v53  ;;  %v6274_v21 = vpop.f32.mrf.mxu2  ;;  %v10811_v28 = vor.u32 %v12173_v17, %v10810_v29  ;;  %v12079_v17 = vld [vmem:[#allocation2 + $0x1e8] sm:$0xf0] }
 0x543   : > { %v6275_v27 = vadd.f32 %v6274_v21, %v13830_v30  ;;  %v11068_v21 = vld [vmem:[#allocation2 + $0xe4] sm:$0xf0] }
 0x544   : > { %14941 = vst [vmem:[#allocation59_spill] sm:$0xff] %v13996_v2  ;;  %7176 = vmatmul.bf16.gmra.mxu1 %v11059_v55 }
 0x546   : > { %v6403_v31 = vpop.f32.mrf.mxu3  ;;  %v7063_v0 = vpop.f32.mrf.mxu0 }
 0x547   : > { %v6404_v41 = vadd.f32 %v6403_v31, %v6275_v27  ;;  %6316 = vmatmul.bf16.gmra.mxu2 %v10807_v34  ;;  %v11071_v31 = vor.u32 %v12045_v26, %v11068_v21 }
 0x549   : > { %v7139_v53 = vpop.f32.mrf.mxu1  ;;  %7102 = vmatmul.bf16.gmra.mxu0 %v11187_v47  ;;  %v14004_v49 = vadd.f32 %v7060_v38, %v6404_v41  ;;  %v10816_v38 = vld [vmem:[#allocation2 + $0x210] sm:$0xf0]  ;;  %v12176_v41 = vld [vmem:[#allocation2 + $0x214] sm:$0xf0]  ;;  %v12174_v47 = vld [vmem:[#allocation2 + $0x208] sm:$0xf] }
 0x54a   : > { %v14002_v40 = vadd.f32 %v7139_v53, %v13902_v4  ;;  %v6277_v30 = vpop.f32.mrf.mxu2  ;;  %v11198_v53 = vld [vmem:[#allocation2 + $0x1e0] sm:$0xf] }
 0x54b   : > { %6445 = vmatmul.bf16.gmra.mxu3 %v10811_v28  ;;  %v6278_v9 = vadd.f32 %v6277_v30, %v13837_v11  ;;  %v10822_v11 = vld [vmem:[#allocation2 + $0x20c] sm:$0xf]  ;;  %v10819_v30 = vor.u32 %v12174_v47, %v10816_v38  ;;  %v12301_v47 = vld [vmem:[#allocation8 + $0x218] sm:$0xff] }
 0x54c   : > { %8321 = vmatpush.bf16.msra.mxu1 %v12301_v47  ;;  %v11092_v47 = vld [vmem:[#allocation2 + $0x114] sm:$0xf0] }
 0x54e   : > { %v6406_v23 = vpop.f32.mrf.mxu3  ;;  %v7065_v55 = vpop.f32.mrf.mxu0 }
 0x54f   : > { %v6407_v2 = vadd.f32 %v6406_v23, %v6278_v9  ;;  %v11199_v9 = vor.u32 %v12079_v17, %v11198_v53  ;;  %v10823_v23 = vor.u32 %v12176_v41, %v10822_v11  ;;  %v12109_v17 = vld [vmem:[#allocation8 + $0x98] sm:$0xff] }
 0x550   : > { %7261 = vmatpush.bf16.msra.mxu2 %v12109_v17 }
 0x551   : > { %v7142_v27 = vpop.f32.mrf.mxu1  ;;  %v14010_v4 = vadd.f32 %v7063_v0, %v6407_v2 }
 0x552   : > { %v14008_v52 = vadd.f32 %v7142_v27, %v13907_v12  ;;  %v6279_v29 = vpop.f32.mrf.mxu2 }
 0x553   : > { %v6280_v3 = vadd.f32 %v6279_v29, %v13849_v25  ;;  %v12285_v25 = vld [vmem:[#allocation8 + $0x198] sm:$0xff] }
 0x554   : > { %7181 = vmatmul.bf16.gmra.mxu1 %v11071_v31  ;;  %8063 = vmatpush.bf16.msra.mxu3 %v12285_v25  ;;  %v11080_v29 = vld [vmem:[#allocation2 + $0xfc] sm:$0xf0] }
 0x555   : > { %v12177_v25 = vld [vmem:[#allocation2 + $0x220] sm:$0xf] }
 0x556   : > { %v6408_v15 = vpop.f32.mrf.mxu3  ;;  %v7068_v34 = vpop.f32.mrf.mxu0 }
 0x557   : > { %v6409_v28 = vadd.f32 %v6408_v15, %v6280_v3  ;;  %6321 = vmatmul.bf16.gmra.mxu2 %v10819_v30  ;;  %v12048_v15 = vld [vmem:[#allocation2 + $0xf4] sm:$0xf] }
 0x558   : > { %v11083_v11 = vor.u32 %v12048_v15, %v11080_v29 }
 0x559   : > { %v7144_v12 = vpop.f32.mrf.mxu1  ;;  %7107 = vmatmul.bf16.gmra.mxu0 %v11199_v9  ;;  %v14016_v0 = vadd.f32 %v7065_v55, %v6409_v28  ;;  %v12293_v55 = vld [vmem:[#allocation8 + $0x1d8] sm:$0xff] }
 0x55a   : > { %v14014_v2 = vadd.f32 %v7144_v12, %v13912_v1  ;;  %v6282_v21 = vpop.f32.mrf.mxu2  ;;  %8192 = vmatpush.bf16.msra.mxu0 %v12293_v55  ;;  %v12082_v28 = vld [vmem:[#allocation2 + $0x200] sm:$0xf0]  ;;  %v12179_v12 = vld [vmem:[#allocation2 + $0x22c] sm:$0xf0] }
 0x55b   : > { %6450 = vmatmul.bf16.gmra.mxu3 %v10823_v23  ;;  %v6283_v27 = vadd.f32 %v6282_v21, %v13854_v42  ;;  %v10828_v42 = vld [vmem:[#allocation2 + $0x228] sm:$0xf0] }
 0x55e   : > { %v6411_v26 = vpop.f32.mrf.mxu3  ;;  %v7070_v31 = vpop.f32.mrf.mxu0 }
 0x55f   : > { %v6412_v38 = vadd.f32 %v6411_v26, %v6283_v27  ;;  %v10831_v27 = vor.u32 %v12177_v25, %v10828_v42  ;;  %v10834_v26 = vld [vmem:[#allocation2 + $0x224] sm:$0xf]  ;;  %v12108_v42 = vld [vmem:[#allocation8 + $0x90] sm:$0xff] }
 0x560   : > { %7262 = vmatpush.bf16.msra.mxu2 %v12108_v42 }
 0x561   : > { %v7147_v3 = vpop.f32.mrf.mxu1  ;;  %v14022_v41 = vadd.f32 %v7068_v34, %v6412_v38  ;;  %v10835_v38 = vor.u32 %v12179_v12, %v10834_v26  ;;  %v12051_v12 = vld [vmem:[#allocation2 + $0x10c] sm:$0xf]  ;;  %v10840_v26 = vld [vmem:[#allocation2 + $0x240] sm:$0xf0] }
 0x562   : > { %v14020_v1 = vadd.f32 %v7147_v3, %v13917_v59  ;;  %v6284_v53 = vpop.f32.mrf.mxu2  ;;  %v11210_v59 = vld [vmem:[#allocation2 + $0x1f8] sm:$0xf]  ;;  %v11095_v25 = vor.u32 %v12051_v12, %v11092_v47  ;;  %v11222_v47 = vld [vmem:[#allocation2 + $0x210] sm:$0xf] }
 0x563   : > { %v6285_v30 = vadd.f32 %v6284_v53, %v13864_v37  ;;  %v11211_v29 = vor.u32 %v12082_v28, %v11210_v59  ;;  %v12292_v28 = vld [vmem:[#allocation8 + $0x1d0] sm:$0xff]  ;;  %v12283_v59 = vld [vmem:[#allocation8 + $0x188] sm:$0xff] }
 0x564   : > { %7186 = vmatmul.bf16.gmra.mxu1 %v11083_v11  ;;  %8193 = vmatpush.bf16.msra.mxu0 %v12292_v28  ;;  %v12282_v28 = vld [vmem:[#allocation8 + $0x180] sm:$0xff] }
 0x566   : > { %v6413_v9 = vpop.f32.mrf.mxu3  ;;  %v7073_v23 = vpop.f32.mrf.mxu0 }
 0x567   : > { %v6414_v21 = vadd.f32 %v6413_v9, %v6285_v30  ;;  %6326 = vmatmul.bf16.gmra.mxu2 %v10831_v27  ;;  %v12284_v30 = vld [vmem:[#allocation8 + $0x190] sm:$0xff] }
 0x568   : > { %8064 = vmatpush.bf16.msra.mxu3 %v12284_v30  ;;  %v12106_v30 = vld [vmem:[#allocation8 + $0x80] sm:$0xff] }
 0x569   : > { %v7149_v34 = vpop.f32.mrf.mxu1  ;;  %7112 = vmatmul.bf16.gmra.mxu0 %v11211_v29  ;;  %v14028_v3 = vadd.f32 %v7070_v31, %v6414_v21  ;;  %v12291_v21 = vld [vmem:[#allocation8 + $0x1c8] sm:$0xff]  ;;  %v12085_v29 = vld [vmem:[#allocation2 + $0x218] sm:$0xf0] }
 0x56a   : > { %v14026_v17 = vadd.f32 %v7149_v34, %v13922_v36  ;;  %v6287_v37 = vpop.f32.mrf.mxu2  ;;  %8194 = vmatpush.bf16.msra.mxu0 %v12291_v21  ;;  %v11223_v42 = vor.u32 %v12085_v29, %v11222_v47  ;;  %v12088_v47 = vld [vmem:[#allocation2 + $0x230] sm:$0xf0] }
 0x56b   : > { %6455 = vmatmul.bf16.gmra.mxu3 %v10835_v38  ;;  %v6288_v15 = vadd.f32 %v6287_v37, %v13873_v22  ;;  %v12107_v22 = vld [vmem:[#allocation8 + $0x88] sm:$0xff]  ;;  %v10846_v37 = vld [vmem:[#allocation2 + $0x23c] sm:$0xf] }
 0x56c   : > { %7263 = vmatpush.bf16.msra.mxu2 %v12107_v22  ;;  %8065 = vmatpush.bf16.msra.mxu3 %v12283_v59 }
 0x56e   : > { %v6416_v11 = vpop.f32.mrf.mxu3  ;;  %v7075_v55 = vpop.f32.mrf.mxu0 }
 0x56f   : > { %v6417_v53 = vadd.f32 %v6416_v11, %v6288_v15  ;;  %v12182_v15 = vld [vmem:[#allocation2 + $0x244] sm:$0xf0]  ;;  %v12180_v11 = vld [vmem:[#allocation2 + $0x238] sm:$0xf] }
 0x570   : > { %7264 = vmatpush.bf16.msra.mxu2 %v12106_v30  ;;  %8066 = vmatpush.bf16.msra.mxu3 %v12282_v28  ;;  %v12183_v28 = vld [vmem:[#allocation2 + $0x250] sm:$0xf] }
 0x571   : > { %v7152_v9 = vpop.f32.mrf.mxu1  ;;  %v14034_v31 = vadd.f32 %v7073_v23, %v6417_v53  ;;  %v10843_v53 = vor.u32 %v12180_v11, %v10840_v26  ;;  %v11104_v26 = vld [vmem:[#allocation2 + $0x12c] sm:$0xf0]  ;;  %v10852_v11 = vld [vmem:[#allocation2 + $0x258] sm:$0xf0] }
 0x572   : > { %v14032_v36 = vadd.f32 %v7152_v9, %v13927_v14  ;;  %v6289_v27 = vpop.f32.mrf.mxu2  ;;  %v12290_v9 = vld [vmem:[#allocation8 + $0x1c0] sm:$0xff] }
 0x573   : > { %v6290_v34 = vadd.f32 %v6289_v27, %v13881_v60  ;;  %8195 = vmatpush.bf16.msra.mxu0 %v12290_v9  ;;  %v11234_v9 = vld [vmem:[#allocation2 + $0x228] sm:$0xf] }
 0x574   : > { %14942 = vst [vmem:[#allocation62_spill] sm:$0xff] %v14032_v36  ;;  %7191 = vmatmul.bf16.gmra.mxu1 %v11095_v25  ;;  %v10847_v25 = vor.u32 %v12182_v15, %v10846_v37 }
 0x576   : > { %v6418_v38 = vpop.f32.mrf.mxu3  ;;  %v7078_v14 = vpop.f32.mrf.mxu0 }
 0x577   : > { %v6419_v23 = vadd.f32 %v6418_v38, %v6290_v34  ;;  %6331 = vmatmul.bf16.gmra.mxu2 %v10843_v53  ;;  %v12054_v38 = vld [vmem:[#allocation2 + $0x124] sm:$0xf] }
 0x578   : > { %v11107_v37 = vor.u32 %v12054_v38, %v11104_v26  ;;  %v11116_v38 = vld [vmem:[#allocation2 + $0x144] sm:$0xf0] }
 0x579   : > { %v7154_v12 = vpop.f32.mrf.mxu1  ;;  %7117 = vmatmul.bf16.gmra.mxu0 %v11223_v42  ;;  %v14040_v60 = vadd.f32 %v7075_v55, %v6419_v23  ;;  %v12185_v42 = vld [vmem:[#allocation2 + $0x25c] sm:$0xf0] }
 0x57a   : > { %v14038_v36 = vadd.f32 %v7154_v12, %v13932_v54  ;;  %v6292_v22 = vpop.f32.mrf.mxu2 }
 0x57b   : > { %6460 = vmatmul.bf16.gmra.mxu3 %v10847_v25  ;;  %v6293_v59 = vadd.f32 %v6292_v22, %v13889_v43  ;;  %v10858_v43 = vld [vmem:[#allocation2 + $0x254] sm:$0xf]  ;;  %v10855_v25 = vor.u32 %v12183_v28, %v10852_v11  ;;  %v11235_v22 = vor.u32 %v12088_v47, %v11234_v9  ;;  %v12057_v11 = vld [vmem:[#allocation2 + $0x13c] sm:$0xf]  ;;  %v11344_v28 = vld [vmem:[#allocation2 + $0x54] sm:$0xf0] }
 0x57e   : > { %v6421_v21 = vpop.f32.mrf.mxu3  ;;  %v7080_v27 = vpop.f32.mrf.mxu0 }
 0x57f   : > { %v6422_v29 = vadd.f32 %v6421_v21, %v6293_v59  ;;  %v10859_v59 = vor.u32 %v12185_v42, %v10858_v43  ;;  %v12020_v43 = vld [vmem:[#allocation2 + $0x10] sm:$0xf0] }
 0x581   : > { %v7157_v34 = vpop.f32.mrf.mxu1  ;;  %v14046_v15 = vadd.f32 %v7078_v14, %v6422_v29 }
 0x582   : > { %v14044_v54 = vadd.f32 %v7157_v34, %v13937_v35  ;;  %v6294_v55 = vpop.f32.mrf.mxu2 }
 0x583   : > { %v6295_v23 = vadd.f32 %v6294_v55, %v13900_v61 }
 0x584   : > { %7196 = vmatmul.bf16.gmra.mxu1 %v11107_v37 }
 0x586   : > { %v6423_v53 = vpop.f32.mrf.mxu3  ;;  %v7083_v30 = vpop.f32.mrf.mxu0 }
 0x587   : > { %v6424_v12 = vadd.f32 %v6423_v53, %v6295_v23  ;;  %6336 = vmatmul.bf16.gmra.mxu2 %v10855_v25  ;;  %v11119_v23 = vor.u32 %v12057_v11, %v11116_v38  ;;  %v10966_v53 = vld [vmem:[#allocation2 + $0x8] sm:$0xf]  ;;  %v12211_v25 = vld [vmem:[#allocation2 + $0x50] sm:$0xf0] }
 0x589   : > { %v7159_v35 = vpop.f32.mrf.mxu1  ;;  %7122 = vmatmul.bf16.gmra.mxu0 %v11235_v22  ;;  %v14052_v21 = vadd.f32 %v7080_v27, %v6424_v12  ;;  %v12300_v27 = vld [vmem:[#allocation8 + $0x210] sm:$0xff]  ;;  %v10967_v12 = vor.u32 %v12020_v43, %v10966_v53 }
 0x58a   : > { %v14050_v14 = vadd.f32 %v7159_v35, %v13942_v51  ;;  %v6297_v61 = vpop.f32.mrf.mxu2  ;;  %8322 = vmatpush.bf16.msra.mxu1 %v12300_v27  ;;  %v12210_v35 = vld [vmem:[#allocation2 + $0x4c] sm:$0xf]  ;;  %v12060_v27 = vld [vmem:[#allocation2 + $0x154] sm:$0xf] }
 0x58b   : > { %6465 = vmatmul.bf16.gmra.mxu3 %v10859_v59  ;;  %v6298_v26 = vadd.f32 %v6297_v61, %v13905_v7  ;;  %v11347_v61 = vor.u32 %v12210_v35, %v11344_v28  ;;  %v12214_v35 = vld [vmem:[#allocation2 + $0x68] sm:$0xf0] }
 0x58e   : > { %v6426_v29 = vpop.f32.mrf.mxu3  ;;  %v7085_v34 = vpop.f32.mrf.mxu0 }
 0x58f   : > { %v6427_v37 = vadd.f32 %v6426_v29, %v6298_v26 }
 0x591   : > { %v7162_v55 = vpop.f32.mrf.mxu1  ;;  %v14058_v51 = vadd.f32 %v7083_v30, %v6427_v37 }
 0x592   : > { %v14056_v47 = vadd.f32 %v7162_v55, %v13947_v24  ;;  %v6299_v42 = vpop.f32.mrf.mxu2  ;;  %v11342_v24 = vld [vmem:[#allocation2 + $0x48] sm:$0xf] }
 0x593   : > { %v6300_v7 = vadd.f32 %v6299_v42, %v13910_v63  ;;  %v11343_v30 = vor.u32 %v12211_v25, %v11342_v24  ;;  %v12213_v24 = vld [vmem:[#allocation2 + $0x64] sm:$0xf] }
 0x594   : > { %7201 = vmatmul.bf16.gmra.mxu1 %v11119_v23  ;;  %v11128_v23 = vld [vmem:[#allocation2 + $0x15c] sm:$0xf0] }
 0x595   : > { %v11131_v28 = vor.u32 %v12060_v27, %v11128_v23  ;;  %v11140_v27 = vld [vmem:[#allocation2 + $0x174] sm:$0xf0] }
 0x596   : > { %v6428_v9 = vpop.f32.mrf.mxu3  ;;  %v7088_v22 = vpop.f32.mrf.mxu0 }
 0x597   : > { %v6429_v59 = vadd.f32 %v6428_v9, %v6300_v7  ;;  %7265 = vmatmul.bf16.vlgmr.msra.gmra.mxu2 %v10967_v12  ;;  %v12023_v9 = vld [vmem:[#allocation2 + $0x28] sm:$0xf0]  ;;  %v11356_v12 = vld [vmem:[#allocation2 + $0x6c] sm:$0xf0] }
 0x599   : > { %v7164_v26 = vpop.f32.mrf.mxu1  ;;  %8196 = vmatmul.bf16.vlgmr.msra.gmra.mxu0 %v11347_v61  ;;  %v14064_v38 = vadd.f32 %v7085_v34, %v6429_v59  ;;  %v10978_v34 = vld [vmem:[#allocation2 + $0x20] sm:$0xf] }
 0x59a   : > { %v14062_v29 = vadd.f32 %v7164_v26, %v13952_v46  ;;  %v6302_v63 = vpop.f32.mrf.mxu2  ;;  %v10979_v26 = vor.u32 %v12023_v9, %v10978_v34  ;;  %v12063_v34 = vld [vmem:[#allocation2 + $0x16c] sm:$0xf] }
 0x59b   : > { %8067 = vmatmul.bf16.vlgmr.msra.gmra.mxu3 %v11343_v30  ;;  %v6303_v37 = vadd.f32 %v6302_v63, %v13915_v8  ;;  %v11354_v30 = vld [vmem:[#allocation2 + $0x60] sm:$0xf]  ;;  %v11359_v63 = vor.u32 %v12213_v24, %v11356_v12  ;;  %v11143_v12 = vor.u32 %v12063_v34, %v11140_v27  ;;  %v11152_v34 = vld [vmem:[#allocation2 + $0x18c] sm:$0xf0] }
 0x59e   : > { %v6431_v55 = vpop.f32.mrf.mxu3  ;;  %v7090_v11 = vpop.f32.mrf.mxu0 }
 0x59f   : > { %v6432_v53 = vadd.f32 %v6431_v55, %v6303_v37  ;;  %v11355_v37 = vor.u32 %v12214_v35, %v11354_v30  ;;  %v11368_v35 = vld [vmem:[#allocation2 + $0x84] sm:$0xf0]  ;;  %v12216_v30 = vld [vmem:[#allocation2 + $0x7c] sm:$0xf] }
 0x5a1   : > { %v7167_v43 = vpop.f32.mrf.mxu1  ;;  %v14070_v46 = vadd.f32 %v7088_v22, %v6432_v53 }
 0x5a2   : > { %v14068_v42 = vadd.f32 %v7167_v43, %v13957_v56  ;;  %v6304_v7 = vpop.f32.mrf.mxu2 }
 0x5a3   : > { %v6305_v25 = vadd.f32 %v6304_v7, %v13920_v39 }
 0x5a4   : > { %7206 = vmatmul.bf16.gmra.mxu1 %v11131_v28 }
 0x5a6   : > { %v6433_v8 = vpop.f32.mrf.mxu3  ;;  %v7093_v59 = vpop.f32.mrf.mxu0 }
 0x5a7   : > { %v6434_v61 = vadd.f32 %v6433_v8, %v6305_v25  ;;  %7270 = vmatmul.bf16.gmra.mxu2 %v10979_v26  ;;  %v12026_v8 = vld [vmem:[#allocation2 + $0x40] sm:$0xf0] }
 0x5a9   : > { %v7169_v56 = vpop.f32.mrf.mxu1  ;;  %8201 = vmatmul.bf16.gmra.mxu0 %v11359_v63  ;;  %v14076_v55 = vadd.f32 %v7090_v11, %v6434_v61  ;;  %v10990_v11 = vld [vmem:[#allocation2 + $0x38] sm:$0xf]  ;;  %v12217_v61 = vld [vmem:[#allocation2 + $0x80] sm:$0xf0] }
 0x5aa   : > { %v14074_v22 = vadd.f32 %v7169_v56, %v13962_v45  ;;  %v6307_v23 = vpop.f32.mrf.mxu2  ;;  %v10991_v56 = vor.u32 %v12026_v8, %v10990_v11  ;;  %v12066_v11 = vld [vmem:[#allocation2 + $0x184] sm:$0xf] }
 0x5ab   : > { %8072 = vmatmul.bf16.gmra.mxu3 %v11355_v37  ;;  %v6308_v39 = vadd.f32 %v6307_v23, %v13925_v33  ;;  %v11366_v37 = vld [vmem:[#allocation2 + $0x78] sm:$0xf]  ;;  %v11371_v23 = vor.u32 %v12216_v30, %v11368_v35  ;;  %v11155_v35 = vor.u32 %v12066_v11, %v11152_v34 }
 0x5ae   : > { %v6436_v53 = vpop.f32.mrf.mxu3  ;;  %v7095_v43 = vpop.f32.mrf.mxu0 }
 0x5af   : > { %v6437_v28 = vadd.f32 %v6436_v53, %v6308_v39  ;;  %v11367_v39 = vor.u32 %v12217_v61, %v11366_v37  ;;  %v11380_v61 = vld [vmem:[#allocation2 + $0x9c] sm:$0xf0]  ;;  %v11002_v37 = vld [vmem:[#allocation2 + $0x50] sm:$0xf] }
 0x5b1   : > { %v7172_v7 = vpop.f32.mrf.mxu1  ;;  %v14082_v45 = vadd.f32 %v7093_v59, %v6437_v28 }
 0x5b2   : > { %v14080_v9 = vadd.f32 %v7172_v7, %v13967_v48  ;;  %v6309_v25 = vpop.f32.mrf.mxu2 }
 0x5b3   : > { %v6310_v24 = vadd.f32 %v6309_v25, %v13930_v58 }
 0x5b4   : > { %7211 = vmatmul.bf16.gmra.mxu1 %v11143_v12 }
 0x5b6   : > { %v6438_v33 = vpop.f32.mrf.mxu3  ;;  %v7098_v26 = vpop.f32.mrf.mxu0 }
 0x5b7   : > { %v6439_v63 = vadd.f32 %v6438_v33, %v6310_v24  ;;  %7275 = vmatmul.bf16.gmra.mxu2 %v10991_v56  ;;  %v12299_v24 = vld [vmem:[#allocation8 + $0x208] sm:$0xff]  ;;  %v12029_v33 = vld [vmem:[#allocation2 + $0x58] sm:$0xf0] }
 0x5b8   : > { %8323 = vmatpush.bf16.msra.mxu1 %v12299_v24 }
 0x5b9   : > { %v7174_v48 = vpop.f32.mrf.mxu1  ;;  %8206 = vmatmul.bf16.gmra.mxu0 %v11371_v23  ;;  %v14088_v53 = vadd.f32 %v7095_v43, %v6439_v63  ;;  %v12220_v63 = vld [vmem:[#allocation2 + $0x98] sm:$0xf0]  ;;  %v12219_v23 = vld [vmem:[#allocation2 + $0x94] sm:$0xf] }
 0x5ba   : > { %v14086_v59 = vadd.f32 %v7174_v48, %v13972_v32  ;;  %v6312_v27 = vpop.f32.mrf.mxu2 }
 0x5bb   : > { %8077 = vmatmul.bf16.gmra.mxu3 %v11367_v39  ;;  %v6313_v58 = vadd.f32 %v6312_v27, %v13935_v50  ;;  %v11003_v39 = vor.u32 %v12029_v33, %v11002_v37  ;;  %v11383_v27 = vor.u32 %v12219_v23, %v11380_v61  ;;  %v12069_v33 = vld [vmem:[#allocation2 + $0x19c] sm:$0xf]  ;;  %v11392_v37 = vld [vmem:[#allocation2 + $0xb4] sm:$0xf0] }
 0x5be   : > { %v6441_v28 = vpop.f32.mrf.mxu3  ;;  %v7100_v7 = vpop.f32.mrf.mxu0 }
 0x5bf   : > { %v6442_v12 = vadd.f32 %v6441_v28, %v6313_v58 }
 0x5c1   : > { %v7177_v25 = vpop.f32.mrf.mxu1  ;;  %v14094_v32 = vadd.f32 %v7098_v26, %v6442_v12 }
 0x5c2   : > { %v14092_v8 = vadd.f32 %v7177_v25, %v13977_v57  ;;  %v6314_v43 = vpop.f32.mrf.mxu2  ;;  %v11378_v57 = vld [vmem:[#allocation2 + $0x90] sm:$0xf] }
 0x5c3   : > { %v6315_v30 = vadd.f32 %v6314_v43, %v13940_v10  ;;  %v11379_v26 = vor.u32 %v12220_v63, %v11378_v57  ;;  %v12032_v63 = vld [vmem:[#allocation2 + $0x70] sm:$0xf0]  ;;  %v12222_v57 = vld [vmem:[#allocation2 + $0xac] sm:$0xf] }
 0x5c4   : > { %7216 = vmatmul.bf16.gmra.mxu1 %v11155_v35  ;;  %v11164_v35 = vld [vmem:[#allocation2 + $0x1a4] sm:$0xf0] }
 0x5c6   : > { %v6443_v50 = vpop.f32.mrf.mxu3  ;;  %v7103_v56 = vpop.f32.mrf.mxu0 }
 0x5c7   : > { %v6444_v48 = vadd.f32 %v6443_v50, %v6315_v30  ;;  %7280 = vmatmul.bf16.gmra.mxu2 %v11003_v39  ;;  %v11167_v30 = vor.u32 %v12069_v33, %v11164_v35  ;;  %v11176_v33 = vld [vmem:[#allocation2 + $0x1bc] sm:$0xf0] }
 0x5c9   : > { %v7179_v58 = vpop.f32.mrf.mxu1  ;;  %8211 = vmatmul.bf16.gmra.mxu0 %v11383_v27  ;;  %v14100_v34 = vadd.f32 %v7100_v7, %v6444_v48  ;;  %v11014_v7 = vld [vmem:[#allocation2 + $0x68] sm:$0xf]  ;;  %v12223_v48 = vld [vmem:[#allocation2 + $0xb0] sm:$0xf0] }
 0x5ca   : > { %v14098_v28 = vadd.f32 %v7179_v58, %v13982_v18  ;;  %v6317_v10 = vpop.f32.mrf.mxu2  ;;  %v11015_v58 = vor.u32 %v12032_v63, %v11014_v7  ;;  %v12072_v7 = vld [vmem:[#allocation2 + $0x1b4] sm:$0xf] }
 0x5cb   : > { %8082 = vmatmul.bf16.gmra.mxu3 %v11379_v26  ;;  %v6318_v12 = vadd.f32 %v6317_v10, %v13945_v62  ;;  %v11390_v26 = vld [vmem:[#allocation2 + $0xa8] sm:$0xf]  ;;  %v11395_v10 = vor.u32 %v12222_v57, %v11392_v37  ;;  %v11179_v37 = vor.u32 %v12072_v7, %v11176_v33 }
 0x5ce   : > { %v6446_v25 = vpop.f32.mrf.mxu3  ;;  %v7105_v11 = vpop.f32.mrf.mxu0 }
 0x5cf   : > { %v6447_v24 = vadd.f32 %v6446_v25, %v6318_v12  ;;  %v11391_v12 = vor.u32 %v12223_v48, %v11390_v26  ;;  %v11404_v48 = vld [vmem:[#allocation2 + $0xcc] sm:$0xf0]  ;;  %v12225_v26 = vld [vmem:[#allocation2 + $0xc4] sm:$0xf] }
 0x5d1   : > { %v7182_v43 = vpop.f32.mrf.mxu1  ;;  %v14106_v18 = vadd.f32 %v7103_v56, %v6447_v24 }
 0x5d2   : > { %v14104_v61 = vadd.f32 %v7182_v43, %v13987_v16  ;;  %v6319_v50 = vpop.f32.mrf.mxu2 }
 0x5d3   : > { %v6320_v23 = vadd.f32 %v6319_v50, %v13950_v20 }
 0x5d4   : > { %7221 = vmatmul.bf16.gmra.mxu1 %v11167_v30 }
 0x5d6   : > { %v6448_v62 = vpop.f32.mrf.mxu3  ;;  %v7108_v39 = vpop.f32.mrf.mxu0 }
 0x5d7   : > { %v6449_v27 = vadd.f32 %v6448_v62, %v6320_v23  ;;  %7285 = vmatmul.bf16.gmra.mxu2 %v11015_v58  ;;  %v12035_v62 = vld [vmem:[#allocation2 + $0x88] sm:$0xf0] }
 0x5d9   : > { %v7184_v16 = vpop.f32.mrf.mxu1  ;;  %8216 = vmatmul.bf16.gmra.mxu0 %v11395_v10  ;;  %v14112_v25 = vadd.f32 %v7105_v11, %v6449_v27  ;;  %v11026_v11 = vld [vmem:[#allocation2 + $0x80] sm:$0xf]  ;;  %v12226_v27 = vld [vmem:[#allocation2 + $0xc8] sm:$0xf0] }
 0x5da   : > { %v14110_v56 = vadd.f32 %v7184_v16, %v13992_v19  ;;  %v6322_v35 = vpop.f32.mrf.mxu2  ;;  %v11027_v16 = vor.u32 %v12035_v62, %v11026_v11  ;;  %v12075_v62 = vld [vmem:[#allocation2 + $0x1cc] sm:$0xf] }
 0x5db   : > { %8087 = vmatmul.bf16.gmra.mxu3 %v11391_v12  ;;  %v6323_v20 = vadd.f32 %v6322_v35, %v13955_v5  ;;  %v11402_v12 = vld [vmem:[#allocation2 + $0xc0] sm:$0xf]  ;;  %v11407_v35 = vor.u32 %v12225_v26, %v11404_v48  ;;  %v11416_v26 = vld [vmem:[#allocation2 + $0xe4] sm:$0xf0] }
 0x5de   : > { %v6451_v24 = vpop.f32.mrf.mxu3  ;;  %v7110_v43 = vpop.f32.mrf.mxu0 }
 0x5df   : > { %v6452_v30 = vadd.f32 %v6451_v24, %v6323_v20  ;;  %v11403_v20 = vor.u32 %v12226_v27, %v11402_v12  ;;  %v12038_v27 = vld [vmem:[#allocation2 + $0xa0] sm:$0xf0] }
 0x5e1   : > { %v7187_v50 = vpop.f32.mrf.mxu1  ;;  %v14118_v19 = vadd.f32 %v7108_v39, %v6452_v30 }
 0x5e2   : > { %v14116_v63 = vadd.f32 %v7187_v50, %v13998_v13  ;;  %v6324_v23 = vpop.f32.mrf.mxu2 }
 0x5e3   : > { %v6325_v57 = vadd.f32 %v6324_v23, %v13960_v6  ;;  %v14943_v6 = vld [vmem:[#allocation17_spill] sm:$0xff] }
 0x5e4   : > { %7226 = vmatmul.bf16.gmra.mxu1 %v11179_v37  ;;  %v11188_v37 = vld [vmem:[#allocation2 + $0x1d4] sm:$0xf0] }
 0x5e6   : > { %v6453_v5 = vpop.f32.mrf.mxu3  ;;  %v7113_v58 = vpop.f32.mrf.mxu0 }
 0x5e7   : > { %v6454_v10 = vadd.f32 %v6453_v5, %v6325_v57  ;;  %7290 = vmatmul.bf16.gmra.mxu2 %v11027_v16  ;;  %v11191_v57 = vor.u32 %v12075_v62, %v11188_v37  ;;  %v12298_v5 = vld [vmem:[#allocation8 + $0x200] sm:$0xff] }
 0x5e8   : > { %8324 = vmatpush.bf16.msra.mxu1 %v12298_v5 }
 0x5e9   : > { %v7189_v13 = vpop.f32.mrf.mxu1  ;;  %8221 = vmatmul.bf16.gmra.mxu0 %v11407_v35  ;;  %v14124_v24 = vadd.f32 %v7110_v43, %v6454_v10  ;;  %v14945_v10 = vld [vmem:[#allocation18_spill] sm:$0xff]  ;;  %v12229_v35 = vld [vmem:[#allocation2 + $0xe0] sm:$0xf0] }
 0x5ea   : > { %v14122_v39 = vadd.f32 %v7189_v13, %v14004_v49  ;;  %v6327_v33 = vpop.f32.mrf.mxu2 }
 0x5eb   : > { %8092 = vmatmul.bf16.gmra.mxu3 %v11403_v20  ;;  %v6328_v30 = vadd.f32 %v6327_v33, %v14943_v6  ;;  %v11038_v20 = vld [vmem:[#allocation2 + $0x98] sm:$0xf]  ;;  %v12228_v33 = vld [vmem:[#allocation2 + $0xdc] sm:$0xf] }
 0x5ee   : > { %v6456_v50 = vpop.f32.mrf.mxu3  ;;  %v7115_v7 = vpop.f32.mrf.mxu0 }
 0x5ef   : > { %v6457_v23 = vadd.f32 %v6456_v50, %v6328_v30  ;;  %v11039_v30 = vor.u32 %v12038_v27, %v11038_v20  ;;  %v11419_v50 = vor.u32 %v12228_v33, %v11416_v26  ;;  %v12041_v33 = vld [vmem:[#allocation2 + $0xb8] sm:$0xf0] }
 0x5f1   : > { %v7192_v11 = vpop.f32.mrf.mxu1  ;;  %v14130_v49 = vadd.f32 %v7113_v58, %v6457_v23 }
 0x5f2   : > { %v14128_v48 = vadd.f32 %v7192_v11, %v14010_v4  ;;  %v6329_v43 = vpop.f32.mrf.mxu2  ;;  %v11414_v4 = vld [vmem:[#allocation2 + $0xd8] sm:$0xf] }
 0x5f3   : > { %v6330_v16 = vadd.f32 %v6329_v43, %v14945_v10  ;;  %v11415_v58 = vor.u32 %v12229_v35, %v11414_v4 }
 0x5f4   : > { %14944 = vst [vmem:[#allocation63_spill] sm:$0xff] %v14128_v48  ;;  %7231 = vmatmul.bf16.gmra.mxu1 %v11191_v57  ;;  %v14947_v57 = vld [vmem:[#allocation57_spill] sm:$0xff]  ;;  %v11200_v48 = vld [vmem:[#allocation2 + $0x1ec] sm:$0xf0] }
 0x5f6   : > { %v6458_v12 = vpop.f32.mrf.mxu3  ;;  %v7118_v13 = vpop.f32.mrf.mxu0 }
 0x5f7   : > { %v6459_v6 = vadd.f32 %v6458_v12, %v6330_v16  ;;  %7295 = vmatmul.bf16.gmra.mxu2 %v11039_v30  ;;  %v12078_v12 = vld [vmem:[#allocation2 + $0x1e4] sm:$0xf]  ;;  %v14949_v30 = vld [vmem:[#allocation58_spill] sm:$0xff] }
 0x5f8   : > { %v11203_v35 = vor.u32 %v12078_v12, %v11200_v48  ;;  %v14951_v12 = vld [vmem:[#allocation60_spill] sm:$0xff] }
 0x5f9   : > { %v7194_v37 = vpop.f32.mrf.mxu1  ;;  %8226 = vmatmul.bf16.gmra.mxu0 %v11419_v50  ;;  %v14136_v11 = vadd.f32 %v7115_v7, %v6459_v6  ;;  %v11050_v7 = vld [vmem:[#allocation2 + $0xb0] sm:$0xf]  ;;  %v11428_v6 = vld [vmem:[#allocation2 + $0xfc] sm:$0xf0] }
 0x5fa   : > { %v14134_v23 = vadd.f32 %v7194_v37, %v14016_v0  ;;  %v6332_v62 = vpop.f32.mrf.mxu2  ;;  %v12232_v37 = vld [vmem:[#allocation2 + $0xf8] sm:$0xf0] }
 0x5fb   : > { %8097 = vmatmul.bf16.gmra.mxu3 %v11415_v58  ;;  %v6333_v5 = vadd.f32 %v6332_v62, %v14947_v57  ;;  %v12231_v62 = vld [vmem:[#allocation2 + $0xf4] sm:$0xf] }
 0x5fc   : > { %14946 = vst [vmem:[#allocation61_spill] sm:$0xff] %v14134_v23  ;;  %v11431_v23 = vor.u32 %v12231_v62, %v11428_v6  ;;  %v11440_v62 = vld [vmem:[#allocation2 + $0x114] sm:$0xf0] }
 0x5fe   : > { %v6461_v43 = vpop.f32.mrf.mxu3  ;;  %v7120_v10 = vpop.f32.mrf.mxu0 }
 0x5ff   : > { %v6462_v16 = vadd.f32 %v6461_v43, %v6333_v5  ;;  %v11051_v5 = vor.u32 %v12041_v33, %v11050_v7  ;;  %v11426_v43 = vld [vmem:[#allocation2 + $0xf0] sm:$0xf]  ;;  %v12081_v33 = vld [vmem:[#allocation2 + $0x1fc] sm:$0xf] }
 0x601   : > { %v7197_v27 = vpop.f32.mrf.mxu1  ;;  %v14142_v0 = vadd.f32 %v7118_v13, %v6462_v16 }
 0x602   : > { %v14140_v26 = vadd.f32 %v7197_v27, %v14022_v41  ;;  %v6334_v20 = vpop.f32.mrf.mxu2  ;;  %v11427_v27 = vor.u32 %v12232_v37, %v11426_v43  ;;  %v12044_v37 = vld [vmem:[#allocation2 + $0xd0] sm:$0xf0] }
 0x603   : > { %v6335_v4 = vadd.f32 %v6334_v20, %v14949_v30  ;;  %v12235_v43 = vld [vmem:[#allocation2 + $0x110] sm:$0xf0] }
 0x604   : > { %14948 = vst [vmem:[#allocation65_spill] sm:$0xff] %v14140_v26  ;;  %7236 = vmatmul.bf16.gmra.mxu1 %v11203_v35  ;;  %v11212_v26 = vld [vmem:[#allocation2 + $0x204] sm:$0xf0] }
 0x606   : > { %v6463_v50 = vpop.f32.mrf.mxu3  ;;  %v7123_v58 = vpop.f32.mrf.mxu0 }
 0x607   : > { %v6464_v57 = vadd.f32 %v6463_v50, %v6335_v4  ;;  %7300 = vmatmul.bf16.gmra.mxu2 %v11051_v5  ;;  %v11215_v50 = vor.u32 %v12081_v33, %v11212_v26 }
 0x609   : > { %v7199_v41 = vpop.f32.mrf.mxu1  ;;  %8231 = vmatmul.bf16.gmra.mxu0 %v11431_v23  ;;  %v14148_v13 = vadd.f32 %v7120_v10, %v6464_v57  ;;  %v11062_v10 = vld [vmem:[#allocation2 + $0xc8] sm:$0xf] }
 0x60a   : > { %v14146_v48 = vadd.f32 %v7199_v41, %v14028_v3  ;;  %v6337_v16 = vpop.f32.mrf.mxu2 }
 0x60b   : > { %8102 = vmatmul.bf16.gmra.mxu3 %v11427_v27  ;;  %v6338_v35 = vadd.f32 %v6337_v16, %v14951_v12  ;;  %v12234_v27 = vld [vmem:[#allocation2 + $0x10c] sm:$0xf]  ;;  %v11063_v12 = vor.u32 %v12044_v37, %v11062_v10  ;;  %v11224_v37 = vld [vmem:[#allocation2 + $0x21c] sm:$0xf0] }
 0x60c   : > { %14950 = vst [vmem:[#allocation66_spill] sm:$0xff] %v14146_v48 }
 0x60e   : > { %v6466_v20 = vpop.f32.mrf.mxu3  ;;  %v7125_v30 = vpop.f32.mrf.mxu0 }
 0x60f   : > { %v6467_v4 = vadd.f32 %v6466_v20, %v6338_v35  ;;  %v11438_v35 = vld [vmem:[#allocation2 + $0x108] sm:$0xf]  ;;  %v11443_v20 = vor.u32 %v12234_v27, %v11440_v62  ;;  %v11452_v27 = vld [vmem:[#allocation2 + $0x12c] sm:$0xf0] }
 0x611   : > { %v7202_v7 = vpop.f32.mrf.mxu1  ;;  %v14154_v3 = vadd.f32 %v7123_v58, %v6467_v4 }
 0x612   : > { %v14152_v6 = vadd.f32 %v7202_v7, %v14034_v31  ;;  %v6339_v23 = vpop.f32.mrf.mxu2  ;;  %v11439_v7 = vor.u32 %v12235_v43, %v11438_v35  ;;  %v12238_v35 = vld [vmem:[#allocation2 + $0x128] sm:$0xf0] }
 0x613   : > { %v6340_v57 = vadd.f32 %v6339_v23, %v13990_v44  ;;  %v14954_v44 = vld [vmem:[#allocation59_spill] sm:$0xff] }
 0x614   : > { %14952 = vst [vmem:[#allocation64_spill] sm:$0xff] %v14152_v6  ;;  %7241 = vmatmul.bf16.gmra.mxu1 %v11215_v50 }
 0x616   : > { %v6468_v5 = vpop.f32.mrf.mxu3  ;;  %v8197_v41 = vpop.f32.mrf.mxu0 }
 0x617   : > { %v6469_v16 = vadd.f32 %v6468_v5, %v6340_v57  ;;  %7305 = vmatmul.bf16.gmra.mxu2 %v11063_v12  ;;  %v12084_v57 = vld [vmem:[#allocation2 + $0x214] sm:$0xf] }
 0x619   : > { %v7204_v31 = vpop.f32.mrf.mxu1  ;;  %8236 = vmatmul.bf16.gmra.mxu0 %v11443_v20  ;;  %v14160_v58 = vadd.f32 %v7125_v30, %v6469_v16  ;;  %v12047_v30 = vld [vmem:[#allocation2 + $0xe8] sm:$0xf0] }
 0x61a   : > { %v14158_v26 = vadd.f32 %v7204_v31, %v14040_v60  ;;  %v7266_v4 = vpop.f32.mrf.mxu2  ;;  %v11227_v60 = vor.u32 %v12084_v57, %v11224_v37  ;;  %v11074_v31 = vld [vmem:[#allocation2 + $0xe0] sm:$0xf] }
 0x61b   : > { %8107 = vmatmul.bf16.gmra.mxu3 %v11439_v7  ;;  %v14163_v33 = vadd.f32 %v7266_v4, %v14954_v44  ;;  %v12237_v7 = vld [vmem:[#allocation2 + $0x124] sm:$0xf]  ;;  %v11075_v4 = vor.u32 %v12047_v30, %v11074_v31  ;;  %v11450_v44 = vld [vmem:[#allocation2 + $0x120] sm:$0xf]  ;;  %v12087_v31 = vld [vmem:[#allocation2 + $0x22c] sm:$0xf] }
 0x61c   : > { %14953 = vst [vmem:[#allocation68_spill] sm:$0xff] %v14158_v26 }
 0x61e   : > { %v8068_v50 = vpop.f32.mrf.mxu3  ;;  %v8199_v10 = vpop.f32.mrf.mxu0 }
 0x61f   : > { %v14165_v23 = vadd.f32 %v8197_v41, %v8068_v50  ;;  %v11455_v50 = vor.u32 %v12237_v7, %v11452_v27  ;;  %v11086_v7 = vld [vmem:[#allocation2 + $0xf8] sm:$0xf] }
 0x621   : > { %v7207_v62 = vpop.f32.mrf.mxu1 }
 0x622   : > { %v14168_v5 = vadd.f32 %v7207_v62, %v14046_v15  ;;  %v7268_v43 = vpop.f32.mrf.mxu2  ;;  %v11451_v62 = vor.u32 %v12238_v35, %v11450_v44  ;;  %v11464_v44 = vld [vmem:[#allocation2 + $0x144] sm:$0xf0] }
 0x623   : > { %v14171_v16 = vadd.f32 %v7268_v43, %v14002_v40 }
 0x624   : > { %14955 = vst [vmem:[#allocation69_spill] sm:$0xff] %v14168_v5  ;;  %7246 = vmatmul.bf16.gmra.mxu1 %v11227_v60 }
 0x626   : > { %v8070_v12 = vpop.f32.mrf.mxu3  ;;  %v8202_v41 = vpop.f32.mrf.mxu0 }
 0x627   : > { %v14173_v20 = vadd.f32 %v8199_v10, %v8070_v12  ;;  %7310 = vmatmul.bf16.gmra.mxu2 %v11075_v4  ;;  %v11236_v12 = vld [vmem:[#allocation2 + $0x234] sm:$0xf0]  ;;  %v12050_v4 = vld [vmem:[#allocation2 + $0x100] sm:$0xf0] }
 0x628   : > { %v11239_v35 = vor.u32 %v12087_v31, %v11236_v12 }
 0x629   : > { %v7209_v15 = vpop.f32.mrf.mxu1  ;;  %8241 = vmatmul.bf16.gmra.mxu0 %v11455_v50 }
 0x62a   : > { %v14176_v37 = vadd.f32 %v7209_v15, %v14052_v21  ;;  %v7271_v40 = vpop.f32.mrf.mxu2  ;;  %v12241_v15 = vld [vmem:[#allocation2 + $0x140] sm:$0xf0] }
 0x62b   : > { %8112 = vmatmul.bf16.gmra.mxu3 %v11451_v62  ;;  %v14179_v57 = vadd.f32 %v7271_v40, %v14008_v52  ;;  %v12240_v40 = vld [vmem:[#allocation2 + $0x13c] sm:$0xf] }
 0x62c   : > { %14956 = vst [vmem:[#allocation67_spill] sm:$0xff] %v14176_v37  ;;  %v11462_v37 = vld [vmem:[#allocation2 + $0x138] sm:$0xf]  ;;  %v11467_v5 = vor.u32 %v12240_v40, %v11464_v44  ;;  %v11476_v40 = vld [vmem:[#allocation2 + $0x15c] sm:$0xf0] }
 0x62e   : > { %v8073_v10 = vpop.f32.mrf.mxu3  ;;  %v8204_v43 = vpop.f32.mrf.mxu0 }
 0x62f   : > { %v14181_v60 = vadd.f32 %v8202_v41, %v8073_v10  ;;  %v11087_v10 = vor.u32 %v12050_v4, %v11086_v7  ;;  %v11350_v4 = vld [vmem:[#allocation2 + $0x50] sm:$0xf] }
 0x631   : > { %v7212_v30 = vpop.f32.mrf.mxu1 }
 0x632   : > { %v14184_v27 = vadd.f32 %v7212_v30, %v14058_v51  ;;  %v7273_v21 = vpop.f32.mrf.mxu2  ;;  %v11463_v30 = vor.u32 %v12241_v15, %v11462_v37  ;;  %v11098_v15 = vld [vmem:[#allocation2 + $0x110] sm:$0xf] }
 0x633   : > { %v14187_v50 = vadd.f32 %v7273_v21, %v14014_v2 }
 0x634   : > { %14957 = vst [vmem:[#allocation71_spill] sm:$0xff] %v14184_v27  ;;  %7251 = vmatmul.bf16.gmra.mxu1 %v11239_v35 }
 0x636   : > { %v8075_v52 = vpop.f32.mrf.mxu3  ;;  %v8207_v62 = vpop.f32.mrf.mxu0 }
 0x637   : > { %v14189_v41 = vadd.f32 %v8204_v43, %v8075_v52  ;;  %7315 = vmatmul.bf16.gmra.mxu2 %v11087_v10  ;;  %v12212_v52 = vld [vmem:[#allocation2 + $0x58] sm:$0xf0] }
 0x638   : > { %v11351_v37 = vor.u32 %v12212_v52, %v11350_v4 }
 0x639   : > { %v7214_v51 = vpop.f32.mrf.mxu1  ;;  %8246 = vmatmul.bf16.gmra.mxu0 %v11467_v5  ;;  %v12053_v5 = vld [vmem:[#allocation2 + $0x118] sm:$0xf0] }
 0x63a   : > { %v14192_v12 = vadd.f32 %v7214_v51, %v14064_v38  ;;  %v7276_v31 = vpop.f32.mrf.mxu2  ;;  %v12244_v51 = vld [vmem:[#allocation2 + $0x158] sm:$0xf0] }
 0x63b   : > { %8117 = vmatmul.bf16.gmra.mxu3 %v11463_v30  ;;  %v14195_v2 = vadd.f32 %v7276_v31, %v14020_v1  ;;  %v12243_v31 = vld [vmem:[#allocation2 + $0x154] sm:$0xf] }
 0x63c   : > { %14958 = vst [vmem:[#allocation47_spill] sm:$0xff] %v14192_v12  ;;  %v11474_v12 = vld [vmem:[#allocation2 + $0x150] sm:$0xf]  ;;  %v11479_v27 = vor.u32 %v12243_v31, %v11476_v40 }
 0x63e   : > { %v8078_v35 = vpop.f32.mrf.mxu3  ;;  %v8209_v21 = vpop.f32.mrf.mxu0 }
 0x63f   : > { %v14197_v43 = vadd.f32 %v8207_v62, %v8078_v35  ;;  %v11099_v35 = vor.u32 %v12053_v5, %v11098_v15  ;;  %v12215_v15 = vld [vmem:[#allocation2 + $0x70] sm:$0xf0] }
 0x641   : > { %v7217_v7 = vpop.f32.mrf.mxu1 }
 0x642   : > { %v14200_v44 = vadd.f32 %v7217_v7, %v14070_v46  ;;  %v7278_v38 = vpop.f32.mrf.mxu2  ;;  %v11475_v7 = vor.u32 %v12244_v51, %v11474_v12  ;;  %v12056_v51 = vld [vmem:[#allocation2 + $0x130] sm:$0xf0] }
 0x643   : > { %v14203_v10 = vadd.f32 %v7278_v38, %v14026_v17  ;;  %v14961_v17 = vld [vmem:[#allocation62_spill] sm:$0xff] }
 0x644   : > { %14959 = vst [vmem:[#allocation70_spill] sm:$0xff] %v14200_v44  ;;  %8325 = vmatmul.bf16.vlgmr.msra.gmra.mxu1 %v11351_v37  ;;  %v11362_v44 = vld [vmem:[#allocation2 + $0x68] sm:$0xf] }
 0x645   : > { %v11363_v12 = vor.u32 %v12215_v15, %v11362_v44 }
 0x646   : > { %v8080_v1 = vpop.f32.mrf.mxu3  ;;  %v8212_v30 = vpop.f32.mrf.mxu0 }
 0x647   : > { %v14205_v62 = vadd.f32 %v8209_v21, %v8080_v1  ;;  %7320 = vmatmul.bf16.gmra.mxu2 %v11099_v35 }
 0x649   : > { %v7219_v46 = vpop.f32.mrf.mxu1  ;;  %8251 = vmatmul.bf16.gmra.mxu0 %v11479_v27  ;;  %v11488_v27 = vld [vmem:[#allocation2 + $0x174] sm:$0xf0] }
 0x64a   : > { %v14208_v52 = vadd.f32 %v7219_v46, %v14076_v55  ;;  %v7281_v4 = vpop.f32.mrf.mxu2  ;;  %v12247_v46 = vld [vmem:[#allocation2 + $0x170] sm:$0xf0] }
 0x64b   : > { %8122 = vmatmul.bf16.gmra.mxu3 %v11475_v7  ;;  %v14211_v37 = vadd.f32 %v7281_v4, %v14961_v17  ;;  %v11110_v4 = vld [vmem:[#allocation2 + $0x128] sm:$0xf]  ;;  %v12246_v17 = vld [vmem:[#allocation2 + $0x16c] sm:$0xf] }
 0x64c   : > { %14960 = vst [vmem:[#allocation72_spill] sm:$0xff] %v14208_v52  ;;  %v11486_v52 = vld [vmem:[#allocation2 + $0x168] sm:$0xf]  ;;  %v11491_v26 = vor.u32 %v12246_v17, %v11488_v27  ;;  %v11500_v17 = vld [vmem:[#allocation2 + $0x18c] sm:$0xf0] }
 0x64e   : > { %v8083_v38 = vpop.f32.mrf.mxu3  ;;  %v8214_v1 = vpop.f32.mrf.mxu0 }
 0x64f   : > { %v14213_v21 = vadd.f32 %v8212_v30, %v8083_v38  ;;  %v11111_v38 = vor.u32 %v12056_v51, %v11110_v4  ;;  %v12218_v51 = vld [vmem:[#allocation2 + $0x88] sm:$0xf0] }
 0x651   : > { %v7222_v5 = vpop.f32.mrf.mxu1 }
 0x652   : > { %v14216_v40 = vadd.f32 %v7222_v5, %v14082_v45  ;;  %v7283_v55 = vpop.f32.mrf.mxu2  ;;  %v11487_v5 = vor.u32 %v12247_v46, %v11486_v52  ;;  %v11122_v46 = vld [vmem:[#allocation2 + $0x140] sm:$0xf] }
 0x653   : > { %v14219_v31 = vadd.f32 %v7283_v55, %v14038_v36 }
 0x654   : > { %14962 = vst [vmem:[#allocation49_spill] sm:$0xff] %v14216_v40  ;;  %8330 = vmatmul.bf16.gmra.mxu1 %v11363_v12 }
 0x656   : > { %v8085_v35 = vpop.f32.mrf.mxu3  ;;  %v8217_v30 = vpop.f32.mrf.mxu0 }
 0x657   : > { %v14221_v7 = vadd.f32 %v8214_v1, %v8085_v35  ;;  %7325 = vmatmul.bf16.gmra.mxu2 %v11111_v38  ;;  %v11374_v35 = vld [vmem:[#allocation2 + $0x80] sm:$0xf] }
 0x658   : > { %v11375_v52 = vor.u32 %v12218_v51, %v11374_v35 }
 0x659   : > { %v7224_v45 = vpop.f32.mrf.mxu1  ;;  %8256 = vmatmul.bf16.gmra.mxu0 %v11491_v26  ;;  %v12059_v26 = vld [vmem:[#allocation2 + $0x148] sm:$0xf0] }
 0x65a   : > { %v14224_v44 = vadd.f32 %v7224_v45, %v14088_v53  ;;  %v7286_v36 = vpop.f32.mrf.mxu2  ;;  %v12250_v45 = vld [vmem:[#allocation2 + $0x188] sm:$0xf0] }
 0x65b   : > { %8127 = vmatmul.bf16.gmra.mxu3 %v11487_v5  ;;  %v14227_v15 = vadd.f32 %v7286_v36, %v14044_v54  ;;  %v12249_v36 = vld [vmem:[#allocation2 + $0x184] sm:$0xf] }
 0x65c   : > { %14963 = vst [vmem:[#allocation48_spill] sm:$0xff] %v14224_v44  ;;  %v11498_v44 = vld [vmem:[#allocation2 + $0x180] sm:$0xf]  ;;  %v11503_v40 = vor.u32 %v12249_v36, %v11500_v17  ;;  %v11512_v36 = vld [vmem:[#allocation2 + $0x1a4] sm:$0xf0] }
 0x65e   : > { %v8088_v1 = vpop.f32.mrf.mxu3  ;;  %v8219_v55 = vpop.f32.mrf.mxu0 }
 0x65f   : > { %v14229_v12 = vadd.f32 %v8217_v30, %v8088_v1  ;;  %v11123_v1 = vor.u32 %v12059_v26, %v11122_v46  ;;  %v11386_v26 = vld [vmem:[#allocation2 + $0x98] sm:$0xf] }
 0x661   : > { %v7227_v4 = vpop.f32.mrf.mxu1 }
 0x662   : > { %v14232_v27 = vadd.f32 %v7227_v4, %v14094_v32  ;;  %v7288_v53 = vpop.f32.mrf.mxu2  ;;  %v11499_v4 = vor.u32 %v12250_v45, %v11498_v44  ;;  %v11134_v45 = vld [vmem:[#allocation2 + $0x158] sm:$0xf] }
 0x663   : > { %v14235_v38 = vadd.f32 %v7288_v53, %v14050_v14 }
 0x664   : > { %14964 = vst [vmem:[#allocation73_spill] sm:$0xff] %v14232_v27  ;;  %8335 = vmatmul.bf16.gmra.mxu1 %v11375_v52 }
 0x666   : > { %v8090_v54 = vpop.f32.mrf.mxu3  ;;  %v8222_v5 = vpop.f32.mrf.mxu0 }
 0x667   : > { %v14237_v30 = vadd.f32 %v8219_v55, %v8090_v54  ;;  %7330 = vmatmul.bf16.gmra.mxu2 %v11123_v1  ;;  %v12221_v54 = vld [vmem:[#allocation2 + $0xa0] sm:$0xf0] }
 0x668   : > { %v11387_v44 = vor.u32 %v12221_v54, %v11386_v26 }
 0x669   : > { %v7229_v32 = vpop.f32.mrf.mxu1  ;;  %8261 = vmatmul.bf16.gmra.mxu0 %v11503_v40  ;;  %v12062_v40 = vld [vmem:[#allocation2 + $0x160] sm:$0xf0] }
 0x66a   : > { %v14240_v35 = vadd.f32 %v7229_v32, %v14100_v34  ;;  %v7291_v51 = vpop.f32.mrf.mxu2  ;;  %v12253_v32 = vld [vmem:[#allocation2 + $0x1a0] sm:$0xf0] }
 0x66b   : > { %8132 = vmatmul.bf16.gmra.mxu3 %v11499_v4  ;;  %v14243_v14 = vadd.f32 %v7291_v51, %v14056_v47  ;;  %v12252_v51 = vld [vmem:[#allocation2 + $0x19c] sm:$0xf] }
 0x66c   : > { %14965 = vst [vmem:[#allocation51_spill] sm:$0xff] %v14240_v35  ;;  %v11510_v35 = vld [vmem:[#allocation2 + $0x198] sm:$0xf]  ;;  %v11515_v27 = vor.u32 %v12252_v51, %v11512_v36 }
 0x66e   : > { %v8093_v52 = vpop.f32.mrf.mxu3  ;;  %v8224_v53 = vpop.f32.mrf.mxu0 }
 0x66f   : > { %v14245_v55 = vadd.f32 %v8222_v5, %v8093_v52  ;;  %v11135_v52 = vor.u32 %v12062_v40, %v11134_v45  ;;  %v12224_v45 = vld [vmem:[#allocation2 + $0xb8] sm:$0xf0] }
 0x671   : > { %v7232_v46 = vpop.f32.mrf.mxu1 }
 0x672   : > { %v14248_v17 = vadd.f32 %v7232_v46, %v14106_v18  ;;  %v7293_v34 = vpop.f32.mrf.mxu2  ;;  %v11511_v46 = vor.u32 %v12253_v32, %v11510_v35  ;;  %v12065_v32 = vld [vmem:[#allocation2 + $0x178] sm:$0xf0] }
 0x673   : > { %v14251_v1 = vadd.f32 %v7293_v34, %v14062_v29 }
 0x674   : > { %14966 = vst [vmem:[#allocation50_spill] sm:$0xff] %v14248_v17  ;;  %8340 = vmatmul.bf16.gmra.mxu1 %v11387_v44 }
 0x676   : > { %v8095_v47 = vpop.f32.mrf.mxu3  ;;  %v8227_v4 = vpop.f32.mrf.mxu0 }
 0x677   : > { %v14253_v5 = vadd.f32 %v8224_v53, %v8095_v47  ;;  %7335 = vmatmul.bf16.gmra.mxu2 %v11135_v52  ;;  %v11398_v47 = vld [vmem:[#allocation2 + $0xb0] sm:$0xf]  ;;  %v12256_v52 = vld [vmem:[#allocation2 + $0x1b8] sm:$0xf0] }
 0x678   : > { %v11399_v35 = vor.u32 %v12224_v45, %v11398_v47 }
 0x679   : > { %v7234_v18 = vpop.f32.mrf.mxu1  ;;  %8266 = vmatmul.bf16.gmra.mxu0 %v11515_v27  ;;  %v11524_v27 = vld [vmem:[#allocation2 + $0x1bc] sm:$0xf0] }
 0x67a   : > { %v14256_v54 = vadd.f32 %v7234_v18, %v14112_v25  ;;  %v7296_v26 = vpop.f32.mrf.mxu2 }
 0x67b   : > { %8137 = vmatmul.bf16.gmra.mxu3 %v11511_v46  ;;  %v14259_v29 = vadd.f32 %v7296_v26, %v14068_v42  ;;  %v11146_v46 = vld [vmem:[#allocation2 + $0x170] sm:$0xf]  ;;  %v12255_v26 = vld [vmem:[#allocation2 + $0x1b4] sm:$0xf] }
 0x67c   : > { %14967 = vst [vmem:[#allocation52_spill] sm:$0xff] %v14256_v54  ;;  %v11522_v54 = vld [vmem:[#allocation2 + $0x1b0] sm:$0xf]  ;;  %v11527_v17 = vor.u32 %v12255_v26, %v11524_v27  ;;  %v11536_v26 = vld [vmem:[#allocation2 + $0x1d4] sm:$0xf0] }
 0x67e   : > { %v8098_v44 = vpop.f32.mrf.mxu3  ;;  %v8229_v34 = vpop.f32.mrf.mxu0 }
 0x67f   : > { %v14261_v53 = vadd.f32 %v8227_v4, %v8098_v44  ;;  %v11147_v44 = vor.u32 %v12065_v32, %v11146_v46  ;;  %v12227_v32 = vld [vmem:[#allocation2 + $0xd0] sm:$0xf0] }
 0x681   : > { %v7237_v40 = vpop.f32.mrf.mxu1 }
 0x682   : > { %v14264_v36 = vadd.f32 %v7237_v40, %v14118_v19  ;;  %v7298_v25 = vpop.f32.mrf.mxu2  ;;  %v11523_v40 = vor.u32 %v12256_v52, %v11522_v54  ;;  %v11158_v52 = vld [vmem:[#allocation2 + $0x188] sm:$0xf] }
 0x683   : > { %v14267_v51 = vadd.f32 %v7298_v25, %v14074_v22 }
 0x684   : > { %14968 = vst [vmem:[#allocation74_spill] sm:$0xff] %v14264_v36  ;;  %8345 = vmatmul.bf16.gmra.mxu1 %v11399_v35 }
 0x686   : > { %v8100_v42 = vpop.f32.mrf.mxu3  ;;  %v8232_v4 = vpop.f32.mrf.mxu0 }
 0x687   : > { %v14269_v18 = vadd.f32 %v8229_v34, %v8100_v42  ;;  %7340 = vmatmul.bf16.gmra.mxu2 %v11147_v44  ;;  %v11410_v42 = vld [vmem:[#allocation2 + $0xc8] sm:$0xf] }
 0x688   : > { %v11411_v54 = vor.u32 %v12227_v32, %v11410_v42 }
 0x689   : > { %v7239_v19 = vpop.f32.mrf.mxu1  ;;  %8271 = vmatmul.bf16.gmra.mxu0 %v11527_v17  ;;  %v12068_v17 = vld [vmem:[#allocation2 + $0x190] sm:$0xf0] }
 0x68a   : > { %v14272_v47 = vadd.f32 %v7239_v19, %v14124_v24  ;;  %v7301_v22 = vpop.f32.mrf.mxu2  ;;  %v12259_v19 = vld [vmem:[#allocation2 + $0x1d0] sm:$0xf0] }
 0x68b   : > { %8142 = vmatmul.bf16.gmra.mxu3 %v11523_v40  ;;  %v14275_v45 = vadd.f32 %v7301_v22, %v14080_v9  ;;  %v12258_v22 = vld [vmem:[#allocation2 + $0x1cc] sm:$0xf] }
 0x68c   : > { %14969 = vst [vmem:[#allocation53_spill] sm:$0xff] %v14272_v47  ;;  %v11534_v47 = vld [vmem:[#allocation2 + $0x1c8] sm:$0xf]  ;;  %v11539_v36 = vor.u32 %v12258_v22, %v11536_v26  ;;  %v11548_v22 = vld [vmem:[#allocation2 + $0x1ec] sm:$0xf0] }
 0x68e   : > { %v8103_v34 = vpop.f32.mrf.mxu3  ;;  %v8234_v25 = vpop.f32.mrf.mxu0 }
 0x68f   : > { %v14277_v35 = vadd.f32 %v8232_v4, %v8103_v34  ;;  %v11159_v34 = vor.u32 %v12068_v17, %v11158_v52  ;;  %v11422_v17 = vld [vmem:[#allocation2 + $0xe0] sm:$0xf] }
 0x691   : > { %v7242_v46 = vpop.f32.mrf.mxu1 }
 0x692   : > { %v14280_v27 = vadd.f32 %v7242_v46, %v14130_v49  ;;  %v7303_v24 = vpop.f32.mrf.mxu2  ;;  %v11535_v46 = vor.u32 %v12259_v19, %v11534_v47  ;;  %v11170_v19 = vld [vmem:[#allocation2 + $0x1a0] sm:$0xf] }
 0x693   : > { %v14283_v44 = vadd.f32 %v7303_v24, %v14086_v59 }
 0x694   : > { %14970 = vst [vmem:[#allocation54_spill] sm:$0xff] %v14280_v27  ;;  %8350 = vmatmul.bf16.gmra.mxu1 %v11411_v54 }
 0x696   : > { %v8105_v9 = vpop.f32.mrf.mxu3  ;;  %v8237_v40 = vpop.f32.mrf.mxu0 }
 0x697   : > { %v14285_v4 = vadd.f32 %v8234_v25, %v8105_v9  ;;  %7345 = vmatmul.bf16.gmra.mxu2 %v11159_v34  ;;  %v12230_v9 = vld [vmem:[#allocation2 + $0xe8] sm:$0xf0] }
 0x698   : > { %v11423_v47 = vor.u32 %v12230_v9, %v11422_v17 }
 0x699   : > { %v7244_v49 = vpop.f32.mrf.mxu1  ;;  %8276 = vmatmul.bf16.gmra.mxu0 %v11539_v36  ;;  %v12071_v36 = vld [vmem:[#allocation2 + $0x1a8] sm:$0xf0] }
 0x69a   : > { %v14288_v42 = vadd.f32 %v7244_v49, %v14136_v11  ;;  %v7306_v32 = vpop.f32.mrf.mxu2  ;;  %v12262_v49 = vld [vmem:[#allocation2 + $0x1e8] sm:$0xf0] }
 0x69b   : > { %8147 = vmatmul.bf16.gmra.mxu3 %v11535_v46  ;;  %v14291_v59 = vadd.f32 %v7306_v32, %v14092_v8  ;;  %v12261_v46 = vld [vmem:[#allocation2 + $0x1e4] sm:$0xf] }
 0x69c   : > { %14971 = vst [vmem:[#allocation55_spill] sm:$0xff] %v14288_v42  ;;  %v11546_v42 = vld [vmem:[#allocation2 + $0x1e0] sm:$0xf]  ;;  %v11551_v27 = vor.u32 %v12261_v46, %v11548_v22 }
 0x69e   : > { %v8108_v54 = vpop.f32.mrf.mxu3  ;;  %v8239_v24 = vpop.f32.mrf.mxu0 }
 0x69f   : > { %v14293_v25 = vadd.f32 %v8237_v40, %v8108_v54  ;;  %v11171_v54 = vor.u32 %v12071_v36, %v11170_v19 }
 0x6a1   : > { %v7247_v52 = vpop.f32.mrf.mxu1 }
 0x6a2   : > { %v14296_v26 = vadd.f32 %v7247_v52, %v14142_v0  ;;  %v7308_v11 = vpop.f32.mrf.mxu2  ;;  %v11547_v52 = vor.u32 %v12262_v49, %v11546_v42  ;;  %v12074_v49 = vld [vmem:[#allocation2 + $0x1c0] sm:$0xf0] }
 0x6a3   : > { %v14299_v34 = vadd.f32 %v7308_v11, %v14098_v28  ;;  %v11434_v11 = vld [vmem:[#allocation2 + $0xf8] sm:$0xf] }
 0x6a4   : > { %14972 = vst [vmem:[#allocation17_spill] sm:$0xff] %v14296_v26  ;;  %8355 = vmatmul.bf16.gmra.mxu1 %v11423_v47 }
 0x6a6   : > { %v8110_v8 = vpop.f32.mrf.mxu3  ;;  %v8242_v32 = vpop.f32.mrf.mxu0 }
 0x6a7   : > { %v14301_v40 = vadd.f32 %v8239_v24, %v8110_v8  ;;  %7350 = vmatmul.bf16.gmra.mxu2 %v11171_v54  ;;  %v12233_v8 = vld [vmem:[#allocation2 + $0x100] sm:$0xf0] }
 0x6a8   : > { %v11435_v42 = vor.u32 %v12233_v8, %v11434_v11  ;;  %v12265_v54 = vld [vmem:[#allocation2 + $0x200] sm:$0xf0] }
 0x6a9   : > { %v7249_v0 = vpop.f32.mrf.mxu1  ;;  %8281 = vmatmul.bf16.gmra.mxu0 %v11551_v27  ;;  %v11560_v27 = vld [vmem:[#allocation2 + $0x204] sm:$0xf0] }
 0x6aa   : > { %v14304_v9 = vadd.f32 %v7249_v0, %v14148_v13  ;;  %v7311_v17 = vpop.f32.mrf.mxu2 }
 0x6ab   : > { %8152 = vmatmul.bf16.gmra.mxu3 %v11547_v52  ;;  %v14307_v28 = vadd.f32 %v7311_v17, %v14104_v61  ;;  %v12264_v52 = vld [vmem:[#allocation2 + $0x1fc] sm:$0xf] }
 0x6ac   : > { %14973 = vst [vmem:[#allocation18_spill] sm:$0xff] %v14304_v9  ;;  %v11563_v9 = vor.u32 %v12264_v52, %v11560_v27 }
 0x6ae   : > { %v8113_v47 = vpop.f32.mrf.mxu3  ;;  %v8244_v36 = vpop.f32.mrf.mxu0 }
 0x6af   : > { %v14309_v24 = vadd.f32 %v8242_v32, %v8113_v47  ;;  %v11182_v32 = vld [vmem:[#allocation2 + $0x1b8] sm:$0xf] }
 0x6b0   : > { %v11183_v17 = vor.u32 %v12074_v49, %v11182_v32  ;;  %v11558_v47 = vld [vmem:[#allocation2 + $0x1f8] sm:$0xf]  ;;  %v12236_v49 = vld [vmem:[#allocation2 + $0x118] sm:$0xf0] }
 0x6b1   : > { %v7252_v19 = vpop.f32.mrf.mxu1 }
 0x6b2   : > { %v14312_v22 = vadd.f32 %v7252_v19, %v14154_v3  ;;  %v7313_v13 = vpop.f32.mrf.mxu2  ;;  %v11559_v3 = vor.u32 %v12265_v54, %v11558_v47 }
 0x6b3   : > { %v14315_v46 = vadd.f32 %v7313_v13, %v14110_v56  ;;  %v11446_v13 = vld [vmem:[#allocation2 + $0x110] sm:$0xf] }
 0x6b4   : > { %14974 = vst [vmem:[#allocation57_spill] sm:$0xff] %v14312_v22  ;;  %8360 = vmatmul.bf16.gmra.mxu1 %v11435_v42 }
 0x6b6   : > { %v8115_v61 = vpop.f32.mrf.mxu3  ;;  %v8247_v8 = vpop.f32.mrf.mxu0 }
 0x6b7   : > { %v14317_v0 = vadd.f32 %v8244_v36, %v8115_v61  ;;  %7355 = vmatmul.bf16.gmra.mxu2 %v11183_v17  ;;  %v14977_v61 = vld [vmem:[#allocation13_spill] sm:$0xff]  ;;  %v14978_v17 = vld [vmem:[#allocation14_spill] sm:$0xff] }
 0x6b8   : > { %v8546_v27 = vunpack.c.l.bf16 %v14977_v61  ;;  %v8547_v47 = vunpack.c.l.bf16 %v14978_v17 }
 0x6b9   : > { %v7254_v26 = vpop.f32.mrf.mxu1  ;;  %8286 = vmatmul.bf16.gmra.mxu0 %v11563_v9 }
 0x6ba   : > { %v14320_v11 = vadd.f32 %v7254_v26, %v14160_v58  ;;  %v7316_v56 = vpop.f32.mrf.mxu2  ;;  %v14332_v58 = vld [vmem:[%s14766_s4] ss:$0 sm:$0xff]  ;;  %v11447_v26 = vor.u32 %v12236_v49, %v11446_v13  ;;  %v12267_v13 = vld [vmem:[#allocation2 + $0x214] sm:$0xf]  ;;  %v8612_v17 = vrot.slane %v8547_v47, 7 }
 0x6bb   : > { %8157 = vmatmul.bf16.gmra.mxu3 %v11559_v3  ;;  %v14323_v19 = vadd.f32 %v7316_v56, %v14116_v63  ;;  %v8611_v63 = vrot.slane %v8546_v27, 7  ;;  %v11194_v3 = vld [vmem:[#allocation2 + $0x1d0] sm:$0xf]  ;;  %v11572_v56 = vld [vmem:[#allocation2 + $0x21c] sm:$0xf0] }
 0x6bc   : > { %14975 = vst [vmem:[#allocation58_spill] sm:$0xff] %v14320_v11  ;;  %v12268_v11 = vld [vmem:[#allocation2 + $0x218] sm:$0xf0]  ;;  %v11570_v27 = vld [vmem:[#allocation2 + $0x210] sm:$0xf] }
 0x6bd   : > { %14976 = vst [vmem:[#allocation60_spill] sm:$0xff] %v14323_v19  ;;  %v11571_v6 = vor.u32 %v12268_v11, %v11570_v27  ;;  %v12239_v11 = vld [vmem:[#allocation2 + $0x130] sm:$0xf0] }
 0x6be   : > { %v8118_v36 = vpop.f32.mrf.mxu3 }
 0x6bf   : > { %v14325_v42 = vadd.f32 %v8247_v8, %v8118_v36  ;;  %v12077_v8 = vld [vmem:[#allocation2 + $0x1d8] sm:$0xf0]  ;;  %v8249_v36 = vpop.f32.mrf.mxu0 }
 0x6c0   : > { %v11195_v49 = vor.u32 %v12077_v8, %v11194_v3  ;;  %v14980_v8 = vld [vmem:[#allocation63_spill] sm:$0xff] }
 0x6c1   : > { %v8326_v32 = vpop.f32.mrf.mxu1 }
 0x6c2   : > { %v8327_v54 = vadd.f32 %v8326_v32, %v14165_v23  ;;  %v7318_v52 = vpop.f32.mrf.mxu2 }
 0x6c3   : > { %v14338_v23 = vadd.f32 %v7318_v52, %v14122_v39  ;;  %v8613_v52 = vsel %vm293_vm0, %v8611_v63, %v8612_v17 }
 0x6c4   : > { %v8446_v9 = vadd.f32 %v8327_v54, %v14163_v33  ;;  %8365 = vmatmul.bf16.gmra.mxu1 %v11447_v26  ;;  %v11575_v54 = vor.u32 %v12267_v13, %v11572_v56 }
 0x6c5   : > { %14979 = vst [vmem:[#allocation59_spill] sm:$0xff] %v14338_v23 }
 0x6c6   : > { %v8498_v61 = vadd.f32 %v14332_v58, %v8446_v9  ;;  %v8120_v32 = vpop.f32.mrf.mxu3 }
 0x6c7   : > { %v14340_v22 = vadd.f32 %v8249_v36, %v8120_v32  ;;  %7360 = vmatmul.bf16.gmra.mxu2 %v11195_v49  ;;  %v11458_v49 = vld [vmem:[#allocation2 + $0x128] sm:$0xf] }
 0x6c8   : > { %v8707_v33 = vadd.f32 %v8611_v63, %v8498_v61 }
 0x6c9   : > { %v8328_v26 = vpop.f32.mrf.mxu1  ;;  %8291 = vmatmul.bf16.gmra.mxu0 %v11575_v54  ;;  %v11206_v54 = vld [vmem:[#allocation2 + $0x1e8] sm:$0xf] }
 0x6ca   : > { %v8755_v48 = vmax.f32 %v8707_v33, 0.0  ;;  %v8329_v19 = vadd.f32 %v8328_v26, %v14173_v20  ;;  %v7321_v36 = vpop.f32.mrf.mxu2  ;;  %v12080_v26 = vld [vmem:[#allocation2 + $0x1f0] sm:$0xf0] }
 0x6cb   : > { %8162 = vmatmul.bf16.gmra.mxu3 %v11571_v6  ;;  %v14347_v56 = vadd.f32 %v7321_v36, %v14980_v8 }
 0x6cc   : > { %v8803_v39 = vpack.c.bf16 %v8755_v48, %v8755_v48  ;;  %v8447_v9 = vadd.f32 %v8329_v19, %v14171_v16  ;;  %v11459_v16 = vor.u32 %v12239_v11, %v11458_v49 }
 0x6cd   : > { %14981 = vst [vmem:[#allocation62_spill] sm:$0xff] %v14347_v56 }
 0x6ce   : > { %v8852_v32 = vshrl.u32 %v8803_v39, 16  ;;  %v8855_v61 = vshll.u32 %v8803_v39, 16  ;;  %v8499_v3 = vadd.f32 %v14332_v58, %v8447_v9  ;;  %v11584_v39 = vld [vmem:[#allocation2 + $0x234] sm:$0xf0] }
 0x6d0   : > { %v8854_v47 = vrot.slane %v8852_v32, 4  ;;  %v8857_v13 = vrot.slane %v8855_v61, 5  ;;  %v8708_v20 = vadd.f32 %v8613_v52, %v8499_v3  ;;  %v14982_v52 = vld [vmem:[#allocation61_spill] sm:$0xff]  ;;  %v12271_v3 = vld [vmem:[#allocation2 + $0x230] sm:$0xf0] }
 0x6d1   : > { %v8331_v33 = vpop.f32.mrf.mxu1 }
 0x6d2   : > { %v8756_v6 = vmax.f32 %v8708_v20, 0.0  ;;  %v8332_v48 = vadd.f32 %v8331_v33, %v14181_v60  ;;  %v8858_v19 = vor.u32 %v8857_v13, %v8854_v47  ;;  %v7323_v9 = vpop.f32.mrf.mxu2  ;;  %v12270_v20 = vld [vmem:[#allocation2 + $0x22c] sm:$0xf]  ;;  %v14983_v60 = vld [vmem:[#allocation19_spill] sm:$0xff]  ;;  %v11207_v47 = vor.u32 %v12080_v26, %v11206_v54 }
 0x6d3   : > { %v14353_v61 = vadd.f32 %v7323_v9, %v14982_v52  ;;  %v8548_v11 = vunpack.c.l.bf16 %v14983_v60  ;;  %v11587_v13 = vor.u32 %v12270_v20, %v11584_v39  ;;  %v14985_v39 = vld [vmem:[#allocation21_spill] sm:$0xff] }
 0x6d4   : > { %v8804_v63 = vpack.c.bf16 %v8756_v6, %v8756_v6  ;;  %v8448_v27 = vadd.f32 %v8332_v48, %v14179_v57  ;;  %8370 = vmatmul.bf16.gmra.mxu1 %v11459_v16  ;;  %v8859_v57 = vrot.slane %v8858_v19, 4  ;;  %v11582_v48 = vld [vmem:[#allocation2 + $0x228] sm:$0xf]  ;;  %v12242_v52 = vld [vmem:[#allocation2 + $0x148] sm:$0xf0] }
 0x6d5   : > { %v11583_v56 = vor.u32 %v12271_v3, %v11582_v48  ;;  %v8614_v26 = vrot.slane %v8548_v11, 7  ;;  %v11596_v48 = vld [vmem:[#allocation2 + $0x24c] sm:$0xf0] }
 0x6d6   : > { %v8861_v36 = vshll.u32 %v8804_v63, 16  ;;  %v8865_v8 = vshrl.u32 %v8804_v63, 16  ;;  %v8500_v32 = vadd.f32 %v14332_v58, %v8448_v27 }
 0x6d7   : > { %7365 = vmatmul.bf16.gmra.mxu2 %v11207_v47 }
 0x6d8   : > { %v8863_v33 = vrot.slane %v8861_v36, 5  ;;  %v8867_v49 = vrot.slane %v8865_v8, 4  ;;  %v8709_v6 = vadd.f32 %v8612_v17, %v8500_v32  ;;  %v8549_v36 = vunpack.c.l.bf16 %v14985_v39  ;;  %v12273_v39 = vld [vmem:[#allocation2 + $0x244] sm:$0xf] }
 0x6d9   : > { %v8333_v16 = vpop.f32.mrf.mxu1  ;;  %8296 = vmatmul.bf16.gmra.mxu0 %v11587_v13 }
 0x6da   : > { %v8864_v27 = vsel %vm13524_vm13, %v8859_v57, %v8863_v33  ;;  %v8757_v23 = vmax.f32 %v8709_v6, 0.0  ;;  %v8334_v9 = vadd.f32 %v8333_v16, %v14189_v41  ;;  %v8868_v19 = vor.u32 %v8867_v49, %v8863_v33  ;;  %v11470_v41 = vld [vmem:[#allocation2 + $0x140] sm:$0xf]  ;;  %v12083_v49 = vld [vmem:[#allocation2 + $0x208] sm:$0xf0] }
 0x6db   : > { %9267 = vst [vmem:[%s14361_s30] sm:$0xf] %v8864_v27  ;;  %8167 = vmatmul.bf16.gmra.mxu3 %v11583_v56  ;;  %v8615_v13 = vrot.slane %v8549_v36, 7  ;;  %v11471_v57 = vor.u32 %v12242_v52, %v11470_v41  ;;  %v11599_v41 = vor.u32 %v12273_v39, %v11596_v48 }
 0x6dc   : > { %v8805_v54 = vpack.c.bf16 %v8757_v23, %v8757_v23  ;;  %v8449_v17 = vadd.f32 %v8334_v9, %v14187_v50  ;;  %v8869_v3 = vrot.slane %v8868_v19, 4  ;;  %v11218_v19 = vld [vmem:[#allocation2 + $0x200] sm:$0xf] }
 0x6dd   : > { %v8616_v6 = vsel %vm293_vm0, %v8614_v26, %v8615_v13 }
 0x6de   : > { %v8871_v8 = vshll.u32 %v8805_v54, 16  ;;  %v8501_v32 = vadd.f32 %v14332_v58, %v8449_v17  ;;  %v12274_v54 = vld [vmem:[#allocation2 + $0x248] sm:$0xf0]  ;;  %v11219_v17 = vor.u32 %v12083_v49, %v11218_v19  ;;  %v12245_v49 = vld [vmem:[#allocation2 + $0x160] sm:$0xf0] }
 0x6e0   : > { %v8873_v20 = vrot.slane %v8871_v8, 5  ;;  %v8710_v60 = vadd.f32 %v8614_v26, %v8501_v32  ;;  %v11594_v32 = vld [vmem:[#allocation2 + $0x240] sm:$0xf] }
 0x6e1   : > { %v8336_v47 = vpop.f32.mrf.mxu1 }
 0x6e2   : > { %v8874_v56 = vsel %vm13524_vm13, %v8869_v3, %v8873_v20  ;;  %v8758_v23 = vmax.f32 %v8710_v60, 0.0  ;;  %v8337_v50 = vadd.f32 %v8336_v47, %v14197_v43 }
 0x6e3   : > { %9268 = vst [vmem:[%s14361_s30 + $0x4] sm:$0xf] %v8874_v56 }
 0x6e4   : > { %v8806_v11 = vpack.c.bf16 %v8758_v23, %v8758_v23  ;;  %v8450_v33 = vadd.f32 %v8337_v50, %v14195_v2  ;;  %8375 = vmatmul.bf16.gmra.mxu1 %v11471_v57  ;;  %v11595_v2 = vor.u32 %v12274_v54, %v11594_v32  ;;  %v14986_v57 = vld [vmem:[#allocation23_spill] sm:$0xff]  ;;  %v12086_v32 = vld [vmem:[#allocation2 + $0x220] sm:$0xf0] }
 0x6e6   : > { %v8876_v16 = vshrl.u32 %v8806_v11, 16  ;;  %v8879_v27 = vshll.u32 %v8806_v11, 16  ;;  %v8502_v9 = vadd.f32 %v14332_v58, %v8450_v33  ;;  %v8550_v11 = vunpack.c.l.bf16 %v14986_v57  ;;  %v11482_v33 = vld [vmem:[#allocation2 + $0x158] sm:$0xf] }
 0x6e7   : > { %7370 = vmatmul.bf16.gmra.mxu2 %v11219_v17  ;;  %v11483_v54 = vor.u32 %v12245_v49, %v11482_v33 }
 0x6e8   : > { %v8878_v36 = vrot.slane %v8876_v16, 4  ;;  %v8881_v43 = vrot.slane %v8879_v27, 5  ;;  %v8711_v8 = vadd.f32 %v8616_v6, %v8502_v9 }
 0x6e9   : > { %v8338_v52 = vpop.f32.mrf.mxu1  ;;  %8301 = vmatmul.bf16.gmra.mxu0 %v11599_v41  ;;  %v14987_v41 = vld [vmem:[#allocation24_spill] sm:$0xff] }
 0x6ea   : > { %v8759_v3 = vmax.f32 %v8711_v8, 0.0  ;;  %v8339_v20 = vadd.f32 %v8338_v52, %v14205_v62  ;;  %v8882_v26 = vor.u32 %v8881_v43, %v8878_v36  ;;  %v8617_v43 = vrot.slane %v8550_v11, 7  ;;  %v11230_v8 = vld [vmem:[#allocation2 + $0x218] sm:$0xf] }
 0x6eb   : > { %8172 = vmatmul.bf16.gmra.mxu3 %v11595_v2  ;;  %v8551_v52 = vunpack.c.l.bf16 %v14987_v41  ;;  %v11608_v2 = vld [vmem:[#allocation2 + $0x264] sm:$0xf0] }
 0x6ec   : > { %v8807_v60 = vpack.c.bf16 %v8759_v3, %v8759_v3  ;;  %v8451_v47 = vadd.f32 %v8339_v20, %v14203_v10  ;;  %v8883_v6 = vrot.slane %v8882_v26, 4  ;;  %v11606_v26 = vld [vmem:[#allocation2 + $0x258] sm:$0xf] }
 0x6ed   : > { %v8618_v57 = vrot.slane %v8551_v52, 7 }
 0x6ee   : > { %v8885_v56 = vshll.u32 %v8807_v60, 16  ;;  %v8889_v23 = vshrl.u32 %v8807_v60, 16  ;;  %v8503_v50 = vadd.f32 %v14332_v58, %v8451_v47  ;;  %v11231_v60 = vor.u32 %v12086_v32, %v11230_v8  ;;  %v11494_v8 = vld [vmem:[#allocation2 + $0x170] sm:$0xf] }
 0x6f0   : > { %v8887_v48 = vrot.slane %v8885_v56, 5  ;;  %v8891_v16 = vrot.slane %v8889_v23, 4  ;;  %v8712_v62 = vadd.f32 %v8615_v13, %v8503_v50  ;;  %v12276_v13 = vld [vmem:[#allocation2 + $0x25c] sm:$0xf] }
 0x6f1   : > { %v8341_v27 = vpop.f32.mrf.mxu1  ;;  %v11611_v50 = vor.u32 %v12276_v13, %v11608_v2  ;;  %v12089_v2 = vld [vmem:[#allocation2 + $0x238] sm:$0xf0] }
 0x6f2   : > { %v8888_v9 = vsel %vm13524_vm13, %v8883_v6, %v8887_v48  ;;  %v8760_v19 = vmax.f32 %v8712_v62, 0.0  ;;  %v8342_v10 = vadd.f32 %v8341_v27, %v14213_v21  ;;  %v8892_v17 = vor.u32 %v8891_v16, %v8887_v48  ;;  %v12277_v21 = vld [vmem:[#allocation2 + $0x260] sm:$0xf0] }
 0x6f3   : > { %9269 = vst [vmem:[%s14361_s30 + $0x8] sm:$0xf] %v8888_v9  ;;  %v11607_v11 = vor.u32 %v12277_v21, %v11606_v26  ;;  %v8619_v62 = vsel %vm293_vm0, %v8617_v43, %v8618_v57  ;;  %v14988_v21 = vld [vmem:[#allocation27_spill] sm:$0xff] }
 0x6f4   : > { %v8808_v39 = vpack.c.bf16 %v8760_v19, %v8760_v19  ;;  %v8452_v36 = vadd.f32 %v8342_v10, %v14211_v37  ;;  %8380 = vmatmul.bf16.gmra.mxu1 %v11483_v54  ;;  %v8893_v47 = vrot.slane %v8892_v17, 4  ;;  %v12248_v10 = vld [vmem:[#allocation2 + $0x178] sm:$0xf0] }
 0x6f5   : > { %v11495_v41 = vor.u32 %v12248_v10, %v11494_v8  ;;  %v12251_v10 = vld [vmem:[#allocation2 + $0x190] sm:$0xf0] }
 0x6f6   : > { %v8895_v3 = vshll.u32 %v8808_v39, 16  ;;  %v8504_v20 = vadd.f32 %v14332_v58, %v8452_v36 }
 0x6f7   : > { %7375 = vmatmul.bf16.gmra.mxu2 %v11231_v60  ;;  %v8552_v60 = vunpack.c.l.bf16 %v14988_v21 }
 0x6f8   : > { %v8897_v56 = vrot.slane %v8895_v3, 5  ;;  %v8713_v23 = vadd.f32 %v8617_v43, %v8504_v20  ;;  %v11242_v43 = vld [vmem:[#allocation2 + $0x230] sm:$0xf] }
 0x6f9   : > { %v8343_v37 = vpop.f32.mrf.mxu1  ;;  %8306 = vmatmul.bf16.gmra.mxu0 %v11611_v50 }
 0x6fa   : > { %v8898_v33 = vsel %vm13524_vm13, %v8893_v47, %v8897_v56  ;;  %v8761_v49 = vmax.f32 %v8713_v23, 0.0  ;;  %v8344_v6 = vadd.f32 %v8343_v37, %v14221_v7  ;;  %v11243_v47 = vor.u32 %v12089_v2, %v11242_v43 }
 0x6fb   : > { %9270 = vst [vmem:[%s14361_s30 + $0xc] sm:$0xf] %v8898_v33  ;;  %8177 = vmatmul.bf16.gmra.mxu3 %v11607_v11 }
 0x6fc   : > { %v8809_v48 = vpack.c.bf16 %v8761_v49, %v8761_v49  ;;  %v8453_v16 = vadd.f32 %v8344_v6, %v14219_v31 }
 0x6fe   : > { %v8900_v27 = vshrl.u32 %v8809_v48, 16  ;;  %v8903_v9 = vshll.u32 %v8809_v48, 16  ;;  %v8505_v19 = vadd.f32 %v14332_v58, %v8453_v16  ;;  %v8620_v16 = vrot.slane %v8552_v60, 7 }
 0x700   : > { %v8902_v54 = vrot.slane %v8900_v27, 4  ;;  %v8905_v17 = vrot.slane %v8903_v9, 5  ;;  %v8714_v39 = vadd.f32 %v8619_v62, %v8505_v19  ;;  %v14989_v62 = vld [vmem:[#allocation29_spill] sm:$0xff] }
 0x701   : > { %v8346_v36 = vpop.f32.mrf.mxu1  ;;  %v8553_v27 = vunpack.c.l.bf16 %v14989_v62  ;;  %v11506_v19 = vld [vmem:[#allocation2 + $0x188] sm:$0xf] }
 0x702   : > { %v8762_v7 = vmax.f32 %v8714_v39, 0.0  ;;  %v8347_v32 = vadd.f32 %v8346_v36, %v14229_v12  ;;  %v8906_v52 = vor.u32 %v8905_v17, %v8902_v54 }
 0x704   : > { %v8810_v13 = vpack.c.bf16 %v8762_v7, %v8762_v7  ;;  %v8454_v31 = vadd.f32 %v8347_v32, %v14227_v15  ;;  %8385 = vmatmul.bf16.gmra.mxu1 %v11495_v41  ;;  %v8907_v56 = vrot.slane %v8906_v52, 4  ;;  %v11507_v32 = vor.u32 %v12251_v10, %v11506_v19 }
 0x706   : > { %v8909_v3 = vshll.u32 %v8810_v13, 16  ;;  %v8913_v20 = vshrl.u32 %v8810_v13, 16  ;;  %v8506_v26 = vadd.f32 %v14332_v58, %v8454_v31 }
 0x707   : > { %7380 = vmatmul.bf16.gmra.mxu2 %v11243_v47 }
 0x708   : > { %v8911_v23 = vrot.slane %v8909_v3, 5  ;;  %v8915_v50 = vrot.slane %v8913_v20, 4  ;;  %v8715_v12 = vadd.f32 %v8618_v57, %v8506_v26 }
 0x709   : > { %v8348_v37 = vpop.f32.mrf.mxu1 }
 0x70a   : > { %v8912_v11 = vsel %vm13524_vm13, %v8907_v56, %v8911_v23  ;;  %v8763_v15 = vmax.f32 %v8715_v12, 0.0  ;;  %v8349_v33 = vadd.f32 %v8348_v37, %v14237_v30  ;;  %v8916_v49 = vor.u32 %v8915_v50, %v8911_v23  ;;  %v14990_v37 = vld [vmem:[#allocation31_spill] sm:$0xff] }
 0x70b   : > { %9271 = vst [vmem:[%s14361_s30 + $0x10] sm:$0xf] %v8912_v11  ;;  %v8621_v30 = vrot.slane %v8553_v27, 7  ;;  %v8554_v11 = vunpack.c.l.bf16 %v14990_v37 }
 0x70c   : > { %v8811_v6 = vpack.c.bf16 %v8763_v15, %v8763_v15  ;;  %v8455_v48 = vadd.f32 %v8349_v33, %v14235_v38  ;;  %v8917_v54 = vrot.slane %v8916_v49, 4  ;;  %v11518_v15 = vld [vmem:[#allocation2 + $0x1a0] sm:$0xf]  ;;  %v12254_v33 = vld [vmem:[#allocation2 + $0x1a8] sm:$0xf0] }
 0x70d   : > { %v8622_v13 = vsel %vm293_vm0, %v8620_v16, %v8621_v30 }
 0x70e   : > { %v8919_v9 = vshll.u32 %v8811_v6, 16  ;;  %v8507_v57 = vadd.f32 %v14332_v58, %v8455_v48 }
 0x710   : > { %v8921_v17 = vrot.slane %v8919_v9, 5  ;;  %v8716_v39 = vadd.f32 %v8620_v16, %v8507_v57  ;;  %v11519_v9 = vor.u32 %v12254_v33, %v11518_v15  ;;  %v14992_v33 = vld [vmem:[#allocation35_spill] sm:$0xff] }
 0x711   : > { %v8351_v36 = vpop.f32.mrf.mxu1 }
 0x712   : > { %v8922_v8 = vsel %vm13524_vm13, %v8917_v54, %v8921_v17  ;;  %v8764_v7 = vmax.f32 %v8716_v39, 0.0  ;;  %v8352_v38 = vadd.f32 %v8351_v36, %v14245_v55  ;;  %v8623_v54 = vrot.slane %v8554_v11, 7  ;;  %v14991_v17 = vld [vmem:[#allocation32_spill] sm:$0xff] }
 0x713   : > { %9272 = vst [vmem:[%s14361_s30 + $0x14] sm:$0xf] %v8922_v8  ;;  %v8555_v39 = vunpack.c.l.bf16 %v14991_v17  ;;  %v14993_v17 = vld [vmem:[#allocation37_spill] sm:$0xff] }
 0x714   : > { %v8812_v41 = vpack.c.bf16 %v8764_v7, %v8764_v7  ;;  %v8456_v52 = vadd.f32 %v8352_v38, %v14243_v14  ;;  %8390 = vmatmul.bf16.gmra.mxu1 %v11507_v32 }
 0x716   : > { %v8924_v31 = vshrl.u32 %v8812_v41, 16  ;;  %v8927_v43 = vshll.u32 %v8812_v41, 16  ;;  %v8508_v2 = vadd.f32 %v14332_v58, %v8456_v52  ;;  %v8624_v41 = vrot.slane %v8555_v39, 7 }
 0x717   : > { %v8557_v39 = vunpack.c.l.bf16 %v14993_v17 }
 0x718   : > { %v8926_v3 = vrot.slane %v8924_v31, 4  ;;  %v8929_v20 = vrot.slane %v8927_v43, 5  ;;  %v8717_v26 = vadd.f32 %v8622_v13, %v8508_v2  ;;  %v8625_v43 = vsel %vm293_vm0, %v8623_v54, %v8624_v41 }
 0x719   : > { %v8353_v21 = vpop.f32.mrf.mxu1 }
 0x71a   : > { %v8765_v60 = vmax.f32 %v8717_v26, 0.0  ;;  %v8354_v47 = vadd.f32 %v8353_v21, %v14253_v5  ;;  %v8930_v55 = vor.u32 %v8929_v20, %v8926_v3  ;;  %v12257_v26 = vld [vmem:[#allocation2 + $0x1c0] sm:$0xf0] }
 0x71c   : > { %v8813_v56 = vpack.c.bf16 %v8765_v60, %v8765_v60  ;;  %v8457_v23 = vadd.f32 %v8354_v47, %v14251_v1  ;;  %v8931_v49 = vrot.slane %v8930_v55, 4 }
 0x71e   : > { %v8933_v14 = vshll.u32 %v8813_v56, 16  ;;  %v8937_v50 = vshrl.u32 %v8813_v56, 16  ;;  %v8509_v12 = vadd.f32 %v14332_v58, %v8457_v23  ;;  %v11530_v56 = vld [vmem:[#allocation2 + $0x1b8] sm:$0xf] }
 0x720   : > { %v8935_v6 = vrot.slane %v8933_v14, 5  ;;  %v8939_v48 = vrot.slane %v8937_v50, 4  ;;  %v8718_v16 = vadd.f32 %v8621_v30, %v8509_v12 }
 0x721   : > { %v8356_v62 = vpop.f32.mrf.mxu1 }
 0x722   : > { %v8936_v5 = vsel %vm13524_vm13, %v8931_v49, %v8935_v6  ;;  %v8766_v27 = vmax.f32 %v8718_v16, 0.0  ;;  %v8357_v1 = vadd.f32 %v8356_v62, %v14261_v53  ;;  %v8940_v57 = vor.u32 %v8939_v48, %v8935_v6 }
 0x723   : > { %9273 = vst [vmem:[%s14361_s30 + $0x18] sm:$0xf] %v8936_v5  ;;  %v8556_v49 = vunpack.c.l.bf16 %v14992_v33  ;;  %v11554_v33 = vld [vmem:[#allocation2 + $0x1e8] sm:$0xf] }
 0x724   : > { %v8814_v19 = vpack.c.bf16 %v8766_v27, %v8766_v27  ;;  %v8458_v10 = vadd.f32 %v8357_v1, %v14259_v29  ;;  %8395 = vmatmul.bf16.gmra.mxu1 %v11519_v9  ;;  %v8941_v8 = vrot.slane %v8940_v57, 4 }
 0x726   : > { %v8943_v36 = vshll.u32 %v8814_v19, 16  ;;  %v8510_v30 = vadd.f32 %v14332_v58, %v8458_v10  ;;  %v8626_v10 = vrot.slane %v8556_v49, 7  ;;  %v12263_v49 = vld [vmem:[#allocation2 + $0x1f0] sm:$0xf0] }
 0x728   : > { %v8945_v7 = vrot.slane %v8943_v36, 5  ;;  %v8719_v38 = vadd.f32 %v8623_v54, %v8510_v30  ;;  %v14439_v54 = vpop.f32.mrf.mxu3 }
 0x729   : > { %v8358_v32 = vpop.f32.mrf.mxu1 }
 0x72a   : > { %v8946_v53 = vsel %vm13524_vm13, %v8941_v8, %v8945_v7  ;;  %v8767_v52 = vmax.f32 %v8719_v38, 0.0  ;;  %v8359_v13 = vadd.f32 %v8358_v32, %v14269_v18  ;;  %v11531_v18 = vor.u32 %v12257_v26, %v11530_v56  ;;  %v11542_v8 = vld [vmem:[#allocation2 + $0x1d0] sm:$0xf]  ;;  %v12260_v7 = vld [vmem:[#allocation2 + $0x1d8] sm:$0xf0] }
 0x72b   : > { %9274 = vst [vmem:[%s14361_s30 + $0x1c] sm:$0xf] %v8946_v53  ;;  %v8627_v53 = vrot.slane %v8557_v39, 7 }
 0x72c   : > { %v8815_v29 = vpack.c.bf16 %v8767_v52, %v8767_v52  ;;  %v8459_v31 = vadd.f32 %v8359_v13, %v14267_v51 }
 0x72e   : > { %v8948_v2 = vshrl.u32 %v8815_v29, 16  ;;  %v8951_v3 = vshll.u32 %v8815_v29, 16  ;;  %v8511_v20 = vadd.f32 %v14332_v58, %v8459_v31  ;;  %v11543_v29 = vor.u32 %v12260_v7, %v11542_v8 }
 0x730   : > { %v8950_v21 = vrot.slane %v8948_v2, 4  ;;  %v8953_v60 = vrot.slane %v8951_v3, 5  ;;  %v8720_v47 = vadd.f32 %v8625_v43, %v8511_v20  ;;  %v8628_v2 = vsel %vm293_vm0, %v8626_v10, %v8627_v53 }
 0x731   : > { %v8361_v55 = vpop.f32.mrf.mxu1 }
 0x732   : > { %v8768_v23 = vmax.f32 %v8720_v47, 0.0  ;;  %v8362_v14 = vadd.f32 %v8361_v55, %v14277_v35  ;;  %v8954_v50 = vor.u32 %v8953_v60, %v8950_v21  ;;  %v14452_v60 = vpop.f32.mrf.mxu3 }
 0x734   : > { %v8816_v12 = vpack.c.bf16 %v8768_v23, %v8768_v23  ;;  %v8460_v51 = vadd.f32 %v8362_v14, %v14275_v45  ;;  %8400 = vmatmul.bf16.gmra.mxu1 %v11531_v18  ;;  %v8955_v6 = vrot.slane %v8954_v50, 4  ;;  %v14436_v45 = vpop.f32.mrf.mxu0 }
 0x736   : > { %v8957_v37 = vshll.u32 %v8816_v12, 16  ;;  %v8961_v11 = vshrl.u32 %v8816_v12, 16  ;;  %v8512_v15 = vadd.f32 %v14332_v58, %v8460_v51 }
 0x738   : > { %v8959_v48 = vrot.slane %v8957_v37, 5  ;;  %v8963_v16 = vrot.slane %v8961_v11, 4  ;;  %v8721_v62 = vadd.f32 %v8624_v41, %v8512_v15  ;;  %v14994_v11 = vld [vmem:[#allocation39_spill] sm:$0xff] }
 0x739   : > { %v8363_v5 = vpop.f32.mrf.mxu1  ;;  %v8558_v15 = vunpack.c.l.bf16 %v14994_v11 }
 0x73a   : > { %v8960_v35 = vsel %vm13524_vm13, %v8955_v6, %v8959_v48  ;;  %v8769_v27 = vmax.f32 %v8721_v62, 0.0  ;;  %v8364_v1 = vadd.f32 %v8363_v5, %v14285_v4  ;;  %v8964_v9 = vor.u32 %v8963_v16, %v8959_v48  ;;  %v14460_v48 = vpop.f32.mrf.mxu2 }
 0x73b   : > { %9275 = vst [vmem:[%s14361_s30 + $0x20] sm:$0xf] %v8960_v35  ;;  %v14462_v35 = vpop.f32.mrf.mxu3  ;;  %v8629_v39 = vrot.slane %v8558_v15, 7 }
 0x73c   : > { %v8817_v57 = vpack.c.bf16 %v8769_v27, %v8769_v27  ;;  %v8461_v19 = vadd.f32 %v8364_v1, %v14283_v44  ;;  %v8965_v38 = vrot.slane %v8964_v9, 4  ;;  %v14449_v3 = vpop.f32.mrf.mxu0 }
 0x73e   : > { %v8967_v36 = vshll.u32 %v8817_v57, 16  ;;  %v8513_v30 = vadd.f32 %v14332_v58, %v8461_v19  ;;  %v11555_v57 = vor.u32 %v12263_v49, %v11554_v33 }
 0x740   : > { %v8969_v4 = vrot.slane %v8967_v36, 5  ;;  %v8722_v32 = vadd.f32 %v8626_v10, %v8513_v30  ;;  %v14995_v36 = vld [vmem:[#allocation40_spill] sm:$0xff] }
 0x741   : > { %v8366_v41 = vpop.f32.mrf.mxu1  ;;  %v8559_v30 = vunpack.c.l.bf16 %v14995_v36 }
 0x742   : > { %v8970_v52 = vsel %vm13524_vm13, %v8965_v38, %v8969_v4  ;;  %v8770_v44 = vmax.f32 %v8722_v32, 0.0  ;;  %v8367_v13 = vadd.f32 %v8366_v41, %v14293_v25 }
 0x743   : > { %9276 = vst [vmem:[%s14361_s30 + $0x24] sm:$0xf] %v8970_v52  ;;  %v14473_v52 = vpop.f32.mrf.mxu2 }
 0x744   : > { %v8818_v31 = vpack.c.bf16 %v8770_v44, %v8770_v44  ;;  %v8462_v43 = vadd.f32 %v8367_v13, %v14291_v59  ;;  %8405 = vmatmul.bf16.gmra.mxu1 %v11543_v29  ;;  %v14458_v6 = vpop.f32.mrf.mxu0  ;;  %v14478_v29 = vpop.f32.mrf.mxu3 }
 0x746   : > { %v8972_v20 = vshrl.u32 %v8818_v31, 16  ;;  %v8975_v26 = vshll.u32 %v8818_v31, 16  ;;  %v8514_v21 = vadd.f32 %v14332_v58, %v8462_v43 }
 0x748   : > { %v8974_v47 = vrot.slane %v8972_v20, 4  ;;  %v8977_v55 = vrot.slane %v8975_v26, 5  ;;  %v8723_v56 = vadd.f32 %v8628_v2, %v8514_v21 }
 0x749   : > { %v8368_v25 = vpop.f32.mrf.mxu1 }
 0x74a   : > { %v8771_v23 = vmax.f32 %v8723_v56, 0.0  ;;  %v8369_v14 = vadd.f32 %v8368_v25, %v14301_v40  ;;  %v8978_v18 = vor.u32 %v8977_v55, %v8974_v47  ;;  %v12266_v47 = vld [vmem:[#allocation2 + $0x208] sm:$0xf0] }
 0x74c   : > { %v8819_v59 = vpack.c.bf16 %v8771_v23, %v8771_v23  ;;  %v8463_v50 = vadd.f32 %v8369_v14, %v14299_v34  ;;  %v8979_v16 = vrot.slane %v8978_v18, 4  ;;  %v11566_v14 = vld [vmem:[#allocation2 + $0x200] sm:$0xf]  ;;  %v14490_v15 = vpop.f32.mrf.mxu3 }
 0x74e   : > { %v8981_v12 = vshll.u32 %v8819_v59, 16  ;;  %v8985_v51 = vshrl.u32 %v8819_v59, 16  ;;  %v8515_v37 = vadd.f32 %v14332_v58, %v8463_v50  ;;  %v11567_v59 = vor.u32 %v12266_v47, %v11566_v14 }
 0x750   : > { %v8983_v62 = vrot.slane %v8981_v12, 5  ;;  %v8987_v40 = vrot.slane %v8985_v51, 4  ;;  %v8724_v5 = vadd.f32 %v8627_v53, %v8515_v37  ;;  %v8630_v53 = vrot.slane %v8559_v30, 7  ;;  %v14487_v12 = vpop.f32.mrf.mxu2  ;;  %v14996_v37 = vld [vmem:[#allocation60_spill] sm:$0xff] }
 0x751   : > { %v8371_v34 = vpop.f32.mrf.mxu1 }
 0x752   : > { %v8984_v27 = vsel %vm13524_vm13, %v8979_v16, %v8983_v62  ;;  %v8772_v1 = vmax.f32 %v8724_v5, 0.0  ;;  %v8372_v9 = vadd.f32 %v8371_v34, %v14309_v24  ;;  %v8988_v19 = vor.u32 %v8987_v40, %v8983_v62  ;;  %v14471_v24 = vpop.f32.mrf.mxu0  ;;  %v14997_v62 = vld [vmem:[#allocation43_spill] sm:$0xff] }
 0x753   : > { %9277 = vst [vmem:[%s14361_s30 + $0x28] sm:$0xf] %v8984_v27  ;;  %v8631_v2 = vsel %vm293_vm0, %v8629_v39, %v8630_v53  ;;  %v8560_v40 = vunpack.c.l.bf16 %v14997_v62 }
 0x754   : > { %v8820_v10 = vpack.c.bf16 %v8772_v1, %v8772_v1  ;;  %v8464_v17 = vadd.f32 %v8372_v9, %v14307_v28  ;;  %8410 = vmatmul.bf16.gmra.mxu1 %v11555_v57  ;;  %v8989_v38 = vrot.slane %v8988_v19, 4 }
 0x755   : > { %v8632_v30 = vrot.slane %v8560_v40, 7 }
 0x756   : > { %v8991_v8 = vshll.u32 %v8820_v10, 16  ;;  %v8516_v7 = vadd.f32 %v14332_v58, %v8464_v17 }
 0x758   : > { %v8993_v4 = vrot.slane %v8991_v8, 5  ;;  %v8725_v32 = vadd.f32 %v8629_v39, %v8516_v7  ;;  %v14998_v39 = vld [vmem:[#allocation59_spill] sm:$0xff]  ;;  %v14999_v8 = vld [vmem:[#allocation45_spill] sm:$0xff] }
 0x759   : > { %v8373_v41 = vpop.f32.mrf.mxu1  ;;  %v8561_v7 = vunpack.c.l.bf16 %v14999_v8 }
 0x75a   : > { %v8994_v28 = vsel %vm13524_vm13, %v8989_v38, %v8993_v4  ;;  %v8773_v44 = vmax.f32 %v8725_v32, 0.0  ;;  %v8374_v13 = vadd.f32 %v8373_v41, %v14317_v0  ;;  %v14485_v50 = vpop.f32.mrf.mxu0  ;;  %v14502_v4 = vpop.f32.mrf.mxu2 }
 0x75b   : > { %9278 = vst [vmem:[%s14361_s30 + $0x2c] sm:$0xf] %v8994_v28  ;;  %v11578_v28 = vld [vmem:[#allocation2 + $0x218] sm:$0xf] }
 0x75c   : > { %v8821_v31 = vpack.c.bf16 %v8773_v44, %v8773_v44  ;;  %v8465_v43 = vadd.f32 %v8374_v13, %v14315_v46  ;;  %v8253_v44 = vadd.f32 %v14436_v45, %v14439_v54 }
 0x75e   : > { %v8996_v20 = vshrl.u32 %v8821_v31, 16  ;;  %v8999_v26 = vshll.u32 %v8821_v31, 16  ;;  %v8517_v21 = vadd.f32 %v14332_v58, %v8465_v43 }
 0x760   : > { %v8998_v55 = vrot.slane %v8996_v20, 4  ;;  %v9001_v56 = vrot.slane %v8999_v26, 5  ;;  %v8726_v25 = vadd.f32 %v8631_v2, %v8517_v21  ;;  %v8633_v20 = vrot.slane %v8561_v7, 7  ;;  %v15002_v7 = vld [vmem:[#allocation65_spill] sm:$0xff] }
 0x761   : > { %v8376_v23 = vpop.f32.mrf.mxu1 }
 0x762   : > { %v8774_v18 = vmax.f32 %v8726_v25, 0.0  ;;  %v8377_v0 = vadd.f32 %v8376_v23, %v14325_v42  ;;  %v9002_v46 = vor.u32 %v9001_v56, %v8998_v55  ;;  %v14500_v38 = vpop.f32.mrf.mxu0  ;;  %v15000_v25 = vld [vmem:[#allocation62_spill] sm:$0xff]  ;;  %v8634_v14 = vsel %vm293_vm0, %v8632_v30, %v8633_v20 }
 0x764   : > { %v8822_v51 = vpack.c.bf16 %v8774_v18, %v8774_v18  ;;  %v8466_v11 = vadd.f32 %v8377_v0, %v14996_v37  ;;  %8415 = vmatmul.bf16.gmra.mxu1 %v11567_v59  ;;  %v9003_v42 = vrot.slane %v9002_v46, 4  ;;  %v8255_v0 = vadd.f32 %v14449_v3, %v14452_v60  ;;  %v14519_v46 = vpop.f32.mrf.mxu2  ;;  %v11590_v60 = vld [vmem:[#allocation2 + $0x230] sm:$0xf] }
 0x766   : > { %v9005_v33 = vshll.u32 %v8822_v51, 16  ;;  %v9009_v49 = vshrl.u32 %v8822_v51, 16  ;;  %v8518_v16 = vadd.f32 %v14332_v58, %v8466_v11 }
 0x768   : > { %v9007_v5 = vrot.slane %v9005_v33, 5  ;;  %v9011_v34 = vrot.slane %v9009_v49, 4  ;;  %v8727_v27 = vadd.f32 %v8630_v53, %v8518_v16  ;;  %v14505_v53 = vpop.f32.mrf.mxu3 }
 0x769   : > { %v8378_v1 = vpop.f32.mrf.mxu1 }
 0x76a   : > { %v9008_v9 = vsel %vm13524_vm13, %v9003_v42, %v9007_v5  ;;  %v8775_v57 = vmax.f32 %v8727_v27, 0.0  ;;  %v8379_v19 = vadd.f32 %v8378_v1, %v14340_v22  ;;  %v9012_v10 = vor.u32 %v9011_v34, %v9007_v5  ;;  %v12269_v22 = vld [vmem:[#allocation2 + $0x220] sm:$0xf0]  ;;  %v14517_v59 = vpop.f32.mrf.mxu0  ;;  %v12272_v1 = vld [vmem:[#allocation2 + $0x238] sm:$0xf0] }
 0x76b   : > { %9279 = vst [vmem:[%s14361_s30 + $0x30] sm:$0xf] %v9008_v9  ;;  %v11579_v55 = vor.u32 %v12269_v22, %v11578_v28  ;;  %v8258_v9 = vadd.f32 %v14458_v6, %v14462_v35  ;;  %v11591_v8 = vor.u32 %v12272_v1, %v11590_v60 }
 0x76c   : > { %v8823_v17 = vpack.c.bf16 %v8775_v57, %v8775_v57  ;;  %v8467_v36 = vadd.f32 %v8379_v19, %v14998_v39  ;;  %v9013_v13 = vrot.slane %v9012_v10, 4  ;;  %v15001_v57 = vld [vmem:[#allocation15_spill] sm:$0xff] }
 0x76d   : > { %v8562_v19 = vunpack.c.l.bf16 %v15001_v57  ;;  %v11602_v57 = vld [vmem:[#allocation2 + $0x248] sm:$0xf] }
 0x76e   : > { %v9015_v32 = vshll.u32 %v8823_v17, 16  ;;  %v8519_v41 = vadd.f32 %v14332_v58, %v8467_v36 }
 0x770   : > { %v9017_v31 = vrot.slane %v9015_v32, 5  ;;  %v8728_v43 = vadd.f32 %v8632_v30, %v8519_v41  ;;  %v14521_v33 = vpop.f32.mrf.mxu3  ;;  %v14532_v41 = vpop.f32.mrf.mxu2 }
 0x771   : > { %v8381_v2 = vpop.f32.mrf.mxu1 }
 0x772   : > { %v9018_v26 = vsel %vm13524_vm13, %v9013_v13, %v9017_v31  ;;  %v8776_v21 = vmax.f32 %v8728_v43, 0.0  ;;  %v8382_v47 = vadd.f32 %v8381_v2, %v8253_v44  ;;  %v14530_v32 = vpop.f32.mrf.mxu0  ;;  %v8635_v43 = vrot.slane %v8562_v19, 7  ;;  %v15003_v2 = vld [vmem:[#allocation16_spill] sm:$0xff] }
 0x773   : > { %9280 = vst [vmem:[%s14361_s30 + $0x34] sm:$0xf] %v9018_v26  ;;  %v15005_v19 = vld [vmem:[#allocation64_spill] sm:$0xff] }
 0x774   : > { %v8824_v56 = vpack.c.bf16 %v8776_v21, %v8776_v21  ;;  %v8468_v23 = vadd.f32 %v8382_v47, %v15000_v25  ;;  %8420 = vmatmul.bf16.gmra.mxu1 %v11579_v55  ;;  %v8260_v21 = vadd.f32 %v14471_v24, %v14478_v29 }
 0x776   : > { %v9020_v18 = vshrl.u32 %v8824_v56, 16  ;;  %v9023_v45 = vshll.u32 %v8824_v56, 16  ;;  %v8520_v54 = vadd.f32 %v14332_v58, %v8468_v23 }
 0x778   : > { %v9022_v51 = vrot.slane %v9020_v18, 4  ;;  %v9025_v37 = vrot.slane %v9023_v45, 5  ;;  %v8729_v11 = vadd.f32 %v8634_v14, %v8520_v54  ;;  %v14536_v35 = vpop.f32.mrf.mxu3  ;;  %v15004_v14 = vld [vmem:[#allocation66_spill] sm:$0xff] }
 0x779   : > { %v8383_v49 = vpop.f32.mrf.mxu1  ;;  %v7329_v18 = vadd.f32 %v14473_v52, %v15004_v14 }
 0x77a   : > { %v8777_v16 = vmax.f32 %v8729_v11, 0.0  ;;  %v8384_v62 = vadd.f32 %v8383_v49, %v8255_v0  ;;  %v9026_v40 = vor.u32 %v9025_v37, %v9022_v51  ;;  %v14548_v51 = vpop.f32.mrf.mxu0  ;;  %v14550_v37 = vpop.f32.mrf.mxu2 }
 0x77c   : > { %v8825_v42 = vpack.c.bf16 %v8777_v16, %v8777_v16  ;;  %v8469_v5 = vadd.f32 %v8384_v62, %v14353_v61  ;;  %v9027_v10 = vrot.slane %v9026_v40, 4  ;;  %v7327_v61 = vadd.f32 %v14460_v48, %v15002_v7 }
 0x77d   : > { %v8563_v48 = vunpack.c.l.bf16 %v15003_v2  ;;  %v8263_v40 = vadd.f32 %v14485_v50, %v14490_v15  ;;  %v12279_v50 = vld [vmem:[#allocation2 + $0x274] sm:$0xf]  ;;  %v11620_v15 = vld [vmem:[#allocation2 + $0x27c] sm:$0xf0] }
 0x77e   : > { %v9029_v34 = vshll.u32 %v8825_v42, 16  ;;  %v9033_v27 = vshrl.u32 %v8825_v42, 16  ;;  %v8521_v3 = vadd.f32 %v14332_v58, %v8469_v5  ;;  %v12275_v42 = vld [vmem:[#allocation2 + $0x250] sm:$0xf0]  ;;  %v11618_v5 = vld [vmem:[#allocation2 + $0x270] sm:$0xf]  ;;  %v11623_v2 = vor.u32 %v12279_v50, %v11620_v15 }
 0x77f   : > { %v8636_v23 = vrot.slane %v8563_v48, 7 }
 0x780   : > { %v9031_v17 = vrot.slane %v9029_v34, 5  ;;  %v9035_v39 = vrot.slane %v9033_v27, 4  ;;  %v8730_v36 = vadd.f32 %v8633_v20, %v8521_v3  ;;  %v14552_v29 = vpop.f32.mrf.mxu3  ;;  %v12280_v34 = vld [vmem:[#allocation2 + $0x278] sm:$0xf0]  ;;  %8311 = vmatmul.bf16.gmra.mxu0 %v11623_v2 }
 0x781   : > { %v8386_v30 = vpop.f32.mrf.mxu1  ;;  %v8637_v49 = vsel %vm293_vm0, %v8635_v43, %v8636_v23  ;;  %v11619_v1 = vor.u32 %v12280_v34, %v11618_v5 }
 0x782   : > { %v9032_v28 = vsel %vm13524_vm13, %v9027_v10, %v9031_v17  ;;  %v8778_v22 = vmax.f32 %v8730_v36, 0.0  ;;  %v8387_v6 = vadd.f32 %v8386_v30, %v8258_v9  ;;  %v9036_v44 = vor.u32 %v9035_v39, %v9031_v17  ;;  %v14560_v7 = vpop.f32.mrf.mxu0 }
 0x783   : > { %9281 = vst [vmem:[%s14361_s30 + $0x38] sm:$0xf] %v9032_v28  ;;  %v7332_v10 = vadd.f32 %v14487_v12, %v15005_v19  ;;  %v11603_v36 = vor.u32 %v12275_v42, %v11602_v57  ;;  %8182 = vmatmul.bf16.gmra.mxu3 %v11619_v1  ;;  %v14567_v12 = vld [vmem:[%s14766_s4] ss:$0 sm:$0xff]  ;;  %v15009_v1 = vld [vmem:[#allocation69_spill] sm:$0xff] }
 0x784   : > { %v8826_v13 = vpack.c.bf16 %v8778_v22, %v8778_v22  ;;  %v8470_v31 = vadd.f32 %v8387_v6, %v7327_v61  ;;  %8425 = vmatmul.bf16.gmra.mxu1 %v11591_v8  ;;  %v9037_v47 = vrot.slane %v9036_v44, 4  ;;  %v14562_v61 = vpop.f32.mrf.mxu2  ;;  %v8265_v44 = vadd.f32 %v14500_v38, %v14505_v53 }
 0x786   : > { %v9039_v20 = vshll.u32 %v8826_v13, 16  ;;  %v8522_v26 = vadd.f32 %v14332_v58, %v8470_v31  ;;  %v15006_v31 = vld [vmem:[#allocation20_spill] sm:$0xff] }
 0x788   : > { %v9041_v55 = vrot.slane %v9039_v20, 5  ;;  %v8731_v56 = vadd.f32 %v8635_v43, %v8522_v26  ;;  %v14572_v13 = vpop.f32.mrf.mxu3  ;;  %v8564_v43 = vunpack.c.l.bf16 %v15006_v31 }
 0x789   : > { %v8388_v25 = vpop.f32.mrf.mxu1 }
 0x78a   : > { %v9042_v45 = vsel %vm13524_vm13, %v9037_v47, %v9041_v55  ;;  %v8779_v54 = vmax.f32 %v8731_v56, 0.0  ;;  %v8389_v0 = vadd.f32 %v8388_v25, %v8260_v21  ;;  %v15007_v55 = vld [vmem:[#allocation68_spill] sm:$0xff] }
 0x78b   : > { %9282 = vst [vmem:[%s14361_s30 + $0x3c] sm:$0xf] %v9042_v45  ;;  %v7334_v56 = vadd.f32 %v14502_v4, %v15007_v55  ;;  %v8268_v4 = vadd.f32 %v14517_v59, %v14521_v33 }
 0x78c   : > { %v8827_v11 = vpack.c.bf16 %v8779_v54, %v8779_v54  ;;  %v8471_v24 = vadd.f32 %v8389_v0, %v7329_v18  ;;  %v8638_v54 = vrot.slane %v8564_v43, 7  ;;  %v15008_v0 = vld [vmem:[#allocation22_spill] sm:$0xff] }
 0x78e   : > { %v9044_v16 = vshrl.u32 %v8827_v11, 16  ;;  %v9047_v62 = vshll.u32 %v8827_v11, 16  ;;  %v8523_v52 = vadd.f32 %v14332_v58, %v8471_v24  ;;  %v8565_v11 = vunpack.c.l.bf16 %v15008_v0  ;;  %v11614_v24 = vld [vmem:[#allocation2 + $0x260] sm:$0xf]  ;;  %v15012_v0 = vld [vmem:[#allocation71_spill] sm:$0xff] }
 0x790   : > { %v9046_v27 = vrot.slane %v9044_v16, 4  ;;  %v9049_v3 = vrot.slane %v9047_v62, 5  ;;  %v8732_v60 = vadd.f32 %v8637_v49, %v8523_v52  ;;  %v12278_v49 = vld [vmem:[#allocation2 + $0x268] sm:$0xf0]  ;;  %v14584_v62 = vpop.f32.mrf.mxu0  ;;  %v14586_v52 = vpop.f32.mrf.mxu2 }
 0x791   : > { %v8391_v9 = vpop.f32.mrf.mxu1  ;;  %v11615_v34 = vor.u32 %v12278_v49, %v11614_v24 }
 0x792   : > { %v8780_v17 = vmax.f32 %v8732_v60, 0.0  ;;  %v8392_v39 = vadd.f32 %v8391_v9, %v8263_v40  ;;  %v9050_v58 = vor.u32 %v9049_v3, %v9046_v27  ;;  %v14588_v27 = vpop.f32.mrf.mxu3  ;;  %v8639_v60 = vrot.slane %v8565_v11, 7 }
 0x793   : > { %v7337_v9 = vadd.f32 %v14519_v46, %v15009_v1  ;;  %v7342_v11 = vadd.f32 %v14550_v37, %v15012_v0  ;;  %v8275_v1 = vadd.f32 %v14560_v7, %v14572_v13 }
 0x794   : > { %v8828_v30 = vpack.c.bf16 %v8780_v17, %v8780_v17  ;;  %v8472_v8 = vadd.f32 %v8392_v39, %v7332_v10  ;;  %8430 = vmatmul.bf16.gmra.mxu1 %v11603_v36  ;;  %v9051_v48 = vrot.slane %v9050_v58, 4  ;;  %v8640_v17 = vsel %vm293_vm0, %v8638_v54, %v8639_v60 }
 0x796   : > { %v9053_v28 = vshll.u32 %v8828_v30, 16  ;;  %v9057_v22 = vshrl.u32 %v8828_v30, 16  ;;  %v8524_v6 = vadd.f32 %v14567_v12, %v8472_v8  ;;  %v8270_v30 = vadd.f32 %v14530_v32, %v14536_v35  ;;  %v12281_v32 = vld [vmem:[#allocation2 + $0x280] sm:$0xf0] }
 0x798   : > { %v9055_v20 = vrot.slane %v9053_v28, 5  ;;  %v9059_v26 = vrot.slane %v9057_v22, 4  ;;  %v8733_v21 = vadd.f32 %v8636_v23, %v8524_v6  ;;  %v15010_v28 = vld [vmem:[#allocation67_spill] sm:$0xff]  ;;  %v14601_v6 = vpop.f32.mrf.mxu0 }
 0x799   : > { %v8393_v47 = vpop.f32.mrf.mxu1  ;;  %v7339_v22 = vadd.f32 %v14532_v41, %v15010_v28  ;;  %v8273_v41 = vadd.f32 %v14548_v51, %v14552_v29 }
 0x79a   : > { %v9056_v25 = vsel %vm13524_vm13, %v9051_v48, %v9055_v20  ;;  %v8781_v14 = vmax.f32 %v8733_v21, 0.0  ;;  %v8394_v18 = vadd.f32 %v8393_v47, %v8265_v44  ;;  %v9060_v38 = vor.u32 %v9059_v26, %v9055_v20  ;;  %v14603_v44 = vpop.f32.mrf.mxu2  ;;  %v14605_v2 = vpop.f32.mrf.mxu3  ;;  %v11626_v21 = vld [vmem:[#allocation2 + $0x278] sm:$0xf] }
 0x79b   : > { %9283 = vst [vmem:[%s14361_s30 + $0x40] sm:$0xf] %v9056_v25 }
 0x79c   : > { %v8829_v53 = vpack.c.bf16 %v8781_v14, %v8781_v14  ;;  %v8473_v45 = vadd.f32 %v8394_v18, %v7334_v56  ;;  %v9061_v40 = vrot.slane %v9060_v38, 4  ;;  %v15011_v56 = vld [vmem:[#allocation25_spill] sm:$0xff]  ;;  %v11627_v14 = vor.u32 %v12281_v32, %v11626_v21 }
 0x79d   : > { %v8566_v25 = vunpack.c.l.bf16 %v15011_v56 }
 0x79e   : > { %v9063_v23 = vshll.u32 %v8829_v53, 16  ;;  %v8525_v16 = vadd.f32 %v14567_v12, %v8473_v45 }
 0x7a0   : > { %v9065_v42 = vrot.slane %v9063_v23, 5  ;;  %v8734_v5 = vadd.f32 %v8638_v54, %v8525_v16  ;;  %v14616_v16 = vpop.f32.mrf.mxu0 }
 0x7a1   : > { %v8396_v3 = vpop.f32.mrf.mxu1 }
 0x7a2   : > { %v9066_v57 = vsel %vm13524_vm13, %v9061_v40, %v9065_v42  ;;  %v8782_v19 = vmax.f32 %v8734_v5, 0.0  ;;  %v8397_v59 = vadd.f32 %v8396_v3, %v8268_v4  ;;  %v14618_v51 = vpop.f32.mrf.mxu2  ;;  %v8641_v42 = vrot.slane %v8566_v25, 7  ;;  %v8153_v5 = vpop.f32.mrf.mxu3 }
 0x7a3   : > { %9284 = vst [vmem:[%s14361_s30 + $0x44] sm:$0xf] %v9066_v57 }
 0x7a4   : > { %v8830_v33 = vpack.c.bf16 %v8782_v19, %v8782_v19  ;;  %v8474_v10 = vadd.f32 %v8397_v59, %v7337_v9  ;;  %8435 = vmatmul.bf16.gmra.mxu1 %v11615_v34  ;;  %v15013_v34 = vld [vmem:[#allocation26_spill] sm:$0xff] }
 0x7a5   : > { %v8567_v3 = vunpack.c.l.bf16 %v15013_v34 }
 0x7a6   : > { %v9068_v39 = vshrl.u32 %v8830_v33, 16  ;;  %v9071_v36 = vshll.u32 %v8830_v33, 16  ;;  %v8526_v58 = vadd.f32 %v14567_v12, %v8474_v10  ;;  %v15014_v10 = vld [vmem:[#allocation47_spill] sm:$0xff] }
 0x7a7   : > { %v8642_v33 = vrot.slane %v8567_v3, 7  ;;  %v15018_v3 = vld [vmem:[#allocation30_spill] sm:$0xff] }
 0x7a8   : > { %v9070_v8 = vrot.slane %v9068_v39, 4  ;;  %v9073_v46 = vrot.slane %v9071_v36, 5  ;;  %v8735_v50 = vadd.f32 %v8640_v17, %v8526_v58  ;;  %v7344_v17 = vadd.f32 %v14562_v61, %v15014_v10  ;;  %v15019_v10 = vld [vmem:[#allocation49_spill] sm:$0xff] }
 0x7a9   : > { %v8398_v15 = vpop.f32.mrf.mxu1  ;;  %v8278_v61 = vadd.f32 %v14584_v62, %v14588_v27  ;;  %v8280_v62 = vadd.f32 %v14601_v6, %v14605_v2  ;;  %v15016_v27 = vld [vmem:[#allocation28_spill] sm:$0xff] }
 0x7aa   : > { %v8783_v31 = vmax.f32 %v8735_v50, 0.0  ;;  %v8399_v43 = vadd.f32 %v8398_v15, %v8270_v30  ;;  %v9074_v48 = vor.u32 %v9073_v46, %v9070_v8  ;;  %v8643_v46 = vsel %vm293_vm0, %v8641_v42, %v8642_v33  ;;  %v8284_v50 = vpop.f32.mrf.mxu0  ;;  %v14630_v7 = vpop.f32.mrf.mxu2 }
 0x7ac   : > { %v8831_v20 = vpack.c.bf16 %v8783_v31, %v8783_v31  ;;  %v8475_v26 = vadd.f32 %v8399_v43, %v7339_v22  ;;  %v9075_v18 = vrot.slane %v9074_v48, 4  ;;  %v8155_v22 = vpop.f32.mrf.mxu3 }
 0x7ae   : > { %v9077_v35 = vshll.u32 %v8831_v20, 16  ;;  %v9081_v47 = vshrl.u32 %v8831_v20, 16  ;;  %v8527_v55 = vadd.f32 %v14567_v12, %v8475_v26  ;;  %v15015_v26 = vld [vmem:[#allocation70_spill] sm:$0xff] }
 0x7af   : > { %v7347_v21 = vadd.f32 %v14586_v52, %v15015_v26  ;;  %v15020_v26 = vld [vmem:[#allocation48_spill] sm:$0xff] }
 0x7b0   : > { %v9079_v38 = vrot.slane %v9077_v35, 5  ;;  %v9083_v53 = vrot.slane %v9081_v47, 4  ;;  %v8736_v45 = vadd.f32 %v8639_v60, %v8527_v55 }
 0x7b1   : > { %v8401_v54 = vpop.f32.mrf.mxu1 }
 0x7b2   : > { %v9080_v24 = vsel %vm13524_vm13, %v9075_v18, %v9079_v38  ;;  %v8784_v49 = vmax.f32 %v8736_v45, 0.0  ;;  %v8402_v23 = vadd.f32 %v8401_v54, %v8273_v41  ;;  %v9084_v29 = vor.u32 %v9083_v53, %v9079_v38  ;;  %v8287_v38 = vpop.f32.mrf.mxu0  ;;  %v14641_v53 = vpop.f32.mrf.mxu2 }
 0x7b3   : > { %9285 = vst [vmem:[%s14361_s30 + $0x48] sm:$0xf] %v9080_v24  ;;  %v8568_v18 = vunpack.c.l.bf16 %v15016_v27 }
 0x7b4   : > { %v8832_v4 = vpack.c.bf16 %v8784_v49, %v8784_v49  ;;  %v8476_v40 = vadd.f32 %v8402_v23, %v7342_v11  ;;  %8440 = vmatmul.bf16.gmra.mxu1 %v11627_v14  ;;  %v9085_v9 = vrot.slane %v9084_v29, 4  ;;  %v8158_v11 = vpop.f32.mrf.mxu3  ;;  %v15017_v49 = vld [vmem:[#allocation72_spill] sm:$0xff] }
 0x7b5   : > { %v7349_v23 = vadd.f32 %v14603_v44, %v15017_v49  ;;  %v8644_v34 = vrot.slane %v8568_v18, 7  ;;  %v15021_v18 = vld [vmem:[#allocation33_spill] sm:$0xff] }
 0x7b6   : > { %v9087_v37 = vshll.u32 %v8832_v4, 16  ;;  %v8528_v60 = vadd.f32 %v14567_v12, %v8476_v40  ;;  %v15022_v49 = vld [vmem:[#allocation73_spill] sm:$0xff] }
 0x7b8   : > { %v9089_v57 = vrot.slane %v9087_v37, 5  ;;  %v8737_v19 = vadd.f32 %v8641_v42, %v8528_v60  ;;  %v8569_v37 = vunpack.c.l.bf16 %v15018_v3 }
 0x7b9   : > { %v8403_v59 = vpop.f32.mrf.mxu1 }
 0x7ba   : > { %v9090_v39 = vsel %vm13524_vm13, %v9085_v9, %v9089_v57  ;;  %v8785_v36 = vmax.f32 %v8737_v19, 0.0  ;;  %v8404_v58 = vadd.f32 %v8403_v59, %v8275_v1  ;;  %v8283_v9 = vadd.f32 %v14616_v16, %v8153_v5 }
 0x7bb   : > { %9286 = vst [vmem:[%s14361_s30 + $0x4c] sm:$0xf] %v9090_v39  ;;  %v8289_v39 = vpop.f32.mrf.mxu0 }
 0x7bc   : > { %v8833_v30 = vpack.c.bf16 %v8785_v36, %v8785_v36  ;;  %v8477_v8 = vadd.f32 %v8404_v58, %v7344_v17  ;;  %v7352_v17 = vadd.f32 %v14618_v51, %v15019_v10  ;;  %v7358_v36 = vpop.f32.mrf.mxu2  ;;  %v15024_v10 = vld [vmem:[#allocation51_spill] sm:$0xff] }
 0x7be   : > { %v9092_v13 = vshrl.u32 %v8833_v30, 16  ;;  %v9095_v15 = vshll.u32 %v8833_v30, 16  ;;  %v8529_v28 = vadd.f32 %v14567_v12, %v8477_v8 }
 0x7c0   : > { %v9094_v31 = vrot.slane %v9092_v13, 4  ;;  %v9097_v43 = vrot.slane %v9095_v15, 5  ;;  %v8738_v48 = vadd.f32 %v8643_v46, %v8529_v28  ;;  %v8160_v46 = vpop.f32.mrf.mxu3 }
 0x7c1   : > { %v8406_v20 = vpop.f32.mrf.mxu1 }
 0x7c2   : > { %v8786_v32 = vmax.f32 %v8738_v48, 0.0  ;;  %v8407_v35 = vadd.f32 %v8406_v20, %v8278_v61  ;;  %v9098_v47 = vor.u32 %v9097_v43, %v9094_v31  ;;  %v8285_v31 = vadd.f32 %v8284_v50, %v8155_v22 }
 0x7c3   : > { %v8288_v22 = vadd.f32 %v8287_v38, %v8158_v11  ;;  %v15023_v11 = vld [vmem:[#allocation34_spill] sm:$0xff] }
 0x7c4   : > { %v8834_v55 = vpack.c.bf16 %v8786_v32, %v8786_v32  ;;  %v8478_v41 = vadd.f32 %v8407_v35, %v7347_v21  ;;  %v9099_v45 = vrot.slane %v9098_v47, 4  ;;  %v7354_v21 = vadd.f32 %v14630_v7, %v15020_v26  ;;  %v8292_v47 = vpop.f32.mrf.mxu0  ;;  %v15025_v26 = vld [vmem:[#allocation50_spill] sm:$0xff] }
 0x7c6   : > { %v9101_v56 = vshll.u32 %v8834_v55, 16  ;;  %v9105_v25 = vshrl.u32 %v8834_v55, 16  ;;  %v8530_v14 = vadd.f32 %v14567_v12, %v8478_v41  ;;  %v7361_v55 = vpop.f32.mrf.mxu2 }
 0x7c8   : > { %v9103_v52 = vrot.slane %v9101_v56, 5  ;;  %v9107_v54 = vrot.slane %v9105_v25, 4  ;;  %v8739_v0 = vadd.f32 %v8642_v33, %v8530_v14  ;;  %v8645_v33 = vrot.slane %v8569_v37, 7  ;;  %v8163_v14 = vpop.f32.mrf.mxu3 }
 0x7c9   : > { %v8408_v24 = vpop.f32.mrf.mxu1 }
 0x7ca   : > { %v9104_v29 = vsel %vm13524_vm13, %v9099_v45, %v9103_v52  ;;  %v8787_v4 = vmax.f32 %v8739_v0, 0.0  ;;  %v8409_v40 = vadd.f32 %v8408_v24, %v8280_v62  ;;  %v9108_v6 = vor.u32 %v9107_v54, %v9103_v52 }
 0x7cb   : > { %9287 = vst [vmem:[%s14361_s30 + $0x50] sm:$0xf] %v9104_v29  ;;  %v8646_v16 = vsel %vm293_vm0, %v8644_v34, %v8645_v33  ;;  %v8570_v45 = vunpack.c.l.bf16 %v15021_v18 }
 0x7cc   : > { %v8835_v2 = vpack.c.bf16 %v8787_v4, %v8787_v4  ;;  %v8479_v42 = vadd.f32 %v8409_v40, %v7349_v23  ;;  %v9109_v57 = vrot.slane %v9108_v6, 4  ;;  %v7357_v23 = vadd.f32 %v14641_v53, %v15022_v49  ;;  %v8294_v3 = vpop.f32.mrf.mxu0 }
 0x7cd   : > { %v8647_v38 = vrot.slane %v8570_v45, 7  ;;  %v8290_v53 = vadd.f32 %v8289_v39, %v8160_v46  ;;  %v8293_v46 = vadd.f32 %v8292_v47, %v8163_v14  ;;  %v15026_v14 = vld [vmem:[#allocation36_spill] sm:$0xff] }
 0x7ce   : > { %v9111_v60 = vshll.u32 %v8835_v2, 16  ;;  %v8531_v1 = vadd.f32 %v14567_v12, %v8479_v42  ;;  %v7363_v37 = vpop.f32.mrf.mxu2 }
 0x7d0   : > { %v9113_v44 = vrot.slane %v9111_v60, 5  ;;  %v8740_v19 = vadd.f32 %v8644_v34, %v8531_v1  ;;  %v8571_v34 = vunpack.c.l.bf16 %v15023_v11  ;;  %v15028_v11 = vld [vmem:[#allocation38_spill] sm:$0xff] }
 0x7d1   : > { %v8411_v59 = vpop.f32.mrf.mxu1 }
 0x7d2   : > { %v9114_v58 = vsel %vm13524_vm13, %v9109_v57, %v9113_v44  ;;  %v8788_v30 = vmax.f32 %v8740_v19, 0.0  ;;  %v8412_v8 = vadd.f32 %v8411_v59, %v8283_v9  ;;  %v8165_v9 = vpop.f32.mrf.mxu3 }
 0x7d3   : > { %9288 = vst [vmem:[%s14361_s30 + $0x54] sm:$0xf] %v9114_v58  ;;  %v8295_v47 = vadd.f32 %v8294_v3, %v8165_v9 }
 0x7d4   : > { %v8836_v13 = vpack.c.bf16 %v8788_v30, %v8788_v30  ;;  %v8480_v15 = vadd.f32 %v8412_v8, %v7352_v17  ;;  %v7359_v17 = vadd.f32 %v7358_v36, %v15024_v10 }
 0x7d6   : > { %v9116_v5 = vshrl.u32 %v8836_v13, 16  ;;  %v9119_v28 = vshll.u32 %v8836_v13, 16  ;;  %v8532_v61 = vadd.f32 %v14567_v12, %v8480_v15 }
 0x7d8   : > { %v9118_v43 = vrot.slane %v9116_v5, 4  ;;  %v9121_v51 = vrot.slane %v9119_v28, 5  ;;  %v8741_v48 = vadd.f32 %v8646_v16, %v8532_v61  ;;  %v8297_v61 = vpop.f32.mrf.mxu0 }
 0x7d9   : > { %v8413_v20 = vpop.f32.mrf.mxu1 }
 0x7da   : > { %v8789_v32 = vmax.f32 %v8741_v48, 0.0  ;;  %v8414_v35 = vadd.f32 %v8413_v20, %v8285_v31  ;;  %v9122_v41 = vor.u32 %v9121_v51, %v9118_v43  ;;  %v7366_v31 = vpop.f32.mrf.mxu2  ;;  %v8168_v48 = vpop.f32.mrf.mxu3 }
 0x7dc   : > { %v8837_v56 = vpack.c.bf16 %v8789_v32, %v8789_v32  ;;  %v8481_v25 = vadd.f32 %v8414_v35, %v7354_v21  ;;  %v9123_v52 = vrot.slane %v9122_v41, 4  ;;  %v7362_v21 = vadd.f32 %v7361_v55, %v15025_v26 }
 0x7de   : > { %v9125_v62 = vshll.u32 %v8837_v56, 16  ;;  %v9129_v27 = vshrl.u32 %v8837_v56, 16  ;;  %v8533_v50 = vadd.f32 %v14567_v12, %v8481_v25 }
 0x7e0   : > { %v9127_v54 = vrot.slane %v9125_v62, 5  ;;  %v9131_v0 = vrot.slane %v9129_v27, 4  ;;  %v8742_v7 = vadd.f32 %v8645_v33, %v8533_v50  ;;  %v8648_v33 = vrot.slane %v8571_v34, 7 }
 0x7e1   : > { %v8416_v24 = vpop.f32.mrf.mxu1  ;;  %v8573_v34 = vunpack.c.l.bf16 %v15028_v11 }
 0x7e2   : > { %v9128_v29 = vsel %vm13524_vm13, %v9123_v52, %v9127_v54  ;;  %v8790_v4 = vmax.f32 %v8742_v7, 0.0  ;;  %v8417_v40 = vadd.f32 %v8416_v24, %v8288_v22  ;;  %v9132_v6 = vor.u32 %v9131_v0, %v9127_v54  ;;  %v15027_v7 = vld [vmem:[#allocation52_spill] sm:$0xff]  ;;  %v8299_v24 = vpop.f32.mrf.mxu0  ;;  %v7368_v49 = vpop.f32.mrf.mxu2 }
 0x7e3   : > { %9289 = vst [vmem:[%s14361_s30 + $0x58] sm:$0xf] %v9128_v29  ;;  %v8649_v16 = vsel %vm293_vm0, %v8647_v38, %v8648_v33  ;;  %v8572_v22 = vunpack.c.l.bf16 %v15026_v14  ;;  %v7364_v55 = vadd.f32 %v7363_v37, %v15027_v7  ;;  %v8298_v37 = vadd.f32 %v8297_v61, %v8168_v48  ;;  %v15031_v14 = vld [vmem:[#allocation41_spill] sm:$0xff]  ;;  %v15032_v7 = vld [vmem:[#allocation54_spill] sm:$0xff] }
 0x7e4   : > { %v8838_v2 = vpack.c.bf16 %v8790_v4, %v8790_v4  ;;  %v8482_v42 = vadd.f32 %v8417_v40, %v7357_v23  ;;  %v9133_v57 = vrot.slane %v9132_v6, 4  ;;  %v8170_v40 = vpop.f32.mrf.mxu3 }
 0x7e6   : > { %v9135_v60 = vshll.u32 %v8838_v2, 16  ;;  %v8534_v1 = vadd.f32 %v14567_v12, %v8482_v42 }
 0x7e8   : > { %v9137_v44 = vrot.slane %v9135_v60, 5  ;;  %v8743_v19 = vadd.f32 %v8647_v38, %v8534_v1  ;;  %v8650_v38 = vrot.slane %v8572_v22, 7  ;;  %v8574_v22 = vunpack.c.l.bf16 %v15031_v14 }
 0x7e9   : > { %v8418_v59 = vpop.f32.mrf.mxu1 }
 0x7ea   : > { %v9138_v58 = vsel %vm13524_vm13, %v9133_v57, %v9137_v44  ;;  %v8791_v30 = vmax.f32 %v8743_v19, 0.0  ;;  %v8419_v8 = vadd.f32 %v8418_v59, %v8290_v53  ;;  %v8651_v44 = vrot.slane %v8573_v34, 7  ;;  %v15029_v19 = vld [vmem:[#allocation74_spill] sm:$0xff] }
 0x7eb   : > { %9290 = vst [vmem:[%s14361_s30 + $0x5c] sm:$0xf] %v9138_v58  ;;  %v7367_v59 = vadd.f32 %v7366_v31, %v15029_v19  ;;  %v8302_v58 = vpop.f32.mrf.mxu0  ;;  %v15034_v19 = vld [vmem:[#allocation55_spill] sm:$0xff] }
 0x7ec   : > { %v8839_v13 = vpack.c.bf16 %v8791_v30, %v8791_v30  ;;  %v8483_v15 = vadd.f32 %v8419_v8, %v7359_v17  ;;  %v7371_v30 = vpop.f32.mrf.mxu2 }
 0x7ee   : > { %v9140_v5 = vshrl.u32 %v8839_v13, 16  ;;  %v9143_v28 = vshll.u32 %v8839_v13, 16  ;;  %v8535_v39 = vadd.f32 %v14567_v12, %v8483_v15  ;;  %v8173_v15 = vpop.f32.mrf.mxu3 }
 0x7f0   : > { %v9142_v43 = vrot.slane %v9140_v5, 4  ;;  %v9145_v51 = vrot.slane %v9143_v28, 5  ;;  %v8744_v36 = vadd.f32 %v8649_v16, %v8535_v39  ;;  %v8652_v16 = vsel %vm293_vm0, %v8650_v38, %v8651_v44 }
 0x7f1   : > { %v8421_v20 = vpop.f32.mrf.mxu1 }
 0x7f2   : > { %v8792_v32 = vmax.f32 %v8744_v36, 0.0  ;;  %v8422_v35 = vadd.f32 %v8421_v20, %v8293_v46  ;;  %v9146_v41 = vor.u32 %v9145_v51, %v9142_v43  ;;  %v8300_v46 = vadd.f32 %v8299_v24, %v8170_v40  ;;  %v15030_v36 = vld [vmem:[#allocation53_spill] sm:$0xff] }
 0x7f3   : > { %v7369_v48 = vadd.f32 %v7368_v49, %v15030_v36 }
 0x7f4   : > { %v8840_v56 = vpack.c.bf16 %v8792_v32, %v8792_v32  ;;  %v8484_v25 = vadd.f32 %v8422_v35, %v7362_v21  ;;  %v9147_v18 = vrot.slane %v9146_v41, 4  ;;  %v8304_v41 = vpop.f32.mrf.mxu0 }
 0x7f6   : > { %v9149_v62 = vshll.u32 %v8840_v56, 16  ;;  %v9153_v27 = vshrl.u32 %v8840_v56, 16  ;;  %v8536_v50 = vadd.f32 %v14567_v12, %v8484_v25  ;;  %v7373_v56 = vpop.f32.mrf.mxu2 }
 0x7f8   : > { %v9151_v45 = vrot.slane %v9149_v62, 5  ;;  %v9155_v52 = vrot.slane %v9153_v27, 4  ;;  %v8745_v54 = vadd.f32 %v8648_v33, %v8536_v50  ;;  %v8303_v50 = vadd.f32 %v8302_v58, %v8173_v15 }
 0x7f9   : > { %v8423_v0 = vpop.f32.mrf.mxu1 }
 0x7fa   : > { %v9152_v23 = vsel %vm13524_vm13, %v9147_v18, %v9151_v45  ;;  %v8793_v29 = vmax.f32 %v8745_v54, 0.0  ;;  %v8424_v4 = vadd.f32 %v8423_v0, %v8295_v47  ;;  %v9156_v6 = vor.u32 %v9155_v52, %v9151_v45  ;;  %v8175_v47 = vpop.f32.mrf.mxu3 }
 0x7fb   : > { %9291 = vst [vmem:[%s14361_s30 + $0x60] sm:$0xf] %v9152_v23  ;;  %v8305_v34 = vadd.f32 %v8304_v41, %v8175_v47 }
 0x7fc   : > { %v8841_v2 = vpack.c.bf16 %v8793_v29, %v8793_v29  ;;  %v8485_v42 = vadd.f32 %v8424_v4, %v7364_v55  ;;  %v9157_v1 = vrot.slane %v9156_v6, 4  ;;  %v7372_v55 = vadd.f32 %v7371_v30, %v15032_v7 }
 0x7fd   : > { %v8653_v6 = vrot.slane %v8574_v22, 7 }
 0x7fe   : > { %v9159_v3 = vshll.u32 %v8841_v2, 16  ;;  %v8537_v60 = vadd.f32 %v14567_v12, %v8485_v42  ;;  %v15033_v2 = vld [vmem:[#allocation42_spill] sm:$0xff] }
 0x7ff   : > { %v8575_v42 = vunpack.c.l.bf16 %v15033_v2  ;;  %v15038_v2 = vld [vmem:[#allocation46_spill] sm:$0xff] }
 0x800   : > { %v9161_v9 = vrot.slane %v9159_v3, 5  ;;  %v8746_v53 = vadd.f32 %v8650_v38, %v8537_v60  ;;  %v8307_v3 = vpop.f32.mrf.mxu0  ;;  %v7376_v60 = vpop.f32.mrf.mxu2 }
 0x801   : > { %v8426_v57 = vpop.f32.mrf.mxu1 }
 0x802   : > { %v9162_v33 = vsel %vm13524_vm13, %v9157_v1, %v9161_v9  ;;  %v8794_v10 = vmax.f32 %v8746_v53, 0.0  ;;  %v8427_v17 = vadd.f32 %v8426_v57, %v8298_v37  ;;  %v8178_v53 = vpop.f32.mrf.mxu3 }
 0x803   : > { %9292 = vst [vmem:[%s14361_s30 + $0x64] sm:$0xf] %v9162_v33 }
 0x804   : > { %v8842_v8 = vpack.c.bf16 %v8794_v10, %v8794_v10  ;;  %v8486_v13 = vadd.f32 %v8427_v17, %v7367_v59  ;;  %v7374_v59 = vadd.f32 %v7373_v56, %v15034_v19 }
 0x806   : > { %v9164_v5 = vshrl.u32 %v8842_v8, 16  ;;  %v9167_v28 = vshll.u32 %v8842_v8, 16  ;;  %v8538_v39 = vadd.f32 %v14567_v12, %v8486_v13 }
 0x808   : > { %v9166_v61 = vrot.slane %v9164_v5, 4  ;;  %v9169_v31 = vrot.slane %v9167_v28, 5  ;;  %v8747_v43 = vadd.f32 %v8652_v16, %v8538_v39  ;;  %v8308_v5 = vadd.f32 %v8307_v3, %v8178_v53  ;;  %v15039_v53 = vld [vmem:[#allocation57_spill] sm:$0xff] }
 0x809   : > { %v8428_v51 = vpop.f32.mrf.mxu1 }
 0x80a   : > { %v8795_v20 = vmax.f32 %v8747_v43, 0.0  ;;  %v8429_v26 = vadd.f32 %v8428_v51, %v8300_v46  ;;  %v9170_v21 = vor.u32 %v9169_v31, %v9166_v61  ;;  %v15035_v31 = vld [vmem:[#allocation17_spill] sm:$0xff]  ;;  %v8309_v51 = vpop.f32.mrf.mxu0 }
 0x80b   : > { %v7377_v43 = vadd.f32 %v7376_v60, %v15035_v31  ;;  %v15040_v31 = vld [vmem:[#allocation58_spill] sm:$0xff] }
 0x80c   : > { %v8843_v32 = vpack.c.bf16 %v8795_v20, %v8795_v20  ;;  %v8487_v35 = vadd.f32 %v8429_v26, %v7369_v48  ;;  %v9171_v18 = vrot.slane %v9170_v21, 4  ;;  %v7378_v20 = vpop.f32.mrf.mxu2  ;;  %v8180_v26 = vpop.f32.mrf.mxu3 }
 0x80e   : > { %v9173_v25 = vshll.u32 %v8843_v32, 16  ;;  %v9177_v62 = vshrl.u32 %v8843_v32, 16  ;;  %v8539_v27 = vadd.f32 %v14567_v12, %v8487_v35 }
 0x810   : > { %v9175_v45 = vrot.slane %v9173_v25, 5  ;;  %v9179_v52 = vrot.slane %v9177_v62, 4  ;;  %v8748_v54 = vadd.f32 %v8651_v44, %v8539_v27  ;;  %v8654_v44 = vrot.slane %v8575_v42, 7  ;;  %v15036_v27 = vld [vmem:[#allocation44_spill] sm:$0xff] }
 0x811   : > { %v8431_v0 = vpop.f32.mrf.mxu1  ;;  %v8310_v62 = vadd.f32 %v8309_v51, %v8180_v26  ;;  %v8577_v42 = vunpack.c.l.bf16 %v15038_v2 }
 0x812   : > { %v9176_v24 = vsel %vm13524_vm13, %v9171_v18, %v9175_v45  ;;  %v8796_v49 = vmax.f32 %v8748_v54, 0.0  ;;  %v8432_v23 = vadd.f32 %v8431_v0, %v8303_v50  ;;  %v9180_v29 = vor.u32 %v9179_v52, %v9175_v45  ;;  %v15037_v52 = vld [vmem:[#allocation18_spill] sm:$0xff] }
 0x813   : > { %9293 = vst [vmem:[%s14361_s30 + $0x68] sm:$0xf] %v9176_v24  ;;  %v8655_v8 = vsel %vm293_vm0, %v8653_v6, %v8654_v44  ;;  %v8576_v50 = vunpack.c.l.bf16 %v15036_v27  ;;  %v7379_v54 = vadd.f32 %v7378_v20, %v15037_v52 }
 0x814   : > { %v8844_v4 = vpack.c.bf16 %v8796_v49, %v8796_v49  ;;  %v8488_v40 = vadd.f32 %v8432_v23, %v7372_v55  ;;  %v9181_v37 = vrot.slane %v9180_v29, 4  ;;  %v8183_v24 = vpop.f32.mrf.mxu3  ;;  %v8312_v49 = vpop.f32.mrf.mxu0 }
 0x816   : > { %v9183_v38 = vshll.u32 %v8844_v4, 16  ;;  %v8540_v11 = vadd.f32 %v14567_v12, %v8488_v40  ;;  %v8656_v40 = vrot.slane %v8576_v50, 7 }
 0x818   : > { %v9185_v1 = vrot.slane %v9183_v38, 5  ;;  %v8749_v9 = vadd.f32 %v8653_v6, %v8540_v11  ;;  %v7381_v6 = vpop.f32.mrf.mxu2  ;;  %v8313_v11 = vadd.f32 %v8312_v49, %v8183_v24 }
 0x819   : > { %v8433_v57 = vpop.f32.mrf.mxu1 }
 0x81a   : > { %v9186_v33 = vsel %vm13524_vm13, %v9181_v37, %v9185_v1  ;;  %v8797_v10 = vmax.f32 %v8749_v9, 0.0  ;;  %v8434_v17 = vadd.f32 %v8433_v57, %v8305_v34  ;;  %v8657_v9 = vrot.slane %v8577_v42, 7 }
 0x81b   : > { %9294 = vst [vmem:[%s14361_s30 + $0x6c] sm:$0xf] %v9186_v33  ;;  %v7382_v57 = vadd.f32 %v7381_v6, %v15039_v53 }
 0x81c   : > { %v8845_v58 = vpack.c.bf16 %v8797_v10, %v8797_v10  ;;  %v8489_v30 = vadd.f32 %v8434_v17, %v7374_v59  ;;  %v8185_v17 = vpop.f32.mrf.mxu3 }
 0x81e   : > { %v9188_v13 = vshrl.u32 %v8845_v58, 16  ;;  %v9191_v15 = vshll.u32 %v8845_v58, 16  ;;  %v8541_v16 = vadd.f32 %v14567_v12, %v8489_v30  ;;  %v8314_v58 = vpop.f32.mrf.mxu0  ;;  %v8658_v30 = vsel %vm293_vm0, %v8656_v40, %v8657_v9 }
 0x820   : > { %v9190_v28 = vrot.slane %v9188_v13, 4  ;;  %v9193_v39 = vrot.slane %v9191_v15, 5  ;;  %v8750_v46 = vadd.f32 %v8655_v8, %v8541_v16  ;;  %v7383_v16 = vpop.f32.mrf.mxu2 }
 0x821   : > { %v8436_v61 = vpop.f32.mrf.mxu1 }
 0x822   : > { %v8798_v36 = vmax.f32 %v8750_v46, 0.0  ;;  %v8437_v48 = vadd.f32 %v8436_v61, %v8308_v5  ;;  %v9194_v21 = vor.u32 %v9193_v39, %v9190_v28  ;;  %v8315_v39 = vadd.f32 %v8314_v58, %v8185_v17 }
 0x824   : > { %v8846_v32 = vpack.c.bf16 %v8798_v36, %v8798_v36  ;;  %v8490_v35 = vadd.f32 %v8437_v48, %v7377_v43  ;;  %v9195_v47 = vrot.slane %v9194_v21, 4  ;;  %v7384_v43 = vadd.f32 %v7383_v16, %v15040_v31 }
 0x826   : > { %v9197_v41 = vshll.u32 %v8846_v32, 16  ;;  %v9201_v56 = vshrl.u32 %v8846_v32, 16  ;;  %v8542_v25 = vadd.f32 %v14567_v12, %v8490_v35 }
 0x828   : > { %v9199_v14 = vrot.slane %v9197_v41, 5  ;;  %v9203_v22 = vrot.slane %v9201_v56, 4  ;;  %v8751_v18 = vadd.f32 %v8654_v44, %v8542_v25 }
 0x829   : > { %v8438_v45 = vpop.f32.mrf.mxu1 }
 0x82a   : > { %v9200_v0 = vsel %vm13524_vm13, %v9195_v47, %v9199_v14  ;;  %v8799_v7 = vmax.f32 %v8751_v18, 0.0  ;;  %v8439_v55 = vadd.f32 %v8438_v45, %v8310_v62  ;;  %v9204_v23 = vor.u32 %v9203_v22, %v9199_v14 }
 0x82b   : > { %9295 = vst [vmem:[%s14361_s30 + $0x70] sm:$0xf] %v9200_v0 }
 0x82c   : > { %v8847_v29 = vpack.c.bf16 %v8799_v7, %v8799_v7  ;;  %v8491_v4 = vadd.f32 %v8439_v55, %v7379_v54  ;;  %v9205_v3 = vrot.slane %v9204_v23, 4 }
 0x82e   : > { %v9207_v38 = vshll.u32 %v8847_v29, 16  ;;  %v8543_v34 = vadd.f32 %v14567_v12, %v8491_v4 }
 0x830   : > { %v9209_v60 = vrot.slane %v9207_v38, 5  ;;  %v8752_v37 = vadd.f32 %v8656_v40, %v8543_v34 }
 0x831   : > { %v8441_v1 = vpop.f32.mrf.mxu1 }
 0x832   : > { %v9210_v44 = vsel %vm13524_vm13, %v9205_v3, %v9209_v60  ;;  %v8800_v19 = vmax.f32 %v8752_v37, 0.0  ;;  %v8442_v59 = vadd.f32 %v8441_v1, %v8313_v11 }
 0x833   : > { %9296 = vst [vmem:[%s14361_s30 + $0x74] sm:$0xf] %v9210_v44 }
 0x834   : > { %v8848_v33 = vpack.c.bf16 %v8800_v19, %v8800_v19  ;;  %v8492_v10 = vadd.f32 %v8442_v59, %v7382_v57 }
 0x836   : > { %v9212_v8 = vshrl.u32 %v8848_v33, 16  ;;  %v9215_v13 = vshll.u32 %v8848_v33, 16  ;;  %v8544_v15 = vadd.f32 %v14567_v12, %v8492_v10 }
 0x838   : > { %v9214_v5 = vrot.slane %v9212_v8, 4  ;;  %v9217_v28 = vrot.slane %v9215_v13, 5  ;;  %v8753_v46 = vadd.f32 %v8658_v30, %v8544_v15 }
 0x839   : > { %v8443_v61 = vpop.f32.mrf.mxu1 }
 0x83a   : > { %v8801_v51 = vmax.f32 %v8753_v46, 0.0  ;;  %v8444_v36 = vadd.f32 %v8443_v61, %v8315_v39  ;;  %v9218_v48 = vor.u32 %v9217_v28, %v9214_v5 }
 0x83c   : > { %v8849_v20 = vpack.c.bf16 %v8801_v51, %v8801_v51  ;;  %v8493_v26 = vadd.f32 %v8444_v36, %v7384_v43  ;;  %v9219_v41 = vrot.slane %v9218_v48, 4 }
 0x83e   : > { %v9221_v21 = vshll.u32 %v8849_v20, 16  ;;  %v9225_v32 = vshrl.u32 %v8849_v20, 16  ;;  %v8545_v35 = vadd.f32 %v14567_v12, %v8493_v26 }
 0x840   : > { %v9223_v56 = vrot.slane %v9221_v21, 5  ;;  %v9227_v25 = vrot.slane %v9225_v32, 4  ;;  %v8754_v62 = vadd.f32 %v8657_v9, %v8545_v35 }
 0x842   : > { %v9224_v27 = vsel %vm13524_vm13, %v9219_v41, %v9223_v56  ;;  %v8802_v50 = vmax.f32 %v8754_v62, 0.0  ;;  %v9228_v47 = vor.u32 %v9227_v25, %v9223_v56 }
 0x843   : > { %9297 = vst [vmem:[%s14361_s30 + $0x78] sm:$0xf] %v9224_v27 }
 0x844   : > { %v8850_v14 = vpack.c.bf16 %v8802_v50, %v8802_v50  ;;  %v9229_v22 = vrot.slane %v9228_v47, 4 }
 0x846   : > { %v9231_v12 = vshll.u32 %v8850_v14, 16 }
 0x848   : > { %v9233_v18 = vrot.slane %v9231_v12, 5 }
 0x84a   : > { %v9234_v45 = vsel %vm13524_vm13, %v9229_v22, %v9233_v18 }
 0x84b   : > { %9298 = vst [vmem:[%s14361_s30 + $0x7c] sm:$0xf] %v9234_v45 }
 0x84c   : > { %12517 = shalt.err (!%p12514_p10)
}
 0x84d   : > { %s12567_s8 = smov 64   ;;  %s12568_s30 = smov 4  }
 0x84e   : > { %12333 = dma.vmem_to_hbm [thread:$0]  (%p12671_p3), %s9313_s24, 2048, %s9315_s22, %s9300_s29, %s12567_s8, %s12567_s8, %s12568_s30  }
 0x84f PF: > { %s9329_s7 = sand.u32 1, %s12548_s18   ;;  %p15041_p12 = scmp.ge.s32.totalorder %s12560_s21, 2 }
 0x850   : > { %s9330_s26 = scalar_lea.sflag [#allocation5], %s9329_s7 }
 0x851   : > { %p12347_p13 = pnand %p15041_p12, %p12634_p6 }
 0x853   : > { %p12348_p0 = pneg %p12347_p13 }
 0x855   : > { %12543 = dma.done.wait (%p12348_p0), %s9330_s26, 2048  }
 0x856   : > { %12545 = vsyncadd (%p12348_p0), %s9330_s26, 4294965248  ;;  %p19_p5 = scmp.ge.s32.totalorder %s12661_s14, 4   ;;  %s15042_s18 = smov %s12552_s19 }
 0x857   : > { %s15043_s19 = smov %s12556_s20  ;;  %s15044_s20 = smov %s12677_s23 }
 0x858   : > { %s15045_s21 = smov %s12661_s14  ;;  %21 = sbr.rel (!%p19_p5) target bundleno = 6 (0x6), region = 100 }
 0x85d   :  { %9336 = vsyncpa [#allocation4], 1 }
 0x85e   :  { %9338 = vsyncpa [#allocation4 + $0x1], 1 }
 0x85f   :  { %9339 = vsyncpa [#allocation7], 1 }
 0x860   :  { %9340 = vsyncpa [#allocation5], 1 }
 0x861   :  { %9342 = vsyncpa [#allocation5 + $0x1], 1 }

</bundles_post_ra>
